<compile_context>
chip_gen: v7x
topology: tpu7x:2x2x1
jax: 0.10.0
libtpu: 0.0.40
codegen_flags: <defaults>
</compile_context>

<pallas_src>
import functools

import jax
import jax.numpy as jnp
import numpy as np
from jax.experimental import pallas as pl
from jax.experimental.pallas import tpu as pltpu

MAX_PAD = 3  # half-width of the largest (7x7) branch


def _fpa_kernel(x_ref, hidx_ref, widx_ref, segm_ref, segb_ref,
                wg_ref, bg_ref, w7_ref, b7_ref, w5_ref, b5_ref,
                w3_ref, b3_ref, wf_ref, bf_ref, o_ref, *, H, W):
    f32, bf16 = jnp.float32, jnp.bfloat16
    C, L = x_ref.shape

    x = x_ref[...]                    # (C, L) f32, L = Nb*H*W (lane-dense)
    x_bf = x.astype(bf16)             # reused by the centre tap + global mean
    h_idx = hidx_ref[...]             # (1, L) int32 : output row index per lane
    w_idx = widx_ref[...]             # (1, L) int32 : output col index per lane

    def shifted_bf16(ddh, ddw):
        """x[(n, h+ddh, w+ddw)] on every lane, 0 outside the image, bf16."""
        if ddh == 0 and ddw == 0:
            return x_bf
        s = ddh * W + ddw                              # flat source offset
        xs = pltpu.roll(x, (-s) % L, axis=1)           # XLU lane rotation
        mask = ((h_idx + ddh >= 0) & (h_idx + ddh < H) &
                (w_idx + ddw >= 0) & (w_idx + ddw < W))
        return jnp.where(mask, xs, 0.0).astype(bf16)

    # ---- 7x7 / 5x5 / 3x3 branches: shared shifted slabs, three independent
    # accumulation chains (natural ILP for the MXU result path). -------------
    acc7 = jnp.zeros((C, L), f32)
    acc5 = jnp.zeros((C, L), f32)
    acc3 = jnp.zeros((C, L), f32)
    for ddh in range(-MAX_PAD, MAX_PAD + 1):
        for ddw in range(-MAX_PAD, MAX_PAD + 1):
            xs = shifted_bf16(ddh, ddw)
            t7 = (ddh + 3) * 7 + (ddw + 3)
            acc7 = acc7 + jnp.dot(w7_ref[t7], xs, preferred_element_type=f32)
            if abs(ddh) <= 2 and abs(ddw) <= 2:
                t5 = (ddh + 2) * 5 + (ddw + 2)
                acc5 = acc5 + jnp.dot(w5_ref[t5], xs,
                                      preferred_element_type=f32)
            if abs(ddh) <= 1 and abs(ddw) <= 1:
                t3 = (ddh + 1) * 3 + (ddw + 1)
                acc3 = acc3 + jnp.dot(w3_ref[t3], xs,
                                      preferred_element_type=f32)

    # Branch epilogues (BN folded) + immediate 1x1 fuse contribution.
    f7 = jnp.maximum(acc7 + b7_ref[...], 0.0).astype(bf16)
    f5 = jnp.maximum(acc5 + b5_ref[...], 0.0).astype(bf16)
    f3 = jnp.maximum(acc3 + b3_ref[...], 0.0).astype(bf16)
    facc = jnp.dot(wf_ref[1], f7, preferred_element_type=f32)
    facc = facc + jnp.dot(wf_ref[2], f5, preferred_element_type=f32)
    facc = facc + jnp.dot(wf_ref[3], f3, preferred_element_type=f32)

    # ---- global branch ------------------------------------------------------
    # Per-image spatial mean via one MXU dot against the (L, Nb) segment-mean
    # matrix; bilinear upsampling of a 1x1 map (align_corners=True) is an
    # exact broadcast, realised by the one-hot (Nb, L) matmul below.
    m = jnp.dot(x_bf, segm_ref[...], preferred_element_type=f32)        # (C, Nb)
    g = jnp.maximum(jnp.dot(wg_ref[...], m.astype(bf16),
                            preferred_element_type=f32) + bg_ref[...], 0.0)
    gf = jnp.dot(wf_ref[0], g.astype(bf16), preferred_element_type=f32)  # (C, Nb)
    facc = facc + jnp.dot(gf.astype(bf16), segb_ref[...],
                          preferred_element_type=f32)                    # (C, L)

    # ---- fuse epilogue: bias + ReLU in f32, lane-dense store ---------------
    o_ref[...] = jnp.maximum(facc + bf_ref[...], 0.0).astype(o_ref.dtype)


def fpa_pallas(x, p, *, nb=None):
    """x: (N, C, H, W) float32 (PyTorch NCHW); p: BN-folded OIHW weights."""
    N, C, H, W = x.shape
    HW = H * W
    f32, bf16 = jnp.float32, jnp.bfloat16

    # Batch block: fold as many whole images as fit a small VMEM budget into
    # one grid step (amortises the ~0.35us/step overhead, widens the lane /
    # matmul-N axis).  For the toy shape this is the whole batch (grid = 1).
    if nb is None:
        nb = 1
        for cand in range(N, 0, -1):
            if N % cand == 0 and C * cand * HW * 8 <= 8 * 1024 * 1024:
                nb = cand
                break
    assert N % nb == 0
    L = nb * HW
    grid_n = N // nb

    # ---- layout plumbing (XLA side): channels -> sublanes, batch*spatial ->
    # lanes.  Pure transpose/reshape, no compute hoisted out of the kernel.
    x_cf = jnp.transpose(x, (1, 0, 2, 3)).reshape(C, N * HW).astype(f32)

    # Per-lane (h, w) coordinates and per-image segment matrices of ONE block
    # (identical for every block, hence resident with constant index maps).
    pos = np.arange(L)
    hw_pos = pos % HW
    h_idx = jnp.asarray((hw_pos // W).astype(np.int32).reshape(1, L))
    w_idx = jnp.asarray((hw_pos % W).astype(np.int32).reshape(1, L))
    img = pos // HW
    segm = jnp.asarray((img[:, None] == np.arange(nb)[None, :]).astype(np.float32)
                       / HW, dtype=bf16)                        # (L, nb): mean
    segb = jnp.asarray((np.arange(nb)[:, None] == img[None, :]).astype(np.float32),
                       dtype=bf16)                              # (nb, L): bcast

    # Per-tap weights (k*k, Cout, Cin) in bf16: resident MXU operands.
    wg2 = p["wg"].reshape(C, C).astype(bf16)
    w7t = jnp.transpose(p["w7"], (2, 3, 0, 1)).reshape(49, C, C).astype(bf16)
    w5t = jnp.transpose(p["w5"], (2, 3, 0, 1)).reshape(25, C, C).astype(bf16)
    w3t = jnp.transpose(p["w3"], (2, 3, 0, 1)).reshape(9, C, C).astype(bf16)
    # Fuse weight split by concat block order [global, f7, f5, f3].
    wf4 = jnp.transpose(p["wf"].reshape(C, 4, C), (1, 0, 2)).astype(bf16)
    # Biases stay f32 (element-wise epilogue runs in f32 on all generations).
    bg2 = p["bg"].reshape(C, 1).astype(f32)
    b72 = p["b7"].reshape(C, 1).astype(f32)
    b52 = p["b5"].reshape(C, 1).astype(f32)
    b32 = p["b3"].reshape(C, 1).astype(f32)
    bf2 = p["bf"].reshape(C, 1).astype(f32)

    def resident(arr):
        nd = arr.ndim
        return pl.BlockSpec(arr.shape, lambda n, nd=nd: (0,) * nd)

    grid_spec = pltpu.PrefetchScalarGridSpec(
        num_scalar_prefetch=0,
        grid=(grid_n,),
        in_specs=[
            pl.BlockSpec((C, L), lambda n: (0, n)),
            resident(h_idx), resident(w_idx),
            resident(segm), resident(segb),
            resident(wg2), resident(bg2),
            resident(w7t), resident(b72),
            resident(w5t), resident(b52),
            resident(w3t), resident(b32),
            resident(wf4), resident(bf2),
        ],
        out_specs=pl.BlockSpec((C, L), lambda n: (0, n)),
    )

    # VMEM limit computed from actual block / resident sizes (+ slack for
    # (8,128)/(16,128) tile padding of the many tiny arrays and the in-kernel
    # f32 accumulators), capped at v7x's 64 MiB physical VMEM.
    resident_bytes = ((1 + 49 + 25 + 9 + 4) * C * C * 2      # weights (bf16)
                      + 5 * C * 4                             # biases (f32)
                      + 2 * L * 4                             # h_idx / w_idx
                      + 2 * nb * L * 2)                       # segm / segb
    block_bytes = 2 * C * L * 4                               # x + out (f32)
    temp_bytes = 8 * C * L * 4                                # live accumulators
    vmem_limit = int(min(64 * 1024 * 1024,
                         max(4 * 1024 * 1024,
                             2 * (2 * block_bytes + resident_bytes)
                             + temp_bytes + 2 * 1024 * 1024)))

    taps = 49 + 25 + 9
    flops = (2 * N * HW * C * C * (taps + 3)     # conv taps + 3 branch-fuse dots
             + 2 * N * C * HW * 2                # mean + broadcast dots
             + 2 * N * C * C * 2)                # global 1x1 + its fuse dot
    cost = pl.CostEstimate(
        flops=int(flops),
        transcendentals=0,
        bytes_accessed=int(2 * C * N * HW * 4 + resident_bytes),
    )

    kernel = functools.partial(_fpa_kernel, H=H, W=W)
    out_cf = pl.pallas_call(
        kernel,
        out_shape=jax.ShapeDtypeStruct((C, N * HW), f32),
        grid_spec=grid_spec,
        compiler_params=pltpu.CompilerParams(
            # Batch-block axis is independent; on v7x with a larger batch this
            # axis would be marked CORE_PARALLEL to split across both TCs.
            dimension_semantics=("parallel",),
            vmem_limit_bytes=vmem_limit,
        ),
        cost_estimate=cost,
    )(x_cf, h_idx, w_idx, segm, segb,
      wg2, bg2, w7t, b72, w5t, b52, w3t, b32, wf4, bf2)

    return jnp.transpose(out_cf.reshape(C, N, H, W), (1, 0, 2, 3))


# ---------------- parameter construction (BN folded, OIHW) ----------------

def make_params(key, C, eps=1e-5):
    keys = iter(jax.random.split(key, 40))

    def conv_bn(cout, cin, k):
        w = 0.1 * jax.random.normal(next(keys), (cout, cin, k, k), jnp.float32)
        b = 0.1 * jax.random.normal(next(keys), (cout,), jnp.float32)
        gamma = 1.0 + 0.1 * jax.random.normal(next(keys), (cout,), jnp.float32)
        beta = 0.1 * jax.random.normal(next(keys), (cout,), jnp.float32)
        mean = 0.1 * jax.random.normal(next(keys), (cout,), jnp.float32)
        var = 1.0 + 0.1 * jax.random.uniform(next(keys), (cout,), jnp.float32)
        scale = gamma / jnp.sqrt(var + eps)
        return w * scale[:, None, None, None], (b - mean) * scale + beta

    wg, bg = conv_bn(C, C, 1)
    w7, b7 = conv_bn(C, C, 7)
    w5, b5 = conv_bn(C, C, 5)
    w3, b3 = conv_bn(C, C, 3)
    wf, bf = conv_bn(C, 4 * C, 1)
    return dict(wg=wg, bg=bg, w7=w7, b7=b7, w5=w5, b5=b5, w3=w3, b3=b3,
                wf=wf, bf=bf)


# ---------------- pure-JAX reference (NCHW) for validation ----------------

def fpa_reference(x, p):
    def conv(v, w, b, pad):
        y = jax.lax.conv_general_dilated(
            v, w, (1, 1), ((pad, pad), (pad, pad)),
            dimension_numbers=("NCHW", "OIHW", "NCHW"),
            precision=jax.lax.Precision.HIGHEST)
        return y + b[None, :, None, None]

    gp = jnp.mean(x, axis=(2, 3), keepdims=True)
    g = jax.nn.relu(conv(gp, p["wg"], p["bg"], 0))
    g = jnp.broadcast_to(g, x.shape)      # bilinear upsample of a 1x1 map
    f7 = jax.nn.relu(conv(x, p["w7"], p["b7"], 3))
    f5 = jax.nn.relu(conv(x, p["w5"], p["b5"], 2))
    f3 = jax.nn.relu(conv(x, p["w3"], p["b3"], 1))
    cat = jnp.concatenate([g, f7, f5, f3], axis=1)
    return jax.nn.relu(conv(cat, p["wf"], p["bf"], 0))


if __name__ == "__main__":
    N, C, H, W = 2, 4, 16, 16
    key = jax.random.PRNGKey(0)
    kx, kp = jax.random.split(key)

    x = jax.random.normal(kx, (N, C, H, W), jnp.float32)   # NCHW like PyTorch
    params = make_params(kp, C)

    out = fpa_pallas(x, params)
    out = jax.block_until_ready(out)

    ref = fpa_reference(x, params)
    err = float(jnp.max(jnp.abs(out - ref)))
    assert out.shape == (N, C, H, W)
    # bf16 MXU operands (f32 accumulation) -> slightly looser tolerance.
    if err > 5e-2:
        raise AssertionError(f"Pallas output mismatch vs reference, max abs err = {err}")

    print("KERNEL_OK")
</pallas_src>

<mosaic_0001>
module attributes {stable_mosaic.version = 11 : i64} {
  func.func @_fpa_kernel(%arg0: i32, %arg1: memref<4x512xf32, #tpu.memory_space<vmem>>, %arg2: memref<1x512xi32, #tpu.memory_space<vmem>>, %arg3: memref<1x512xi32, #tpu.memory_space<vmem>>, %arg4: memref<512x2xbf16, #tpu.memory_space<vmem>>, %arg5: memref<2x512xbf16, #tpu.memory_space<vmem>>, %arg6: memref<4x4xbf16, #tpu.memory_space<vmem>>, %arg7: memref<4x1xf32, #tpu.memory_space<vmem>>, %arg8: memref<49x4x4xbf16, #tpu.memory_space<vmem>>, %arg9: memref<4x1xf32, #tpu.memory_space<vmem>>, %arg10: memref<25x4x4xbf16, #tpu.memory_space<vmem>>, %arg11: memref<4x1xf32, #tpu.memory_space<vmem>>, %arg12: memref<9x4x4xbf16, #tpu.memory_space<vmem>>, %arg13: memref<4x1xf32, #tpu.memory_space<vmem>>, %arg14: memref<4x4x4xbf16, #tpu.memory_space<vmem>>, %arg15: memref<4x1xf32, #tpu.memory_space<vmem>>, %arg16: memref<4x512xf32, #tpu.memory_space<vmem>>) attributes {dimension_semantics = [#tpu.dimension_semantics<parallel>], iteration_bounds = array<i64: 1>, scalar_prefetch = 0 : i64, scratch_operands = 0 : i64, tpu.core_type = #tpu.core_type<tc>, window_params = [{transform_indices = @transform_0, window_bounds = array<i64: 4, 512>}, {pipeline_mode = #tpu.pipeline_mode<synchronous>, transform_indices = @transform_1, window_bounds = array<i64: 1, 512>}, {pipeline_mode = #tpu.pipeline_mode<synchronous>, transform_indices = @transform_2, window_bounds = array<i64: 1, 512>}, {pipeline_mode = #tpu.pipeline_mode<synchronous>, transform_indices = @transform_3, window_bounds = array<i64: 512, 2>}, {pipeline_mode = #tpu.pipeline_mode<synchronous>, transform_indices = @transform_4, window_bounds = array<i64: 2, 512>}, {pipeline_mode = #tpu.pipeline_mode<synchronous>, transform_indices = @transform_5, window_bounds = array<i64: 4, 4>}, {pipeline_mode = #tpu.pipeline_mode<synchronous>, transform_indices = @transform_6, window_bounds = array<i64: 4, 1>}, {pipeline_mode = #tpu.pipeline_mode<synchronous>, transform_indices = @transform_7, window_bounds = array<i64: 49, 4, 4>}, {pipeline_mode = #tpu.pipeline_mode<synchronous>, transform_indices = @transform_8, window_bounds = array<i64: 4, 1>}, {pipeline_mode = #tpu.pipeline_mode<synchronous>, transform_indices = @transform_9, window_bounds = array<i64: 25, 4, 4>}, {pipeline_mode = #tpu.pipeline_mode<synchronous>, transform_indices = @transform_10, window_bounds = array<i64: 4, 1>}, {pipeline_mode = #tpu.pipeline_mode<synchronous>, transform_indices = @transform_11, window_bounds = array<i64: 9, 4, 4>}, {pipeline_mode = #tpu.pipeline_mode<synchronous>, transform_indices = @transform_12, window_bounds = array<i64: 4, 1>}, {pipeline_mode = #tpu.pipeline_mode<synchronous>, transform_indices = @transform_13, window_bounds = array<i64: 4, 4, 4>}, {pipeline_mode = #tpu.pipeline_mode<synchronous>, transform_indices = @transform_14, window_bounds = array<i64: 4, 1>}, {transform_indices = @transform_15, window_bounds = array<i64: 4, 512>}]} {
    %c0 = arith.constant 0 : index
    %c0_0 = arith.constant 0 : index
    %0 = vector.load %arg1[%c0, %c0_0] : memref<4x512xf32, #tpu.memory_space<vmem>>, vector<4x512xf32>
    %1 = arith.truncf %0 : vector<4x512xf32> to vector<4x512xbf16>
    %c0_1 = arith.constant 0 : index
    %c0_2 = arith.constant 0 : index
    %2 = vector.load %arg2[%c0_1, %c0_2] : memref<1x512xi32, #tpu.memory_space<vmem>>, vector<1x512xi32>
    %c0_3 = arith.constant 0 : index
    %c0_4 = arith.constant 0 : index
    %3 = vector.load %arg3[%c0_3, %c0_4] : memref<1x512xi32, #tpu.memory_space<vmem>>, vector<1x512xi32>
    %cst = arith.constant 0.000000e+00 : f32
    %4 = vector.broadcast %cst : f32 to vector<4x512xf32>
    %cst_5 = arith.constant 0.000000e+00 : f32
    %5 = vector.broadcast %cst_5 : f32 to vector<4x512xf32>
    %cst_6 = arith.constant 0.000000e+00 : f32
    %6 = vector.broadcast %cst_6 : f32 to vector<4x512xf32>
    %c51_i32 = arith.constant 51 : i32
    %7 = tpu.dynamic_rotate %0 by %c51_i32 dim 1 : vector<4x512xf32>, i32 -> vector<4x512xf32>
    %c-3_i32 = arith.constant -3 : i32
    %8 = vector.broadcast %c-3_i32 : i32 to vector<1x512xi32>
    %9 = arith.addi %2, %8 : vector<1x512xi32>
    %c0_i32 = arith.constant 0 : i32
    %10 = vector.broadcast %c0_i32 : i32 to vector<1x512xi32>
    %11 = arith.cmpi sge, %9, %10 : vector<1x512xi32>
    %c-3_i32_7 = arith.constant -3 : i32
    %12 = vector.broadcast %c-3_i32_7 : i32 to vector<1x512xi32>
    %13 = arith.addi %2, %12 : vector<1x512xi32>
    %c16_i32 = arith.constant 16 : i32
    %14 = vector.broadcast %c16_i32 : i32 to vector<1x512xi32>
    %15 = arith.cmpi slt, %13, %14 : vector<1x512xi32>
    %16 = arith.andi %11, %15 : vector<1x512xi1>
    %c-3_i32_8 = arith.constant -3 : i32
    %17 = vector.broadcast %c-3_i32_8 : i32 to vector<1x512xi32>
    %18 = arith.addi %3, %17 : vector<1x512xi32>
    %c0_i32_9 = arith.constant 0 : i32
    %19 = vector.broadcast %c0_i32_9 : i32 to vector<1x512xi32>
    %20 = arith.cmpi sge, %18, %19 : vector<1x512xi32>
    %21 = arith.andi %16, %20 : vector<1x512xi1>
    %c-3_i32_10 = arith.constant -3 : i32
    %22 = vector.broadcast %c-3_i32_10 : i32 to vector<1x512xi32>
    %23 = arith.addi %3, %22 : vector<1x512xi32>
    %c16_i32_11 = arith.constant 16 : i32
    %24 = vector.broadcast %c16_i32_11 : i32 to vector<1x512xi32>
    %25 = arith.cmpi slt, %23, %24 : vector<1x512xi32>
    %26 = arith.andi %21, %25 : vector<1x512xi1>
    %cst_12 = arith.constant 0.000000e+00 : f32
    %27 = vector.shape_cast %26 : vector<1x512xi1> to vector<1x512xi1>
    %28 = vector.broadcast %27 : vector<1x512xi1> to vector<4x512xi1>
    %29 = vector.broadcast %cst_12 : f32 to vector<4x512xf32>
    %30 = arith.select %28, %7, %29 : vector<4x512xi1>, vector<4x512xf32>
    %31 = arith.truncf %30 : vector<4x512xf32> to vector<4x512xbf16>
    %c0_13 = arith.constant 0 : index
    %c0_14 = arith.constant 0 : index
    %c0_15 = arith.constant 0 : index
    %32 = vector.load %arg8[%c0_13, %c0_14, %c0_15] : memref<49x4x4xbf16, #tpu.memory_space<vmem>>, vector<1x4x4xbf16>
    %33 = vector.shape_cast %32 : vector<1x4x4xbf16> to vector<4x4xbf16>
    %cst_16 = arith.constant dense<0.000000e+00> : vector<4x512xf32>
    %34 = tpu.matmul %33, %31, %cst_16 {dimension_numbers = #tpu.dot_dimension_numbers<[1], [0], [0], [1], [0, 0, 1, 1], [], []>} : vector<4x4xbf16>, vector<4x512xbf16>, vector<4x512xf32> -> vector<4x512xf32>
    %35 = arith.addf %4, %34 : vector<4x512xf32>
    %c50_i32 = arith.constant 50 : i32
    %36 = tpu.dynamic_rotate %0 by %c50_i32 dim 1 : vector<4x512xf32>, i32 -> vector<4x512xf32>
    %c-3_i32_17 = arith.constant -3 : i32
    %37 = vector.broadcast %c-3_i32_17 : i32 to vector<1x512xi32>
    %38 = arith.addi %2, %37 : vector<1x512xi32>
    %c0_i32_18 = arith.constant 0 : i32
    %39 = vector.broadcast %c0_i32_18 : i32 to vector<1x512xi32>
    %40 = arith.cmpi sge, %38, %39 : vector<1x512xi32>
    %c-3_i32_19 = arith.constant -3 : i32
    %41 = vector.broadcast %c-3_i32_19 : i32 to vector<1x512xi32>
    %42 = arith.addi %2, %41 : vector<1x512xi32>
    %c16_i32_20 = arith.constant 16 : i32
    %43 = vector.broadcast %c16_i32_20 : i32 to vector<1x512xi32>
    %44 = arith.cmpi slt, %42, %43 : vector<1x512xi32>
    %45 = arith.andi %40, %44 : vector<1x512xi1>
    %c-2_i32 = arith.constant -2 : i32
    %46 = vector.broadcast %c-2_i32 : i32 to vector<1x512xi32>
    %47 = arith.addi %3, %46 : vector<1x512xi32>
    %c0_i32_21 = arith.constant 0 : i32
    %48 = vector.broadcast %c0_i32_21 : i32 to vector<1x512xi32>
    %49 = arith.cmpi sge, %47, %48 : vector<1x512xi32>
    %50 = arith.andi %45, %49 : vector<1x512xi1>
    %c-2_i32_22 = arith.constant -2 : i32
    %51 = vector.broadcast %c-2_i32_22 : i32 to vector<1x512xi32>
    %52 = arith.addi %3, %51 : vector<1x512xi32>
    %c16_i32_23 = arith.constant 16 : i32
    %53 = vector.broadcast %c16_i32_23 : i32 to vector<1x512xi32>
    %54 = arith.cmpi slt, %52, %53 : vector<1x512xi32>
    %55 = arith.andi %50, %54 : vector<1x512xi1>
    %cst_24 = arith.constant 0.000000e+00 : f32
    %56 = vector.shape_cast %55 : vector<1x512xi1> to vector<1x512xi1>
    %57 = vector.broadcast %56 : vector<1x512xi1> to vector<4x512xi1>
    %58 = vector.broadcast %cst_24 : f32 to vector<4x512xf32>
    %59 = arith.select %57, %36, %58 : vector<4x512xi1>, vector<4x512xf32>
    %60 = arith.truncf %59 : vector<4x512xf32> to vector<4x512xbf16>
    %c1 = arith.constant 1 : index
    %c0_25 = arith.constant 0 : index
    %c0_26 = arith.constant 0 : index
    %61 = vector.load %arg8[%c1, %c0_25, %c0_26] : memref<49x4x4xbf16, #tpu.memory_space<vmem>>, vector<1x4x4xbf16>
    %62 = vector.shape_cast %61 : vector<1x4x4xbf16> to vector<4x4xbf16>
    %cst_27 = arith.constant dense<0.000000e+00> : vector<4x512xf32>
    %63 = tpu.matmul %62, %60, %cst_27 {dimension_numbers = #tpu.dot_dimension_numbers<[1], [0], [0], [1], [0, 0, 1, 1], [], []>} : vector<4x4xbf16>, vector<4x512xbf16>, vector<4x512xf32> -> vector<4x512xf32>
    %64 = arith.addf %35, %63 : vector<4x512xf32>
    %c49_i32 = arith.constant 49 : i32
    %65 = tpu.dynamic_rotate %0 by %c49_i32 dim 1 : vector<4x512xf32>, i32 -> vector<4x512xf32>
    %c-3_i32_28 = arith.constant -3 : i32
    %66 = vector.broadcast %c-3_i32_28 : i32 to vector<1x512xi32>
    %67 = arith.addi %2, %66 : vector<1x512xi32>
    %c0_i32_29 = arith.constant 0 : i32
    %68 = vector.broadcast %c0_i32_29 : i32 to vector<1x512xi32>
    %69 = arith.cmpi sge, %67, %68 : vector<1x512xi32>
    %c-3_i32_30 = arith.constant -3 : i32
    %70 = vector.broadcast %c-3_i32_30 : i32 to vector<1x512xi32>
    %71 = arith.addi %2, %70 : vector<1x512xi32>
    %c16_i32_31 = arith.constant 16 : i32
    %72 = vector.broadcast %c16_i32_31 : i32 to vector<1x512xi32>
    %73 = arith.cmpi slt, %71, %72 : vector<1x512xi32>
    %74 = arith.andi %69, %73 : vector<1x512xi1>
    %c-1_i32 = arith.constant -1 : i32
    %75 = vector.broadcast %c-1_i32 : i32 to vector<1x512xi32>
    %76 = arith.addi %3, %75 : vector<1x512xi32>
    %c0_i32_32 = arith.constant 0 : i32
    %77 = vector.broadcast %c0_i32_32 : i32 to vector<1x512xi32>
    %78 = arith.cmpi sge, %76, %77 : vector<1x512xi32>
    %79 = arith.andi %74, %78 : vector<1x512xi1>
    %c-1_i32_33 = arith.constant -1 : i32
    %80 = vector.broadcast %c-1_i32_33 : i32 to vector<1x512xi32>
    %81 = arith.addi %3, %80 : vector<1x512xi32>
    %c16_i32_34 = arith.constant 16 : i32
    %82 = vector.broadcast %c16_i32_34 : i32 to vector<1x512xi32>
    %83 = arith.cmpi slt, %81, %82 : vector<1x512xi32>
    %84 = arith.andi %79, %83 : vector<1x512xi1>
    %cst_35 = arith.constant 0.000000e+00 : f32
    %85 = vector.shape_cast %84 : vector<1x512xi1> to vector<1x512xi1>
    %86 = vector.broadcast %85 : vector<1x512xi1> to vector<4x512xi1>
    %87 = vector.broadcast %cst_35 : f32 to vector<4x512xf32>
    %88 = arith.select %86, %65, %87 : vector<4x512xi1>, vector<4x512xf32>
    %89 = arith.truncf %88 : vector<4x512xf32> to vector<4x512xbf16>
    %c2 = arith.constant 2 : index
    %c0_36 = arith.constant 0 : index
    %c0_37 = arith.constant 0 : index
    %90 = vector.load %arg8[%c2, %c0_36, %c0_37] : memref<49x4x4xbf16, #tpu.memory_space<vmem>>, vector<1x4x4xbf16>
    %91 = vector.shape_cast %90 : vector<1x4x4xbf16> to vector<4x4xbf16>
    %cst_38 = arith.constant dense<0.000000e+00> : vector<4x512xf32>
    %92 = tpu.matmul %91, %89, %cst_38 {dimension_numbers = #tpu.dot_dimension_numbers<[1], [0], [0], [1], [0, 0, 1, 1], [], []>} : vector<4x4xbf16>, vector<4x512xbf16>, vector<4x512xf32> -> vector<4x512xf32>
    %93 = arith.addf %64, %92 : vector<4x512xf32>
    %c48_i32 = arith.constant 48 : i32
    %94 = tpu.dynamic_rotate %0 by %c48_i32 dim 1 : vector<4x512xf32>, i32 -> vector<4x512xf32>
    %c-3_i32_39 = arith.constant -3 : i32
    %95 = vector.broadcast %c-3_i32_39 : i32 to vector<1x512xi32>
    %96 = arith.addi %2, %95 : vector<1x512xi32>
    %c0_i32_40 = arith.constant 0 : i32
    %97 = vector.broadcast %c0_i32_40 : i32 to vector<1x512xi32>
    %98 = arith.cmpi sge, %96, %97 : vector<1x512xi32>
    %c-3_i32_41 = arith.constant -3 : i32
    %99 = vector.broadcast %c-3_i32_41 : i32 to vector<1x512xi32>
    %100 = arith.addi %2, %99 : vector<1x512xi32>
    %c16_i32_42 = arith.constant 16 : i32
    %101 = vector.broadcast %c16_i32_42 : i32 to vector<1x512xi32>
    %102 = arith.cmpi slt, %100, %101 : vector<1x512xi32>
    %103 = arith.andi %98, %102 : vector<1x512xi1>
    %c0_i32_43 = arith.constant 0 : i32
    %104 = vector.broadcast %c0_i32_43 : i32 to vector<1x512xi32>
    %105 = arith.addi %3, %104 : vector<1x512xi32>
    %c0_i32_44 = arith.constant 0 : i32
    %106 = vector.broadcast %c0_i32_44 : i32 to vector<1x512xi32>
    %107 = arith.cmpi sge, %105, %106 : vector<1x512xi32>
    %108 = arith.andi %103, %107 : vector<1x512xi1>
    %c0_i32_45 = arith.constant 0 : i32
    %109 = vector.broadcast %c0_i32_45 : i32 to vector<1x512xi32>
    %110 = arith.addi %3, %109 : vector<1x512xi32>
    %c16_i32_46 = arith.constant 16 : i32
    %111 = vector.broadcast %c16_i32_46 : i32 to vector<1x512xi32>
    %112 = arith.cmpi slt, %110, %111 : vector<1x512xi32>
    %113 = arith.andi %108, %112 : vector<1x512xi1>
    %cst_47 = arith.constant 0.000000e+00 : f32
    %114 = vector.shape_cast %113 : vector<1x512xi1> to vector<1x512xi1>
    %115 = vector.broadcast %114 : vector<1x512xi1> to vector<4x512xi1>
    %116 = vector.broadcast %cst_47 : f32 to vector<4x512xf32>
    %117 = arith.select %115, %94, %116 : vector<4x512xi1>, vector<4x512xf32>
    %118 = arith.truncf %117 : vector<4x512xf32> to vector<4x512xbf16>
    %c3 = arith.constant 3 : index
    %c0_48 = arith.constant 0 : index
    %c0_49 = arith.constant 0 : index
    %119 = vector.load %arg8[%c3, %c0_48, %c0_49] : memref<49x4x4xbf16, #tpu.memory_space<vmem>>, vector<1x4x4xbf16>
    %120 = vector.shape_cast %119 : vector<1x4x4xbf16> to vector<4x4xbf16>
    %cst_50 = arith.constant dense<0.000000e+00> : vector<4x512xf32>
    %121 = tpu.matmul %120, %118, %cst_50 {dimension_numbers = #tpu.dot_dimension_numbers<[1], [0], [0], [1], [0, 0, 1, 1], [], []>} : vector<4x4xbf16>, vector<4x512xbf16>, vector<4x512xf32> -> vector<4x512xf32>
    %122 = arith.addf %93, %121 : vector<4x512xf32>
    %c47_i32 = arith.constant 47 : i32
    %123 = tpu.dynamic_rotate %0 by %c47_i32 dim 1 : vector<4x512xf32>, i32 -> vector<4x512xf32>
    %c-3_i32_51 = arith.constant -3 : i32
    %124 = vector.broadcast %c-3_i32_51 : i32 to vector<1x512xi32>
    %125 = arith.addi %2, %124 : vector<1x512xi32>
    %c0_i32_52 = arith.constant 0 : i32
    %126 = vector.broadcast %c0_i32_52 : i32 to vector<1x512xi32>
    %127 = arith.cmpi sge, %125, %126 : vector<1x512xi32>
    %c-3_i32_53 = arith.constant -3 : i32
    %128 = vector.broadcast %c-3_i32_53 : i32 to vector<1x512xi32>
    %129 = arith.addi %2, %128 : vector<1x512xi32>
    %c16_i32_54 = arith.constant 16 : i32
    %130 = vector.broadcast %c16_i32_54 : i32 to vector<1x512xi32>
    %131 = arith.cmpi slt, %129, %130 : vector<1x512xi32>
    %132 = arith.andi %127, %131 : vector<1x512xi1>
    %c1_i32 = arith.constant 1 : i32
    %133 = vector.broadcast %c1_i32 : i32 to vector<1x512xi32>
    %134 = arith.addi %3, %133 : vector<1x512xi32>
    %c0_i32_55 = arith.constant 0 : i32
    %135 = vector.broadcast %c0_i32_55 : i32 to vector<1x512xi32>
    %136 = arith.cmpi sge, %134, %135 : vector<1x512xi32>
    %137 = arith.andi %132, %136 : vector<1x512xi1>
    %c1_i32_56 = arith.constant 1 : i32
    %138 = vector.broadcast %c1_i32_56 : i32 to vector<1x512xi32>
    %139 = arith.addi %3, %138 : vector<1x512xi32>
    %c16_i32_57 = arith.constant 16 : i32
    %140 = vector.broadcast %c16_i32_57 : i32 to vector<1x512xi32>
    %141 = arith.cmpi slt, %139, %140 : vector<1x512xi32>
    %142 = arith.andi %137, %141 : vector<1x512xi1>
    %cst_58 = arith.constant 0.000000e+00 : f32
    %143 = vector.shape_cast %142 : vector<1x512xi1> to vector<1x512xi1>
    %144 = vector.broadcast %143 : vector<1x512xi1> to vector<4x512xi1>
    %145 = vector.broadcast %cst_58 : f32 to vector<4x512xf32>
    %146 = arith.select %144, %123, %145 : vector<4x512xi1>, vector<4x512xf32>
    %147 = arith.truncf %146 : vector<4x512xf32> to vector<4x512xbf16>
    %c4 = arith.constant 4 : index
    %c0_59 = arith.constant 0 : index
    %c0_60 = arith.constant 0 : index
    %148 = vector.load %arg8[%c4, %c0_59, %c0_60] : memref<49x4x4xbf16, #tpu.memory_space<vmem>>, vector<1x4x4xbf16>
    %149 = vector.shape_cast %148 : vector<1x4x4xbf16> to vector<4x4xbf16>
    %cst_61 = arith.constant dense<0.000000e+00> : vector<4x512xf32>
    %150 = tpu.matmul %149, %147, %cst_61 {dimension_numbers = #tpu.dot_dimension_numbers<[1], [0], [0], [1], [0, 0, 1, 1], [], []>} : vector<4x4xbf16>, vector<4x512xbf16>, vector<4x512xf32> -> vector<4x512xf32>
    %151 = arith.addf %122, %150 : vector<4x512xf32>
    %c46_i32 = arith.constant 46 : i32
    %152 = tpu.dynamic_rotate %0 by %c46_i32 dim 1 : vector<4x512xf32>, i32 -> vector<4x512xf32>
    %c-3_i32_62 = arith.constant -3 : i32
    %153 = vector.broadcast %c-3_i32_62 : i32 to vector<1x512xi32>
    %154 = arith.addi %2, %153 : vector<1x512xi32>
    %c0_i32_63 = arith.constant 0 : i32
    %155 = vector.broadcast %c0_i32_63 : i32 to vector<1x512xi32>
    %156 = arith.cmpi sge, %154, %155 : vector<1x512xi32>
    %c-3_i32_64 = arith.constant -3 : i32
    %157 = vector.broadcast %c-3_i32_64 : i32 to vector<1x512xi32>
    %158 = arith.addi %2, %157 : vector<1x512xi32>
    %c16_i32_65 = arith.constant 16 : i32
    %159 = vector.broadcast %c16_i32_65 : i32 to vector<1x512xi32>
    %160 = arith.cmpi slt, %158, %159 : vector<1x512xi32>
    %161 = arith.andi %156, %160 : vector<1x512xi1>
    %c2_i32 = arith.constant 2 : i32
    %162 = vector.broadcast %c2_i32 : i32 to vector<1x512xi32>
    %163 = arith.addi %3, %162 : vector<1x512xi32>
    %c0_i32_66 = arith.constant 0 : i32
    %164 = vector.broadcast %c0_i32_66 : i32 to vector<1x512xi32>
    %165 = arith.cmpi sge, %163, %164 : vector<1x512xi32>
    %166 = arith.andi %161, %165 : vector<1x512xi1>
    %c2_i32_67 = arith.constant 2 : i32
    %167 = vector.broadcast %c2_i32_67 : i32 to vector<1x512xi32>
    %168 = arith.addi %3, %167 : vector<1x512xi32>
    %c16_i32_68 = arith.constant 16 : i32
    %169 = vector.broadcast %c16_i32_68 : i32 to vector<1x512xi32>
    %170 = arith.cmpi slt, %168, %169 : vector<1x512xi32>
    %171 = arith.andi %166, %170 : vector<1x512xi1>
    %cst_69 = arith.constant 0.000000e+00 : f32
    %172 = vector.shape_cast %171 : vector<1x512xi1> to vector<1x512xi1>
    %173 = vector.broadcast %172 : vector<1x512xi1> to vector<4x512xi1>
    %174 = vector.broadcast %cst_69 : f32 to vector<4x512xf32>
    %175 = arith.select %173, %152, %174 : vector<4x512xi1>, vector<4x512xf32>
    %176 = arith.truncf %175 : vector<4x512xf32> to vector<4x512xbf16>
    %c5 = arith.constant 5 : index
    %c0_70 = arith.constant 0 : index
    %c0_71 = arith.constant 0 : index
    %177 = vector.load %arg8[%c5, %c0_70, %c0_71] : memref<49x4x4xbf16, #tpu.memory_space<vmem>>, vector<1x4x4xbf16>
    %178 = vector.shape_cast %177 : vector<1x4x4xbf16> to vector<4x4xbf16>
    %cst_72 = arith.constant dense<0.000000e+00> : vector<4x512xf32>
    %179 = tpu.matmul %178, %176, %cst_72 {dimension_numbers = #tpu.dot_dimension_numbers<[1], [0], [0], [1], [0, 0, 1, 1], [], []>} : vector<4x4xbf16>, vector<4x512xbf16>, vector<4x512xf32> -> vector<4x512xf32>
    %180 = arith.addf %151, %179 : vector<4x512xf32>
    %c45_i32 = arith.constant 45 : i32
    %181 = tpu.dynamic_rotate %0 by %c45_i32 dim 1 : vector<4x512xf32>, i32 -> vector<4x512xf32>
    %c-3_i32_73 = arith.constant -3 : i32
    %182 = vector.broadcast %c-3_i32_73 : i32 to vector<1x512xi32>
    %183 = arith.addi %2, %182 : vector<1x512xi32>
    %c0_i32_74 = arith.constant 0 : i32
    %184 = vector.broadcast %c0_i32_74 : i32 to vector<1x512xi32>
    %185 = arith.cmpi sge, %183, %184 : vector<1x512xi32>
    %c-3_i32_75 = arith.constant -3 : i32
    %186 = vector.broadcast %c-3_i32_75 : i32 to vector<1x512xi32>
    %187 = arith.addi %2, %186 : vector<1x512xi32>
    %c16_i32_76 = arith.constant 16 : i32
    %188 = vector.broadcast %c16_i32_76 : i32 to vector<1x512xi32>
    %189 = arith.cmpi slt, %187, %188 : vector<1x512xi32>
    %190 = arith.andi %185, %189 : vector<1x512xi1>
    %c3_i32 = arith.constant 3 : i32
    %191 = vector.broadcast %c3_i32 : i32 to vector<1x512xi32>
    %192 = arith.addi %3, %191 : vector<1x512xi32>
    %c0_i32_77 = arith.constant 0 : i32
    %193 = vector.broadcast %c0_i32_77 : i32 to vector<1x512xi32>
    %194 = arith.cmpi sge, %192, %193 : vector<1x512xi32>
    %195 = arith.andi %190, %194 : vector<1x512xi1>
    %c3_i32_78 = arith.constant 3 : i32
    %196 = vector.broadcast %c3_i32_78 : i32 to vector<1x512xi32>
    %197 = arith.addi %3, %196 : vector<1x512xi32>
    %c16_i32_79 = arith.constant 16 : i32
    %198 = vector.broadcast %c16_i32_79 : i32 to vector<1x512xi32>
    %199 = arith.cmpi slt, %197, %198 : vector<1x512xi32>
    %200 = arith.andi %195, %199 : vector<1x512xi1>
    %cst_80 = arith.constant 0.000000e+00 : f32
    %201 = vector.shape_cast %200 : vector<1x512xi1> to vector<1x512xi1>
    %202 = vector.broadcast %201 : vector<1x512xi1> to vector<4x512xi1>
    %203 = vector.broadcast %cst_80 : f32 to vector<4x512xf32>
    %204 = arith.select %202, %181, %203 : vector<4x512xi1>, vector<4x512xf32>
    %205 = arith.truncf %204 : vector<4x512xf32> to vector<4x512xbf16>
    %c6 = arith.constant 6 : index
    %c0_81 = arith.constant 0 : index
    %c0_82 = arith.constant 0 : index
    %206 = vector.load %arg8[%c6, %c0_81, %c0_82] : memref<49x4x4xbf16, #tpu.memory_space<vmem>>, vector<1x4x4xbf16>
    %207 = vector.shape_cast %206 : vector<1x4x4xbf16> to vector<4x4xbf16>
    %cst_83 = arith.constant dense<0.000000e+00> : vector<4x512xf32>
    %208 = tpu.matmul %207, %205, %cst_83 {dimension_numbers = #tpu.dot_dimension_numbers<[1], [0], [0], [1], [0, 0, 1, 1], [], []>} : vector<4x4xbf16>, vector<4x512xbf16>, vector<4x512xf32> -> vector<4x512xf32>
    %209 = arith.addf %180, %208 : vector<4x512xf32>
    %c35_i32 = arith.constant 35 : i32
    %210 = tpu.dynamic_rotate %0 by %c35_i32 dim 1 : vector<4x512xf32>, i32 -> vector<4x512xf32>
    %c-2_i32_84 = arith.constant -2 : i32
    %211 = vector.broadcast %c-2_i32_84 : i32 to vector<1x512xi32>
    %212 = arith.addi %2, %211 : vector<1x512xi32>
    %c0_i32_85 = arith.constant 0 : i32
    %213 = vector.broadcast %c0_i32_85 : i32 to vector<1x512xi32>
    %214 = arith.cmpi sge, %212, %213 : vector<1x512xi32>
    %c-2_i32_86 = arith.constant -2 : i32
    %215 = vector.broadcast %c-2_i32_86 : i32 to vector<1x512xi32>
    %216 = arith.addi %2, %215 : vector<1x512xi32>
    %c16_i32_87 = arith.constant 16 : i32
    %217 = vector.broadcast %c16_i32_87 : i32 to vector<1x512xi32>
    %218 = arith.cmpi slt, %216, %217 : vector<1x512xi32>
    %219 = arith.andi %214, %218 : vector<1x512xi1>
    %c-3_i32_88 = arith.constant -3 : i32
    %220 = vector.broadcast %c-3_i32_88 : i32 to vector<1x512xi32>
    %221 = arith.addi %3, %220 : vector<1x512xi32>
    %c0_i32_89 = arith.constant 0 : i32
    %222 = vector.broadcast %c0_i32_89 : i32 to vector<1x512xi32>
    %223 = arith.cmpi sge, %221, %222 : vector<1x512xi32>
    %224 = arith.andi %219, %223 : vector<1x512xi1>
    %c-3_i32_90 = arith.constant -3 : i32
    %225 = vector.broadcast %c-3_i32_90 : i32 to vector<1x512xi32>
    %226 = arith.addi %3, %225 : vector<1x512xi32>
    %c16_i32_91 = arith.constant 16 : i32
    %227 = vector.broadcast %c16_i32_91 : i32 to vector<1x512xi32>
    %228 = arith.cmpi slt, %226, %227 : vector<1x512xi32>
    %229 = arith.andi %224, %228 : vector<1x512xi1>
    %cst_92 = arith.constant 0.000000e+00 : f32
    %230 = vector.shape_cast %229 : vector<1x512xi1> to vector<1x512xi1>
    %231 = vector.broadcast %230 : vector<1x512xi1> to vector<4x512xi1>
    %232 = vector.broadcast %cst_92 : f32 to vector<4x512xf32>
    %233 = arith.select %231, %210, %232 : vector<4x512xi1>, vector<4x512xf32>
    %234 = arith.truncf %233 : vector<4x512xf32> to vector<4x512xbf16>
    %c7 = arith.constant 7 : index
    %c0_93 = arith.constant 0 : index
    %c0_94 = arith.constant 0 : index
    %235 = vector.load %arg8[%c7, %c0_93, %c0_94] : memref<49x4x4xbf16, #tpu.memory_space<vmem>>, vector<1x4x4xbf16>
    %236 = vector.shape_cast %235 : vector<1x4x4xbf16> to vector<4x4xbf16>
    %cst_95 = arith.constant dense<0.000000e+00> : vector<4x512xf32>
    %237 = tpu.matmul %236, %234, %cst_95 {dimension_numbers = #tpu.dot_dimension_numbers<[1], [0], [0], [1], [0, 0, 1, 1], [], []>} : vector<4x4xbf16>, vector<4x512xbf16>, vector<4x512xf32> -> vector<4x512xf32>
    %238 = arith.addf %209, %237 : vector<4x512xf32>
    %c34_i32 = arith.constant 34 : i32
    %239 = tpu.dynamic_rotate %0 by %c34_i32 dim 1 : vector<4x512xf32>, i32 -> vector<4x512xf32>
    %c-2_i32_96 = arith.constant -2 : i32
    %240 = vector.broadcast %c-2_i32_96 : i32 to vector<1x512xi32>
    %241 = arith.addi %2, %240 : vector<1x512xi32>
    %c0_i32_97 = arith.constant 0 : i32
    %242 = vector.broadcast %c0_i32_97 : i32 to vector<1x512xi32>
    %243 = arith.cmpi sge, %241, %242 : vector<1x512xi32>
    %c-2_i32_98 = arith.constant -2 : i32
    %244 = vector.broadcast %c-2_i32_98 : i32 to vector<1x512xi32>
    %245 = arith.addi %2, %244 : vector<1x512xi32>
    %c16_i32_99 = arith.constant 16 : i32
    %246 = vector.broadcast %c16_i32_99 : i32 to vector<1x512xi32>
    %247 = arith.cmpi slt, %245, %246 : vector<1x512xi32>
    %248 = arith.andi %243, %247 : vector<1x512xi1>
    %c-2_i32_100 = arith.constant -2 : i32
    %249 = vector.broadcast %c-2_i32_100 : i32 to vector<1x512xi32>
    %250 = arith.addi %3, %249 : vector<1x512xi32>
    %c0_i32_101 = arith.constant 0 : i32
    %251 = vector.broadcast %c0_i32_101 : i32 to vector<1x512xi32>
    %252 = arith.cmpi sge, %250, %251 : vector<1x512xi32>
    %253 = arith.andi %248, %252 : vector<1x512xi1>
    %c-2_i32_102 = arith.constant -2 : i32
    %254 = vector.broadcast %c-2_i32_102 : i32 to vector<1x512xi32>
    %255 = arith.addi %3, %254 : vector<1x512xi32>
    %c16_i32_103 = arith.constant 16 : i32
    %256 = vector.broadcast %c16_i32_103 : i32 to vector<1x512xi32>
    %257 = arith.cmpi slt, %255, %256 : vector<1x512xi32>
    %258 = arith.andi %253, %257 : vector<1x512xi1>
    %cst_104 = arith.constant 0.000000e+00 : f32
    %259 = vector.shape_cast %258 : vector<1x512xi1> to vector<1x512xi1>
    %260 = vector.broadcast %259 : vector<1x512xi1> to vector<4x512xi1>
    %261 = vector.broadcast %cst_104 : f32 to vector<4x512xf32>
    %262 = arith.select %260, %239, %261 : vector<4x512xi1>, vector<4x512xf32>
    %263 = arith.truncf %262 : vector<4x512xf32> to vector<4x512xbf16>
    %c8 = arith.constant 8 : index
    %c0_105 = arith.constant 0 : index
    %c0_106 = arith.constant 0 : index
    %264 = vector.load %arg8[%c8, %c0_105, %c0_106] : memref<49x4x4xbf16, #tpu.memory_space<vmem>>, vector<1x4x4xbf16>
    %265 = vector.shape_cast %264 : vector<1x4x4xbf16> to vector<4x4xbf16>
    %cst_107 = arith.constant dense<0.000000e+00> : vector<4x512xf32>
    %266 = tpu.matmul %265, %263, %cst_107 {dimension_numbers = #tpu.dot_dimension_numbers<[1], [0], [0], [1], [0, 0, 1, 1], [], []>} : vector<4x4xbf16>, vector<4x512xbf16>, vector<4x512xf32> -> vector<4x512xf32>
    %267 = arith.addf %238, %266 : vector<4x512xf32>
    %c0_108 = arith.constant 0 : index
    %c0_109 = arith.constant 0 : index
    %c0_110 = arith.constant 0 : index
    %268 = vector.load %arg10[%c0_108, %c0_109, %c0_110] : memref<25x4x4xbf16, #tpu.memory_space<vmem>>, vector<1x4x4xbf16>
    %269 = vector.shape_cast %268 : vector<1x4x4xbf16> to vector<4x4xbf16>
    %cst_111 = arith.constant dense<0.000000e+00> : vector<4x512xf32>
    %270 = tpu.matmul %269, %263, %cst_111 {dimension_numbers = #tpu.dot_dimension_numbers<[1], [0], [0], [1], [0, 0, 1, 1], [], []>} : vector<4x4xbf16>, vector<4x512xbf16>, vector<4x512xf32> -> vector<4x512xf32>
    %271 = arith.addf %5, %270 : vector<4x512xf32>
    %c33_i32 = arith.constant 33 : i32
    %272 = tpu.dynamic_rotate %0 by %c33_i32 dim 1 : vector<4x512xf32>, i32 -> vector<4x512xf32>
    %c-2_i32_112 = arith.constant -2 : i32
    %273 = vector.broadcast %c-2_i32_112 : i32 to vector<1x512xi32>
    %274 = arith.addi %2, %273 : vector<1x512xi32>
    %c0_i32_113 = arith.constant 0 : i32
    %275 = vector.broadcast %c0_i32_113 : i32 to vector<1x512xi32>
    %276 = arith.cmpi sge, %274, %275 : vector<1x512xi32>
    %c-2_i32_114 = arith.constant -2 : i32
    %277 = vector.broadcast %c-2_i32_114 : i32 to vector<1x512xi32>
    %278 = arith.addi %2, %277 : vector<1x512xi32>
    %c16_i32_115 = arith.constant 16 : i32
    %279 = vector.broadcast %c16_i32_115 : i32 to vector<1x512xi32>
    %280 = arith.cmpi slt, %278, %279 : vector<1x512xi32>
    %281 = arith.andi %276, %280 : vector<1x512xi1>
    %c-1_i32_116 = arith.constant -1 : i32
    %282 = vector.broadcast %c-1_i32_116 : i32 to vector<1x512xi32>
    %283 = arith.addi %3, %282 : vector<1x512xi32>
    %c0_i32_117 = arith.constant 0 : i32
    %284 = vector.broadcast %c0_i32_117 : i32 to vector<1x512xi32>
    %285 = arith.cmpi sge, %283, %284 : vector<1x512xi32>
    %286 = arith.andi %281, %285 : vector<1x512xi1>
    %c-1_i32_118 = arith.constant -1 : i32
    %287 = vector.broadcast %c-1_i32_118 : i32 to vector<1x512xi32>
    %288 = arith.addi %3, %287 : vector<1x512xi32>
    %c16_i32_119 = arith.constant 16 : i32
    %289 = vector.broadcast %c16_i32_119 : i32 to vector<1x512xi32>
    %290 = arith.cmpi slt, %288, %289 : vector<1x512xi32>
    %291 = arith.andi %286, %290 : vector<1x512xi1>
    %cst_120 = arith.constant 0.000000e+00 : f32
    %292 = vector.shape_cast %291 : vector<1x512xi1> to vector<1x512xi1>
    %293 = vector.broadcast %292 : vector<1x512xi1> to vector<4x512xi1>
    %294 = vector.broadcast %cst_120 : f32 to vector<4x512xf32>
    %295 = arith.select %293, %272, %294 : vector<4x512xi1>, vector<4x512xf32>
    %296 = arith.truncf %295 : vector<4x512xf32> to vector<4x512xbf16>
    %c9 = arith.constant 9 : index
    %c0_121 = arith.constant 0 : index
    %c0_122 = arith.constant 0 : index
    %297 = vector.load %arg8[%c9, %c0_121, %c0_122] : memref<49x4x4xbf16, #tpu.memory_space<vmem>>, vector<1x4x4xbf16>
    %298 = vector.shape_cast %297 : vector<1x4x4xbf16> to vector<4x4xbf16>
    %cst_123 = arith.constant dense<0.000000e+00> : vector<4x512xf32>
    %299 = tpu.matmul %298, %296, %cst_123 {dimension_numbers = #tpu.dot_dimension_numbers<[1], [0], [0], [1], [0, 0, 1, 1], [], []>} : vector<4x4xbf16>, vector<4x512xbf16>, vector<4x512xf32> -> vector<4x512xf32>
    %300 = arith.addf %267, %299 : vector<4x512xf32>
    %c1_124 = arith.constant 1 : index
    %c0_125 = arith.constant 0 : index
    %c0_126 = arith.constant 0 : index
    %301 = vector.load %arg10[%c1_124, %c0_125, %c0_126] : memref<25x4x4xbf16, #tpu.memory_space<vmem>>, vector<1x4x4xbf16>
    %302 = vector.shape_cast %301 : vector<1x4x4xbf16> to vector<4x4xbf16>
    %cst_127 = arith.constant dense<0.000000e+00> : vector<4x512xf32>
    %303 = tpu.matmul %302, %296, %cst_127 {dimension_numbers = #tpu.dot_dimension_numbers<[1], [0], [0], [1], [0, 0, 1, 1], [], []>} : vector<4x4xbf16>, vector<4x512xbf16>, vector<4x512xf32> -> vector<4x512xf32>
    %304 = arith.addf %271, %303 : vector<4x512xf32>
    %c32_i32 = arith.constant 32 : i32
    %305 = tpu.dynamic_rotate %0 by %c32_i32 dim 1 : vector<4x512xf32>, i32 -> vector<4x512xf32>
    %c-2_i32_128 = arith.constant -2 : i32
    %306 = vector.broadcast %c-2_i32_128 : i32 to vector<1x512xi32>
    %307 = arith.addi %2, %306 : vector<1x512xi32>
    %c0_i32_129 = arith.constant 0 : i32
    %308 = vector.broadcast %c0_i32_129 : i32 to vector<1x512xi32>
    %309 = arith.cmpi sge, %307, %308 : vector<1x512xi32>
    %c-2_i32_130 = arith.constant -2 : i32
    %310 = vector.broadcast %c-2_i32_130 : i32 to vector<1x512xi32>
    %311 = arith.addi %2, %310 : vector<1x512xi32>
    %c16_i32_131 = arith.constant 16 : i32
    %312 = vector.broadcast %c16_i32_131 : i32 to vector<1x512xi32>
    %313 = arith.cmpi slt, %311, %312 : vector<1x512xi32>
    %314 = arith.andi %309, %313 : vector<1x512xi1>
    %c0_i32_132 = arith.constant 0 : i32
    %315 = vector.broadcast %c0_i32_132 : i32 to vector<1x512xi32>
    %316 = arith.addi %3, %315 : vector<1x512xi32>
    %c0_i32_133 = arith.constant 0 : i32
    %317 = vector.broadcast %c0_i32_133 : i32 to vector<1x512xi32>
    %318 = arith.cmpi sge, %316, %317 : vector<1x512xi32>
    %319 = arith.andi %314, %318 : vector<1x512xi1>
    %c0_i32_134 = arith.constant 0 : i32
    %320 = vector.broadcast %c0_i32_134 : i32 to vector<1x512xi32>
    %321 = arith.addi %3, %320 : vector<1x512xi32>
    %c16_i32_135 = arith.constant 16 : i32
    %322 = vector.broadcast %c16_i32_135 : i32 to vector<1x512xi32>
    %323 = arith.cmpi slt, %321, %322 : vector<1x512xi32>
    %324 = arith.andi %319, %323 : vector<1x512xi1>
    %cst_136 = arith.constant 0.000000e+00 : f32
    %325 = vector.shape_cast %324 : vector<1x512xi1> to vector<1x512xi1>
    %326 = vector.broadcast %325 : vector<1x512xi1> to vector<4x512xi1>
    %327 = vector.broadcast %cst_136 : f32 to vector<4x512xf32>
    %328 = arith.select %326, %305, %327 : vector<4x512xi1>, vector<4x512xf32>
    %329 = arith.truncf %328 : vector<4x512xf32> to vector<4x512xbf16>
    %c10 = arith.constant 10 : index
    %c0_137 = arith.constant 0 : index
    %c0_138 = arith.constant 0 : index
    %330 = vector.load %arg8[%c10, %c0_137, %c0_138] : memref<49x4x4xbf16, #tpu.memory_space<vmem>>, vector<1x4x4xbf16>
    %331 = vector.shape_cast %330 : vector<1x4x4xbf16> to vector<4x4xbf16>
    %cst_139 = arith.constant dense<0.000000e+00> : vector<4x512xf32>
    %332 = tpu.matmul %331, %329, %cst_139 {dimension_numbers = #tpu.dot_dimension_numbers<[1], [0], [0], [1], [0, 0, 1, 1], [], []>} : vector<4x4xbf16>, vector<4x512xbf16>, vector<4x512xf32> -> vector<4x512xf32>
    %333 = arith.addf %300, %332 : vector<4x512xf32>
    %c2_140 = arith.constant 2 : index
    %c0_141 = arith.constant 0 : index
    %c0_142 = arith.constant 0 : index
    %334 = vector.load %arg10[%c2_140, %c0_141, %c0_142] : memref<25x4x4xbf16, #tpu.memory_space<vmem>>, vector<1x4x4xbf16>
    %335 = vector.shape_cast %334 : vector<1x4x4xbf16> to vector<4x4xbf16>
    %cst_143 = arith.constant dense<0.000000e+00> : vector<4x512xf32>
    %336 = tpu.matmul %335, %329, %cst_143 {dimension_numbers = #tpu.dot_dimension_numbers<[1], [0], [0], [1], [0, 0, 1, 1], [], []>} : vector<4x4xbf16>, vector<4x512xbf16>, vector<4x512xf32> -> vector<4x512xf32>
    %337 = arith.addf %304, %336 : vector<4x512xf32>
    %c31_i32 = arith.constant 31 : i32
    %338 = tpu.dynamic_rotate %0 by %c31_i32 dim 1 : vector<4x512xf32>, i32 -> vector<4x512xf32>
    %c-2_i32_144 = arith.constant -2 : i32
    %339 = vector.broadcast %c-2_i32_144 : i32 to vector<1x512xi32>
    %340 = arith.addi %2, %339 : vector<1x512xi32>
    %c0_i32_145 = arith.constant 0 : i32
    %341 = vector.broadcast %c0_i32_145 : i32 to vector<1x512xi32>
    %342 = arith.cmpi sge, %340, %341 : vector<1x512xi32>
    %c-2_i32_146 = arith.constant -2 : i32
    %343 = vector.broadcast %c-2_i32_146 : i32 to vector<1x512xi32>
    %344 = arith.addi %2, %343 : vector<1x512xi32>
    %c16_i32_147 = arith.constant 16 : i32
    %345 = vector.broadcast %c16_i32_147 : i32 to vector<1x512xi32>
    %346 = arith.cmpi slt, %344, %345 : vector<1x512xi32>
    %347 = arith.andi %342, %346 : vector<1x512xi1>
    %c1_i32_148 = arith.constant 1 : i32
    %348 = vector.broadcast %c1_i32_148 : i32 to vector<1x512xi32>
    %349 = arith.addi %3, %348 : vector<1x512xi32>
    %c0_i32_149 = arith.constant 0 : i32
    %350 = vector.broadcast %c0_i32_149 : i32 to vector<1x512xi32>
    %351 = arith.cmpi sge, %349, %350 : vector<1x512xi32>
    %352 = arith.andi %347, %351 : vector<1x512xi1>
    %c1_i32_150 = arith.constant 1 : i32
    %353 = vector.broadcast %c1_i32_150 : i32 to vector<1x512xi32>
    %354 = arith.addi %3, %353 : vector<1x512xi32>
    %c16_i32_151 = arith.constant 16 : i32
    %355 = vector.broadcast %c16_i32_151 : i32 to vector<1x512xi32>
    %356 = arith.cmpi slt, %354, %355 : vector<1x512xi32>
    %357 = arith.andi %352, %356 : vector<1x512xi1>
    %cst_152 = arith.constant 0.000000e+00 : f32
    %358 = vector.shape_cast %357 : vector<1x512xi1> to vector<1x512xi1>
    %359 = vector.broadcast %358 : vector<1x512xi1> to vector<4x512xi1>
    %360 = vector.broadcast %cst_152 : f32 to vector<4x512xf32>
    %361 = arith.select %359, %338, %360 : vector<4x512xi1>, vector<4x512xf32>
    %362 = arith.truncf %361 : vector<4x512xf32> to vector<4x512xbf16>
    %c11 = arith.constant 11 : index
    %c0_153 = arith.constant 0 : index
    %c0_154 = arith.constant 0 : index
    %363 = vector.load %arg8[%c11, %c0_153, %c0_154] : memref<49x4x4xbf16, #tpu.memory_space<vmem>>, vector<1x4x4xbf16>
    %364 = vector.shape_cast %363 : vector<1x4x4xbf16> to vector<4x4xbf16>
    %cst_155 = arith.constant dense<0.000000e+00> : vector<4x512xf32>
    %365 = tpu.matmul %364, %362, %cst_155 {dimension_numbers = #tpu.dot_dimension_numbers<[1], [0], [0], [1], [0, 0, 1, 1], [], []>} : vector<4x4xbf16>, vector<4x512xbf16>, vector<4x512xf32> -> vector<4x512xf32>
    %366 = arith.addf %333, %365 : vector<4x512xf32>
    %c3_156 = arith.constant 3 : index
    %c0_157 = arith.constant 0 : index
    %c0_158 = arith.constant 0 : index
    %367 = vector.load %arg10[%c3_156, %c0_157, %c0_158] : memref<25x4x4xbf16, #tpu.memory_space<vmem>>, vector<1x4x4xbf16>
    %368 = vector.shape_cast %367 : vector<1x4x4xbf16> to vector<4x4xbf16>
    %cst_159 = arith.constant dense<0.000000e+00> : vector<4x512xf32>
    %369 = tpu.matmul %368, %362, %cst_159 {dimension_numbers = #tpu.dot_dimension_numbers<[1], [0], [0], [1], [0, 0, 1, 1], [], []>} : vector<4x4xbf16>, vector<4x512xbf16>, vector<4x512xf32> -> vector<4x512xf32>
    %370 = arith.addf %337, %369 : vector<4x512xf32>
    %c30_i32 = arith.constant 30 : i32
    %371 = tpu.dynamic_rotate %0 by %c30_i32 dim 1 : vector<4x512xf32>, i32 -> vector<4x512xf32>
    %c-2_i32_160 = arith.constant -2 : i32
    %372 = vector.broadcast %c-2_i32_160 : i32 to vector<1x512xi32>
    %373 = arith.addi %2, %372 : vector<1x512xi32>
    %c0_i32_161 = arith.constant 0 : i32
    %374 = vector.broadcast %c0_i32_161 : i32 to vector<1x512xi32>
    %375 = arith.cmpi sge, %373, %374 : vector<1x512xi32>
    %c-2_i32_162 = arith.constant -2 : i32
    %376 = vector.broadcast %c-2_i32_162 : i32 to vector<1x512xi32>
    %377 = arith.addi %2, %376 : vector<1x512xi32>
    %c16_i32_163 = arith.constant 16 : i32
    %378 = vector.broadcast %c16_i32_163 : i32 to vector<1x512xi32>
    %379 = arith.cmpi slt, %377, %378 : vector<1x512xi32>
    %380 = arith.andi %375, %379 : vector<1x512xi1>
    %c2_i32_164 = arith.constant 2 : i32
    %381 = vector.broadcast %c2_i32_164 : i32 to vector<1x512xi32>
    %382 = arith.addi %3, %381 : vector<1x512xi32>
    %c0_i32_165 = arith.constant 0 : i32
    %383 = vector.broadcast %c0_i32_165 : i32 to vector<1x512xi32>
    %384 = arith.cmpi sge, %382, %383 : vector<1x512xi32>
    %385 = arith.andi %380, %384 : vector<1x512xi1>
    %c2_i32_166 = arith.constant 2 : i32
    %386 = vector.broadcast %c2_i32_166 : i32 to vector<1x512xi32>
    %387 = arith.addi %3, %386 : vector<1x512xi32>
    %c16_i32_167 = arith.constant 16 : i32
    %388 = vector.broadcast %c16_i32_167 : i32 to vector<1x512xi32>
    %389 = arith.cmpi slt, %387, %388 : vector<1x512xi32>
    %390 = arith.andi %385, %389 : vector<1x512xi1>
    %cst_168 = arith.constant 0.000000e+00 : f32
    %391 = vector.shape_cast %390 : vector<1x512xi1> to vector<1x512xi1>
    %392 = vector.broadcast %391 : vector<1x512xi1> to vector<4x512xi1>
    %393 = vector.broadcast %cst_168 : f32 to vector<4x512xf32>
    %394 = arith.select %392, %371, %393 : vector<4x512xi1>, vector<4x512xf32>
    %395 = arith.truncf %394 : vector<4x512xf32> to vector<4x512xbf16>
    %c12 = arith.constant 12 : index
    %c0_169 = arith.constant 0 : index
    %c0_170 = arith.constant 0 : index
    %396 = vector.load %arg8[%c12, %c0_169, %c0_170] : memref<49x4x4xbf16, #tpu.memory_space<vmem>>, vector<1x4x4xbf16>
    %397 = vector.shape_cast %396 : vector<1x4x4xbf16> to vector<4x4xbf16>
    %cst_171 = arith.constant dense<0.000000e+00> : vector<4x512xf32>
    %398 = tpu.matmul %397, %395, %cst_171 {dimension_numbers = #tpu.dot_dimension_numbers<[1], [0], [0], [1], [0, 0, 1, 1], [], []>} : vector<4x4xbf16>, vector<4x512xbf16>, vector<4x512xf32> -> vector<4x512xf32>
    %399 = arith.addf %366, %398 : vector<4x512xf32>
    %c4_172 = arith.constant 4 : index
    %c0_173 = arith.constant 0 : index
    %c0_174 = arith.constant 0 : index
    %400 = vector.load %arg10[%c4_172, %c0_173, %c0_174] : memref<25x4x4xbf16, #tpu.memory_space<vmem>>, vector<1x4x4xbf16>
    %401 = vector.shape_cast %400 : vector<1x4x4xbf16> to vector<4x4xbf16>
    %cst_175 = arith.constant dense<0.000000e+00> : vector<4x512xf32>
    %402 = tpu.matmul %401, %395, %cst_175 {dimension_numbers = #tpu.dot_dimension_numbers<[1], [0], [0], [1], [0, 0, 1, 1], [], []>} : vector<4x4xbf16>, vector<4x512xbf16>, vector<4x512xf32> -> vector<4x512xf32>
    %403 = arith.addf %370, %402 : vector<4x512xf32>
    %c29_i32 = arith.constant 29 : i32
    %404 = tpu.dynamic_rotate %0 by %c29_i32 dim 1 : vector<4x512xf32>, i32 -> vector<4x512xf32>
    %c-2_i32_176 = arith.constant -2 : i32
    %405 = vector.broadcast %c-2_i32_176 : i32 to vector<1x512xi32>
    %406 = arith.addi %2, %405 : vector<1x512xi32>
    %c0_i32_177 = arith.constant 0 : i32
    %407 = vector.broadcast %c0_i32_177 : i32 to vector<1x512xi32>
    %408 = arith.cmpi sge, %406, %407 : vector<1x512xi32>
    %c-2_i32_178 = arith.constant -2 : i32
    %409 = vector.broadcast %c-2_i32_178 : i32 to vector<1x512xi32>
    %410 = arith.addi %2, %409 : vector<1x512xi32>
    %c16_i32_179 = arith.constant 16 : i32
    %411 = vector.broadcast %c16_i32_179 : i32 to vector<1x512xi32>
    %412 = arith.cmpi slt, %410, %411 : vector<1x512xi32>
    %413 = arith.andi %408, %412 : vector<1x512xi1>
    %c3_i32_180 = arith.constant 3 : i32
    %414 = vector.broadcast %c3_i32_180 : i32 to vector<1x512xi32>
    %415 = arith.addi %3, %414 : vector<1x512xi32>
    %c0_i32_181 = arith.constant 0 : i32
    %416 = vector.broadcast %c0_i32_181 : i32 to vector<1x512xi32>
    %417 = arith.cmpi sge, %415, %416 : vector<1x512xi32>
    %418 = arith.andi %413, %417 : vector<1x512xi1>
    %c3_i32_182 = arith.constant 3 : i32
    %419 = vector.broadcast %c3_i32_182 : i32 to vector<1x512xi32>
    %420 = arith.addi %3, %419 : vector<1x512xi32>
    %c16_i32_183 = arith.constant 16 : i32
    %421 = vector.broadcast %c16_i32_183 : i32 to vector<1x512xi32>
    %422 = arith.cmpi slt, %420, %421 : vector<1x512xi32>
    %423 = arith.andi %418, %422 : vector<1x512xi1>
    %cst_184 = arith.constant 0.000000e+00 : f32
    %424 = vector.shape_cast %423 : vector<1x512xi1> to vector<1x512xi1>
    %425 = vector.broadcast %424 : vector<1x512xi1> to vector<4x512xi1>
    %426 = vector.broadcast %cst_184 : f32 to vector<4x512xf32>
    %427 = arith.select %425, %404, %426 : vector<4x512xi1>, vector<4x512xf32>
    %428 = arith.truncf %427 : vector<4x512xf32> to vector<4x512xbf16>
    %c13 = arith.constant 13 : index
    %c0_185 = arith.constant 0 : index
    %c0_186 = arith.constant 0 : index
    %429 = vector.load %arg8[%c13, %c0_185, %c0_186] : memref<49x4x4xbf16, #tpu.memory_space<vmem>>, vector<1x4x4xbf16>
    %430 = vector.shape_cast %429 : vector<1x4x4xbf16> to vector<4x4xbf16>
    %cst_187 = arith.constant dense<0.000000e+00> : vector<4x512xf32>
    %431 = tpu.matmul %430, %428, %cst_187 {dimension_numbers = #tpu.dot_dimension_numbers<[1], [0], [0], [1], [0, 0, 1, 1], [], []>} : vector<4x4xbf16>, vector<4x512xbf16>, vector<4x512xf32> -> vector<4x512xf32>
    %432 = arith.addf %399, %431 : vector<4x512xf32>
    %c19_i32 = arith.constant 19 : i32
    %433 = tpu.dynamic_rotate %0 by %c19_i32 dim 1 : vector<4x512xf32>, i32 -> vector<4x512xf32>
    %c-1_i32_188 = arith.constant -1 : i32
    %434 = vector.broadcast %c-1_i32_188 : i32 to vector<1x512xi32>
    %435 = arith.addi %2, %434 : vector<1x512xi32>
    %c0_i32_189 = arith.constant 0 : i32
    %436 = vector.broadcast %c0_i32_189 : i32 to vector<1x512xi32>
    %437 = arith.cmpi sge, %435, %436 : vector<1x512xi32>
    %c-1_i32_190 = arith.constant -1 : i32
    %438 = vector.broadcast %c-1_i32_190 : i32 to vector<1x512xi32>
    %439 = arith.addi %2, %438 : vector<1x512xi32>
    %c16_i32_191 = arith.constant 16 : i32
    %440 = vector.broadcast %c16_i32_191 : i32 to vector<1x512xi32>
    %441 = arith.cmpi slt, %439, %440 : vector<1x512xi32>
    %442 = arith.andi %437, %441 : vector<1x512xi1>
    %c-3_i32_192 = arith.constant -3 : i32
    %443 = vector.broadcast %c-3_i32_192 : i32 to vector<1x512xi32>
    %444 = arith.addi %3, %443 : vector<1x512xi32>
    %c0_i32_193 = arith.constant 0 : i32
    %445 = vector.broadcast %c0_i32_193 : i32 to vector<1x512xi32>
    %446 = arith.cmpi sge, %444, %445 : vector<1x512xi32>
    %447 = arith.andi %442, %446 : vector<1x512xi1>
    %c-3_i32_194 = arith.constant -3 : i32
    %448 = vector.broadcast %c-3_i32_194 : i32 to vector<1x512xi32>
    %449 = arith.addi %3, %448 : vector<1x512xi32>
    %c16_i32_195 = arith.constant 16 : i32
    %450 = vector.broadcast %c16_i32_195 : i32 to vector<1x512xi32>
    %451 = arith.cmpi slt, %449, %450 : vector<1x512xi32>
    %452 = arith.andi %447, %451 : vector<1x512xi1>
    %cst_196 = arith.constant 0.000000e+00 : f32
    %453 = vector.shape_cast %452 : vector<1x512xi1> to vector<1x512xi1>
    %454 = vector.broadcast %453 : vector<1x512xi1> to vector<4x512xi1>
    %455 = vector.broadcast %cst_196 : f32 to vector<4x512xf32>
    %456 = arith.select %454, %433, %455 : vector<4x512xi1>, vector<4x512xf32>
    %457 = arith.truncf %456 : vector<4x512xf32> to vector<4x512xbf16>
    %c14 = arith.constant 14 : index
    %c0_197 = arith.constant 0 : index
    %c0_198 = arith.constant 0 : index
    %458 = vector.load %arg8[%c14, %c0_197, %c0_198] : memref<49x4x4xbf16, #tpu.memory_space<vmem>>, vector<1x4x4xbf16>
    %459 = vector.shape_cast %458 : vector<1x4x4xbf16> to vector<4x4xbf16>
    %cst_199 = arith.constant dense<0.000000e+00> : vector<4x512xf32>
    %460 = tpu.matmul %459, %457, %cst_199 {dimension_numbers = #tpu.dot_dimension_numbers<[1], [0], [0], [1], [0, 0, 1, 1], [], []>} : vector<4x4xbf16>, vector<4x512xbf16>, vector<4x512xf32> -> vector<4x512xf32>
    %461 = arith.addf %432, %460 : vector<4x512xf32>
    %c18_i32 = arith.constant 18 : i32
    %462 = tpu.dynamic_rotate %0 by %c18_i32 dim 1 : vector<4x512xf32>, i32 -> vector<4x512xf32>
    %c-1_i32_200 = arith.constant -1 : i32
    %463 = vector.broadcast %c-1_i32_200 : i32 to vector<1x512xi32>
    %464 = arith.addi %2, %463 : vector<1x512xi32>
    %c0_i32_201 = arith.constant 0 : i32
    %465 = vector.broadcast %c0_i32_201 : i32 to vector<1x512xi32>
    %466 = arith.cmpi sge, %464, %465 : vector<1x512xi32>
    %c-1_i32_202 = arith.constant -1 : i32
    %467 = vector.broadcast %c-1_i32_202 : i32 to vector<1x512xi32>
    %468 = arith.addi %2, %467 : vector<1x512xi32>
    %c16_i32_203 = arith.constant 16 : i32
    %469 = vector.broadcast %c16_i32_203 : i32 to vector<1x512xi32>
    %470 = arith.cmpi slt, %468, %469 : vector<1x512xi32>
    %471 = arith.andi %466, %470 : vector<1x512xi1>
    %c-2_i32_204 = arith.constant -2 : i32
    %472 = vector.broadcast %c-2_i32_204 : i32 to vector<1x512xi32>
    %473 = arith.addi %3, %472 : vector<1x512xi32>
    %c0_i32_205 = arith.constant 0 : i32
    %474 = vector.broadcast %c0_i32_205 : i32 to vector<1x512xi32>
    %475 = arith.cmpi sge, %473, %474 : vector<1x512xi32>
    %476 = arith.andi %471, %475 : vector<1x512xi1>
    %c-2_i32_206 = arith.constant -2 : i32
    %477 = vector.broadcast %c-2_i32_206 : i32 to vector<1x512xi32>
    %478 = arith.addi %3, %477 : vector<1x512xi32>
    %c16_i32_207 = arith.constant 16 : i32
    %479 = vector.broadcast %c16_i32_207 : i32 to vector<1x512xi32>
    %480 = arith.cmpi slt, %478, %479 : vector<1x512xi32>
    %481 = arith.andi %476, %480 : vector<1x512xi1>
    %cst_208 = arith.constant 0.000000e+00 : f32
    %482 = vector.shape_cast %481 : vector<1x512xi1> to vector<1x512xi1>
    %483 = vector.broadcast %482 : vector<1x512xi1> to vector<4x512xi1>
    %484 = vector.broadcast %cst_208 : f32 to vector<4x512xf32>
    %485 = arith.select %483, %462, %484 : vector<4x512xi1>, vector<4x512xf32>
    %486 = arith.truncf %485 : vector<4x512xf32> to vector<4x512xbf16>
    %c15 = arith.constant 15 : index
    %c0_209 = arith.constant 0 : index
    %c0_210 = arith.constant 0 : index
    %487 = vector.load %arg8[%c15, %c0_209, %c0_210] : memref<49x4x4xbf16, #tpu.memory_space<vmem>>, vector<1x4x4xbf16>
    %488 = vector.shape_cast %487 : vector<1x4x4xbf16> to vector<4x4xbf16>
    %cst_211 = arith.constant dense<0.000000e+00> : vector<4x512xf32>
    %489 = tpu.matmul %488, %486, %cst_211 {dimension_numbers = #tpu.dot_dimension_numbers<[1], [0], [0], [1], [0, 0, 1, 1], [], []>} : vector<4x4xbf16>, vector<4x512xbf16>, vector<4x512xf32> -> vector<4x512xf32>
    %490 = arith.addf %461, %489 : vector<4x512xf32>
    %c5_212 = arith.constant 5 : index
    %c0_213 = arith.constant 0 : index
    %c0_214 = arith.constant 0 : index
    %491 = vector.load %arg10[%c5_212, %c0_213, %c0_214] : memref<25x4x4xbf16, #tpu.memory_space<vmem>>, vector<1x4x4xbf16>
    %492 = vector.shape_cast %491 : vector<1x4x4xbf16> to vector<4x4xbf16>
    %cst_215 = arith.constant dense<0.000000e+00> : vector<4x512xf32>
    %493 = tpu.matmul %492, %486, %cst_215 {dimension_numbers = #tpu.dot_dimension_numbers<[1], [0], [0], [1], [0, 0, 1, 1], [], []>} : vector<4x4xbf16>, vector<4x512xbf16>, vector<4x512xf32> -> vector<4x512xf32>
    %494 = arith.addf %403, %493 : vector<4x512xf32>
    %c17_i32 = arith.constant 17 : i32
    %495 = tpu.dynamic_rotate %0 by %c17_i32 dim 1 : vector<4x512xf32>, i32 -> vector<4x512xf32>
    %c-1_i32_216 = arith.constant -1 : i32
    %496 = vector.broadcast %c-1_i32_216 : i32 to vector<1x512xi32>
    %497 = arith.addi %2, %496 : vector<1x512xi32>
    %c0_i32_217 = arith.constant 0 : i32
    %498 = vector.broadcast %c0_i32_217 : i32 to vector<1x512xi32>
    %499 = arith.cmpi sge, %497, %498 : vector<1x512xi32>
    %c-1_i32_218 = arith.constant -1 : i32
    %500 = vector.broadcast %c-1_i32_218 : i32 to vector<1x512xi32>
    %501 = arith.addi %2, %500 : vector<1x512xi32>
    %c16_i32_219 = arith.constant 16 : i32
    %502 = vector.broadcast %c16_i32_219 : i32 to vector<1x512xi32>
    %503 = arith.cmpi slt, %501, %502 : vector<1x512xi32>
    %504 = arith.andi %499, %503 : vector<1x512xi1>
    %c-1_i32_220 = arith.constant -1 : i32
    %505 = vector.broadcast %c-1_i32_220 : i32 to vector<1x512xi32>
    %506 = arith.addi %3, %505 : vector<1x512xi32>
    %c0_i32_221 = arith.constant 0 : i32
    %507 = vector.broadcast %c0_i32_221 : i32 to vector<1x512xi32>
    %508 = arith.cmpi sge, %506, %507 : vector<1x512xi32>
    %509 = arith.andi %504, %508 : vector<1x512xi1>
    %c-1_i32_222 = arith.constant -1 : i32
    %510 = vector.broadcast %c-1_i32_222 : i32 to vector<1x512xi32>
    %511 = arith.addi %3, %510 : vector<1x512xi32>
    %c16_i32_223 = arith.constant 16 : i32
    %512 = vector.broadcast %c16_i32_223 : i32 to vector<1x512xi32>
    %513 = arith.cmpi slt, %511, %512 : vector<1x512xi32>
    %514 = arith.andi %509, %513 : vector<1x512xi1>
    %cst_224 = arith.constant 0.000000e+00 : f32
    %515 = vector.shape_cast %514 : vector<1x512xi1> to vector<1x512xi1>
    %516 = vector.broadcast %515 : vector<1x512xi1> to vector<4x512xi1>
    %517 = vector.broadcast %cst_224 : f32 to vector<4x512xf32>
    %518 = arith.select %516, %495, %517 : vector<4x512xi1>, vector<4x512xf32>
    %519 = arith.truncf %518 : vector<4x512xf32> to vector<4x512xbf16>
    %c16 = arith.constant 16 : index
    %c0_225 = arith.constant 0 : index
    %c0_226 = arith.constant 0 : index
    %520 = vector.load %arg8[%c16, %c0_225, %c0_226] : memref<49x4x4xbf16, #tpu.memory_space<vmem>>, vector<1x4x4xbf16>
    %521 = vector.shape_cast %520 : vector<1x4x4xbf16> to vector<4x4xbf16>
    %cst_227 = arith.constant dense<0.000000e+00> : vector<4x512xf32>
    %522 = tpu.matmul %521, %519, %cst_227 {dimension_numbers = #tpu.dot_dimension_numbers<[1], [0], [0], [1], [0, 0, 1, 1], [], []>} : vector<4x4xbf16>, vector<4x512xbf16>, vector<4x512xf32> -> vector<4x512xf32>
    %523 = arith.addf %490, %522 : vector<4x512xf32>
    %c6_228 = arith.constant 6 : index
    %c0_229 = arith.constant 0 : index
    %c0_230 = arith.constant 0 : index
    %524 = vector.load %arg10[%c6_228, %c0_229, %c0_230] : memref<25x4x4xbf16, #tpu.memory_space<vmem>>, vector<1x4x4xbf16>
    %525 = vector.shape_cast %524 : vector<1x4x4xbf16> to vector<4x4xbf16>
    %cst_231 = arith.constant dense<0.000000e+00> : vector<4x512xf32>
    %526 = tpu.matmul %525, %519, %cst_231 {dimension_numbers = #tpu.dot_dimension_numbers<[1], [0], [0], [1], [0, 0, 1, 1], [], []>} : vector<4x4xbf16>, vector<4x512xbf16>, vector<4x512xf32> -> vector<4x512xf32>
    %527 = arith.addf %494, %526 : vector<4x512xf32>
    %c0_232 = arith.constant 0 : index
    %c0_233 = arith.constant 0 : index
    %c0_234 = arith.constant 0 : index
    %528 = vector.load %arg12[%c0_232, %c0_233, %c0_234] : memref<9x4x4xbf16, #tpu.memory_space<vmem>>, vector<1x4x4xbf16>
    %529 = vector.shape_cast %528 : vector<1x4x4xbf16> to vector<4x4xbf16>
    %cst_235 = arith.constant dense<0.000000e+00> : vector<4x512xf32>
    %530 = tpu.matmul %529, %519, %cst_235 {dimension_numbers = #tpu.dot_dimension_numbers<[1], [0], [0], [1], [0, 0, 1, 1], [], []>} : vector<4x4xbf16>, vector<4x512xbf16>, vector<4x512xf32> -> vector<4x512xf32>
    %531 = arith.addf %6, %530 : vector<4x512xf32>
    %c16_i32_236 = arith.constant 16 : i32
    %532 = tpu.dynamic_rotate %0 by %c16_i32_236 dim 1 : vector<4x512xf32>, i32 -> vector<4x512xf32>
    %c-1_i32_237 = arith.constant -1 : i32
    %533 = vector.broadcast %c-1_i32_237 : i32 to vector<1x512xi32>
    %534 = arith.addi %2, %533 : vector<1x512xi32>
    %c0_i32_238 = arith.constant 0 : i32
    %535 = vector.broadcast %c0_i32_238 : i32 to vector<1x512xi32>
    %536 = arith.cmpi sge, %534, %535 : vector<1x512xi32>
    %c-1_i32_239 = arith.constant -1 : i32
    %537 = vector.broadcast %c-1_i32_239 : i32 to vector<1x512xi32>
    %538 = arith.addi %2, %537 : vector<1x512xi32>
    %c16_i32_240 = arith.constant 16 : i32
    %539 = vector.broadcast %c16_i32_240 : i32 to vector<1x512xi32>
    %540 = arith.cmpi slt, %538, %539 : vector<1x512xi32>
    %541 = arith.andi %536, %540 : vector<1x512xi1>
    %c0_i32_241 = arith.constant 0 : i32
    %542 = vector.broadcast %c0_i32_241 : i32 to vector<1x512xi32>
    %543 = arith.addi %3, %542 : vector<1x512xi32>
    %c0_i32_242 = arith.constant 0 : i32
    %544 = vector.broadcast %c0_i32_242 : i32 to vector<1x512xi32>
    %545 = arith.cmpi sge, %543, %544 : vector<1x512xi32>
    %546 = arith.andi %541, %545 : vector<1x512xi1>
    %c0_i32_243 = arith.constant 0 : i32
    %547 = vector.broadcast %c0_i32_243 : i32 to vector<1x512xi32>
    %548 = arith.addi %3, %547 : vector<1x512xi32>
    %c16_i32_244 = arith.constant 16 : i32
    %549 = vector.broadcast %c16_i32_244 : i32 to vector<1x512xi32>
    %550 = arith.cmpi slt, %548, %549 : vector<1x512xi32>
    %551 = arith.andi %546, %550 : vector<1x512xi1>
    %cst_245 = arith.constant 0.000000e+00 : f32
    %552 = vector.shape_cast %551 : vector<1x512xi1> to vector<1x512xi1>
    %553 = vector.broadcast %552 : vector<1x512xi1> to vector<4x512xi1>
    %554 = vector.broadcast %cst_245 : f32 to vector<4x512xf32>
    %555 = arith.select %553, %532, %554 : vector<4x512xi1>, vector<4x512xf32>
    %556 = arith.truncf %555 : vector<4x512xf32> to vector<4x512xbf16>
    %c17 = arith.constant 17 : index
    %c0_246 = arith.constant 0 : index
    %c0_247 = arith.constant 0 : index
    %557 = vector.load %arg8[%c17, %c0_246, %c0_247] : memref<49x4x4xbf16, #tpu.memory_space<vmem>>, vector<1x4x4xbf16>
    %558 = vector.shape_cast %557 : vector<1x4x4xbf16> to vector<4x4xbf16>
    %cst_248 = arith.constant dense<0.000000e+00> : vector<4x512xf32>
    %559 = tpu.matmul %558, %556, %cst_248 {dimension_numbers = #tpu.dot_dimension_numbers<[1], [0], [0], [1], [0, 0, 1, 1], [], []>} : vector<4x4xbf16>, vector<4x512xbf16>, vector<4x512xf32> -> vector<4x512xf32>
    %560 = arith.addf %523, %559 : vector<4x512xf32>
    %c7_249 = arith.constant 7 : index
    %c0_250 = arith.constant 0 : index
    %c0_251 = arith.constant 0 : index
    %561 = vector.load %arg10[%c7_249, %c0_250, %c0_251] : memref<25x4x4xbf16, #tpu.memory_space<vmem>>, vector<1x4x4xbf16>
    %562 = vector.shape_cast %561 : vector<1x4x4xbf16> to vector<4x4xbf16>
    %cst_252 = arith.constant dense<0.000000e+00> : vector<4x512xf32>
    %563 = tpu.matmul %562, %556, %cst_252 {dimension_numbers = #tpu.dot_dimension_numbers<[1], [0], [0], [1], [0, 0, 1, 1], [], []>} : vector<4x4xbf16>, vector<4x512xbf16>, vector<4x512xf32> -> vector<4x512xf32>
    %564 = arith.addf %527, %563 : vector<4x512xf32>
    %c1_253 = arith.constant 1 : index
    %c0_254 = arith.constant 0 : index
    %c0_255 = arith.constant 0 : index
    %565 = vector.load %arg12[%c1_253, %c0_254, %c0_255] : memref<9x4x4xbf16, #tpu.memory_space<vmem>>, vector<1x4x4xbf16>
    %566 = vector.shape_cast %565 : vector<1x4x4xbf16> to vector<4x4xbf16>
    %cst_256 = arith.constant dense<0.000000e+00> : vector<4x512xf32>
    %567 = tpu.matmul %566, %556, %cst_256 {dimension_numbers = #tpu.dot_dimension_numbers<[1], [0], [0], [1], [0, 0, 1, 1], [], []>} : vector<4x4xbf16>, vector<4x512xbf16>, vector<4x512xf32> -> vector<4x512xf32>
    %568 = arith.addf %531, %567 : vector<4x512xf32>
    %c15_i32 = arith.constant 15 : i32
    %569 = tpu.dynamic_rotate %0 by %c15_i32 dim 1 : vector<4x512xf32>, i32 -> vector<4x512xf32>
    %c-1_i32_257 = arith.constant -1 : i32
    %570 = vector.broadcast %c-1_i32_257 : i32 to vector<1x512xi32>
    %571 = arith.addi %2, %570 : vector<1x512xi32>
    %c0_i32_258 = arith.constant 0 : i32
    %572 = vector.broadcast %c0_i32_258 : i32 to vector<1x512xi32>
    %573 = arith.cmpi sge, %571, %572 : vector<1x512xi32>
    %c-1_i32_259 = arith.constant -1 : i32
    %574 = vector.broadcast %c-1_i32_259 : i32 to vector<1x512xi32>
    %575 = arith.addi %2, %574 : vector<1x512xi32>
    %c16_i32_260 = arith.constant 16 : i32
    %576 = vector.broadcast %c16_i32_260 : i32 to vector<1x512xi32>
    %577 = arith.cmpi slt, %575, %576 : vector<1x512xi32>
    %578 = arith.andi %573, %577 : vector<1x512xi1>
    %c1_i32_261 = arith.constant 1 : i32
    %579 = vector.broadcast %c1_i32_261 : i32 to vector<1x512xi32>
    %580 = arith.addi %3, %579 : vector<1x512xi32>
    %c0_i32_262 = arith.constant 0 : i32
    %581 = vector.broadcast %c0_i32_262 : i32 to vector<1x512xi32>
    %582 = arith.cmpi sge, %580, %581 : vector<1x512xi32>
    %583 = arith.andi %578, %582 : vector<1x512xi1>
    %c1_i32_263 = arith.constant 1 : i32
    %584 = vector.broadcast %c1_i32_263 : i32 to vector<1x512xi32>
    %585 = arith.addi %3, %584 : vector<1x512xi32>
    %c16_i32_264 = arith.constant 16 : i32
    %586 = vector.broadcast %c16_i32_264 : i32 to vector<1x512xi32>
    %587 = arith.cmpi slt, %585, %586 : vector<1x512xi32>
    %588 = arith.andi %583, %587 : vector<1x512xi1>
    %cst_265 = arith.constant 0.000000e+00 : f32
    %589 = vector.shape_cast %588 : vector<1x512xi1> to vector<1x512xi1>
    %590 = vector.broadcast %589 : vector<1x512xi1> to vector<4x512xi1>
    %591 = vector.broadcast %cst_265 : f32 to vector<4x512xf32>
    %592 = arith.select %590, %569, %591 : vector<4x512xi1>, vector<4x512xf32>
    %593 = arith.truncf %592 : vector<4x512xf32> to vector<4x512xbf16>
    %c18 = arith.constant 18 : index
    %c0_266 = arith.constant 0 : index
    %c0_267 = arith.constant 0 : index
    %594 = vector.load %arg8[%c18, %c0_266, %c0_267] : memref<49x4x4xbf16, #tpu.memory_space<vmem>>, vector<1x4x4xbf16>
    %595 = vector.shape_cast %594 : vector<1x4x4xbf16> to vector<4x4xbf16>
    %cst_268 = arith.constant dense<0.000000e+00> : vector<4x512xf32>
    %596 = tpu.matmul %595, %593, %cst_268 {dimension_numbers = #tpu.dot_dimension_numbers<[1], [0], [0], [1], [0, 0, 1, 1], [], []>} : vector<4x4xbf16>, vector<4x512xbf16>, vector<4x512xf32> -> vector<4x512xf32>
    %597 = arith.addf %560, %596 : vector<4x512xf32>
    %c8_269 = arith.constant 8 : index
    %c0_270 = arith.constant 0 : index
    %c0_271 = arith.constant 0 : index
    %598 = vector.load %arg10[%c8_269, %c0_270, %c0_271] : memref<25x4x4xbf16, #tpu.memory_space<vmem>>, vector<1x4x4xbf16>
    %599 = vector.shape_cast %598 : vector<1x4x4xbf16> to vector<4x4xbf16>
    %cst_272 = arith.constant dense<0.000000e+00> : vector<4x512xf32>
    %600 = tpu.matmul %599, %593, %cst_272 {dimension_numbers = #tpu.dot_dimension_numbers<[1], [0], [0], [1], [0, 0, 1, 1], [], []>} : vector<4x4xbf16>, vector<4x512xbf16>, vector<4x512xf32> -> vector<4x512xf32>
    %601 = arith.addf %564, %600 : vector<4x512xf32>
    %c2_273 = arith.constant 2 : index
    %c0_274 = arith.constant 0 : index
    %c0_275 = arith.constant 0 : index
    %602 = vector.load %arg12[%c2_273, %c0_274, %c0_275] : memref<9x4x4xbf16, #tpu.memory_space<vmem>>, vector<1x4x4xbf16>
    %603 = vector.shape_cast %602 : vector<1x4x4xbf16> to vector<4x4xbf16>
    %cst_276 = arith.constant dense<0.000000e+00> : vector<4x512xf32>
    %604 = tpu.matmul %603, %593, %cst_276 {dimension_numbers = #tpu.dot_dimension_numbers<[1], [0], [0], [1], [0, 0, 1, 1], [], []>} : vector<4x4xbf16>, vector<4x512xbf16>, vector<4x512xf32> -> vector<4x512xf32>
    %605 = arith.addf %568, %604 : vector<4x512xf32>
    %c14_i32 = arith.constant 14 : i32
    %606 = tpu.dynamic_rotate %0 by %c14_i32 dim 1 : vector<4x512xf32>, i32 -> vector<4x512xf32>
    %c-1_i32_277 = arith.constant -1 : i32
    %607 = vector.broadcast %c-1_i32_277 : i32 to vector<1x512xi32>
    %608 = arith.addi %2, %607 : vector<1x512xi32>
    %c0_i32_278 = arith.constant 0 : i32
    %609 = vector.broadcast %c0_i32_278 : i32 to vector<1x512xi32>
    %610 = arith.cmpi sge, %608, %609 : vector<1x512xi32>
    %c-1_i32_279 = arith.constant -1 : i32
    %611 = vector.broadcast %c-1_i32_279 : i32 to vector<1x512xi32>
    %612 = arith.addi %2, %611 : vector<1x512xi32>
    %c16_i32_280 = arith.constant 16 : i32
    %613 = vector.broadcast %c16_i32_280 : i32 to vector<1x512xi32>
    %614 = arith.cmpi slt, %612, %613 : vector<1x512xi32>
    %615 = arith.andi %610, %614 : vector<1x512xi1>
    %c2_i32_281 = arith.constant 2 : i32
    %616 = vector.broadcast %c2_i32_281 : i32 to vector<1x512xi32>
    %617 = arith.addi %3, %616 : vector<1x512xi32>
    %c0_i32_282 = arith.constant 0 : i32
    %618 = vector.broadcast %c0_i32_282 : i32 to vector<1x512xi32>
    %619 = arith.cmpi sge, %617, %618 : vector<1x512xi32>
    %620 = arith.andi %615, %619 : vector<1x512xi1>
    %c2_i32_283 = arith.constant 2 : i32
    %621 = vector.broadcast %c2_i32_283 : i32 to vector<1x512xi32>
    %622 = arith.addi %3, %621 : vector<1x512xi32>
    %c16_i32_284 = arith.constant 16 : i32
    %623 = vector.broadcast %c16_i32_284 : i32 to vector<1x512xi32>
    %624 = arith.cmpi slt, %622, %623 : vector<1x512xi32>
    %625 = arith.andi %620, %624 : vector<1x512xi1>
    %cst_285 = arith.constant 0.000000e+00 : f32
    %626 = vector.shape_cast %625 : vector<1x512xi1> to vector<1x512xi1>
    %627 = vector.broadcast %626 : vector<1x512xi1> to vector<4x512xi1>
    %628 = vector.broadcast %cst_285 : f32 to vector<4x512xf32>
    %629 = arith.select %627, %606, %628 : vector<4x512xi1>, vector<4x512xf32>
    %630 = arith.truncf %629 : vector<4x512xf32> to vector<4x512xbf16>
    %c19 = arith.constant 19 : index
    %c0_286 = arith.constant 0 : index
    %c0_287 = arith.constant 0 : index
    %631 = vector.load %arg8[%c19, %c0_286, %c0_287] : memref<49x4x4xbf16, #tpu.memory_space<vmem>>, vector<1x4x4xbf16>
    %632 = vector.shape_cast %631 : vector<1x4x4xbf16> to vector<4x4xbf16>
    %cst_288 = arith.constant dense<0.000000e+00> : vector<4x512xf32>
    %633 = tpu.matmul %632, %630, %cst_288 {dimension_numbers = #tpu.dot_dimension_numbers<[1], [0], [0], [1], [0, 0, 1, 1], [], []>} : vector<4x4xbf16>, vector<4x512xbf16>, vector<4x512xf32> -> vector<4x512xf32>
    %634 = arith.addf %597, %633 : vector<4x512xf32>
    %c9_289 = arith.constant 9 : index
    %c0_290 = arith.constant 0 : index
    %c0_291 = arith.constant 0 : index
    %635 = vector.load %arg10[%c9_289, %c0_290, %c0_291] : memref<25x4x4xbf16, #tpu.memory_space<vmem>>, vector<1x4x4xbf16>
    %636 = vector.shape_cast %635 : vector<1x4x4xbf16> to vector<4x4xbf16>
    %cst_292 = arith.constant dense<0.000000e+00> : vector<4x512xf32>
    %637 = tpu.matmul %636, %630, %cst_292 {dimension_numbers = #tpu.dot_dimension_numbers<[1], [0], [0], [1], [0, 0, 1, 1], [], []>} : vector<4x4xbf16>, vector<4x512xbf16>, vector<4x512xf32> -> vector<4x512xf32>
    %638 = arith.addf %601, %637 : vector<4x512xf32>
    %c13_i32 = arith.constant 13 : i32
    %639 = tpu.dynamic_rotate %0 by %c13_i32 dim 1 : vector<4x512xf32>, i32 -> vector<4x512xf32>
    %c-1_i32_293 = arith.constant -1 : i32
    %640 = vector.broadcast %c-1_i32_293 : i32 to vector<1x512xi32>
    %641 = arith.addi %2, %640 : vector<1x512xi32>
    %c0_i32_294 = arith.constant 0 : i32
    %642 = vector.broadcast %c0_i32_294 : i32 to vector<1x512xi32>
    %643 = arith.cmpi sge, %641, %642 : vector<1x512xi32>
    %c-1_i32_295 = arith.constant -1 : i32
    %644 = vector.broadcast %c-1_i32_295 : i32 to vector<1x512xi32>
    %645 = arith.addi %2, %644 : vector<1x512xi32>
    %c16_i32_296 = arith.constant 16 : i32
    %646 = vector.broadcast %c16_i32_296 : i32 to vector<1x512xi32>
    %647 = arith.cmpi slt, %645, %646 : vector<1x512xi32>
    %648 = arith.andi %643, %647 : vector<1x512xi1>
    %c3_i32_297 = arith.constant 3 : i32
    %649 = vector.broadcast %c3_i32_297 : i32 to vector<1x512xi32>
    %650 = arith.addi %3, %649 : vector<1x512xi32>
    %c0_i32_298 = arith.constant 0 : i32
    %651 = vector.broadcast %c0_i32_298 : i32 to vector<1x512xi32>
    %652 = arith.cmpi sge, %650, %651 : vector<1x512xi32>
    %653 = arith.andi %648, %652 : vector<1x512xi1>
    %c3_i32_299 = arith.constant 3 : i32
    %654 = vector.broadcast %c3_i32_299 : i32 to vector<1x512xi32>
    %655 = arith.addi %3, %654 : vector<1x512xi32>
    %c16_i32_300 = arith.constant 16 : i32
    %656 = vector.broadcast %c16_i32_300 : i32 to vector<1x512xi32>
    %657 = arith.cmpi slt, %655, %656 : vector<1x512xi32>
    %658 = arith.andi %653, %657 : vector<1x512xi1>
    %cst_301 = arith.constant 0.000000e+00 : f32
    %659 = vector.shape_cast %658 : vector<1x512xi1> to vector<1x512xi1>
    %660 = vector.broadcast %659 : vector<1x512xi1> to vector<4x512xi1>
    %661 = vector.broadcast %cst_301 : f32 to vector<4x512xf32>
    %662 = arith.select %660, %639, %661 : vector<4x512xi1>, vector<4x512xf32>
    %663 = arith.truncf %662 : vector<4x512xf32> to vector<4x512xbf16>
    %c20 = arith.constant 20 : index
    %c0_302 = arith.constant 0 : index
    %c0_303 = arith.constant 0 : index
    %664 = vector.load %arg8[%c20, %c0_302, %c0_303] : memref<49x4x4xbf16, #tpu.memory_space<vmem>>, vector<1x4x4xbf16>
    %665 = vector.shape_cast %664 : vector<1x4x4xbf16> to vector<4x4xbf16>
    %cst_304 = arith.constant dense<0.000000e+00> : vector<4x512xf32>
    %666 = tpu.matmul %665, %663, %cst_304 {dimension_numbers = #tpu.dot_dimension_numbers<[1], [0], [0], [1], [0, 0, 1, 1], [], []>} : vector<4x4xbf16>, vector<4x512xbf16>, vector<4x512xf32> -> vector<4x512xf32>
    %667 = arith.addf %634, %666 : vector<4x512xf32>
    %c3_i32_305 = arith.constant 3 : i32
    %668 = tpu.dynamic_rotate %0 by %c3_i32_305 dim 1 : vector<4x512xf32>, i32 -> vector<4x512xf32>
    %c0_i32_306 = arith.constant 0 : i32
    %669 = vector.broadcast %c0_i32_306 : i32 to vector<1x512xi32>
    %670 = arith.addi %2, %669 : vector<1x512xi32>
    %c0_i32_307 = arith.constant 0 : i32
    %671 = vector.broadcast %c0_i32_307 : i32 to vector<1x512xi32>
    %672 = arith.cmpi sge, %670, %671 : vector<1x512xi32>
    %c0_i32_308 = arith.constant 0 : i32
    %673 = vector.broadcast %c0_i32_308 : i32 to vector<1x512xi32>
    %674 = arith.addi %2, %673 : vector<1x512xi32>
    %c16_i32_309 = arith.constant 16 : i32
    %675 = vector.broadcast %c16_i32_309 : i32 to vector<1x512xi32>
    %676 = arith.cmpi slt, %674, %675 : vector<1x512xi32>
    %677 = arith.andi %672, %676 : vector<1x512xi1>
    %c-3_i32_310 = arith.constant -3 : i32
    %678 = vector.broadcast %c-3_i32_310 : i32 to vector<1x512xi32>
    %679 = arith.addi %3, %678 : vector<1x512xi32>
    %c0_i32_311 = arith.constant 0 : i32
    %680 = vector.broadcast %c0_i32_311 : i32 to vector<1x512xi32>
    %681 = arith.cmpi sge, %679, %680 : vector<1x512xi32>
    %682 = arith.andi %677, %681 : vector<1x512xi1>
    %c-3_i32_312 = arith.constant -3 : i32
    %683 = vector.broadcast %c-3_i32_312 : i32 to vector<1x512xi32>
    %684 = arith.addi %3, %683 : vector<1x512xi32>
    %c16_i32_313 = arith.constant 16 : i32
    %685 = vector.broadcast %c16_i32_313 : i32 to vector<1x512xi32>
    %686 = arith.cmpi slt, %684, %685 : vector<1x512xi32>
    %687 = arith.andi %682, %686 : vector<1x512xi1>
    %cst_314 = arith.constant 0.000000e+00 : f32
    %688 = vector.shape_cast %687 : vector<1x512xi1> to vector<1x512xi1>
    %689 = vector.broadcast %688 : vector<1x512xi1> to vector<4x512xi1>
    %690 = vector.broadcast %cst_314 : f32 to vector<4x512xf32>
    %691 = arith.select %689, %668, %690 : vector<4x512xi1>, vector<4x512xf32>
    %692 = arith.truncf %691 : vector<4x512xf32> to vector<4x512xbf16>
    %c21 = arith.constant 21 : index
    %c0_315 = arith.constant 0 : index
    %c0_316 = arith.constant 0 : index
    %693 = vector.load %arg8[%c21, %c0_315, %c0_316] : memref<49x4x4xbf16, #tpu.memory_space<vmem>>, vector<1x4x4xbf16>
    %694 = vector.shape_cast %693 : vector<1x4x4xbf16> to vector<4x4xbf16>
    %cst_317 = arith.constant dense<0.000000e+00> : vector<4x512xf32>
    %695 = tpu.matmul %694, %692, %cst_317 {dimension_numbers = #tpu.dot_dimension_numbers<[1], [0], [0], [1], [0, 0, 1, 1], [], []>} : vector<4x4xbf16>, vector<4x512xbf16>, vector<4x512xf32> -> vector<4x512xf32>
    %696 = arith.addf %667, %695 : vector<4x512xf32>
    %c2_i32_318 = arith.constant 2 : i32
    %697 = tpu.dynamic_rotate %0 by %c2_i32_318 dim 1 : vector<4x512xf32>, i32 -> vector<4x512xf32>
    %c0_i32_319 = arith.constant 0 : i32
    %698 = vector.broadcast %c0_i32_319 : i32 to vector<1x512xi32>
    %699 = arith.addi %2, %698 : vector<1x512xi32>
    %c0_i32_320 = arith.constant 0 : i32
    %700 = vector.broadcast %c0_i32_320 : i32 to vector<1x512xi32>
    %701 = arith.cmpi sge, %699, %700 : vector<1x512xi32>
    %c0_i32_321 = arith.constant 0 : i32
    %702 = vector.broadcast %c0_i32_321 : i32 to vector<1x512xi32>
    %703 = arith.addi %2, %702 : vector<1x512xi32>
    %c16_i32_322 = arith.constant 16 : i32
    %704 = vector.broadcast %c16_i32_322 : i32 to vector<1x512xi32>
    %705 = arith.cmpi slt, %703, %704 : vector<1x512xi32>
    %706 = arith.andi %701, %705 : vector<1x512xi1>
    %c-2_i32_323 = arith.constant -2 : i32
    %707 = vector.broadcast %c-2_i32_323 : i32 to vector<1x512xi32>
    %708 = arith.addi %3, %707 : vector<1x512xi32>
    %c0_i32_324 = arith.constant 0 : i32
    %709 = vector.broadcast %c0_i32_324 : i32 to vector<1x512xi32>
    %710 = arith.cmpi sge, %708, %709 : vector<1x512xi32>
    %711 = arith.andi %706, %710 : vector<1x512xi1>
    %c-2_i32_325 = arith.constant -2 : i32
    %712 = vector.broadcast %c-2_i32_325 : i32 to vector<1x512xi32>
    %713 = arith.addi %3, %712 : vector<1x512xi32>
    %c16_i32_326 = arith.constant 16 : i32
    %714 = vector.broadcast %c16_i32_326 : i32 to vector<1x512xi32>
    %715 = arith.cmpi slt, %713, %714 : vector<1x512xi32>
    %716 = arith.andi %711, %715 : vector<1x512xi1>
    %cst_327 = arith.constant 0.000000e+00 : f32
    %717 = vector.shape_cast %716 : vector<1x512xi1> to vector<1x512xi1>
    %718 = vector.broadcast %717 : vector<1x512xi1> to vector<4x512xi1>
    %719 = vector.broadcast %cst_327 : f32 to vector<4x512xf32>
    %720 = arith.select %718, %697, %719 : vector<4x512xi1>, vector<4x512xf32>
    %721 = arith.truncf %720 : vector<4x512xf32> to vector<4x512xbf16>
    %c22 = arith.constant 22 : index
    %c0_328 = arith.constant 0 : index
    %c0_329 = arith.constant 0 : index
    %722 = vector.load %arg8[%c22, %c0_328, %c0_329] : memref<49x4x4xbf16, #tpu.memory_space<vmem>>, vector<1x4x4xbf16>
    %723 = vector.shape_cast %722 : vector<1x4x4xbf16> to vector<4x4xbf16>
    %cst_330 = arith.constant dense<0.000000e+00> : vector<4x512xf32>
    %724 = tpu.matmul %723, %721, %cst_330 {dimension_numbers = #tpu.dot_dimension_numbers<[1], [0], [0], [1], [0, 0, 1, 1], [], []>} : vector<4x4xbf16>, vector<4x512xbf16>, vector<4x512xf32> -> vector<4x512xf32>
    %725 = arith.addf %696, %724 : vector<4x512xf32>
    %c10_331 = arith.constant 10 : index
    %c0_332 = arith.constant 0 : index
    %c0_333 = arith.constant 0 : index
    %726 = vector.load %arg10[%c10_331, %c0_332, %c0_333] : memref<25x4x4xbf16, #tpu.memory_space<vmem>>, vector<1x4x4xbf16>
    %727 = vector.shape_cast %726 : vector<1x4x4xbf16> to vector<4x4xbf16>
    %cst_334 = arith.constant dense<0.000000e+00> : vector<4x512xf32>
    %728 = tpu.matmul %727, %721, %cst_334 {dimension_numbers = #tpu.dot_dimension_numbers<[1], [0], [0], [1], [0, 0, 1, 1], [], []>} : vector<4x4xbf16>, vector<4x512xbf16>, vector<4x512xf32> -> vector<4x512xf32>
    %729 = arith.addf %638, %728 : vector<4x512xf32>
    %c1_i32_335 = arith.constant 1 : i32
    %730 = tpu.dynamic_rotate %0 by %c1_i32_335 dim 1 : vector<4x512xf32>, i32 -> vector<4x512xf32>
    %c0_i32_336 = arith.constant 0 : i32
    %731 = vector.broadcast %c0_i32_336 : i32 to vector<1x512xi32>
    %732 = arith.addi %2, %731 : vector<1x512xi32>
    %c0_i32_337 = arith.constant 0 : i32
    %733 = vector.broadcast %c0_i32_337 : i32 to vector<1x512xi32>
    %734 = arith.cmpi sge, %732, %733 : vector<1x512xi32>
    %c0_i32_338 = arith.constant 0 : i32
    %735 = vector.broadcast %c0_i32_338 : i32 to vector<1x512xi32>
    %736 = arith.addi %2, %735 : vector<1x512xi32>
    %c16_i32_339 = arith.constant 16 : i32
    %737 = vector.broadcast %c16_i32_339 : i32 to vector<1x512xi32>
    %738 = arith.cmpi slt, %736, %737 : vector<1x512xi32>
    %739 = arith.andi %734, %738 : vector<1x512xi1>
    %c-1_i32_340 = arith.constant -1 : i32
    %740 = vector.broadcast %c-1_i32_340 : i32 to vector<1x512xi32>
    %741 = arith.addi %3, %740 : vector<1x512xi32>
    %c0_i32_341 = arith.constant 0 : i32
    %742 = vector.broadcast %c0_i32_341 : i32 to vector<1x512xi32>
    %743 = arith.cmpi sge, %741, %742 : vector<1x512xi32>
    %744 = arith.andi %739, %743 : vector<1x512xi1>
    %c-1_i32_342 = arith.constant -1 : i32
    %745 = vector.broadcast %c-1_i32_342 : i32 to vector<1x512xi32>
    %746 = arith.addi %3, %745 : vector<1x512xi32>
    %c16_i32_343 = arith.constant 16 : i32
    %747 = vector.broadcast %c16_i32_343 : i32 to vector<1x512xi32>
    %748 = arith.cmpi slt, %746, %747 : vector<1x512xi32>
    %749 = arith.andi %744, %748 : vector<1x512xi1>
    %cst_344 = arith.constant 0.000000e+00 : f32
    %750 = vector.shape_cast %749 : vector<1x512xi1> to vector<1x512xi1>
    %751 = vector.broadcast %750 : vector<1x512xi1> to vector<4x512xi1>
    %752 = vector.broadcast %cst_344 : f32 to vector<4x512xf32>
    %753 = arith.select %751, %730, %752 : vector<4x512xi1>, vector<4x512xf32>
    %754 = arith.truncf %753 : vector<4x512xf32> to vector<4x512xbf16>
    %c23 = arith.constant 23 : index
    %c0_345 = arith.constant 0 : index
    %c0_346 = arith.constant 0 : index
    %755 = vector.load %arg8[%c23, %c0_345, %c0_346] : memref<49x4x4xbf16, #tpu.memory_space<vmem>>, vector<1x4x4xbf16>
    %756 = vector.shape_cast %755 : vector<1x4x4xbf16> to vector<4x4xbf16>
    %cst_347 = arith.constant dense<0.000000e+00> : vector<4x512xf32>
    %757 = tpu.matmul %756, %754, %cst_347 {dimension_numbers = #tpu.dot_dimension_numbers<[1], [0], [0], [1], [0, 0, 1, 1], [], []>} : vector<4x4xbf16>, vector<4x512xbf16>, vector<4x512xf32> -> vector<4x512xf32>
    %758 = arith.addf %725, %757 : vector<4x512xf32>
    %c11_348 = arith.constant 11 : index
    %c0_349 = arith.constant 0 : index
    %c0_350 = arith.constant 0 : index
    %759 = vector.load %arg10[%c11_348, %c0_349, %c0_350] : memref<25x4x4xbf16, #tpu.memory_space<vmem>>, vector<1x4x4xbf16>
    %760 = vector.shape_cast %759 : vector<1x4x4xbf16> to vector<4x4xbf16>
    %cst_351 = arith.constant dense<0.000000e+00> : vector<4x512xf32>
    %761 = tpu.matmul %760, %754, %cst_351 {dimension_numbers = #tpu.dot_dimension_numbers<[1], [0], [0], [1], [0, 0, 1, 1], [], []>} : vector<4x4xbf16>, vector<4x512xbf16>, vector<4x512xf32> -> vector<4x512xf32>
    %762 = arith.addf %729, %761 : vector<4x512xf32>
    %c3_352 = arith.constant 3 : index
    %c0_353 = arith.constant 0 : index
    %c0_354 = arith.constant 0 : index
    %763 = vector.load %arg12[%c3_352, %c0_353, %c0_354] : memref<9x4x4xbf16, #tpu.memory_space<vmem>>, vector<1x4x4xbf16>
    %764 = vector.shape_cast %763 : vector<1x4x4xbf16> to vector<4x4xbf16>
    %cst_355 = arith.constant dense<0.000000e+00> : vector<4x512xf32>
    %765 = tpu.matmul %764, %754, %cst_355 {dimension_numbers = #tpu.dot_dimension_numbers<[1], [0], [0], [1], [0, 0, 1, 1], [], []>} : vector<4x4xbf16>, vector<4x512xbf16>, vector<4x512xf32> -> vector<4x512xf32>
    %766 = arith.addf %605, %765 : vector<4x512xf32>
    %c24 = arith.constant 24 : index
    %c0_356 = arith.constant 0 : index
    %c0_357 = arith.constant 0 : index
    %767 = vector.load %arg8[%c24, %c0_356, %c0_357] : memref<49x4x4xbf16, #tpu.memory_space<vmem>>, vector<1x4x4xbf16>
    %768 = vector.shape_cast %767 : vector<1x4x4xbf16> to vector<4x4xbf16>
    %cst_358 = arith.constant dense<0.000000e+00> : vector<4x512xf32>
    %769 = tpu.matmul %768, %1, %cst_358 {dimension_numbers = #tpu.dot_dimension_numbers<[1], [0], [0], [1], [0, 0, 1, 1], [], []>} : vector<4x4xbf16>, vector<4x512xbf16>, vector<4x512xf32> -> vector<4x512xf32>
    %770 = arith.addf %758, %769 : vector<4x512xf32>
    %c12_359 = arith.constant 12 : index
    %c0_360 = arith.constant 0 : index
    %c0_361 = arith.constant 0 : index
    %771 = vector.load %arg10[%c12_359, %c0_360, %c0_361] : memref<25x4x4xbf16, #tpu.memory_space<vmem>>, vector<1x4x4xbf16>
    %772 = vector.shape_cast %771 : vector<1x4x4xbf16> to vector<4x4xbf16>
    %cst_362 = arith.constant dense<0.000000e+00> : vector<4x512xf32>
    %773 = tpu.matmul %772, %1, %cst_362 {dimension_numbers = #tpu.dot_dimension_numbers<[1], [0], [0], [1], [0, 0, 1, 1], [], []>} : vector<4x4xbf16>, vector<4x512xbf16>, vector<4x512xf32> -> vector<4x512xf32>
    %774 = arith.addf %762, %773 : vector<4x512xf32>
    %c4_363 = arith.constant 4 : index
    %c0_364 = arith.constant 0 : index
    %c0_365 = arith.constant 0 : index
    %775 = vector.load %arg12[%c4_363, %c0_364, %c0_365] : memref<9x4x4xbf16, #tpu.memory_space<vmem>>, vector<1x4x4xbf16>
    %776 = vector.shape_cast %775 : vector<1x4x4xbf16> to vector<4x4xbf16>
    %cst_366 = arith.constant dense<0.000000e+00> : vector<4x512xf32>
    %777 = tpu.matmul %776, %1, %cst_366 {dimension_numbers = #tpu.dot_dimension_numbers<[1], [0], [0], [1], [0, 0, 1, 1], [], []>} : vector<4x4xbf16>, vector<4x512xbf16>, vector<4x512xf32> -> vector<4x512xf32>
    %778 = arith.addf %766, %777 : vector<4x512xf32>
    %c511_i32 = arith.constant 511 : i32
    %779 = tpu.dynamic_rotate %0 by %c511_i32 dim 1 : vector<4x512xf32>, i32 -> vector<4x512xf32>
    %c0_i32_367 = arith.constant 0 : i32
    %780 = vector.broadcast %c0_i32_367 : i32 to vector<1x512xi32>
    %781 = arith.addi %2, %780 : vector<1x512xi32>
    %c0_i32_368 = arith.constant 0 : i32
    %782 = vector.broadcast %c0_i32_368 : i32 to vector<1x512xi32>
    %783 = arith.cmpi sge, %781, %782 : vector<1x512xi32>
    %c0_i32_369 = arith.constant 0 : i32
    %784 = vector.broadcast %c0_i32_369 : i32 to vector<1x512xi32>
    %785 = arith.addi %2, %784 : vector<1x512xi32>
    %c16_i32_370 = arith.constant 16 : i32
    %786 = vector.broadcast %c16_i32_370 : i32 to vector<1x512xi32>
    %787 = arith.cmpi slt, %785, %786 : vector<1x512xi32>
    %788 = arith.andi %783, %787 : vector<1x512xi1>
    %c1_i32_371 = arith.constant 1 : i32
    %789 = vector.broadcast %c1_i32_371 : i32 to vector<1x512xi32>
    %790 = arith.addi %3, %789 : vector<1x512xi32>
    %c0_i32_372 = arith.constant 0 : i32
    %791 = vector.broadcast %c0_i32_372 : i32 to vector<1x512xi32>
    %792 = arith.cmpi sge, %790, %791 : vector<1x512xi32>
    %793 = arith.andi %788, %792 : vector<1x512xi1>
    %c1_i32_373 = arith.constant 1 : i32
    %794 = vector.broadcast %c1_i32_373 : i32 to vector<1x512xi32>
    %795 = arith.addi %3, %794 : vector<1x512xi32>
    %c16_i32_374 = arith.constant 16 : i32
    %796 = vector.broadcast %c16_i32_374 : i32 to vector<1x512xi32>
    %797 = arith.cmpi slt, %795, %796 : vector<1x512xi32>
    %798 = arith.andi %793, %797 : vector<1x512xi1>
    %cst_375 = arith.constant 0.000000e+00 : f32
    %799 = vector.shape_cast %798 : vector<1x512xi1> to vector<1x512xi1>
    %800 = vector.broadcast %799 : vector<1x512xi1> to vector<4x512xi1>
    %801 = vector.broadcast %cst_375 : f32 to vector<4x512xf32>
    %802 = arith.select %800, %779, %801 : vector<4x512xi1>, vector<4x512xf32>
    %803 = arith.truncf %802 : vector<4x512xf32> to vector<4x512xbf16>
    %c25 = arith.constant 25 : index
    %c0_376 = arith.constant 0 : index
    %c0_377 = arith.constant 0 : index
    %804 = vector.load %arg8[%c25, %c0_376, %c0_377] : memref<49x4x4xbf16, #tpu.memory_space<vmem>>, vector<1x4x4xbf16>
    %805 = vector.shape_cast %804 : vector<1x4x4xbf16> to vector<4x4xbf16>
    %cst_378 = arith.constant dense<0.000000e+00> : vector<4x512xf32>
    %806 = tpu.matmul %805, %803, %cst_378 {dimension_numbers = #tpu.dot_dimension_numbers<[1], [0], [0], [1], [0, 0, 1, 1], [], []>} : vector<4x4xbf16>, vector<4x512xbf16>, vector<4x512xf32> -> vector<4x512xf32>
    %807 = arith.addf %770, %806 : vector<4x512xf32>
    %c13_379 = arith.constant 13 : index
    %c0_380 = arith.constant 0 : index
    %c0_381 = arith.constant 0 : index
    %808 = vector.load %arg10[%c13_379, %c0_380, %c0_381] : memref<25x4x4xbf16, #tpu.memory_space<vmem>>, vector<1x4x4xbf16>
    %809 = vector.shape_cast %808 : vector<1x4x4xbf16> to vector<4x4xbf16>
    %cst_382 = arith.constant dense<0.000000e+00> : vector<4x512xf32>
    %810 = tpu.matmul %809, %803, %cst_382 {dimension_numbers = #tpu.dot_dimension_numbers<[1], [0], [0], [1], [0, 0, 1, 1], [], []>} : vector<4x4xbf16>, vector<4x512xbf16>, vector<4x512xf32> -> vector<4x512xf32>
    %811 = arith.addf %774, %810 : vector<4x512xf32>
    %c5_383 = arith.constant 5 : index
    %c0_384 = arith.constant 0 : index
    %c0_385 = arith.constant 0 : index
    %812 = vector.load %arg12[%c5_383, %c0_384, %c0_385] : memref<9x4x4xbf16, #tpu.memory_space<vmem>>, vector<1x4x4xbf16>
    %813 = vector.shape_cast %812 : vector<1x4x4xbf16> to vector<4x4xbf16>
    %cst_386 = arith.constant dense<0.000000e+00> : vector<4x512xf32>
    %814 = tpu.matmul %813, %803, %cst_386 {dimension_numbers = #tpu.dot_dimension_numbers<[1], [0], [0], [1], [0, 0, 1, 1], [], []>} : vector<4x4xbf16>, vector<4x512xbf16>, vector<4x512xf32> -> vector<4x512xf32>
    %815 = arith.addf %778, %814 : vector<4x512xf32>
    %c510_i32 = arith.constant 510 : i32
    %816 = tpu.dynamic_rotate %0 by %c510_i32 dim 1 : vector<4x512xf32>, i32 -> vector<4x512xf32>
    %c0_i32_387 = arith.constant 0 : i32
    %817 = vector.broadcast %c0_i32_387 : i32 to vector<1x512xi32>
    %818 = arith.addi %2, %817 : vector<1x512xi32>
    %c0_i32_388 = arith.constant 0 : i32
    %819 = vector.broadcast %c0_i32_388 : i32 to vector<1x512xi32>
    %820 = arith.cmpi sge, %818, %819 : vector<1x512xi32>
    %c0_i32_389 = arith.constant 0 : i32
    %821 = vector.broadcast %c0_i32_389 : i32 to vector<1x512xi32>
    %822 = arith.addi %2, %821 : vector<1x512xi32>
    %c16_i32_390 = arith.constant 16 : i32
    %823 = vector.broadcast %c16_i32_390 : i32 to vector<1x512xi32>
    %824 = arith.cmpi slt, %822, %823 : vector<1x512xi32>
    %825 = arith.andi %820, %824 : vector<1x512xi1>
    %c2_i32_391 = arith.constant 2 : i32
    %826 = vector.broadcast %c2_i32_391 : i32 to vector<1x512xi32>
    %827 = arith.addi %3, %826 : vector<1x512xi32>
    %c0_i32_392 = arith.constant 0 : i32
    %828 = vector.broadcast %c0_i32_392 : i32 to vector<1x512xi32>
    %829 = arith.cmpi sge, %827, %828 : vector<1x512xi32>
    %830 = arith.andi %825, %829 : vector<1x512xi1>
    %c2_i32_393 = arith.constant 2 : i32
    %831 = vector.broadcast %c2_i32_393 : i32 to vector<1x512xi32>
    %832 = arith.addi %3, %831 : vector<1x512xi32>
    %c16_i32_394 = arith.constant 16 : i32
    %833 = vector.broadcast %c16_i32_394 : i32 to vector<1x512xi32>
    %834 = arith.cmpi slt, %832, %833 : vector<1x512xi32>
    %835 = arith.andi %830, %834 : vector<1x512xi1>
    %cst_395 = arith.constant 0.000000e+00 : f32
    %836 = vector.shape_cast %835 : vector<1x512xi1> to vector<1x512xi1>
    %837 = vector.broadcast %836 : vector<1x512xi1> to vector<4x512xi1>
    %838 = vector.broadcast %cst_395 : f32 to vector<4x512xf32>
    %839 = arith.select %837, %816, %838 : vector<4x512xi1>, vector<4x512xf32>
    %840 = arith.truncf %839 : vector<4x512xf32> to vector<4x512xbf16>
    %c26 = arith.constant 26 : index
    %c0_396 = arith.constant 0 : index
    %c0_397 = arith.constant 0 : index
    %841 = vector.load %arg8[%c26, %c0_396, %c0_397] : memref<49x4x4xbf16, #tpu.memory_space<vmem>>, vector<1x4x4xbf16>
    %842 = vector.shape_cast %841 : vector<1x4x4xbf16> to vector<4x4xbf16>
    %cst_398 = arith.constant dense<0.000000e+00> : vector<4x512xf32>
    %843 = tpu.matmul %842, %840, %cst_398 {dimension_numbers = #tpu.dot_dimension_numbers<[1], [0], [0], [1], [0, 0, 1, 1], [], []>} : vector<4x4xbf16>, vector<4x512xbf16>, vector<4x512xf32> -> vector<4x512xf32>
    %844 = arith.addf %807, %843 : vector<4x512xf32>
    %c14_399 = arith.constant 14 : index
    %c0_400 = arith.constant 0 : index
    %c0_401 = arith.constant 0 : index
    %845 = vector.load %arg10[%c14_399, %c0_400, %c0_401] : memref<25x4x4xbf16, #tpu.memory_space<vmem>>, vector<1x4x4xbf16>
    %846 = vector.shape_cast %845 : vector<1x4x4xbf16> to vector<4x4xbf16>
    %cst_402 = arith.constant dense<0.000000e+00> : vector<4x512xf32>
    %847 = tpu.matmul %846, %840, %cst_402 {dimension_numbers = #tpu.dot_dimension_numbers<[1], [0], [0], [1], [0, 0, 1, 1], [], []>} : vector<4x4xbf16>, vector<4x512xbf16>, vector<4x512xf32> -> vector<4x512xf32>
    %848 = arith.addf %811, %847 : vector<4x512xf32>
    %c509_i32 = arith.constant 509 : i32
    %849 = tpu.dynamic_rotate %0 by %c509_i32 dim 1 : vector<4x512xf32>, i32 -> vector<4x512xf32>
    %c0_i32_403 = arith.constant 0 : i32
    %850 = vector.broadcast %c0_i32_403 : i32 to vector<1x512xi32>
    %851 = arith.addi %2, %850 : vector<1x512xi32>
    %c0_i32_404 = arith.constant 0 : i32
    %852 = vector.broadcast %c0_i32_404 : i32 to vector<1x512xi32>
    %853 = arith.cmpi sge, %851, %852 : vector<1x512xi32>
    %c0_i32_405 = arith.constant 0 : i32
    %854 = vector.broadcast %c0_i32_405 : i32 to vector<1x512xi32>
    %855 = arith.addi %2, %854 : vector<1x512xi32>
    %c16_i32_406 = arith.constant 16 : i32
    %856 = vector.broadcast %c16_i32_406 : i32 to vector<1x512xi32>
    %857 = arith.cmpi slt, %855, %856 : vector<1x512xi32>
    %858 = arith.andi %853, %857 : vector<1x512xi1>
    %c3_i32_407 = arith.constant 3 : i32
    %859 = vector.broadcast %c3_i32_407 : i32 to vector<1x512xi32>
    %860 = arith.addi %3, %859 : vector<1x512xi32>
    %c0_i32_408 = arith.constant 0 : i32
    %861 = vector.broadcast %c0_i32_408 : i32 to vector<1x512xi32>
    %862 = arith.cmpi sge, %860, %861 : vector<1x512xi32>
    %863 = arith.andi %858, %862 : vector<1x512xi1>
    %c3_i32_409 = arith.constant 3 : i32
    %864 = vector.broadcast %c3_i32_409 : i32 to vector<1x512xi32>
    %865 = arith.addi %3, %864 : vector<1x512xi32>
    %c16_i32_410 = arith.constant 16 : i32
    %866 = vector.broadcast %c16_i32_410 : i32 to vector<1x512xi32>
    %867 = arith.cmpi slt, %865, %866 : vector<1x512xi32>
    %868 = arith.andi %863, %867 : vector<1x512xi1>
    %cst_411 = arith.constant 0.000000e+00 : f32
    %869 = vector.shape_cast %868 : vector<1x512xi1> to vector<1x512xi1>
    %870 = vector.broadcast %869 : vector<1x512xi1> to vector<4x512xi1>
    %871 = vector.broadcast %cst_411 : f32 to vector<4x512xf32>
    %872 = arith.select %870, %849, %871 : vector<4x512xi1>, vector<4x512xf32>
    %873 = arith.truncf %872 : vector<4x512xf32> to vector<4x512xbf16>
    %c27 = arith.constant 27 : index
    %c0_412 = arith.constant 0 : index
    %c0_413 = arith.constant 0 : index
    %874 = vector.load %arg8[%c27, %c0_412, %c0_413] : memref<49x4x4xbf16, #tpu.memory_space<vmem>>, vector<1x4x4xbf16>
    %875 = vector.shape_cast %874 : vector<1x4x4xbf16> to vector<4x4xbf16>
    %cst_414 = arith.constant dense<0.000000e+00> : vector<4x512xf32>
    %876 = tpu.matmul %875, %873, %cst_414 {dimension_numbers = #tpu.dot_dimension_numbers<[1], [0], [0], [1], [0, 0, 1, 1], [], []>} : vector<4x4xbf16>, vector<4x512xbf16>, vector<4x512xf32> -> vector<4x512xf32>
    %877 = arith.addf %844, %876 : vector<4x512xf32>
    %c499_i32 = arith.constant 499 : i32
    %878 = tpu.dynamic_rotate %0 by %c499_i32 dim 1 : vector<4x512xf32>, i32 -> vector<4x512xf32>
    %c1_i32_415 = arith.constant 1 : i32
    %879 = vector.broadcast %c1_i32_415 : i32 to vector<1x512xi32>
    %880 = arith.addi %2, %879 : vector<1x512xi32>
    %c0_i32_416 = arith.constant 0 : i32
    %881 = vector.broadcast %c0_i32_416 : i32 to vector<1x512xi32>
    %882 = arith.cmpi sge, %880, %881 : vector<1x512xi32>
    %c1_i32_417 = arith.constant 1 : i32
    %883 = vector.broadcast %c1_i32_417 : i32 to vector<1x512xi32>
    %884 = arith.addi %2, %883 : vector<1x512xi32>
    %c16_i32_418 = arith.constant 16 : i32
    %885 = vector.broadcast %c16_i32_418 : i32 to vector<1x512xi32>
    %886 = arith.cmpi slt, %884, %885 : vector<1x512xi32>
    %887 = arith.andi %882, %886 : vector<1x512xi1>
    %c-3_i32_419 = arith.constant -3 : i32
    %888 = vector.broadcast %c-3_i32_419 : i32 to vector<1x512xi32>
    %889 = arith.addi %3, %888 : vector<1x512xi32>
    %c0_i32_420 = arith.constant 0 : i32
    %890 = vector.broadcast %c0_i32_420 : i32 to vector<1x512xi32>
    %891 = arith.cmpi sge, %889, %890 : vector<1x512xi32>
    %892 = arith.andi %887, %891 : vector<1x512xi1>
    %c-3_i32_421 = arith.constant -3 : i32
    %893 = vector.broadcast %c-3_i32_421 : i32 to vector<1x512xi32>
    %894 = arith.addi %3, %893 : vector<1x512xi32>
    %c16_i32_422 = arith.constant 16 : i32
    %895 = vector.broadcast %c16_i32_422 : i32 to vector<1x512xi32>
    %896 = arith.cmpi slt, %894, %895 : vector<1x512xi32>
    %897 = arith.andi %892, %896 : vector<1x512xi1>
    %cst_423 = arith.constant 0.000000e+00 : f32
    %898 = vector.shape_cast %897 : vector<1x512xi1> to vector<1x512xi1>
    %899 = vector.broadcast %898 : vector<1x512xi1> to vector<4x512xi1>
    %900 = vector.broadcast %cst_423 : f32 to vector<4x512xf32>
    %901 = arith.select %899, %878, %900 : vector<4x512xi1>, vector<4x512xf32>
    %902 = arith.truncf %901 : vector<4x512xf32> to vector<4x512xbf16>
    %c28 = arith.constant 28 : index
    %c0_424 = arith.constant 0 : index
    %c0_425 = arith.constant 0 : index
    %903 = vector.load %arg8[%c28, %c0_424, %c0_425] : memref<49x4x4xbf16, #tpu.memory_space<vmem>>, vector<1x4x4xbf16>
    %904 = vector.shape_cast %903 : vector<1x4x4xbf16> to vector<4x4xbf16>
    %cst_426 = arith.constant dense<0.000000e+00> : vector<4x512xf32>
    %905 = tpu.matmul %904, %902, %cst_426 {dimension_numbers = #tpu.dot_dimension_numbers<[1], [0], [0], [1], [0, 0, 1, 1], [], []>} : vector<4x4xbf16>, vector<4x512xbf16>, vector<4x512xf32> -> vector<4x512xf32>
    %906 = arith.addf %877, %905 : vector<4x512xf32>
    %c498_i32 = arith.constant 498 : i32
    %907 = tpu.dynamic_rotate %0 by %c498_i32 dim 1 : vector<4x512xf32>, i32 -> vector<4x512xf32>
    %c1_i32_427 = arith.constant 1 : i32
    %908 = vector.broadcast %c1_i32_427 : i32 to vector<1x512xi32>
    %909 = arith.addi %2, %908 : vector<1x512xi32>
    %c0_i32_428 = arith.constant 0 : i32
    %910 = vector.broadcast %c0_i32_428 : i32 to vector<1x512xi32>
    %911 = arith.cmpi sge, %909, %910 : vector<1x512xi32>
    %c1_i32_429 = arith.constant 1 : i32
    %912 = vector.broadcast %c1_i32_429 : i32 to vector<1x512xi32>
    %913 = arith.addi %2, %912 : vector<1x512xi32>
    %c16_i32_430 = arith.constant 16 : i32
    %914 = vector.broadcast %c16_i32_430 : i32 to vector<1x512xi32>
    %915 = arith.cmpi slt, %913, %914 : vector<1x512xi32>
    %916 = arith.andi %911, %915 : vector<1x512xi1>
    %c-2_i32_431 = arith.constant -2 : i32
    %917 = vector.broadcast %c-2_i32_431 : i32 to vector<1x512xi32>
    %918 = arith.addi %3, %917 : vector<1x512xi32>
    %c0_i32_432 = arith.constant 0 : i32
    %919 = vector.broadcast %c0_i32_432 : i32 to vector<1x512xi32>
    %920 = arith.cmpi sge, %918, %919 : vector<1x512xi32>
    %921 = arith.andi %916, %920 : vector<1x512xi1>
    %c-2_i32_433 = arith.constant -2 : i32
    %922 = vector.broadcast %c-2_i32_433 : i32 to vector<1x512xi32>
    %923 = arith.addi %3, %922 : vector<1x512xi32>
    %c16_i32_434 = arith.constant 16 : i32
    %924 = vector.broadcast %c16_i32_434 : i32 to vector<1x512xi32>
    %925 = arith.cmpi slt, %923, %924 : vector<1x512xi32>
    %926 = arith.andi %921, %925 : vector<1x512xi1>
    %cst_435 = arith.constant 0.000000e+00 : f32
    %927 = vector.shape_cast %926 : vector<1x512xi1> to vector<1x512xi1>
    %928 = vector.broadcast %927 : vector<1x512xi1> to vector<4x512xi1>
    %929 = vector.broadcast %cst_435 : f32 to vector<4x512xf32>
    %930 = arith.select %928, %907, %929 : vector<4x512xi1>, vector<4x512xf32>
    %931 = arith.truncf %930 : vector<4x512xf32> to vector<4x512xbf16>
    %c29 = arith.constant 29 : index
    %c0_436 = arith.constant 0 : index
    %c0_437 = arith.constant 0 : index
    %932 = vector.load %arg8[%c29, %c0_436, %c0_437] : memref<49x4x4xbf16, #tpu.memory_space<vmem>>, vector<1x4x4xbf16>
    %933 = vector.shape_cast %932 : vector<1x4x4xbf16> to vector<4x4xbf16>
    %cst_438 = arith.constant dense<0.000000e+00> : vector<4x512xf32>
    %934 = tpu.matmul %933, %931, %cst_438 {dimension_numbers = #tpu.dot_dimension_numbers<[1], [0], [0], [1], [0, 0, 1, 1], [], []>} : vector<4x4xbf16>, vector<4x512xbf16>, vector<4x512xf32> -> vector<4x512xf32>
    %935 = arith.addf %906, %934 : vector<4x512xf32>
    %c15_439 = arith.constant 15 : index
    %c0_440 = arith.constant 0 : index
    %c0_441 = arith.constant 0 : index
    %936 = vector.load %arg10[%c15_439, %c0_440, %c0_441] : memref<25x4x4xbf16, #tpu.memory_space<vmem>>, vector<1x4x4xbf16>
    %937 = vector.shape_cast %936 : vector<1x4x4xbf16> to vector<4x4xbf16>
    %cst_442 = arith.constant dense<0.000000e+00> : vector<4x512xf32>
    %938 = tpu.matmul %937, %931, %cst_442 {dimension_numbers = #tpu.dot_dimension_numbers<[1], [0], [0], [1], [0, 0, 1, 1], [], []>} : vector<4x4xbf16>, vector<4x512xbf16>, vector<4x512xf32> -> vector<4x512xf32>
    %939 = arith.addf %848, %938 : vector<4x512xf32>
    %c497_i32 = arith.constant 497 : i32
    %940 = tpu.dynamic_rotate %0 by %c497_i32 dim 1 : vector<4x512xf32>, i32 -> vector<4x512xf32>
    %c1_i32_443 = arith.constant 1 : i32
    %941 = vector.broadcast %c1_i32_443 : i32 to vector<1x512xi32>
    %942 = arith.addi %2, %941 : vector<1x512xi32>
    %c0_i32_444 = arith.constant 0 : i32
    %943 = vector.broadcast %c0_i32_444 : i32 to vector<1x512xi32>
    %944 = arith.cmpi sge, %942, %943 : vector<1x512xi32>
    %c1_i32_445 = arith.constant 1 : i32
    %945 = vector.broadcast %c1_i32_445 : i32 to vector<1x512xi32>
    %946 = arith.addi %2, %945 : vector<1x512xi32>
    %c16_i32_446 = arith.constant 16 : i32
    %947 = vector.broadcast %c16_i32_446 : i32 to vector<1x512xi32>
    %948 = arith.cmpi slt, %946, %947 : vector<1x512xi32>
    %949 = arith.andi %944, %948 : vector<1x512xi1>
    %c-1_i32_447 = arith.constant -1 : i32
    %950 = vector.broadcast %c-1_i32_447 : i32 to vector<1x512xi32>
    %951 = arith.addi %3, %950 : vector<1x512xi32>
    %c0_i32_448 = arith.constant 0 : i32
    %952 = vector.broadcast %c0_i32_448 : i32 to vector<1x512xi32>
    %953 = arith.cmpi sge, %951, %952 : vector<1x512xi32>
    %954 = arith.andi %949, %953 : vector<1x512xi1>
    %c-1_i32_449 = arith.constant -1 : i32
    %955 = vector.broadcast %c-1_i32_449 : i32 to vector<1x512xi32>
    %956 = arith.addi %3, %955 : vector<1x512xi32>
    %c16_i32_450 = arith.constant 16 : i32
    %957 = vector.broadcast %c16_i32_450 : i32 to vector<1x512xi32>
    %958 = arith.cmpi slt, %956, %957 : vector<1x512xi32>
    %959 = arith.andi %954, %958 : vector<1x512xi1>
    %cst_451 = arith.constant 0.000000e+00 : f32
    %960 = vector.shape_cast %959 : vector<1x512xi1> to vector<1x512xi1>
    %961 = vector.broadcast %960 : vector<1x512xi1> to vector<4x512xi1>
    %962 = vector.broadcast %cst_451 : f32 to vector<4x512xf32>
    %963 = arith.select %961, %940, %962 : vector<4x512xi1>, vector<4x512xf32>
    %964 = arith.truncf %963 : vector<4x512xf32> to vector<4x512xbf16>
    %c30 = arith.constant 30 : index
    %c0_452 = arith.constant 0 : index
    %c0_453 = arith.constant 0 : index
    %965 = vector.load %arg8[%c30, %c0_452, %c0_453] : memref<49x4x4xbf16, #tpu.memory_space<vmem>>, vector<1x4x4xbf16>
    %966 = vector.shape_cast %965 : vector<1x4x4xbf16> to vector<4x4xbf16>
    %cst_454 = arith.constant dense<0.000000e+00> : vector<4x512xf32>
    %967 = tpu.matmul %966, %964, %cst_454 {dimension_numbers = #tpu.dot_dimension_numbers<[1], [0], [0], [1], [0, 0, 1, 1], [], []>} : vector<4x4xbf16>, vector<4x512xbf16>, vector<4x512xf32> -> vector<4x512xf32>
    %968 = arith.addf %935, %967 : vector<4x512xf32>
    %c16_455 = arith.constant 16 : index
    %c0_456 = arith.constant 0 : index
    %c0_457 = arith.constant 0 : index
    %969 = vector.load %arg10[%c16_455, %c0_456, %c0_457] : memref<25x4x4xbf16, #tpu.memory_space<vmem>>, vector<1x4x4xbf16>
    %970 = vector.shape_cast %969 : vector<1x4x4xbf16> to vector<4x4xbf16>
    %cst_458 = arith.constant dense<0.000000e+00> : vector<4x512xf32>
    %971 = tpu.matmul %970, %964, %cst_458 {dimension_numbers = #tpu.dot_dimension_numbers<[1], [0], [0], [1], [0, 0, 1, 1], [], []>} : vector<4x4xbf16>, vector<4x512xbf16>, vector<4x512xf32> -> vector<4x512xf32>
    %972 = arith.addf %939, %971 : vector<4x512xf32>
    %c6_459 = arith.constant 6 : index
    %c0_460 = arith.constant 0 : index
    %c0_461 = arith.constant 0 : index
    %973 = vector.load %arg12[%c6_459, %c0_460, %c0_461] : memref<9x4x4xbf16, #tpu.memory_space<vmem>>, vector<1x4x4xbf16>
    %974 = vector.shape_cast %973 : vector<1x4x4xbf16> to vector<4x4xbf16>
    %cst_462 = arith.constant dense<0.000000e+00> : vector<4x512xf32>
    %975 = tpu.matmul %974, %964, %cst_462 {dimension_numbers = #tpu.dot_dimension_numbers<[1], [0], [0], [1], [0, 0, 1, 1], [], []>} : vector<4x4xbf16>, vector<4x512xbf16>, vector<4x512xf32> -> vector<4x512xf32>
    %976 = arith.addf %815, %975 : vector<4x512xf32>
    %c496_i32 = arith.constant 496 : i32
    %977 = tpu.dynamic_rotate %0 by %c496_i32 dim 1 : vector<4x512xf32>, i32 -> vector<4x512xf32>
    %c1_i32_463 = arith.constant 1 : i32
    %978 = vector.broadcast %c1_i32_463 : i32 to vector<1x512xi32>
    %979 = arith.addi %2, %978 : vector<1x512xi32>
    %c0_i32_464 = arith.constant 0 : i32
    %980 = vector.broadcast %c0_i32_464 : i32 to vector<1x512xi32>
    %981 = arith.cmpi sge, %979, %980 : vector<1x512xi32>
    %c1_i32_465 = arith.constant 1 : i32
    %982 = vector.broadcast %c1_i32_465 : i32 to vector<1x512xi32>
    %983 = arith.addi %2, %982 : vector<1x512xi32>
    %c16_i32_466 = arith.constant 16 : i32
    %984 = vector.broadcast %c16_i32_466 : i32 to vector<1x512xi32>
    %985 = arith.cmpi slt, %983, %984 : vector<1x512xi32>
    %986 = arith.andi %981, %985 : vector<1x512xi1>
    %c0_i32_467 = arith.constant 0 : i32
    %987 = vector.broadcast %c0_i32_467 : i32 to vector<1x512xi32>
    %988 = arith.addi %3, %987 : vector<1x512xi32>
    %c0_i32_468 = arith.constant 0 : i32
    %989 = vector.broadcast %c0_i32_468 : i32 to vector<1x512xi32>
    %990 = arith.cmpi sge, %988, %989 : vector<1x512xi32>
    %991 = arith.andi %986, %990 : vector<1x512xi1>
    %c0_i32_469 = arith.constant 0 : i32
    %992 = vector.broadcast %c0_i32_469 : i32 to vector<1x512xi32>
    %993 = arith.addi %3, %992 : vector<1x512xi32>
    %c16_i32_470 = arith.constant 16 : i32
    %994 = vector.broadcast %c16_i32_470 : i32 to vector<1x512xi32>
    %995 = arith.cmpi slt, %993, %994 : vector<1x512xi32>
    %996 = arith.andi %991, %995 : vector<1x512xi1>
    %cst_471 = arith.constant 0.000000e+00 : f32
    %997 = vector.shape_cast %996 : vector<1x512xi1> to vector<1x512xi1>
    %998 = vector.broadcast %997 : vector<1x512xi1> to vector<4x512xi1>
    %999 = vector.broadcast %cst_471 : f32 to vector<4x512xf32>
    %1000 = arith.select %998, %977, %999 : vector<4x512xi1>, vector<4x512xf32>
    %1001 = arith.truncf %1000 : vector<4x512xf32> to vector<4x512xbf16>
    %c31 = arith.constant 31 : index
    %c0_472 = arith.constant 0 : index
    %c0_473 = arith.constant 0 : index
    %1002 = vector.load %arg8[%c31, %c0_472, %c0_473] : memref<49x4x4xbf16, #tpu.memory_space<vmem>>, vector<1x4x4xbf16>
    %1003 = vector.shape_cast %1002 : vector<1x4x4xbf16> to vector<4x4xbf16>
    %cst_474 = arith.constant dense<0.000000e+00> : vector<4x512xf32>
    %1004 = tpu.matmul %1003, %1001, %cst_474 {dimension_numbers = #tpu.dot_dimension_numbers<[1], [0], [0], [1], [0, 0, 1, 1], [], []>} : vector<4x4xbf16>, vector<4x512xbf16>, vector<4x512xf32> -> vector<4x512xf32>
    %1005 = arith.addf %968, %1004 : vector<4x512xf32>
    %c17_475 = arith.constant 17 : index
    %c0_476 = arith.constant 0 : index
    %c0_477 = arith.constant 0 : index
    %1006 = vector.load %arg10[%c17_475, %c0_476, %c0_477] : memref<25x4x4xbf16, #tpu.memory_space<vmem>>, vector<1x4x4xbf16>
    %1007 = vector.shape_cast %1006 : vector<1x4x4xbf16> to vector<4x4xbf16>
    %cst_478 = arith.constant dense<0.000000e+00> : vector<4x512xf32>
    %1008 = tpu.matmul %1007, %1001, %cst_478 {dimension_numbers = #tpu.dot_dimension_numbers<[1], [0], [0], [1], [0, 0, 1, 1], [], []>} : vector<4x4xbf16>, vector<4x512xbf16>, vector<4x512xf32> -> vector<4x512xf32>
    %1009 = arith.addf %972, %1008 : vector<4x512xf32>
    %c7_479 = arith.constant 7 : index
    %c0_480 = arith.constant 0 : index
    %c0_481 = arith.constant 0 : index
    %1010 = vector.load %arg12[%c7_479, %c0_480, %c0_481] : memref<9x4x4xbf16, #tpu.memory_space<vmem>>, vector<1x4x4xbf16>
    %1011 = vector.shape_cast %1010 : vector<1x4x4xbf16> to vector<4x4xbf16>
    %cst_482 = arith.constant dense<0.000000e+00> : vector<4x512xf32>
    %1012 = tpu.matmul %1011, %1001, %cst_482 {dimension_numbers = #tpu.dot_dimension_numbers<[1], [0], [0], [1], [0, 0, 1, 1], [], []>} : vector<4x4xbf16>, vector<4x512xbf16>, vector<4x512xf32> -> vector<4x512xf32>
    %1013 = arith.addf %976, %1012 : vector<4x512xf32>
    %c495_i32 = arith.constant 495 : i32
    %1014 = tpu.dynamic_rotate %0 by %c495_i32 dim 1 : vector<4x512xf32>, i32 -> vector<4x512xf32>
    %c1_i32_483 = arith.constant 1 : i32
    %1015 = vector.broadcast %c1_i32_483 : i32 to vector<1x512xi32>
    %1016 = arith.addi %2, %1015 : vector<1x512xi32>
    %c0_i32_484 = arith.constant 0 : i32
    %1017 = vector.broadcast %c0_i32_484 : i32 to vector<1x512xi32>
    %1018 = arith.cmpi sge, %1016, %1017 : vector<1x512xi32>
    %c1_i32_485 = arith.constant 1 : i32
    %1019 = vector.broadcast %c1_i32_485 : i32 to vector<1x512xi32>
    %1020 = arith.addi %2, %1019 : vector<1x512xi32>
    %c16_i32_486 = arith.constant 16 : i32
    %1021 = vector.broadcast %c16_i32_486 : i32 to vector<1x512xi32>
    %1022 = arith.cmpi slt, %1020, %1021 : vector<1x512xi32>
    %1023 = arith.andi %1018, %1022 : vector<1x512xi1>
    %c1_i32_487 = arith.constant 1 : i32
    %1024 = vector.broadcast %c1_i32_487 : i32 to vector<1x512xi32>
    %1025 = arith.addi %3, %1024 : vector<1x512xi32>
    %c0_i32_488 = arith.constant 0 : i32
    %1026 = vector.broadcast %c0_i32_488 : i32 to vector<1x512xi32>
    %1027 = arith.cmpi sge, %1025, %1026 : vector<1x512xi32>
    %1028 = arith.andi %1023, %1027 : vector<1x512xi1>
    %c1_i32_489 = arith.constant 1 : i32
    %1029 = vector.broadcast %c1_i32_489 : i32 to vector<1x512xi32>
    %1030 = arith.addi %3, %1029 : vector<1x512xi32>
    %c16_i32_490 = arith.constant 16 : i32
    %1031 = vector.broadcast %c16_i32_490 : i32 to vector<1x512xi32>
    %1032 = arith.cmpi slt, %1030, %1031 : vector<1x512xi32>
    %1033 = arith.andi %1028, %1032 : vector<1x512xi1>
    %cst_491 = arith.constant 0.000000e+00 : f32
    %1034 = vector.shape_cast %1033 : vector<1x512xi1> to vector<1x512xi1>
    %1035 = vector.broadcast %1034 : vector<1x512xi1> to vector<4x512xi1>
    %1036 = vector.broadcast %cst_491 : f32 to vector<4x512xf32>
    %1037 = arith.select %1035, %1014, %1036 : vector<4x512xi1>, vector<4x512xf32>
    %1038 = arith.truncf %1037 : vector<4x512xf32> to vector<4x512xbf16>
    %c32 = arith.constant 32 : index
    %c0_492 = arith.constant 0 : index
    %c0_493 = arith.constant 0 : index
    %1039 = vector.load %arg8[%c32, %c0_492, %c0_493] : memref<49x4x4xbf16, #tpu.memory_space<vmem>>, vector<1x4x4xbf16>
    %1040 = vector.shape_cast %1039 : vector<1x4x4xbf16> to vector<4x4xbf16>
    %cst_494 = arith.constant dense<0.000000e+00> : vector<4x512xf32>
    %1041 = tpu.matmul %1040, %1038, %cst_494 {dimension_numbers = #tpu.dot_dimension_numbers<[1], [0], [0], [1], [0, 0, 1, 1], [], []>} : vector<4x4xbf16>, vector<4x512xbf16>, vector<4x512xf32> -> vector<4x512xf32>
    %1042 = arith.addf %1005, %1041 : vector<4x512xf32>
    %c18_495 = arith.constant 18 : index
    %c0_496 = arith.constant 0 : index
    %c0_497 = arith.constant 0 : index
    %1043 = vector.load %arg10[%c18_495, %c0_496, %c0_497] : memref<25x4x4xbf16, #tpu.memory_space<vmem>>, vector<1x4x4xbf16>
    %1044 = vector.shape_cast %1043 : vector<1x4x4xbf16> to vector<4x4xbf16>
    %cst_498 = arith.constant dense<0.000000e+00> : vector<4x512xf32>
    %1045 = tpu.matmul %1044, %1038, %cst_498 {dimension_numbers = #tpu.dot_dimension_numbers<[1], [0], [0], [1], [0, 0, 1, 1], [], []>} : vector<4x4xbf16>, vector<4x512xbf16>, vector<4x512xf32> -> vector<4x512xf32>
    %1046 = arith.addf %1009, %1045 : vector<4x512xf32>
    %c8_499 = arith.constant 8 : index
    %c0_500 = arith.constant 0 : index
    %c0_501 = arith.constant 0 : index
    %1047 = vector.load %arg12[%c8_499, %c0_500, %c0_501] : memref<9x4x4xbf16, #tpu.memory_space<vmem>>, vector<1x4x4xbf16>
    %1048 = vector.shape_cast %1047 : vector<1x4x4xbf16> to vector<4x4xbf16>
    %cst_502 = arith.constant dense<0.000000e+00> : vector<4x512xf32>
    %1049 = tpu.matmul %1048, %1038, %cst_502 {dimension_numbers = #tpu.dot_dimension_numbers<[1], [0], [0], [1], [0, 0, 1, 1], [], []>} : vector<4x4xbf16>, vector<4x512xbf16>, vector<4x512xf32> -> vector<4x512xf32>
    %1050 = arith.addf %1013, %1049 : vector<4x512xf32>
    %c494_i32 = arith.constant 494 : i32
    %1051 = tpu.dynamic_rotate %0 by %c494_i32 dim 1 : vector<4x512xf32>, i32 -> vector<4x512xf32>
    %c1_i32_503 = arith.constant 1 : i32
    %1052 = vector.broadcast %c1_i32_503 : i32 to vector<1x512xi32>
    %1053 = arith.addi %2, %1052 : vector<1x512xi32>
    %c0_i32_504 = arith.constant 0 : i32
    %1054 = vector.broadcast %c0_i32_504 : i32 to vector<1x512xi32>
    %1055 = arith.cmpi sge, %1053, %1054 : vector<1x512xi32>
    %c1_i32_505 = arith.constant 1 : i32
    %1056 = vector.broadcast %c1_i32_505 : i32 to vector<1x512xi32>
    %1057 = arith.addi %2, %1056 : vector<1x512xi32>
    %c16_i32_506 = arith.constant 16 : i32
    %1058 = vector.broadcast %c16_i32_506 : i32 to vector<1x512xi32>
    %1059 = arith.cmpi slt, %1057, %1058 : vector<1x512xi32>
    %1060 = arith.andi %1055, %1059 : vector<1x512xi1>
    %c2_i32_507 = arith.constant 2 : i32
    %1061 = vector.broadcast %c2_i32_507 : i32 to vector<1x512xi32>
    %1062 = arith.addi %3, %1061 : vector<1x512xi32>
    %c0_i32_508 = arith.constant 0 : i32
    %1063 = vector.broadcast %c0_i32_508 : i32 to vector<1x512xi32>
    %1064 = arith.cmpi sge, %1062, %1063 : vector<1x512xi32>
    %1065 = arith.andi %1060, %1064 : vector<1x512xi1>
    %c2_i32_509 = arith.constant 2 : i32
    %1066 = vector.broadcast %c2_i32_509 : i32 to vector<1x512xi32>
    %1067 = arith.addi %3, %1066 : vector<1x512xi32>
    %c16_i32_510 = arith.constant 16 : i32
    %1068 = vector.broadcast %c16_i32_510 : i32 to vector<1x512xi32>
    %1069 = arith.cmpi slt, %1067, %1068 : vector<1x512xi32>
    %1070 = arith.andi %1065, %1069 : vector<1x512xi1>
    %cst_511 = arith.constant 0.000000e+00 : f32
    %1071 = vector.shape_cast %1070 : vector<1x512xi1> to vector<1x512xi1>
    %1072 = vector.broadcast %1071 : vector<1x512xi1> to vector<4x512xi1>
    %1073 = vector.broadcast %cst_511 : f32 to vector<4x512xf32>
    %1074 = arith.select %1072, %1051, %1073 : vector<4x512xi1>, vector<4x512xf32>
    %1075 = arith.truncf %1074 : vector<4x512xf32> to vector<4x512xbf16>
    %c33 = arith.constant 33 : index
    %c0_512 = arith.constant 0 : index
    %c0_513 = arith.constant 0 : index
    %1076 = vector.load %arg8[%c33, %c0_512, %c0_513] : memref<49x4x4xbf16, #tpu.memory_space<vmem>>, vector<1x4x4xbf16>
    %1077 = vector.shape_cast %1076 : vector<1x4x4xbf16> to vector<4x4xbf16>
    %cst_514 = arith.constant dense<0.000000e+00> : vector<4x512xf32>
    %1078 = tpu.matmul %1077, %1075, %cst_514 {dimension_numbers = #tpu.dot_dimension_numbers<[1], [0], [0], [1], [0, 0, 1, 1], [], []>} : vector<4x4xbf16>, vector<4x512xbf16>, vector<4x512xf32> -> vector<4x512xf32>
    %1079 = arith.addf %1042, %1078 : vector<4x512xf32>
    %c19_515 = arith.constant 19 : index
    %c0_516 = arith.constant 0 : index
    %c0_517 = arith.constant 0 : index
    %1080 = vector.load %arg10[%c19_515, %c0_516, %c0_517] : memref<25x4x4xbf16, #tpu.memory_space<vmem>>, vector<1x4x4xbf16>
    %1081 = vector.shape_cast %1080 : vector<1x4x4xbf16> to vector<4x4xbf16>
    %cst_518 = arith.constant dense<0.000000e+00> : vector<4x512xf32>
    %1082 = tpu.matmul %1081, %1075, %cst_518 {dimension_numbers = #tpu.dot_dimension_numbers<[1], [0], [0], [1], [0, 0, 1, 1], [], []>} : vector<4x4xbf16>, vector<4x512xbf16>, vector<4x512xf32> -> vector<4x512xf32>
    %1083 = arith.addf %1046, %1082 : vector<4x512xf32>
    %c493_i32 = arith.constant 493 : i32
    %1084 = tpu.dynamic_rotate %0 by %c493_i32 dim 1 : vector<4x512xf32>, i32 -> vector<4x512xf32>
    %c1_i32_519 = arith.constant 1 : i32
    %1085 = vector.broadcast %c1_i32_519 : i32 to vector<1x512xi32>
    %1086 = arith.addi %2, %1085 : vector<1x512xi32>
    %c0_i32_520 = arith.constant 0 : i32
    %1087 = vector.broadcast %c0_i32_520 : i32 to vector<1x512xi32>
    %1088 = arith.cmpi sge, %1086, %1087 : vector<1x512xi32>
    %c1_i32_521 = arith.constant 1 : i32
    %1089 = vector.broadcast %c1_i32_521 : i32 to vector<1x512xi32>
    %1090 = arith.addi %2, %1089 : vector<1x512xi32>
    %c16_i32_522 = arith.constant 16 : i32
    %1091 = vector.broadcast %c16_i32_522 : i32 to vector<1x512xi32>
    %1092 = arith.cmpi slt, %1090, %1091 : vector<1x512xi32>
    %1093 = arith.andi %1088, %1092 : vector<1x512xi1>
    %c3_i32_523 = arith.constant 3 : i32
    %1094 = vector.broadcast %c3_i32_523 : i32 to vector<1x512xi32>
    %1095 = arith.addi %3, %1094 : vector<1x512xi32>
    %c0_i32_524 = arith.constant 0 : i32
    %1096 = vector.broadcast %c0_i32_524 : i32 to vector<1x512xi32>
    %1097 = arith.cmpi sge, %1095, %1096 : vector<1x512xi32>
    %1098 = arith.andi %1093, %1097 : vector<1x512xi1>
    %c3_i32_525 = arith.constant 3 : i32
    %1099 = vector.broadcast %c3_i32_525 : i32 to vector<1x512xi32>
    %1100 = arith.addi %3, %1099 : vector<1x512xi32>
    %c16_i32_526 = arith.constant 16 : i32
    %1101 = vector.broadcast %c16_i32_526 : i32 to vector<1x512xi32>
    %1102 = arith.cmpi slt, %1100, %1101 : vector<1x512xi32>
    %1103 = arith.andi %1098, %1102 : vector<1x512xi1>
    %cst_527 = arith.constant 0.000000e+00 : f32
    %1104 = vector.shape_cast %1103 : vector<1x512xi1> to vector<1x512xi1>
    %1105 = vector.broadcast %1104 : vector<1x512xi1> to vector<4x512xi1>
    %1106 = vector.broadcast %cst_527 : f32 to vector<4x512xf32>
    %1107 = arith.select %1105, %1084, %1106 : vector<4x512xi1>, vector<4x512xf32>
    %1108 = arith.truncf %1107 : vector<4x512xf32> to vector<4x512xbf16>
    %c34 = arith.constant 34 : index
    %c0_528 = arith.constant 0 : index
    %c0_529 = arith.constant 0 : index
    %1109 = vector.load %arg8[%c34, %c0_528, %c0_529] : memref<49x4x4xbf16, #tpu.memory_space<vmem>>, vector<1x4x4xbf16>
    %1110 = vector.shape_cast %1109 : vector<1x4x4xbf16> to vector<4x4xbf16>
    %cst_530 = arith.constant dense<0.000000e+00> : vector<4x512xf32>
    %1111 = tpu.matmul %1110, %1108, %cst_530 {dimension_numbers = #tpu.dot_dimension_numbers<[1], [0], [0], [1], [0, 0, 1, 1], [], []>} : vector<4x4xbf16>, vector<4x512xbf16>, vector<4x512xf32> -> vector<4x512xf32>
    %1112 = arith.addf %1079, %1111 : vector<4x512xf32>
    %c483_i32 = arith.constant 483 : i32
    %1113 = tpu.dynamic_rotate %0 by %c483_i32 dim 1 : vector<4x512xf32>, i32 -> vector<4x512xf32>
    %c2_i32_531 = arith.constant 2 : i32
    %1114 = vector.broadcast %c2_i32_531 : i32 to vector<1x512xi32>
    %1115 = arith.addi %2, %1114 : vector<1x512xi32>
    %c0_i32_532 = arith.constant 0 : i32
    %1116 = vector.broadcast %c0_i32_532 : i32 to vector<1x512xi32>
    %1117 = arith.cmpi sge, %1115, %1116 : vector<1x512xi32>
    %c2_i32_533 = arith.constant 2 : i32
    %1118 = vector.broadcast %c2_i32_533 : i32 to vector<1x512xi32>
    %1119 = arith.addi %2, %1118 : vector<1x512xi32>
    %c16_i32_534 = arith.constant 16 : i32
    %1120 = vector.broadcast %c16_i32_534 : i32 to vector<1x512xi32>
    %1121 = arith.cmpi slt, %1119, %1120 : vector<1x512xi32>
    %1122 = arith.andi %1117, %1121 : vector<1x512xi1>
    %c-3_i32_535 = arith.constant -3 : i32
    %1123 = vector.broadcast %c-3_i32_535 : i32 to vector<1x512xi32>
    %1124 = arith.addi %3, %1123 : vector<1x512xi32>
    %c0_i32_536 = arith.constant 0 : i32
    %1125 = vector.broadcast %c0_i32_536 : i32 to vector<1x512xi32>
    %1126 = arith.cmpi sge, %1124, %1125 : vector<1x512xi32>
    %1127 = arith.andi %1122, %1126 : vector<1x512xi1>
    %c-3_i32_537 = arith.constant -3 : i32
    %1128 = vector.broadcast %c-3_i32_537 : i32 to vector<1x512xi32>
    %1129 = arith.addi %3, %1128 : vector<1x512xi32>
    %c16_i32_538 = arith.constant 16 : i32
    %1130 = vector.broadcast %c16_i32_538 : i32 to vector<1x512xi32>
    %1131 = arith.cmpi slt, %1129, %1130 : vector<1x512xi32>
    %1132 = arith.andi %1127, %1131 : vector<1x512xi1>
    %cst_539 = arith.constant 0.000000e+00 : f32
    %1133 = vector.shape_cast %1132 : vector<1x512xi1> to vector<1x512xi1>
    %1134 = vector.broadcast %1133 : vector<1x512xi1> to vector<4x512xi1>
    %1135 = vector.broadcast %cst_539 : f32 to vector<4x512xf32>
    %1136 = arith.select %1134, %1113, %1135 : vector<4x512xi1>, vector<4x512xf32>
    %1137 = arith.truncf %1136 : vector<4x512xf32> to vector<4x512xbf16>
    %c35 = arith.constant 35 : index
    %c0_540 = arith.constant 0 : index
    %c0_541 = arith.constant 0 : index
    %1138 = vector.load %arg8[%c35, %c0_540, %c0_541] : memref<49x4x4xbf16, #tpu.memory_space<vmem>>, vector<1x4x4xbf16>
    %1139 = vector.shape_cast %1138 : vector<1x4x4xbf16> to vector<4x4xbf16>
    %cst_542 = arith.constant dense<0.000000e+00> : vector<4x512xf32>
    %1140 = tpu.matmul %1139, %1137, %cst_542 {dimension_numbers = #tpu.dot_dimension_numbers<[1], [0], [0], [1], [0, 0, 1, 1], [], []>} : vector<4x4xbf16>, vector<4x512xbf16>, vector<4x512xf32> -> vector<4x512xf32>
    %1141 = arith.addf %1112, %1140 : vector<4x512xf32>
    %c482_i32 = arith.constant 482 : i32
    %1142 = tpu.dynamic_rotate %0 by %c482_i32 dim 1 : vector<4x512xf32>, i32 -> vector<4x512xf32>
    %c2_i32_543 = arith.constant 2 : i32
    %1143 = vector.broadcast %c2_i32_543 : i32 to vector<1x512xi32>
    %1144 = arith.addi %2, %1143 : vector<1x512xi32>
    %c0_i32_544 = arith.constant 0 : i32
    %1145 = vector.broadcast %c0_i32_544 : i32 to vector<1x512xi32>
    %1146 = arith.cmpi sge, %1144, %1145 : vector<1x512xi32>
    %c2_i32_545 = arith.constant 2 : i32
    %1147 = vector.broadcast %c2_i32_545 : i32 to vector<1x512xi32>
    %1148 = arith.addi %2, %1147 : vector<1x512xi32>
    %c16_i32_546 = arith.constant 16 : i32
    %1149 = vector.broadcast %c16_i32_546 : i32 to vector<1x512xi32>
    %1150 = arith.cmpi slt, %1148, %1149 : vector<1x512xi32>
    %1151 = arith.andi %1146, %1150 : vector<1x512xi1>
    %c-2_i32_547 = arith.constant -2 : i32
    %1152 = vector.broadcast %c-2_i32_547 : i32 to vector<1x512xi32>
    %1153 = arith.addi %3, %1152 : vector<1x512xi32>
    %c0_i32_548 = arith.constant 0 : i32
    %1154 = vector.broadcast %c0_i32_548 : i32 to vector<1x512xi32>
    %1155 = arith.cmpi sge, %1153, %1154 : vector<1x512xi32>
    %1156 = arith.andi %1151, %1155 : vector<1x512xi1>
    %c-2_i32_549 = arith.constant -2 : i32
    %1157 = vector.broadcast %c-2_i32_549 : i32 to vector<1x512xi32>
    %1158 = arith.addi %3, %1157 : vector<1x512xi32>
    %c16_i32_550 = arith.constant 16 : i32
    %1159 = vector.broadcast %c16_i32_550 : i32 to vector<1x512xi32>
    %1160 = arith.cmpi slt, %1158, %1159 : vector<1x512xi32>
    %1161 = arith.andi %1156, %1160 : vector<1x512xi1>
    %cst_551 = arith.constant 0.000000e+00 : f32
    %1162 = vector.shape_cast %1161 : vector<1x512xi1> to vector<1x512xi1>
    %1163 = vector.broadcast %1162 : vector<1x512xi1> to vector<4x512xi1>
    %1164 = vector.broadcast %cst_551 : f32 to vector<4x512xf32>
    %1165 = arith.select %1163, %1142, %1164 : vector<4x512xi1>, vector<4x512xf32>
    %1166 = arith.truncf %1165 : vector<4x512xf32> to vector<4x512xbf16>
    %c36 = arith.constant 36 : index
    %c0_552 = arith.constant 0 : index
    %c0_553 = arith.constant 0 : index
    %1167 = vector.load %arg8[%c36, %c0_552, %c0_553] : memref<49x4x4xbf16, #tpu.memory_space<vmem>>, vector<1x4x4xbf16>
    %1168 = vector.shape_cast %1167 : vector<1x4x4xbf16> to vector<4x4xbf16>
    %cst_554 = arith.constant dense<0.000000e+00> : vector<4x512xf32>
    %1169 = tpu.matmul %1168, %1166, %cst_554 {dimension_numbers = #tpu.dot_dimension_numbers<[1], [0], [0], [1], [0, 0, 1, 1], [], []>} : vector<4x4xbf16>, vector<4x512xbf16>, vector<4x512xf32> -> vector<4x512xf32>
    %1170 = arith.addf %1141, %1169 : vector<4x512xf32>
    %c20_555 = arith.constant 20 : index
    %c0_556 = arith.constant 0 : index
    %c0_557 = arith.constant 0 : index
    %1171 = vector.load %arg10[%c20_555, %c0_556, %c0_557] : memref<25x4x4xbf16, #tpu.memory_space<vmem>>, vector<1x4x4xbf16>
    %1172 = vector.shape_cast %1171 : vector<1x4x4xbf16> to vector<4x4xbf16>
    %cst_558 = arith.constant dense<0.000000e+00> : vector<4x512xf32>
    %1173 = tpu.matmul %1172, %1166, %cst_558 {dimension_numbers = #tpu.dot_dimension_numbers<[1], [0], [0], [1], [0, 0, 1, 1], [], []>} : vector<4x4xbf16>, vector<4x512xbf16>, vector<4x512xf32> -> vector<4x512xf32>
    %1174 = arith.addf %1083, %1173 : vector<4x512xf32>
    %c481_i32 = arith.constant 481 : i32
    %1175 = tpu.dynamic_rotate %0 by %c481_i32 dim 1 : vector<4x512xf32>, i32 -> vector<4x512xf32>
    %c2_i32_559 = arith.constant 2 : i32
    %1176 = vector.broadcast %c2_i32_559 : i32 to vector<1x512xi32>
    %1177 = arith.addi %2, %1176 : vector<1x512xi32>
    %c0_i32_560 = arith.constant 0 : i32
    %1178 = vector.broadcast %c0_i32_560 : i32 to vector<1x512xi32>
    %1179 = arith.cmpi sge, %1177, %1178 : vector<1x512xi32>
    %c2_i32_561 = arith.constant 2 : i32
    %1180 = vector.broadcast %c2_i32_561 : i32 to vector<1x512xi32>
    %1181 = arith.addi %2, %1180 : vector<1x512xi32>
    %c16_i32_562 = arith.constant 16 : i32
    %1182 = vector.broadcast %c16_i32_562 : i32 to vector<1x512xi32>
    %1183 = arith.cmpi slt, %1181, %1182 : vector<1x512xi32>
    %1184 = arith.andi %1179, %1183 : vector<1x512xi1>
    %c-1_i32_563 = arith.constant -1 : i32
    %1185 = vector.broadcast %c-1_i32_563 : i32 to vector<1x512xi32>
    %1186 = arith.addi %3, %1185 : vector<1x512xi32>
    %c0_i32_564 = arith.constant 0 : i32
    %1187 = vector.broadcast %c0_i32_564 : i32 to vector<1x512xi32>
    %1188 = arith.cmpi sge, %1186, %1187 : vector<1x512xi32>
    %1189 = arith.andi %1184, %1188 : vector<1x512xi1>
    %c-1_i32_565 = arith.constant -1 : i32
    %1190 = vector.broadcast %c-1_i32_565 : i32 to vector<1x512xi32>
    %1191 = arith.addi %3, %1190 : vector<1x512xi32>
    %c16_i32_566 = arith.constant 16 : i32
    %1192 = vector.broadcast %c16_i32_566 : i32 to vector<1x512xi32>
    %1193 = arith.cmpi slt, %1191, %1192 : vector<1x512xi32>
    %1194 = arith.andi %1189, %1193 : vector<1x512xi1>
    %cst_567 = arith.constant 0.000000e+00 : f32
    %1195 = vector.shape_cast %1194 : vector<1x512xi1> to vector<1x512xi1>
    %1196 = vector.broadcast %1195 : vector<1x512xi1> to vector<4x512xi1>
    %1197 = vector.broadcast %cst_567 : f32 to vector<4x512xf32>
    %1198 = arith.select %1196, %1175, %1197 : vector<4x512xi1>, vector<4x512xf32>
    %1199 = arith.truncf %1198 : vector<4x512xf32> to vector<4x512xbf16>
    %c37 = arith.constant 37 : index
    %c0_568 = arith.constant 0 : index
    %c0_569 = arith.constant 0 : index
    %1200 = vector.load %arg8[%c37, %c0_568, %c0_569] : memref<49x4x4xbf16, #tpu.memory_space<vmem>>, vector<1x4x4xbf16>
    %1201 = vector.shape_cast %1200 : vector<1x4x4xbf16> to vector<4x4xbf16>
    %cst_570 = arith.constant dense<0.000000e+00> : vector<4x512xf32>
    %1202 = tpu.matmul %1201, %1199, %cst_570 {dimension_numbers = #tpu.dot_dimension_numbers<[1], [0], [0], [1], [0, 0, 1, 1], [], []>} : vector<4x4xbf16>, vector<4x512xbf16>, vector<4x512xf32> -> vector<4x512xf32>
    %1203 = arith.addf %1170, %1202 : vector<4x512xf32>
    %c21_571 = arith.constant 21 : index
    %c0_572 = arith.constant 0 : index
    %c0_573 = arith.constant 0 : index
    %1204 = vector.load %arg10[%c21_571, %c0_572, %c0_573] : memref<25x4x4xbf16, #tpu.memory_space<vmem>>, vector<1x4x4xbf16>
    %1205 = vector.shape_cast %1204 : vector<1x4x4xbf16> to vector<4x4xbf16>
    %cst_574 = arith.constant dense<0.000000e+00> : vector<4x512xf32>
    %1206 = tpu.matmul %1205, %1199, %cst_574 {dimension_numbers = #tpu.dot_dimension_numbers<[1], [0], [0], [1], [0, 0, 1, 1], [], []>} : vector<4x4xbf16>, vector<4x512xbf16>, vector<4x512xf32> -> vector<4x512xf32>
    %1207 = arith.addf %1174, %1206 : vector<4x512xf32>
    %c480_i32 = arith.constant 480 : i32
    %1208 = tpu.dynamic_rotate %0 by %c480_i32 dim 1 : vector<4x512xf32>, i32 -> vector<4x512xf32>
    %c2_i32_575 = arith.constant 2 : i32
    %1209 = vector.broadcast %c2_i32_575 : i32 to vector<1x512xi32>
    %1210 = arith.addi %2, %1209 : vector<1x512xi32>
    %c0_i32_576 = arith.constant 0 : i32
    %1211 = vector.broadcast %c0_i32_576 : i32 to vector<1x512xi32>
    %1212 = arith.cmpi sge, %1210, %1211 : vector<1x512xi32>
    %c2_i32_577 = arith.constant 2 : i32
    %1213 = vector.broadcast %c2_i32_577 : i32 to vector<1x512xi32>
    %1214 = arith.addi %2, %1213 : vector<1x512xi32>
    %c16_i32_578 = arith.constant 16 : i32
    %1215 = vector.broadcast %c16_i32_578 : i32 to vector<1x512xi32>
    %1216 = arith.cmpi slt, %1214, %1215 : vector<1x512xi32>
    %1217 = arith.andi %1212, %1216 : vector<1x512xi1>
    %c0_i32_579 = arith.constant 0 : i32
    %1218 = vector.broadcast %c0_i32_579 : i32 to vector<1x512xi32>
    %1219 = arith.addi %3, %1218 : vector<1x512xi32>
    %c0_i32_580 = arith.constant 0 : i32
    %1220 = vector.broadcast %c0_i32_580 : i32 to vector<1x512xi32>
    %1221 = arith.cmpi sge, %1219, %1220 : vector<1x512xi32>
    %1222 = arith.andi %1217, %1221 : vector<1x512xi1>
    %c0_i32_581 = arith.constant 0 : i32
    %1223 = vector.broadcast %c0_i32_581 : i32 to vector<1x512xi32>
    %1224 = arith.addi %3, %1223 : vector<1x512xi32>
    %c16_i32_582 = arith.constant 16 : i32
    %1225 = vector.broadcast %c16_i32_582 : i32 to vector<1x512xi32>
    %1226 = arith.cmpi slt, %1224, %1225 : vector<1x512xi32>
    %1227 = arith.andi %1222, %1226 : vector<1x512xi1>
    %cst_583 = arith.constant 0.000000e+00 : f32
    %1228 = vector.shape_cast %1227 : vector<1x512xi1> to vector<1x512xi1>
    %1229 = vector.broadcast %1228 : vector<1x512xi1> to vector<4x512xi1>
    %1230 = vector.broadcast %cst_583 : f32 to vector<4x512xf32>
    %1231 = arith.select %1229, %1208, %1230 : vector<4x512xi1>, vector<4x512xf32>
    %1232 = arith.truncf %1231 : vector<4x512xf32> to vector<4x512xbf16>
    %c38 = arith.constant 38 : index
    %c0_584 = arith.constant 0 : index
    %c0_585 = arith.constant 0 : index
    %1233 = vector.load %arg8[%c38, %c0_584, %c0_585] : memref<49x4x4xbf16, #tpu.memory_space<vmem>>, vector<1x4x4xbf16>
    %1234 = vector.shape_cast %1233 : vector<1x4x4xbf16> to vector<4x4xbf16>
    %cst_586 = arith.constant dense<0.000000e+00> : vector<4x512xf32>
    %1235 = tpu.matmul %1234, %1232, %cst_586 {dimension_numbers = #tpu.dot_dimension_numbers<[1], [0], [0], [1], [0, 0, 1, 1], [], []>} : vector<4x4xbf16>, vector<4x512xbf16>, vector<4x512xf32> -> vector<4x512xf32>
    %1236 = arith.addf %1203, %1235 : vector<4x512xf32>
    %c22_587 = arith.constant 22 : index
    %c0_588 = arith.constant 0 : index
    %c0_589 = arith.constant 0 : index
    %1237 = vector.load %arg10[%c22_587, %c0_588, %c0_589] : memref<25x4x4xbf16, #tpu.memory_space<vmem>>, vector<1x4x4xbf16>
    %1238 = vector.shape_cast %1237 : vector<1x4x4xbf16> to vector<4x4xbf16>
    %cst_590 = arith.constant dense<0.000000e+00> : vector<4x512xf32>
    %1239 = tpu.matmul %1238, %1232, %cst_590 {dimension_numbers = #tpu.dot_dimension_numbers<[1], [0], [0], [1], [0, 0, 1, 1], [], []>} : vector<4x4xbf16>, vector<4x512xbf16>, vector<4x512xf32> -> vector<4x512xf32>
    %1240 = arith.addf %1207, %1239 : vector<4x512xf32>
    %c479_i32 = arith.constant 479 : i32
    %1241 = tpu.dynamic_rotate %0 by %c479_i32 dim 1 : vector<4x512xf32>, i32 -> vector<4x512xf32>
    %c2_i32_591 = arith.constant 2 : i32
    %1242 = vector.broadcast %c2_i32_591 : i32 to vector<1x512xi32>
    %1243 = arith.addi %2, %1242 : vector<1x512xi32>
    %c0_i32_592 = arith.constant 0 : i32
    %1244 = vector.broadcast %c0_i32_592 : i32 to vector<1x512xi32>
    %1245 = arith.cmpi sge, %1243, %1244 : vector<1x512xi32>
    %c2_i32_593 = arith.constant 2 : i32
    %1246 = vector.broadcast %c2_i32_593 : i32 to vector<1x512xi32>
    %1247 = arith.addi %2, %1246 : vector<1x512xi32>
    %c16_i32_594 = arith.constant 16 : i32
    %1248 = vector.broadcast %c16_i32_594 : i32 to vector<1x512xi32>
    %1249 = arith.cmpi slt, %1247, %1248 : vector<1x512xi32>
    %1250 = arith.andi %1245, %1249 : vector<1x512xi1>
    %c1_i32_595 = arith.constant 1 : i32
    %1251 = vector.broadcast %c1_i32_595 : i32 to vector<1x512xi32>
    %1252 = arith.addi %3, %1251 : vector<1x512xi32>
    %c0_i32_596 = arith.constant 0 : i32
    %1253 = vector.broadcast %c0_i32_596 : i32 to vector<1x512xi32>
    %1254 = arith.cmpi sge, %1252, %1253 : vector<1x512xi32>
    %1255 = arith.andi %1250, %1254 : vector<1x512xi1>
    %c1_i32_597 = arith.constant 1 : i32
    %1256 = vector.broadcast %c1_i32_597 : i32 to vector<1x512xi32>
    %1257 = arith.addi %3, %1256 : vector<1x512xi32>
    %c16_i32_598 = arith.constant 16 : i32
    %1258 = vector.broadcast %c16_i32_598 : i32 to vector<1x512xi32>
    %1259 = arith.cmpi slt, %1257, %1258 : vector<1x512xi32>
    %1260 = arith.andi %1255, %1259 : vector<1x512xi1>
    %cst_599 = arith.constant 0.000000e+00 : f32
    %1261 = vector.shape_cast %1260 : vector<1x512xi1> to vector<1x512xi1>
    %1262 = vector.broadcast %1261 : vector<1x512xi1> to vector<4x512xi1>
    %1263 = vector.broadcast %cst_599 : f32 to vector<4x512xf32>
    %1264 = arith.select %1262, %1241, %1263 : vector<4x512xi1>, vector<4x512xf32>
    %1265 = arith.truncf %1264 : vector<4x512xf32> to vector<4x512xbf16>
    %c39 = arith.constant 39 : index
    %c0_600 = arith.constant 0 : index
    %c0_601 = arith.constant 0 : index
    %1266 = vector.load %arg8[%c39, %c0_600, %c0_601] : memref<49x4x4xbf16, #tpu.memory_space<vmem>>, vector<1x4x4xbf16>
    %1267 = vector.shape_cast %1266 : vector<1x4x4xbf16> to vector<4x4xbf16>
    %cst_602 = arith.constant dense<0.000000e+00> : vector<4x512xf32>
    %1268 = tpu.matmul %1267, %1265, %cst_602 {dimension_numbers = #tpu.dot_dimension_numbers<[1], [0], [0], [1], [0, 0, 1, 1], [], []>} : vector<4x4xbf16>, vector<4x512xbf16>, vector<4x512xf32> -> vector<4x512xf32>
    %1269 = arith.addf %1236, %1268 : vector<4x512xf32>
    %c23_603 = arith.constant 23 : index
    %c0_604 = arith.constant 0 : index
    %c0_605 = arith.constant 0 : index
    %1270 = vector.load %arg10[%c23_603, %c0_604, %c0_605] : memref<25x4x4xbf16, #tpu.memory_space<vmem>>, vector<1x4x4xbf16>
    %1271 = vector.shape_cast %1270 : vector<1x4x4xbf16> to vector<4x4xbf16>
    %cst_606 = arith.constant dense<0.000000e+00> : vector<4x512xf32>
    %1272 = tpu.matmul %1271, %1265, %cst_606 {dimension_numbers = #tpu.dot_dimension_numbers<[1], [0], [0], [1], [0, 0, 1, 1], [], []>} : vector<4x4xbf16>, vector<4x512xbf16>, vector<4x512xf32> -> vector<4x512xf32>
    %1273 = arith.addf %1240, %1272 : vector<4x512xf32>
    %c478_i32 = arith.constant 478 : i32
    %1274 = tpu.dynamic_rotate %0 by %c478_i32 dim 1 : vector<4x512xf32>, i32 -> vector<4x512xf32>
    %c2_i32_607 = arith.constant 2 : i32
    %1275 = vector.broadcast %c2_i32_607 : i32 to vector<1x512xi32>
    %1276 = arith.addi %2, %1275 : vector<1x512xi32>
    %c0_i32_608 = arith.constant 0 : i32
    %1277 = vector.broadcast %c0_i32_608 : i32 to vector<1x512xi32>
    %1278 = arith.cmpi sge, %1276, %1277 : vector<1x512xi32>
    %c2_i32_609 = arith.constant 2 : i32
    %1279 = vector.broadcast %c2_i32_609 : i32 to vector<1x512xi32>
    %1280 = arith.addi %2, %1279 : vector<1x512xi32>
    %c16_i32_610 = arith.constant 16 : i32
    %1281 = vector.broadcast %c16_i32_610 : i32 to vector<1x512xi32>
    %1282 = arith.cmpi slt, %1280, %1281 : vector<1x512xi32>
    %1283 = arith.andi %1278, %1282 : vector<1x512xi1>
    %c2_i32_611 = arith.constant 2 : i32
    %1284 = vector.broadcast %c2_i32_611 : i32 to vector<1x512xi32>
    %1285 = arith.addi %3, %1284 : vector<1x512xi32>
    %c0_i32_612 = arith.constant 0 : i32
    %1286 = vector.broadcast %c0_i32_612 : i32 to vector<1x512xi32>
    %1287 = arith.cmpi sge, %1285, %1286 : vector<1x512xi32>
    %1288 = arith.andi %1283, %1287 : vector<1x512xi1>
    %c2_i32_613 = arith.constant 2 : i32
    %1289 = vector.broadcast %c2_i32_613 : i32 to vector<1x512xi32>
    %1290 = arith.addi %3, %1289 : vector<1x512xi32>
    %c16_i32_614 = arith.constant 16 : i32
    %1291 = vector.broadcast %c16_i32_614 : i32 to vector<1x512xi32>
    %1292 = arith.cmpi slt, %1290, %1291 : vector<1x512xi32>
    %1293 = arith.andi %1288, %1292 : vector<1x512xi1>
    %cst_615 = arith.constant 0.000000e+00 : f32
    %1294 = vector.shape_cast %1293 : vector<1x512xi1> to vector<1x512xi1>
    %1295 = vector.broadcast %1294 : vector<1x512xi1> to vector<4x512xi1>
    %1296 = vector.broadcast %cst_615 : f32 to vector<4x512xf32>
    %1297 = arith.select %1295, %1274, %1296 : vector<4x512xi1>, vector<4x512xf32>
    %1298 = arith.truncf %1297 : vector<4x512xf32> to vector<4x512xbf16>
    %c40 = arith.constant 40 : index
    %c0_616 = arith.constant 0 : index
    %c0_617 = arith.constant 0 : index
    %1299 = vector.load %arg8[%c40, %c0_616, %c0_617] : memref<49x4x4xbf16, #tpu.memory_space<vmem>>, vector<1x4x4xbf16>
    %1300 = vector.shape_cast %1299 : vector<1x4x4xbf16> to vector<4x4xbf16>
    %cst_618 = arith.constant dense<0.000000e+00> : vector<4x512xf32>
    %1301 = tpu.matmul %1300, %1298, %cst_618 {dimension_numbers = #tpu.dot_dimension_numbers<[1], [0], [0], [1], [0, 0, 1, 1], [], []>} : vector<4x4xbf16>, vector<4x512xbf16>, vector<4x512xf32> -> vector<4x512xf32>
    %1302 = arith.addf %1269, %1301 : vector<4x512xf32>
    %c24_619 = arith.constant 24 : index
    %c0_620 = arith.constant 0 : index
    %c0_621 = arith.constant 0 : index
    %1303 = vector.load %arg10[%c24_619, %c0_620, %c0_621] : memref<25x4x4xbf16, #tpu.memory_space<vmem>>, vector<1x4x4xbf16>
    %1304 = vector.shape_cast %1303 : vector<1x4x4xbf16> to vector<4x4xbf16>
    %cst_622 = arith.constant dense<0.000000e+00> : vector<4x512xf32>
    %1305 = tpu.matmul %1304, %1298, %cst_622 {dimension_numbers = #tpu.dot_dimension_numbers<[1], [0], [0], [1], [0, 0, 1, 1], [], []>} : vector<4x4xbf16>, vector<4x512xbf16>, vector<4x512xf32> -> vector<4x512xf32>
    %1306 = arith.addf %1273, %1305 : vector<4x512xf32>
    %c477_i32 = arith.constant 477 : i32
    %1307 = tpu.dynamic_rotate %0 by %c477_i32 dim 1 : vector<4x512xf32>, i32 -> vector<4x512xf32>
    %c2_i32_623 = arith.constant 2 : i32
    %1308 = vector.broadcast %c2_i32_623 : i32 to vector<1x512xi32>
    %1309 = arith.addi %2, %1308 : vector<1x512xi32>
    %c0_i32_624 = arith.constant 0 : i32
    %1310 = vector.broadcast %c0_i32_624 : i32 to vector<1x512xi32>
    %1311 = arith.cmpi sge, %1309, %1310 : vector<1x512xi32>
    %c2_i32_625 = arith.constant 2 : i32
    %1312 = vector.broadcast %c2_i32_625 : i32 to vector<1x512xi32>
    %1313 = arith.addi %2, %1312 : vector<1x512xi32>
    %c16_i32_626 = arith.constant 16 : i32
    %1314 = vector.broadcast %c16_i32_626 : i32 to vector<1x512xi32>
    %1315 = arith.cmpi slt, %1313, %1314 : vector<1x512xi32>
    %1316 = arith.andi %1311, %1315 : vector<1x512xi1>
    %c3_i32_627 = arith.constant 3 : i32
    %1317 = vector.broadcast %c3_i32_627 : i32 to vector<1x512xi32>
    %1318 = arith.addi %3, %1317 : vector<1x512xi32>
    %c0_i32_628 = arith.constant 0 : i32
    %1319 = vector.broadcast %c0_i32_628 : i32 to vector<1x512xi32>
    %1320 = arith.cmpi sge, %1318, %1319 : vector<1x512xi32>
    %1321 = arith.andi %1316, %1320 : vector<1x512xi1>
    %c3_i32_629 = arith.constant 3 : i32
    %1322 = vector.broadcast %c3_i32_629 : i32 to vector<1x512xi32>
    %1323 = arith.addi %3, %1322 : vector<1x512xi32>
    %c16_i32_630 = arith.constant 16 : i32
    %1324 = vector.broadcast %c16_i32_630 : i32 to vector<1x512xi32>
    %1325 = arith.cmpi slt, %1323, %1324 : vector<1x512xi32>
    %1326 = arith.andi %1321, %1325 : vector<1x512xi1>
    %cst_631 = arith.constant 0.000000e+00 : f32
    %1327 = vector.shape_cast %1326 : vector<1x512xi1> to vector<1x512xi1>
    %1328 = vector.broadcast %1327 : vector<1x512xi1> to vector<4x512xi1>
    %1329 = vector.broadcast %cst_631 : f32 to vector<4x512xf32>
    %1330 = arith.select %1328, %1307, %1329 : vector<4x512xi1>, vector<4x512xf32>
    %1331 = arith.truncf %1330 : vector<4x512xf32> to vector<4x512xbf16>
    %c41 = arith.constant 41 : index
    %c0_632 = arith.constant 0 : index
    %c0_633 = arith.constant 0 : index
    %1332 = vector.load %arg8[%c41, %c0_632, %c0_633] : memref<49x4x4xbf16, #tpu.memory_space<vmem>>, vector<1x4x4xbf16>
    %1333 = vector.shape_cast %1332 : vector<1x4x4xbf16> to vector<4x4xbf16>
    %cst_634 = arith.constant dense<0.000000e+00> : vector<4x512xf32>
    %1334 = tpu.matmul %1333, %1331, %cst_634 {dimension_numbers = #tpu.dot_dimension_numbers<[1], [0], [0], [1], [0, 0, 1, 1], [], []>} : vector<4x4xbf16>, vector<4x512xbf16>, vector<4x512xf32> -> vector<4x512xf32>
    %1335 = arith.addf %1302, %1334 : vector<4x512xf32>
    %c467_i32 = arith.constant 467 : i32
    %1336 = tpu.dynamic_rotate %0 by %c467_i32 dim 1 : vector<4x512xf32>, i32 -> vector<4x512xf32>
    %c3_i32_635 = arith.constant 3 : i32
    %1337 = vector.broadcast %c3_i32_635 : i32 to vector<1x512xi32>
    %1338 = arith.addi %2, %1337 : vector<1x512xi32>
    %c0_i32_636 = arith.constant 0 : i32
    %1339 = vector.broadcast %c0_i32_636 : i32 to vector<1x512xi32>
    %1340 = arith.cmpi sge, %1338, %1339 : vector<1x512xi32>
    %c3_i32_637 = arith.constant 3 : i32
    %1341 = vector.broadcast %c3_i32_637 : i32 to vector<1x512xi32>
    %1342 = arith.addi %2, %1341 : vector<1x512xi32>
    %c16_i32_638 = arith.constant 16 : i32
    %1343 = vector.broadcast %c16_i32_638 : i32 to vector<1x512xi32>
    %1344 = arith.cmpi slt, %1342, %1343 : vector<1x512xi32>
    %1345 = arith.andi %1340, %1344 : vector<1x512xi1>
    %c-3_i32_639 = arith.constant -3 : i32
    %1346 = vector.broadcast %c-3_i32_639 : i32 to vector<1x512xi32>
    %1347 = arith.addi %3, %1346 : vector<1x512xi32>
    %c0_i32_640 = arith.constant 0 : i32
    %1348 = vector.broadcast %c0_i32_640 : i32 to vector<1x512xi32>
    %1349 = arith.cmpi sge, %1347, %1348 : vector<1x512xi32>
    %1350 = arith.andi %1345, %1349 : vector<1x512xi1>
    %c-3_i32_641 = arith.constant -3 : i32
    %1351 = vector.broadcast %c-3_i32_641 : i32 to vector<1x512xi32>
    %1352 = arith.addi %3, %1351 : vector<1x512xi32>
    %c16_i32_642 = arith.constant 16 : i32
    %1353 = vector.broadcast %c16_i32_642 : i32 to vector<1x512xi32>
    %1354 = arith.cmpi slt, %1352, %1353 : vector<1x512xi32>
    %1355 = arith.andi %1350, %1354 : vector<1x512xi1>
    %cst_643 = arith.constant 0.000000e+00 : f32
    %1356 = vector.shape_cast %1355 : vector<1x512xi1> to vector<1x512xi1>
    %1357 = vector.broadcast %1356 : vector<1x512xi1> to vector<4x512xi1>
    %1358 = vector.broadcast %cst_643 : f32 to vector<4x512xf32>
    %1359 = arith.select %1357, %1336, %1358 : vector<4x512xi1>, vector<4x512xf32>
    %1360 = arith.truncf %1359 : vector<4x512xf32> to vector<4x512xbf16>
    %c42 = arith.constant 42 : index
    %c0_644 = arith.constant 0 : index
    %c0_645 = arith.constant 0 : index
    %1361 = vector.load %arg8[%c42, %c0_644, %c0_645] : memref<49x4x4xbf16, #tpu.memory_space<vmem>>, vector<1x4x4xbf16>
    %1362 = vector.shape_cast %1361 : vector<1x4x4xbf16> to vector<4x4xbf16>
    %cst_646 = arith.constant dense<0.000000e+00> : vector<4x512xf32>
    %1363 = tpu.matmul %1362, %1360, %cst_646 {dimension_numbers = #tpu.dot_dimension_numbers<[1], [0], [0], [1], [0, 0, 1, 1], [], []>} : vector<4x4xbf16>, vector<4x512xbf16>, vector<4x512xf32> -> vector<4x512xf32>
    %1364 = arith.addf %1335, %1363 : vector<4x512xf32>
    %c466_i32 = arith.constant 466 : i32
    %1365 = tpu.dynamic_rotate %0 by %c466_i32 dim 1 : vector<4x512xf32>, i32 -> vector<4x512xf32>
    %c3_i32_647 = arith.constant 3 : i32
    %1366 = vector.broadcast %c3_i32_647 : i32 to vector<1x512xi32>
    %1367 = arith.addi %2, %1366 : vector<1x512xi32>
    %c0_i32_648 = arith.constant 0 : i32
    %1368 = vector.broadcast %c0_i32_648 : i32 to vector<1x512xi32>
    %1369 = arith.cmpi sge, %1367, %1368 : vector<1x512xi32>
    %c3_i32_649 = arith.constant 3 : i32
    %1370 = vector.broadcast %c3_i32_649 : i32 to vector<1x512xi32>
    %1371 = arith.addi %2, %1370 : vector<1x512xi32>
    %c16_i32_650 = arith.constant 16 : i32
    %1372 = vector.broadcast %c16_i32_650 : i32 to vector<1x512xi32>
    %1373 = arith.cmpi slt, %1371, %1372 : vector<1x512xi32>
    %1374 = arith.andi %1369, %1373 : vector<1x512xi1>
    %c-2_i32_651 = arith.constant -2 : i32
    %1375 = vector.broadcast %c-2_i32_651 : i32 to vector<1x512xi32>
    %1376 = arith.addi %3, %1375 : vector<1x512xi32>
    %c0_i32_652 = arith.constant 0 : i32
    %1377 = vector.broadcast %c0_i32_652 : i32 to vector<1x512xi32>
    %1378 = arith.cmpi sge, %1376, %1377 : vector<1x512xi32>
    %1379 = arith.andi %1374, %1378 : vector<1x512xi1>
    %c-2_i32_653 = arith.constant -2 : i32
    %1380 = vector.broadcast %c-2_i32_653 : i32 to vector<1x512xi32>
    %1381 = arith.addi %3, %1380 : vector<1x512xi32>
    %c16_i32_654 = arith.constant 16 : i32
    %1382 = vector.broadcast %c16_i32_654 : i32 to vector<1x512xi32>
    %1383 = arith.cmpi slt, %1381, %1382 : vector<1x512xi32>
    %1384 = arith.andi %1379, %1383 : vector<1x512xi1>
    %cst_655 = arith.constant 0.000000e+00 : f32
    %1385 = vector.shape_cast %1384 : vector<1x512xi1> to vector<1x512xi1>
    %1386 = vector.broadcast %1385 : vector<1x512xi1> to vector<4x512xi1>
    %1387 = vector.broadcast %cst_655 : f32 to vector<4x512xf32>
    %1388 = arith.select %1386, %1365, %1387 : vector<4x512xi1>, vector<4x512xf32>
    %1389 = arith.truncf %1388 : vector<4x512xf32> to vector<4x512xbf16>
    %c43 = arith.constant 43 : index
    %c0_656 = arith.constant 0 : index
    %c0_657 = arith.constant 0 : index
    %1390 = vector.load %arg8[%c43, %c0_656, %c0_657] : memref<49x4x4xbf16, #tpu.memory_space<vmem>>, vector<1x4x4xbf16>
    %1391 = vector.shape_cast %1390 : vector<1x4x4xbf16> to vector<4x4xbf16>
    %cst_658 = arith.constant dense<0.000000e+00> : vector<4x512xf32>
    %1392 = tpu.matmul %1391, %1389, %cst_658 {dimension_numbers = #tpu.dot_dimension_numbers<[1], [0], [0], [1], [0, 0, 1, 1], [], []>} : vector<4x4xbf16>, vector<4x512xbf16>, vector<4x512xf32> -> vector<4x512xf32>
    %1393 = arith.addf %1364, %1392 : vector<4x512xf32>
    %c465_i32 = arith.constant 465 : i32
    %1394 = tpu.dynamic_rotate %0 by %c465_i32 dim 1 : vector<4x512xf32>, i32 -> vector<4x512xf32>
    %c3_i32_659 = arith.constant 3 : i32
    %1395 = vector.broadcast %c3_i32_659 : i32 to vector<1x512xi32>
    %1396 = arith.addi %2, %1395 : vector<1x512xi32>
    %c0_i32_660 = arith.constant 0 : i32
    %1397 = vector.broadcast %c0_i32_660 : i32 to vector<1x512xi32>
    %1398 = arith.cmpi sge, %1396, %1397 : vector<1x512xi32>
    %c3_i32_661 = arith.constant 3 : i32
    %1399 = vector.broadcast %c3_i32_661 : i32 to vector<1x512xi32>
    %1400 = arith.addi %2, %1399 : vector<1x512xi32>
    %c16_i32_662 = arith.constant 16 : i32
    %1401 = vector.broadcast %c16_i32_662 : i32 to vector<1x512xi32>
    %1402 = arith.cmpi slt, %1400, %1401 : vector<1x512xi32>
    %1403 = arith.andi %1398, %1402 : vector<1x512xi1>
    %c-1_i32_663 = arith.constant -1 : i32
    %1404 = vector.broadcast %c-1_i32_663 : i32 to vector<1x512xi32>
    %1405 = arith.addi %3, %1404 : vector<1x512xi32>
    %c0_i32_664 = arith.constant 0 : i32
    %1406 = vector.broadcast %c0_i32_664 : i32 to vector<1x512xi32>
    %1407 = arith.cmpi sge, %1405, %1406 : vector<1x512xi32>
    %1408 = arith.andi %1403, %1407 : vector<1x512xi1>
    %c-1_i32_665 = arith.constant -1 : i32
    %1409 = vector.broadcast %c-1_i32_665 : i32 to vector<1x512xi32>
    %1410 = arith.addi %3, %1409 : vector<1x512xi32>
    %c16_i32_666 = arith.constant 16 : i32
    %1411 = vector.broadcast %c16_i32_666 : i32 to vector<1x512xi32>
    %1412 = arith.cmpi slt, %1410, %1411 : vector<1x512xi32>
    %1413 = arith.andi %1408, %1412 : vector<1x512xi1>
    %cst_667 = arith.constant 0.000000e+00 : f32
    %1414 = vector.shape_cast %1413 : vector<1x512xi1> to vector<1x512xi1>
    %1415 = vector.broadcast %1414 : vector<1x512xi1> to vector<4x512xi1>
    %1416 = vector.broadcast %cst_667 : f32 to vector<4x512xf32>
    %1417 = arith.select %1415, %1394, %1416 : vector<4x512xi1>, vector<4x512xf32>
    %1418 = arith.truncf %1417 : vector<4x512xf32> to vector<4x512xbf16>
    %c44 = arith.constant 44 : index
    %c0_668 = arith.constant 0 : index
    %c0_669 = arith.constant 0 : index
    %1419 = vector.load %arg8[%c44, %c0_668, %c0_669] : memref<49x4x4xbf16, #tpu.memory_space<vmem>>, vector<1x4x4xbf16>
    %1420 = vector.shape_cast %1419 : vector<1x4x4xbf16> to vector<4x4xbf16>
    %cst_670 = arith.constant dense<0.000000e+00> : vector<4x512xf32>
    %1421 = tpu.matmul %1420, %1418, %cst_670 {dimension_numbers = #tpu.dot_dimension_numbers<[1], [0], [0], [1], [0, 0, 1, 1], [], []>} : vector<4x4xbf16>, vector<4x512xbf16>, vector<4x512xf32> -> vector<4x512xf32>
    %1422 = arith.addf %1393, %1421 : vector<4x512xf32>
    %c464_i32 = arith.constant 464 : i32
    %1423 = tpu.dynamic_rotate %0 by %c464_i32 dim 1 : vector<4x512xf32>, i32 -> vector<4x512xf32>
    %c3_i32_671 = arith.constant 3 : i32
    %1424 = vector.broadcast %c3_i32_671 : i32 to vector<1x512xi32>
    %1425 = arith.addi %2, %1424 : vector<1x512xi32>
    %c0_i32_672 = arith.constant 0 : i32
    %1426 = vector.broadcast %c0_i32_672 : i32 to vector<1x512xi32>
    %1427 = arith.cmpi sge, %1425, %1426 : vector<1x512xi32>
    %c3_i32_673 = arith.constant 3 : i32
    %1428 = vector.broadcast %c3_i32_673 : i32 to vector<1x512xi32>
    %1429 = arith.addi %2, %1428 : vector<1x512xi32>
    %c16_i32_674 = arith.constant 16 : i32
    %1430 = vector.broadcast %c16_i32_674 : i32 to vector<1x512xi32>
    %1431 = arith.cmpi slt, %1429, %1430 : vector<1x512xi32>
    %1432 = arith.andi %1427, %1431 : vector<1x512xi1>
    %c0_i32_675 = arith.constant 0 : i32
    %1433 = vector.broadcast %c0_i32_675 : i32 to vector<1x512xi32>
    %1434 = arith.addi %3, %1433 : vector<1x512xi32>
    %c0_i32_676 = arith.constant 0 : i32
    %1435 = vector.broadcast %c0_i32_676 : i32 to vector<1x512xi32>
    %1436 = arith.cmpi sge, %1434, %1435 : vector<1x512xi32>
    %1437 = arith.andi %1432, %1436 : vector<1x512xi1>
    %c0_i32_677 = arith.constant 0 : i32
    %1438 = vector.broadcast %c0_i32_677 : i32 to vector<1x512xi32>
    %1439 = arith.addi %3, %1438 : vector<1x512xi32>
    %c16_i32_678 = arith.constant 16 : i32
    %1440 = vector.broadcast %c16_i32_678 : i32 to vector<1x512xi32>
    %1441 = arith.cmpi slt, %1439, %1440 : vector<1x512xi32>
    %1442 = arith.andi %1437, %1441 : vector<1x512xi1>
    %cst_679 = arith.constant 0.000000e+00 : f32
    %1443 = vector.shape_cast %1442 : vector<1x512xi1> to vector<1x512xi1>
    %1444 = vector.broadcast %1443 : vector<1x512xi1> to vector<4x512xi1>
    %1445 = vector.broadcast %cst_679 : f32 to vector<4x512xf32>
    %1446 = arith.select %1444, %1423, %1445 : vector<4x512xi1>, vector<4x512xf32>
    %1447 = arith.truncf %1446 : vector<4x512xf32> to vector<4x512xbf16>
    %c45 = arith.constant 45 : index
    %c0_680 = arith.constant 0 : index
    %c0_681 = arith.constant 0 : index
    %1448 = vector.load %arg8[%c45, %c0_680, %c0_681] : memref<49x4x4xbf16, #tpu.memory_space<vmem>>, vector<1x4x4xbf16>
    %1449 = vector.shape_cast %1448 : vector<1x4x4xbf16> to vector<4x4xbf16>
    %cst_682 = arith.constant dense<0.000000e+00> : vector<4x512xf32>
    %1450 = tpu.matmul %1449, %1447, %cst_682 {dimension_numbers = #tpu.dot_dimension_numbers<[1], [0], [0], [1], [0, 0, 1, 1], [], []>} : vector<4x4xbf16>, vector<4x512xbf16>, vector<4x512xf32> -> vector<4x512xf32>
    %1451 = arith.addf %1422, %1450 : vector<4x512xf32>
    %c463_i32 = arith.constant 463 : i32
    %1452 = tpu.dynamic_rotate %0 by %c463_i32 dim 1 : vector<4x512xf32>, i32 -> vector<4x512xf32>
    %c3_i32_683 = arith.constant 3 : i32
    %1453 = vector.broadcast %c3_i32_683 : i32 to vector<1x512xi32>
    %1454 = arith.addi %2, %1453 : vector<1x512xi32>
    %c0_i32_684 = arith.constant 0 : i32
    %1455 = vector.broadcast %c0_i32_684 : i32 to vector<1x512xi32>
    %1456 = arith.cmpi sge, %1454, %1455 : vector<1x512xi32>
    %c3_i32_685 = arith.constant 3 : i32
    %1457 = vector.broadcast %c3_i32_685 : i32 to vector<1x512xi32>
    %1458 = arith.addi %2, %1457 : vector<1x512xi32>
    %c16_i32_686 = arith.constant 16 : i32
    %1459 = vector.broadcast %c16_i32_686 : i32 to vector<1x512xi32>
    %1460 = arith.cmpi slt, %1458, %1459 : vector<1x512xi32>
    %1461 = arith.andi %1456, %1460 : vector<1x512xi1>
    %c1_i32_687 = arith.constant 1 : i32
    %1462 = vector.broadcast %c1_i32_687 : i32 to vector<1x512xi32>
    %1463 = arith.addi %3, %1462 : vector<1x512xi32>
    %c0_i32_688 = arith.constant 0 : i32
    %1464 = vector.broadcast %c0_i32_688 : i32 to vector<1x512xi32>
    %1465 = arith.cmpi sge, %1463, %1464 : vector<1x512xi32>
    %1466 = arith.andi %1461, %1465 : vector<1x512xi1>
    %c1_i32_689 = arith.constant 1 : i32
    %1467 = vector.broadcast %c1_i32_689 : i32 to vector<1x512xi32>
    %1468 = arith.addi %3, %1467 : vector<1x512xi32>
    %c16_i32_690 = arith.constant 16 : i32
    %1469 = vector.broadcast %c16_i32_690 : i32 to vector<1x512xi32>
    %1470 = arith.cmpi slt, %1468, %1469 : vector<1x512xi32>
    %1471 = arith.andi %1466, %1470 : vector<1x512xi1>
    %cst_691 = arith.constant 0.000000e+00 : f32
    %1472 = vector.shape_cast %1471 : vector<1x512xi1> to vector<1x512xi1>
    %1473 = vector.broadcast %1472 : vector<1x512xi1> to vector<4x512xi1>
    %1474 = vector.broadcast %cst_691 : f32 to vector<4x512xf32>
    %1475 = arith.select %1473, %1452, %1474 : vector<4x512xi1>, vector<4x512xf32>
    %1476 = arith.truncf %1475 : vector<4x512xf32> to vector<4x512xbf16>
    %c46 = arith.constant 46 : index
    %c0_692 = arith.constant 0 : index
    %c0_693 = arith.constant 0 : index
    %1477 = vector.load %arg8[%c46, %c0_692, %c0_693] : memref<49x4x4xbf16, #tpu.memory_space<vmem>>, vector<1x4x4xbf16>
    %1478 = vector.shape_cast %1477 : vector<1x4x4xbf16> to vector<4x4xbf16>
    %cst_694 = arith.constant dense<0.000000e+00> : vector<4x512xf32>
    %1479 = tpu.matmul %1478, %1476, %cst_694 {dimension_numbers = #tpu.dot_dimension_numbers<[1], [0], [0], [1], [0, 0, 1, 1], [], []>} : vector<4x4xbf16>, vector<4x512xbf16>, vector<4x512xf32> -> vector<4x512xf32>
    %1480 = arith.addf %1451, %1479 : vector<4x512xf32>
    %c462_i32 = arith.constant 462 : i32
    %1481 = tpu.dynamic_rotate %0 by %c462_i32 dim 1 : vector<4x512xf32>, i32 -> vector<4x512xf32>
    %c3_i32_695 = arith.constant 3 : i32
    %1482 = vector.broadcast %c3_i32_695 : i32 to vector<1x512xi32>
    %1483 = arith.addi %2, %1482 : vector<1x512xi32>
    %c0_i32_696 = arith.constant 0 : i32
    %1484 = vector.broadcast %c0_i32_696 : i32 to vector<1x512xi32>
    %1485 = arith.cmpi sge, %1483, %1484 : vector<1x512xi32>
    %c3_i32_697 = arith.constant 3 : i32
    %1486 = vector.broadcast %c3_i32_697 : i32 to vector<1x512xi32>
    %1487 = arith.addi %2, %1486 : vector<1x512xi32>
    %c16_i32_698 = arith.constant 16 : i32
    %1488 = vector.broadcast %c16_i32_698 : i32 to vector<1x512xi32>
    %1489 = arith.cmpi slt, %1487, %1488 : vector<1x512xi32>
    %1490 = arith.andi %1485, %1489 : vector<1x512xi1>
    %c2_i32_699 = arith.constant 2 : i32
    %1491 = vector.broadcast %c2_i32_699 : i32 to vector<1x512xi32>
    %1492 = arith.addi %3, %1491 : vector<1x512xi32>
    %c0_i32_700 = arith.constant 0 : i32
    %1493 = vector.broadcast %c0_i32_700 : i32 to vector<1x512xi32>
    %1494 = arith.cmpi sge, %1492, %1493 : vector<1x512xi32>
    %1495 = arith.andi %1490, %1494 : vector<1x512xi1>
    %c2_i32_701 = arith.constant 2 : i32
    %1496 = vector.broadcast %c2_i32_701 : i32 to vector<1x512xi32>
    %1497 = arith.addi %3, %1496 : vector<1x512xi32>
    %c16_i32_702 = arith.constant 16 : i32
    %1498 = vector.broadcast %c16_i32_702 : i32 to vector<1x512xi32>
    %1499 = arith.cmpi slt, %1497, %1498 : vector<1x512xi32>
    %1500 = arith.andi %1495, %1499 : vector<1x512xi1>
    %cst_703 = arith.constant 0.000000e+00 : f32
    %1501 = vector.shape_cast %1500 : vector<1x512xi1> to vector<1x512xi1>
    %1502 = vector.broadcast %1501 : vector<1x512xi1> to vector<4x512xi1>
    %1503 = vector.broadcast %cst_703 : f32 to vector<4x512xf32>
    %1504 = arith.select %1502, %1481, %1503 : vector<4x512xi1>, vector<4x512xf32>
    %1505 = arith.truncf %1504 : vector<4x512xf32> to vector<4x512xbf16>
    %c47 = arith.constant 47 : index
    %c0_704 = arith.constant 0 : index
    %c0_705 = arith.constant 0 : index
    %1506 = vector.load %arg8[%c47, %c0_704, %c0_705] : memref<49x4x4xbf16, #tpu.memory_space<vmem>>, vector<1x4x4xbf16>
    %1507 = vector.shape_cast %1506 : vector<1x4x4xbf16> to vector<4x4xbf16>
    %cst_706 = arith.constant dense<0.000000e+00> : vector<4x512xf32>
    %1508 = tpu.matmul %1507, %1505, %cst_706 {dimension_numbers = #tpu.dot_dimension_numbers<[1], [0], [0], [1], [0, 0, 1, 1], [], []>} : vector<4x4xbf16>, vector<4x512xbf16>, vector<4x512xf32> -> vector<4x512xf32>
    %1509 = arith.addf %1480, %1508 : vector<4x512xf32>
    %c461_i32 = arith.constant 461 : i32
    %1510 = tpu.dynamic_rotate %0 by %c461_i32 dim 1 : vector<4x512xf32>, i32 -> vector<4x512xf32>
    %c3_i32_707 = arith.constant 3 : i32
    %1511 = vector.broadcast %c3_i32_707 : i32 to vector<1x512xi32>
    %1512 = arith.addi %2, %1511 : vector<1x512xi32>
    %c0_i32_708 = arith.constant 0 : i32
    %1513 = vector.broadcast %c0_i32_708 : i32 to vector<1x512xi32>
    %1514 = arith.cmpi sge, %1512, %1513 : vector<1x512xi32>
    %c3_i32_709 = arith.constant 3 : i32
    %1515 = vector.broadcast %c3_i32_709 : i32 to vector<1x512xi32>
    %1516 = arith.addi %2, %1515 : vector<1x512xi32>
    %c16_i32_710 = arith.constant 16 : i32
    %1517 = vector.broadcast %c16_i32_710 : i32 to vector<1x512xi32>
    %1518 = arith.cmpi slt, %1516, %1517 : vector<1x512xi32>
    %1519 = arith.andi %1514, %1518 : vector<1x512xi1>
    %c3_i32_711 = arith.constant 3 : i32
    %1520 = vector.broadcast %c3_i32_711 : i32 to vector<1x512xi32>
    %1521 = arith.addi %3, %1520 : vector<1x512xi32>
    %c0_i32_712 = arith.constant 0 : i32
    %1522 = vector.broadcast %c0_i32_712 : i32 to vector<1x512xi32>
    %1523 = arith.cmpi sge, %1521, %1522 : vector<1x512xi32>
    %1524 = arith.andi %1519, %1523 : vector<1x512xi1>
    %c3_i32_713 = arith.constant 3 : i32
    %1525 = vector.broadcast %c3_i32_713 : i32 to vector<1x512xi32>
    %1526 = arith.addi %3, %1525 : vector<1x512xi32>
    %c16_i32_714 = arith.constant 16 : i32
    %1527 = vector.broadcast %c16_i32_714 : i32 to vector<1x512xi32>
    %1528 = arith.cmpi slt, %1526, %1527 : vector<1x512xi32>
    %1529 = arith.andi %1524, %1528 : vector<1x512xi1>
    %cst_715 = arith.constant 0.000000e+00 : f32
    %1530 = vector.shape_cast %1529 : vector<1x512xi1> to vector<1x512xi1>
    %1531 = vector.broadcast %1530 : vector<1x512xi1> to vector<4x512xi1>
    %1532 = vector.broadcast %cst_715 : f32 to vector<4x512xf32>
    %1533 = arith.select %1531, %1510, %1532 : vector<4x512xi1>, vector<4x512xf32>
    %1534 = arith.truncf %1533 : vector<4x512xf32> to vector<4x512xbf16>
    %c48 = arith.constant 48 : index
    %c0_716 = arith.constant 0 : index
    %c0_717 = arith.constant 0 : index
    %1535 = vector.load %arg8[%c48, %c0_716, %c0_717] : memref<49x4x4xbf16, #tpu.memory_space<vmem>>, vector<1x4x4xbf16>
    %1536 = vector.shape_cast %1535 : vector<1x4x4xbf16> to vector<4x4xbf16>
    %cst_718 = arith.constant dense<0.000000e+00> : vector<4x512xf32>
    %1537 = tpu.matmul %1536, %1534, %cst_718 {dimension_numbers = #tpu.dot_dimension_numbers<[1], [0], [0], [1], [0, 0, 1, 1], [], []>} : vector<4x4xbf16>, vector<4x512xbf16>, vector<4x512xf32> -> vector<4x512xf32>
    %1538 = arith.addf %1509, %1537 : vector<4x512xf32>
    %c0_719 = arith.constant 0 : index
    %c0_720 = arith.constant 0 : index
    %1539 = vector.load %arg9[%c0_719, %c0_720] : memref<4x1xf32, #tpu.memory_space<vmem>>, vector<4x1xf32>
    %1540 = vector.broadcast %1539 : vector<4x1xf32> to vector<4x512xf32>
    %1541 = arith.addf %1538, %1540 : vector<4x512xf32>
    %cst_721 = arith.constant 0.000000e+00 : f32
    %1542 = vector.broadcast %cst_721 : f32 to vector<4x512xf32>
    %1543 = arith.maximumf %1541, %1542 : vector<4x512xf32>
    %1544 = arith.truncf %1543 : vector<4x512xf32> to vector<4x512xbf16>
    %c0_722 = arith.constant 0 : index
    %c0_723 = arith.constant 0 : index
    %1545 = vector.load %arg11[%c0_722, %c0_723] : memref<4x1xf32, #tpu.memory_space<vmem>>, vector<4x1xf32>
    %1546 = vector.broadcast %1545 : vector<4x1xf32> to vector<4x512xf32>
    %1547 = arith.addf %1306, %1546 : vector<4x512xf32>
    %cst_724 = arith.constant 0.000000e+00 : f32
    %1548 = vector.broadcast %cst_724 : f32 to vector<4x512xf32>
    %1549 = arith.maximumf %1547, %1548 : vector<4x512xf32>
    %1550 = arith.truncf %1549 : vector<4x512xf32> to vector<4x512xbf16>
    %c0_725 = arith.constant 0 : index
    %c0_726 = arith.constant 0 : index
    %1551 = vector.load %arg13[%c0_725, %c0_726] : memref<4x1xf32, #tpu.memory_space<vmem>>, vector<4x1xf32>
    %1552 = vector.broadcast %1551 : vector<4x1xf32> to vector<4x512xf32>
    %1553 = arith.addf %1050, %1552 : vector<4x512xf32>
    %cst_727 = arith.constant 0.000000e+00 : f32
    %1554 = vector.broadcast %cst_727 : f32 to vector<4x512xf32>
    %1555 = arith.maximumf %1553, %1554 : vector<4x512xf32>
    %1556 = arith.truncf %1555 : vector<4x512xf32> to vector<4x512xbf16>
    %c1_728 = arith.constant 1 : index
    %c0_729 = arith.constant 0 : index
    %c0_730 = arith.constant 0 : index
    %1557 = vector.load %arg14[%c1_728, %c0_729, %c0_730] : memref<4x4x4xbf16, #tpu.memory_space<vmem>>, vector<1x4x4xbf16>
    %1558 = vector.shape_cast %1557 : vector<1x4x4xbf16> to vector<4x4xbf16>
    %cst_731 = arith.constant dense<0.000000e+00> : vector<4x512xf32>
    %1559 = tpu.matmul %1558, %1544, %cst_731 {dimension_numbers = #tpu.dot_dimension_numbers<[1], [0], [0], [1], [0, 0, 1, 1], [], []>} : vector<4x4xbf16>, vector<4x512xbf16>, vector<4x512xf32> -> vector<4x512xf32>
    %c2_732 = arith.constant 2 : index
    %c0_733 = arith.constant 0 : index
    %c0_734 = arith.constant 0 : index
    %1560 = vector.load %arg14[%c2_732, %c0_733, %c0_734] : memref<4x4x4xbf16, #tpu.memory_space<vmem>>, vector<1x4x4xbf16>
    %1561 = vector.shape_cast %1560 : vector<1x4x4xbf16> to vector<4x4xbf16>
    %cst_735 = arith.constant dense<0.000000e+00> : vector<4x512xf32>
    %1562 = tpu.matmul %1561, %1550, %cst_735 {dimension_numbers = #tpu.dot_dimension_numbers<[1], [0], [0], [1], [0, 0, 1, 1], [], []>} : vector<4x4xbf16>, vector<4x512xbf16>, vector<4x512xf32> -> vector<4x512xf32>
    %1563 = arith.addf %1559, %1562 : vector<4x512xf32>
    %c3_736 = arith.constant 3 : index
    %c0_737 = arith.constant 0 : index
    %c0_738 = arith.constant 0 : index
    %1564 = vector.load %arg14[%c3_736, %c0_737, %c0_738] : memref<4x4x4xbf16, #tpu.memory_space<vmem>>, vector<1x4x4xbf16>
    %1565 = vector.shape_cast %1564 : vector<1x4x4xbf16> to vector<4x4xbf16>
    %cst_739 = arith.constant dense<0.000000e+00> : vector<4x512xf32>
    %1566 = tpu.matmul %1565, %1556, %cst_739 {dimension_numbers = #tpu.dot_dimension_numbers<[1], [0], [0], [1], [0, 0, 1, 1], [], []>} : vector<4x4xbf16>, vector<4x512xbf16>, vector<4x512xf32> -> vector<4x512xf32>
    %1567 = arith.addf %1563, %1566 : vector<4x512xf32>
    %c0_740 = arith.constant 0 : index
    %c0_741 = arith.constant 0 : index
    %1568 = vector.load %arg4[%c0_740, %c0_741] : memref<512x2xbf16, #tpu.memory_space<vmem>>, vector<512x2xbf16>
    %cst_742 = arith.constant dense<0.000000e+00> : vector<4x2xf32>
    %1569 = tpu.matmul %1, %1568, %cst_742 {dimension_numbers = #tpu.dot_dimension_numbers<[1], [0], [0], [1], [0, 0, 1, 1], [], []>} : vector<4x512xbf16>, vector<512x2xbf16>, vector<4x2xf32> -> vector<4x2xf32>
    %c0_743 = arith.constant 0 : index
    %c0_744 = arith.constant 0 : index
    %1570 = vector.load %arg6[%c0_743, %c0_744] : memref<4x4xbf16, #tpu.memory_space<vmem>>, vector<4x4xbf16>
    %1571 = arith.truncf %1569 : vector<4x2xf32> to vector<4x2xbf16>
    %cst_745 = arith.constant dense<0.000000e+00> : vector<4x2xf32>
    %1572 = tpu.matmul %1570, %1571, %cst_745 {dimension_numbers = #tpu.dot_dimension_numbers<[1], [0], [0], [1], [0, 0, 1, 1], [], []>} : vector<4x4xbf16>, vector<4x2xbf16>, vector<4x2xf32> -> vector<4x2xf32>
    %c0_746 = arith.constant 0 : index
    %c0_747 = arith.constant 0 : index
    %1573 = vector.load %arg7[%c0_746, %c0_747] : memref<4x1xf32, #tpu.memory_space<vmem>>, vector<4x1xf32>
    %1574 = vector.broadcast %1573 : vector<4x1xf32> to vector<4x2xf32>
    %1575 = arith.addf %1572, %1574 : vector<4x2xf32>
    %cst_748 = arith.constant 0.000000e+00 : f32
    %1576 = vector.broadcast %cst_748 : f32 to vector<4x2xf32>
    %1577 = arith.maximumf %1575, %1576 : vector<4x2xf32>
    %c0_749 = arith.constant 0 : index
    %c0_750 = arith.constant 0 : index
    %c0_751 = arith.constant 0 : index
    %1578 = vector.load %arg14[%c0_749, %c0_750, %c0_751] : memref<4x4x4xbf16, #tpu.memory_space<vmem>>, vector<1x4x4xbf16>
    %1579 = vector.shape_cast %1578 : vector<1x4x4xbf16> to vector<4x4xbf16>
    %1580 = arith.truncf %1577 : vector<4x2xf32> to vector<4x2xbf16>
    %cst_752 = arith.constant dense<0.000000e+00> : vector<4x2xf32>
    %1581 = tpu.matmul %1579, %1580, %cst_752 {dimension_numbers = #tpu.dot_dimension_numbers<[1], [0], [0], [1], [0, 0, 1, 1], [], []>} : vector<4x4xbf16>, vector<4x2xbf16>, vector<4x2xf32> -> vector<4x2xf32>
    %1582 = arith.truncf %1581 : vector<4x2xf32> to vector<4x2xbf16>
    %c0_753 = arith.constant 0 : index
    %c0_754 = arith.constant 0 : index
    %1583 = vector.load %arg5[%c0_753, %c0_754] : memref<2x512xbf16, #tpu.memory_space<vmem>>, vector<2x512xbf16>
    %cst_755 = arith.constant dense<0.000000e+00> : vector<4x512xf32>
    %1584 = tpu.matmul %1582, %1583, %cst_755 {dimension_numbers = #tpu.dot_dimension_numbers<[1], [0], [0], [1], [0, 0, 1, 1], [], []>} : vector<4x2xbf16>, vector<2x512xbf16>, vector<4x512xf32> -> vector<4x512xf32>
    %1585 = arith.addf %1567, %1584 : vector<4x512xf32>
    %c0_756 = arith.constant 0 : index
    %c0_757 = arith.constant 0 : index
    %1586 = vector.load %arg15[%c0_756, %c0_757] : memref<4x1xf32, #tpu.memory_space<vmem>>, vector<4x1xf32>
    %1587 = vector.broadcast %1586 : vector<4x1xf32> to vector<4x512xf32>
    %1588 = arith.addf %1585, %1587 : vector<4x512xf32>
    %cst_758 = arith.constant 0.000000e+00 : f32
    %1589 = vector.broadcast %cst_758 : f32 to vector<4x512xf32>
    %1590 = arith.maximumf %1588, %1589 : vector<4x512xf32>
    %c0_759 = arith.constant 0 : index
    %c0_760 = arith.constant 0 : index
    %1591 = vector.load %arg16[%c0_759, %c0_760] : memref<4x512xf32, #tpu.memory_space<vmem>>, vector<4x512xf32>
    tpu.vector_store %arg16[%c0_759, %c0_760], %1590 {strides = array<i32>} : memref<4x512xf32, #tpu.memory_space<vmem>>, vector<4x512xf32>,
    return
  }
  func.func @transform_0(%arg0: i32) -> (i32, i32) {
    %c0_i32 = arith.constant 0 : i32
    %c0_i32_0 = arith.constant 0 : i32
    return %c0_i32, %arg0 : i32, i32
  }
  func.func @transform_1(%arg0: i32) -> (i32, i32) {
    %c0_i32 = arith.constant 0 : i32
    %c0_i32_0 = arith.constant 0 : i32
    %c0_i32_1 = arith.constant 0 : i32
    return %c0_i32, %c0_i32_0 : i32, i32
  }
  func.func @transform_2(%arg0: i32) -> (i32, i32) {
    %c0_i32 = arith.constant 0 : i32
    %c0_i32_0 = arith.constant 0 : i32
    %c0_i32_1 = arith.constant 0 : i32
    return %c0_i32, %c0_i32_0 : i32, i32
  }
  func.func @transform_3(%arg0: i32) -> (i32, i32) {
    %c0_i32 = arith.constant 0 : i32
    %c0_i32_0 = arith.constant 0 : i32
    %c0_i32_1 = arith.constant 0 : i32
    return %c0_i32, %c0_i32_0 : i32, i32
  }
  func.func @transform_4(%arg0: i32) -> (i32, i32) {
    %c0_i32 = arith.constant 0 : i32
    %c0_i32_0 = arith.constant 0 : i32
    %c0_i32_1 = arith.constant 0 : i32
    return %c0_i32, %c0_i32_0 : i32, i32
  }
  func.func @transform_5(%arg0: i32) -> (i32, i32) {
    %c0_i32 = arith.constant 0 : i32
    %c0_i32_0 = arith.constant 0 : i32
    %c0_i32_1 = arith.constant 0 : i32
    return %c0_i32, %c0_i32_0 : i32, i32
  }
  func.func @transform_6(%arg0: i32) -> (i32, i32) {
    %c0_i32 = arith.constant 0 : i32
    %c0_i32_0 = arith.constant 0 : i32
    %c0_i32_1 = arith.constant 0 : i32
    return %c0_i32, %c0_i32_0 : i32, i32
  }
  func.func @transform_7(%arg0: i32) -> (i32, i32, i32) {
    %c0_i32 = arith.constant 0 : i32
    %c0_i32_0 = arith.constant 0 : i32
    %c0_i32_1 = arith.constant 0 : i32
    %c0_i32_2 = arith.constant 0 : i32
    return %c0_i32, %c0_i32_0, %c0_i32_1 : i32, i32, i32
  }
  func.func @transform_8(%arg0: i32) -> (i32, i32) {
    %c0_i32 = arith.constant 0 : i32
    %c0_i32_0 = arith.constant 0 : i32
    %c0_i32_1 = arith.constant 0 : i32
    return %c0_i32, %c0_i32_0 : i32, i32
  }
  func.func @transform_9(%arg0: i32) -> (i32, i32, i32) {
    %c0_i32 = arith.constant 0 : i32
    %c0_i32_0 = arith.constant 0 : i32
    %c0_i32_1 = arith.constant 0 : i32
    %c0_i32_2 = arith.constant 0 : i32
    return %c0_i32, %c0_i32_0, %c0_i32_1 : i32, i32, i32
  }
  func.func @transform_10(%arg0: i32) -> (i32, i32) {
    %c0_i32 = arith.constant 0 : i32
    %c0_i32_0 = arith.constant 0 : i32
    %c0_i32_1 = arith.constant 0 : i32
    return %c0_i32, %c0_i32_0 : i32, i32
  }
  func.func @transform_11(%arg0: i32) -> (i32, i32, i32) {
    %c0_i32 = arith.constant 0 : i32
    %c0_i32_0 = arith.constant 0 : i32
    %c0_i32_1 = arith.constant 0 : i32
    %c0_i32_2 = arith.constant 0 : i32
    return %c0_i32, %c0_i32_0, %c0_i32_1 : i32, i32, i32
  }
  func.func @transform_12(%arg0: i32) -> (i32, i32) {
    %c0_i32 = arith.constant 0 : i32
    %c0_i32_0 = arith.constant 0 : i32
    %c0_i32_1 = arith.constant 0 : i32
    return %c0_i32, %c0_i32_0 : i32, i32
  }
  func.func @transform_13(%arg0: i32) -> (i32, i32, i32) {
    %c0_i32 = arith.constant 0 : i32
    %c0_i32_0 = arith.constant 0 : i32
    %c0_i32_1 = arith.constant 0 : i32
    %c0_i32_2 = arith.constant 0 : i32
    return %c0_i32, %c0_i32_0, %c0_i32_1 : i32, i32, i32
  }
  func.func @transform_14(%arg0: i32) -> (i32, i32) {
    %c0_i32 = arith.constant 0 : i32
    %c0_i32_0 = arith.constant 0 : i32
    %c0_i32_1 = arith.constant 0 : i32
    return %c0_i32, %c0_i32_0 : i32, i32
  }
  func.func @transform_15(%arg0: i32) -> (i32, i32) {
    %c0_i32 = arith.constant 0 : i32
    %c0_i32_0 = arith.constant 0 : i32
    return %c0_i32, %arg0 : i32, i32
  }
}

</mosaic_0001>

<bundles_post_ra>
// kernel: tpu_custom_call.1
= control target key start
LH: loop header
LB: loop body
LE: loop exit
PB: predicated region body
PF: predicated region fallthrough
CT: control target
= control target key end

     0   :  { %v12433_v4 = vmov 0   ;;  %s12434_s22 = smov 50   ;;  %s12435_s23 = smov 51   ;;  %s16732_s0 = inlined_call_operand.vmem [shape: f32[4,512], index: 0, kind: input, shape index: {}]   ;;  %s16733_s1 = inlined_call_operand.vmem [shape: s32[1,512], index: 1, kind: input, shape index: {}]   ;;  %s16734_s2 = inlined_call_operand.vmem [shape: s32[1,512], index: 2, kind: input, shape index: {}]   ;;  %s16735_s3 = inlined_call_operand.vmem [shape: bf16[512,2], index: 3, kind: input, shape index: {}]   ;;  %s16736_s4 = inlined_call_operand.vmem [shape: bf16[2,512], index: 4, kind: input, shape index: {}]   ;;  %s16737_s5 = inlined_call_operand.vmem [shape: bf16[4,4], index: 5, kind: input, shape index: {}]   ;;  %s16738_s6 = inlined_call_operand.vmem [shape: f32[4,1], index: 6, kind: input, shape index: {}]   ;;  %s16739_s7 = inlined_call_operand.vmem [shape: bf16[49,4,4], index: 7, kind: input, shape index: {}]   ;;  %s16740_s8 = inlined_call_operand.vmem [shape: f32[4,1], index: 8, kind: input, shape index: {}]   ;;  %s16741_s9 = inlined_call_operand.vmem [shape: bf16[25,4,4], index: 9, kind: input, shape index: {}]   ;;  %s16742_s10 = inlined_call_operand.vmem [shape: f32[4,1], index: 10, kind: input, shape index: {}]   ;;  %s16743_s11 = inlined_call_operand.vmem [shape: bf16[9,4,4], index: 11, kind: input, shape index: {}]   ;;  %s16744_s12 = inlined_call_operand.vmem [shape: f32[4,1], index: 12, kind: input, shape index: {}]   ;;  %s16745_s13 = inlined_call_operand.vmem [shape: bf16[4,4,4], index: 13, kind: input, shape index: {}]   ;;  %s16746_s14 = inlined_call_operand.vmem [shape: f32[4,1], index: 14, kind: input, shape index: {}]   ;;  %s16747_s15 = inlined_call_operand.hbm [shape: f32[4,512], index: 15, kind: output, shape index: {}]  }
   0x1   :  { %v52_v0 = vld [vmem:[%s16732_s0] sm:$0xff]  ;;  %v53_v1 = vld [vmem:[%s16732_s0 + $0x8] sm:$0xff]  ;;  %218 = vmatprep.mubr.bf16.mxu0 %v12433_v4  ;;  %259 = vmatprep.mubr.bf16.mxu1 %v12433_v4  ;;  %s12436_s24 = smov 49   ;;  %s12437_s25 = smov 48  }
   0x2   :  { %v12572_v2 = vcombine.high %v52_v0, %v52_v0  ;;  %v12574_v3 = vcombine.high %v53_v1, %v53_v1  ;;  %12365 = vset.pattern.permute.xlu1 %v12433_v4  ;;  %12364 = vset.pattern.permute.xlu0 %v12433_v4  ;;  %s12438_s26 = smov 47   ;;  %s12439_s27 = smov 46  }
   0x3   :  { %s12440_s28 = smov 45   ;;  %s12441_s29 = smov 35  }
   0x4   :  { %v12579_v5 = vpack.i.bf16 %v12572_v2, %v52_v0  ;;  %v12586_v6 = vpack.i.bf16 %v12574_v3, %v53_v1  ;;  %s12442_s30 = smov 34   ;;  %s12443_s16 = smov 33  }
   0x6   :  { %11885 = vrot.lane.b32.xlu0 %v12579_v5, %s12434_s22  ;;  %11895 = vrot.lane.b32.xlu1 %v12579_v5, %s12435_s23 }
   0xa   :  { %11890 = vrot.lane.b32.xlu0 %v12586_v6, %s12434_s22  ;;  %11900 = vrot.lane.b32.xlu1 %v12586_v6, %s12435_s23 }
   0xe   :  { %11910 = vrot.lane.b32.xlu1 %v12586_v6, %s12436_s24  ;;  %11905 = vrot.lane.b32.xlu0 %v12579_v5, %s12436_s24 }
  0x12   :  { %11920 = vrot.lane.b32.xlu1 %v12586_v6, %s12437_s25  ;;  %11915 = vrot.lane.b32.xlu0 %v12579_v5, %s12437_s25 }
  0x16   :  { %11930 = vrot.lane.b32.xlu1 %v12586_v6, %s12438_s26  ;;  %11925 = vrot.lane.b32.xlu0 %v12579_v5, %s12438_s26 }
  0x1a   :  { %11940 = vrot.lane.b32.xlu1 %v12586_v6, %s12439_s27  ;;  %11935 = vrot.lane.b32.xlu0 %v12579_v5, %s12439_s27 }
  0x1e   :  { %11950 = vrot.lane.b32.xlu1 %v12586_v6, %s12440_s28  ;;  %11945 = vrot.lane.b32.xlu0 %v12579_v5, %s12440_s28 }
  0x22   :  { %11960 = vrot.lane.b32.xlu1 %v12586_v6, %s12441_s29  ;;  %11955 = vrot.lane.b32.xlu0 %v12579_v5, %s12441_s29 }
  0x26   :  { %11970 = vrot.lane.b32.xlu1 %v12586_v6, %s12442_s30  ;;  %11965 = vrot.lane.b32.xlu0 %v12579_v5, %s12442_s30 }
  0x2a   :  { %11980 = vrot.lane.b32.xlu1 %v12586_v6, %s12443_s16  ;;  %11975 = vrot.lane.b32.xlu0 %v12579_v5, %s12443_s16 }
  0x2b   :  { %20 = vsyncpa [#allocation3], 0  ;;  %s12444_s17 = smov 32   ;;  %s12445_s18 = smov 31   ;;  %v12625_v7 = vld [vmem:[%s16733_s1] sm:$0xf]  ;;  %v74_v12 = vlaneseq }
  0x2c   :  { %s12446_s19 = smov 30   ;;  %s12447_s20 = smov 29   ;;  %v12630_v8 = vld [vmem:[%s16734_s2] sm:$0xf]  ;;  %v81_v9 = vadd.s32 4294967293, %v12625_v7 }
  0x2d   :  { %s12448_s21 = smov 19   ;;  %s12449_s22 = smov 18   ;;  %v12634_v10 = vadd.s32 4294967294, %v12630_v8  ;;  %v12637_v11 = vadd.s32 4294967293, %v12630_v8  ;;  %v12646_v14 = vadd.s32 4294967295, %v12630_v8  ;;  %v12653_v15 = vshrl.u32 %v74_v12, 7 }
  0x2e   :  { %11990 = vrot.lane.b32.xlu1 %v12586_v6, %s12444_s17  ;;  %11985 = vrot.lane.b32.xlu0 %v12579_v5, %s12444_s17  ;;  %s12450_s23 = smov 17   ;;  %s12451_s24 = smov 16   ;;  %vm82_vm0 = vcmp.ge.s32.totalorder %v81_v9, 0  ;;  %vm83_vm1 = vcmp.lt.s32.totalorder %v81_v9, 16  ;;  %v12666_v16 = vadd.s32 1, %v12630_v8  ;;  %vm16748_vm14 = vcmp.ge.s32.totalorder %v12630_v8, 0 }
  0x2f   :  { %vm12639_vm2 = vmand %vm82_vm0, %vm83_vm1  ;;  %vm16755_vm3 = vcmp.ge.s32.totalorder %v12634_v10, 0  ;;  %vm16757_vm4 = vcmp.ge.s32.totalorder %v12637_v11, 0  ;;  %vm16752_vm6 = vcmp.lt.s32.totalorder %v12634_v10, 16  ;;  %vm16756_vm8 = vcmp.lt.s32.totalorder %v12637_v11, 16  ;;  %s12452_s2 = smov 15   ;;  %s12453_s16 = smov 14  }
  0x30   :  { %vm135_vm5 = vmand %vm12639_vm2, %vm16755_vm3  ;;  %vm16751_vm9 = vcmp.ge.s32.totalorder %v12646_v14, 0  ;;  %v12671_v17 = vsub.s32 1, %v12653_v15  ;;  %v12674_v18 = vsub.s32 3, %v12653_v15  ;;  %vm16749_vm13 = vcmp.lt.s32.totalorder %v12646_v14, 16  ;;  %s12454_s17 = smov 13   ;;  %s12457_s26 = smov 1  }
  0x31   :  { %vm87_vm7 = vmand %vm12639_vm2, %vm16757_vm4  ;;  %v12683_v20 = vsub.s32 0, %v12653_v15  ;;  %v12686_v21 = vsub.s32 2, %v12653_v15  ;;  %vm16750_vm15 = vcmp.ge.s32.totalorder %v12666_v16, 0  ;;  %v12697_v24 = vand.u32 127, %v74_v12  ;;  %s12458_s30 = smov 127   ;;  %s12468_s25 = smov 99  }
  0x32   :  { %12000 = vrot.lane.b32.xlu1 %v12586_v6, %s12445_s18  ;;  %11995 = vrot.lane.b32.xlu0 %v12579_v5, %s12445_s18  ;;  %vm137_vm10 = vmand %vm135_vm5, %vm16752_vm6  ;;  %vm16753_vm5 = vcmp.lt.s32.totalorder %v12630_v8, 16  ;;  %v12771_v55 = vadd.s32 2, %v12630_v8  ;;  %s12469_s28 = smov 98   ;;  %s12472_s27 = smov 95  }
  0x33   :  { %vm89_vm11 = vmand %vm87_vm7, %vm16756_vm8  ;;  %v138_v19 = vsel %vm137_vm10, 1, %v12433_v4  ;;  %vm16754_vm10 = vcmp.lt.s32.totalorder %v12666_v16, 16  ;;  %s12481_s29 = smov 77  }
  0x34   :  { %vm380_vm12 = vmand %vm12639_vm2, %vm16751_vm9  ;;  %v90_v22 = vsel %vm89_vm11, 1, %v12433_v4  ;;  %v146_v25 = vrot.slane %v138_v19, %v12671_v17  ;;  %v154_v26 = vrot.slane %v138_v19, %v12674_v18  ;;  %v142_v27 = vrot.slane %v138_v19, %v12683_v20 }
  0x35   :  { %vm12693_vm0 = vmand %vm380_vm12, %vm16749_vm13  ;;  %v150_v28 = vrot.slane %v138_v19, %v12686_v21  ;;  %v98_v29 = vrot.slane %v90_v22, %v12671_v17  ;;  %v106_v30 = vrot.slane %v90_v22, %v12674_v18  ;;  %v94_v31 = vrot.slane %v90_v22, %v12683_v20 }
  0x36   :  { %12010 = vrot.lane.b32.xlu1 %v12586_v6, %s12446_s19  ;;  %12005 = vrot.lane.b32.xlu0 %v12579_v5, %s12446_s19  ;;  %vm529_vm1 = vmand %vm12639_vm2, %vm16748_vm14  ;;  %v102_v32 = vrot.slane %v90_v22, %v12686_v21  ;;  %vm76_vm12 = vcmp.lt.s32.totalorder %v12697_v24, 51  ;;  %vm128_vm14 = vcmp.lt.s32.totalorder %v12697_v24, 50  ;;  %vm173_vm13 = vcmask 1041408   ;;  %s12462_s19 = smov 114  }
  0x37   :  { %vm679_vm7 = vmand %vm12639_vm2, %vm16750_vm15  ;;  %v383_v33 = vsel %vm12693_vm0, 1, %v12433_v4  ;;  %vm12726_vm9 = vcmp.eq.s32.totalorder %v146_v25, 1  ;;  %vm12730_vm6 = vcmp.eq.s32.totalorder %v154_v26, 1  ;;  %vm12742_vm0 = vcmp.eq.s32.totalorder %v98_v29, 1 }
  0x38   :  { %vm531_vm11 = vmand %vm529_vm1, %vm16753_vm5  ;;  %vm12734_vm1 = vcmp.eq.s32.totalorder %v142_v27, 1  ;;  %vm12738_vm5 = vcmp.eq.s32.totalorder %v150_v28, 1  ;;  %vm12757_vm3 = vcmp.eq.s32.totalorder %v102_v32, 1  ;;  %v399_v45 = vrot.slane %v383_v33, %v12674_v18 }
  0x39   :  { %vm681_vm15 = vmand %vm679_vm7, %vm16754_vm10  ;;  %vm12746_vm7 = vcmp.eq.s32.totalorder %v106_v30, 1  ;;  %vm12750_vm10 = vcmp.eq.s32.totalorder %v94_v31, 1  ;;  %v12755_v41 = vsel %vm531_vm11, 1, %v12433_v4  ;;  %v391_v46 = vrot.slane %v383_v33, %v12671_v17 }
  0x3a   :  { %12020 = vrot.lane.b32.xlu1 %v12586_v6, %s12447_s20  ;;  %12015 = vrot.lane.b32.xlu0 %v12579_v5, %s12447_s20  ;;  %v12764_v47 = vsel %vm681_vm15, 1, %v12433_v4  ;;  %v548_v52 = vrot.slane %v12755_v41, %v12674_v18  ;;  %v387_v53 = vrot.slane %v383_v33, %v12683_v20  ;;  %v395_v54 = vrot.slane %v383_v33, %v12686_v21  ;;  %v119_v33 = vld [vmem:[%s16739_s7] sm:$0x3]  ;;  %s12455_s20 = smov 3  }
  0x3b   :  { %v540_v58 = vrot.slane %v12755_v41, %v12671_v17  ;;  %v536_v59 = vrot.slane %v12755_v41, %v12683_v20  ;;  %vm12786_vm8 = vcmp.eq.s32.totalorder %v399_v45, 1  ;;  %vm12790_vm4 = vcmp.eq.s32.totalorder %v391_v46, 1 }
  0x3c   :  { %v690_v28 = vrot.slane %v12764_v47, %v12671_v17  ;;  %vm12819_vm11 = vcmp.eq.s32.totalorder %v548_v52, 1  ;;  %v686_v0 = vrot.slane %v12764_v47, %v12683_v20 }
  0x3e   :  { %12030 = vrot.lane.b32.xlu1 %v12586_v6, %s12448_s21  ;;  %12025 = vrot.lane.b32.xlu0 %v12579_v5, %s12448_s21  ;;  %s12478_s21 = smov 80  }
  0x42   :  { %12040 = vrot.lane.b32.xlu1 %v12586_v6, %s12449_s22  ;;  %12035 = vrot.lane.b32.xlu0 %v12579_v5, %s12449_s22  ;;  %s12467_s22 = smov 109  }
  0x46   :  { %12050 = vrot.lane.b32.xlu1 %v12586_v6, %s12450_s23  ;;  %12045 = vrot.lane.b32.xlu0 %v12579_v5, %s12450_s23  ;;  %s12456_s23 = smov 2  }
  0x4a   :  { %12060 = vrot.lane.b32.xlu1 %v12586_v6, %s12451_s24  ;;  %12055 = vrot.lane.b32.xlu0 %v12579_v5, %s12451_s24  ;;  %s12459_s24 = smov 126  }
  0x4e   :  { %12070 = vrot.lane.b32.xlu1 %v12586_v6, %s12452_s2  ;;  %12065 = vrot.lane.b32.xlu0 %v12579_v5, %s12452_s2  ;;  %v698_v5 = vrot.slane %v12764_v47, %v12674_v18  ;;  %v544_v6 = vrot.slane %v12755_v41, %v12686_v21  ;;  %s12460_s2 = smov 125  }
  0x78   :  { %v11886_v42 = vpop.permute.xlu0 %11885  ;;  %v11896_v43 = vpop.permute.xlu1 %11895 }
  0x79   :  { %v11888_v48 = vunpack.i.h.bf16 %v11886_v42  ;;  %v11887_v49 = vunpack.i.l.bf16 %v11886_v42  ;;  %v11898_v50 = vunpack.i.h.bf16 %v11896_v43  ;;  %v11897_v51 = vunpack.i.l.bf16 %v11896_v43 }
  0x7b   :  { %v79_v56 = vsel %vm76_vm12, %v11897_v51, %v11898_v50  ;;  %v131_v57 = vsel %vm128_vm14, %v11887_v49, %v11888_v48 }
  0x7c   :  { %v11891_v60 = vpop.permute.xlu0 %11890  ;;  %v160_v61 = vsel %vm12726_vm9, %v131_v57, 0.0  ;;  %v11901_v62 = vpop.permute.xlu1 %11900  ;;  %v112_v63 = vsel %vm12742_vm0, %v79_v56, 0.0  ;;  %vm12799_vm9 = vcmp.eq.s32.totalorder %v387_v53, 1  ;;  %vm12803_vm0 = vcmp.eq.s32.totalorder %v395_v54, 1 }
  0x7d   :  { %v11893_v9 = vunpack.i.h.bf16 %v11891_v60  ;;  %v11892_v12 = vunpack.i.l.bf16 %v11891_v60  ;;  %v164_v19 = vpack.c.bf16 %v160_v61, %v160_v61  ;;  %v11903_v22 = vunpack.i.h.bf16 %v11901_v62 }
  0x7e   :  { %v11902_v23 = vunpack.i.l.bf16 %v11901_v62  ;;  %v116_v25 = vpack.c.bf16 %v112_v63, %v112_v63 }
  0x7f   :  { %11306 = vmatprep.subr.msk.bf16.mxu0 %vm173_vm13, %v164_v19  ;;  %v129_v29 = vsel %vm128_vm14, %v11892_v12, %v11893_v9  ;;  %v132_v30 = vsel %vm128_vm14, %v11893_v9, %v11887_v49  ;;  %v130_v31 = vsel %vm128_vm14, %v11888_v48, %v11892_v12  ;;  %v80_v32 = vsel %vm76_vm12, %v11903_v22, %v11897_v51 }
  0x80   :  { %v77_v34 = vsel %vm76_vm12, %v11902_v23, %v11903_v22  ;;  %v162_v38 = vsel %vm12730_vm6, %v129_v29, 0.0  ;;  %v159_v41 = vsel %vm12734_vm1, %v132_v30, 0.0  ;;  %v161_v42 = vsel %vm12738_vm5, %v130_v31, 0.0  ;;  %v11911_v43 = vpop.permute.xlu1 %11910  ;;  %v11906_v45 = vpop.permute.xlu0 %11905 }
  0x81   :  { %v166_v46 = vpack.c.bf16 %v162_v38, %v162_v38  ;;  %v163_v48 = vpack.c.bf16 %v159_v41, %v159_v41  ;;  %v165_v49 = vpack.c.bf16 %v161_v42, %v161_v42  ;;  %v114_v51 = vsel %vm12746_vm7, %v77_v34, 0.0 }
  0x82   :  { %vm12833_vm14 = vcmp.eq.s32.totalorder %v540_v58, 1  ;;  %v118_v35 = vpack.c.bf16 %v114_v51, %v114_v51  ;;  %v111_v36 = vsel %vm12750_vm10, %v80_v32, 0.0  ;;  %v78_v37 = vsel %vm76_vm12, %v11898_v50, %v11902_v23  ;;  %v11305_v50 = vld [vmem:[%s16739_s7 + $0x2] sm:$0x3] }
  0x83   :  { %v11913_v53 = vunpack.i.h.bf16 %v11911_v43  ;;  %11308 = vmatprep.subr.msk.bf16.mxu1 %vm173_vm13, %v166_v46  ;;  %v175_v54 = vsel %vm173_vm13, %v163_v48, 0  ;;  %v181_v56 = vsel %vm173_vm13, %v165_v49, 0  ;;  %v115_v39 = vpack.c.bf16 %v111_v36, %v111_v36 }
  0x84   :  { %v113_v57 = vsel %vm12757_vm3, %v78_v37, 0.0  ;;  %vm12846_vm6 = vcmp.eq.s32.totalorder %v536_v59, 1  ;;  %vm12850_vm5 = vcmp.eq.s32.totalorder %v544_v6, 1  ;;  %187 = vmatpush1.bf16.msra.mxu0 %v175_v54  ;;  %228 = vmatpush1.bf16.msra.mxu1 %v181_v56  ;;  %v11912_v61 = vunpack.i.l.bf16 %v11911_v43  ;;  %v11921_v44 = vpop.permute.xlu1 %11920  ;;  %v11916_v9 = vpop.permute.xlu0 %11915 }
  0x85   :  { %v117_v60 = vpack.c.bf16 %v113_v57, %v113_v57  ;;  %v11908_v62 = vunpack.i.h.bf16 %v11906_v45  ;;  %v11907_v63 = vunpack.i.l.bf16 %v11906_v45  ;;  %11310 = vmatprep.subr.msk.bf16.mxu0 %vm173_vm13, %v116_v25  ;;  %11312 = vmatprep.subr.msk.bf16.mxu1 %vm173_vm13, %v118_v35  ;;  %v272_v59 = vsel %vm173_vm13, %v115_v39, 0 }
  0x86   :  { %v11923_v6 = vunpack.i.h.bf16 %v11921_v44  ;;  %v11922_v12 = vunpack.i.l.bf16 %v11921_v44  ;;  %v11918_v19 = vunpack.i.h.bf16 %v11916_v9  ;;  %vm16794_vm10 = vcmp.lt.s32.totalorder %v12697_v24, 49 }
  0x87   :  { %v278_v22 = vsel %vm173_vm13, %v117_v60, 0  ;;  %v374_v23 = vsel %vm16794_vm10, %v11912_v61, %v11913_v53  ;;  %vm16795_vm12 = vmmov %vm16794_vm10  ;;  %vm16797_vm7 = vcmask 31744   ;;  %v11917_v1 = vunpack.i.l.bf16 %v11916_v9 }
  0x88   :  { %v375_v29 = vsel %vm16795_vm12, %v11908_v62, %v11912_v61  ;;  %vm16796_vm1 = vmmov %vm16794_vm10  ;;  %11307 = vmatmul.mubr.msk.bf16.vlgmr.msra.gmra.mrb[0].mxu0 %vm16797_vm7, %v11305_v50  ;;  %v407_v30 = vsel %vm12786_vm8, %v374_v23, 0.0  ;;  %vm16800_vm10 = vcmp.lt.s32.totalorder %v12697_v24, 48  ;;  %v12878_v42 = vpop.permute.xlu1 %11930  ;;  %v11926_v46 = vpop.permute.xlu0 %11925  ;;  %v12898_v49 = vadd.s32 3, %v12630_v8 }
  0x89   :  { %v376_v25 = vsel %vm16796_vm1, %v11907_v63, %v11908_v62  ;;  %vm16798_vm15 = vmmov %vm16797_vm7  ;;  %v524_v34 = vsel %vm16800_vm10, %v11922_v12, %v11923_v6  ;;  %284 = vmatpush1.bf16.msra.mxu0 %v272_v59  ;;  %v411_v41 = vpack.c.bf16 %v407_v30, %v407_v30  ;;  %315 = vmatprep.mubr.bf16.mxu0 %v12433_v4  ;;  %v406_v45 = vsel %vm12803_vm0, %v375_v29, 0.0 }
  0x8a   :  { %11309 = vmatmul.mubr.msk.bf16.vlgmr.msra.gmra.mrb[0].mxu1 %vm16798_vm15, %v11305_v50  ;;  %vm16799_vm3 = vmmov %vm16796_vm1  ;;  %v405_v32 = vsel %vm12790_vm4, %v376_v25, 0.0  ;;  %vm830_vm15 = vcmp.lt.s32.totalorder %v12771_v55, 16  ;;  %vm16801_vm4 = vcmp.ge.s32.totalorder %v12771_v55, 0  ;;  %v556_v26 = vsel %vm12819_vm11, %v524_v34, 0.0  ;;  %v11314_v34 = vld [vmem:[%s16739_s7 + $0x4] sm:$0x3] }
  0x8b   :  { %v377_v31 = vsel %vm16799_vm3, %v11913_v53, %v11907_v63  ;;  %325 = vmatpush1.bf16.msra.mxu1 %v278_v22  ;;  %v409_v38 = vpack.c.bf16 %v405_v32, %v405_v32  ;;  %356 = vmatprep.mubr.bf16.mxu1 %v12433_v4  ;;  %vm12893_vm8 = vmand %vm12639_vm2, %vm16801_vm4  ;;  %v410_v51 = vpack.c.bf16 %v406_v45, %v406_v45  ;;  %v11933_v54 = vunpack.i.h.bf16 %v12878_v42 }
  0x8c   :  { %v404_v43 = vsel %vm12799_vm9, %v377_v31, 0.0  ;;  %11317 = vmatprep.subr.msk.bf16.mxu1 %vm173_vm13, %v411_v41  ;;  %v694_v35 = vrot.slane %v12764_v47, %v12686_v21  ;;  %vm16804_vm9 = vmmov %vm16800_vm10  ;;  %v11932_v39 = vunpack.i.l.bf16 %v12878_v42  ;;  %v11928_v57 = vunpack.i.h.bf16 %v11926_v46  ;;  %v11941_v22 = vpop.permute.xlu1 %11940  ;;  %v11936_v23 = vpop.permute.xlu0 %11935 }
  0x8d   :  { %11315 = vmatprep.subr.msk.bf16.mxu0 %vm173_vm13, %v409_v38  ;;  %v408_v27 = vpack.c.bf16 %v404_v43, %v404_v43  ;;  %v525_v36 = vsel %vm16804_vm9, %v11918_v19, %v11922_v12  ;;  %vm16805_vm0 = vmmov %vm16804_vm9  ;;  %v11927_v50 = vunpack.i.l.bf16 %v11926_v46  ;;  %v424_v61 = vsel %vm173_vm13, %v410_v51, 0 }
  0x8e   :  { %v526_v37 = vsel %vm16805_vm0, %v11917_v1, %v11918_v19  ;;  %vm16806_vm3 = vmmov %vm16805_vm0  ;;  %vm978_vm12 = vcmp.ge.s32.totalorder %v12898_v49, 0  ;;  %v1127_v62 = vadd.s32 4294967294, %v12625_v7  ;;  %v560_v52 = vpack.c.bf16 %v556_v26, %v556_v26 }
  0x8f   :  { %v527_v53 = vsel %vm16806_vm3, %v11923_v6, %v11917_v1  ;;  %v554_v56 = vsel %vm12833_vm14, %v526_v37, 0.0  ;;  %vm831_vm11 = vmand %vm12893_vm8, %vm830_vm15  ;;  %v418_v60 = vsel %vm173_vm13, %v408_v27, 0  ;;  %v555_v9 = vsel %vm12850_vm5, %v525_v36, 0.0 }
  0x90   :  { %v558_v63 = vpack.c.bf16 %v554_v56, %v554_v56  ;;  %v553_v44 = vsel %vm12846_vm6, %v527_v53, 0.0  ;;  %vm16807_vm14 = vmmov %vm16797_vm7  ;;  %vm822_vm10 = vcmp.lt.s32.totalorder %v12697_v24, 46  ;;  %v12942_v7 = vsel %vm831_vm11, 1, %v12433_v4 }
  0x91   :  { %11311 = vmatmul.mubr.msk.bf16.vlgmr.msra.gmra.mrb[4].mxu0 %vm16807_vm14, %v119_v33  ;;  %vm16808_vm1 = vmmov %vm16797_vm7  ;;  %vm12936_vm7 = vcmp.eq.s32.totalorder %v698_v5, 1  ;;  %vm16811_vm6 = vcmp.lt.s32.totalorder %v12697_v24, 47  ;;  %vm12949_vm5 = vcmp.eq.s32.totalorder %v690_v28, 1  ;;  %vm12955_vm8 = vcmp.eq.s32.totalorder %v686_v0, 1 }
  0x92   :  { %11313 = vmatmul.mubr.msk.bf16.vlgmr.msra.gmra.mrb[4].mxu1 %vm16808_vm1, %v119_v33  ;;  %430 = vmatpush1.bf16.msra.mxu0 %v418_v60  ;;  %v673_v58 = vsel %vm16811_vm6, %v11932_v39, %v11933_v54  ;;  %vm16814_vm4 = vmmov %vm16811_vm6  ;;  %v557_v12 = vpack.c.bf16 %v553_v44, %v553_v44  ;;  %v559_v19 = vpack.c.bf16 %v555_v9, %v555_v9  ;;  %vm12961_vm9 = vcmp.eq.s32.totalorder %v694_v35, 1 }
  0x93   :  { %471 = vmatpush1.bf16.msra.mxu1 %v424_v61  ;;  %v675_v5 = vsel %vm16814_vm4, %v11927_v50, %v11928_v57  ;;  %461 = vmatprep.mubr.bf16.mxu0 %v12433_v4  ;;  %vm12969_vm0 = vmand %vm12639_vm2, %vm978_vm12  ;;  %vm980_vm3 = vcmp.lt.s32.totalorder %v12898_v49, 16  ;;  %v848_v29 = vrot.slane %v12942_v7, %v12674_v18  ;;  %v840_v25 = vrot.slane %v12942_v7, %v12671_v17 }
  0x94   :  { %502 = vmatprep.mubr.bf16.mxu1 %v12433_v4  ;;  %11320 = vmatprep.subr.msk.bf16.mxu0 %vm173_vm13, %v558_v63  ;;  %vm1128_vm11 = vcmp.ge.s32.totalorder %v1127_v62, 0  ;;  %vm1129_vm14 = vcmp.lt.s32.totalorder %v1127_v62, 16  ;;  %v706_v13 = vsel %vm12936_vm7, %v673_v58, 0.0  ;;  %vm16821_vm2 = vmmov %vm16814_vm4  ;;  %v704_v32 = vsel %vm12949_vm5, %v675_v5, 0.0  ;;  %v11319_v58 = vld [vmem:[%s16739_s7 + $0x6] sm:$0x3] }
  0x95   :  { %11322 = vmatprep.subr.msk.bf16.mxu1 %vm173_vm13, %v560_v52  ;;  %v674_v30 = vsel %vm16821_vm2, %v11928_v57, %v11932_v39  ;;  %vm16822_vm1 = vmmov %vm16821_vm2  ;;  %v11943_v38 = vunpack.i.h.bf16 %v11941_v22  ;;  %v11942_v41 = vunpack.i.l.bf16 %v11941_v22  ;;  %v11938_v42 = vunpack.i.h.bf16 %v11936_v23  ;;  %v11951_v57 = vpop.permute.xlu1 %11950 }
  0x96   :  { %v676_v31 = vsel %vm16822_vm1, %v11933_v54, %v11927_v50  ;;  %v11937_v0 = vunpack.i.l.bf16 %v11936_v23  ;;  %vm981_vm7 = vmand %vm12969_vm0, %vm980_vm3  ;;  %v567_v1 = vsel %vm173_vm13, %v557_v12, 0  ;;  %v573_v43 = vsel %vm173_vm13, %v559_v19, 0  ;;  %v11946_v50 = vpop.permute.xlu0 %11945 }
  0x97   :  { %v836_v45 = vrot.slane %v12942_v7, %v12683_v20  ;;  %v844_v46 = vrot.slane %v12942_v7, %v12686_v21  ;;  %v708_v48 = vpack.c.bf16 %v704_v32, %v704_v32  ;;  %v710_v26 = vpack.c.bf16 %v706_v13, %v706_v13  ;;  %vm13007_vm6 = vmand %vm1128_vm11, %vm1129_vm14 }
  0x98   :  { %v703_v27 = vsel %vm12955_vm8, %v676_v31, 0.0  ;;  %v705_v51 = vsel %vm12961_vm9, %v674_v30, 0.0  ;;  %vm16825_vm5 = vcmask 31744   ;;  %v982_v36 = vsel %vm981_vm7, 1, %v12433_v4 }
  0x99   :  { %11316 = vmatmul.mubr.msk.bf16.vlgmr.msra.gmra.mrb[8].mxu0 %vm16825_vm5, %v11314_v34  ;;  %vm16826_vm4 = vmmov %vm16825_vm5  ;;  %vm13014_vm0 = vcmp.eq.s32.totalorder %v848_v29, 1  ;;  %v823_v53 = vsel %vm822_vm10, %v11942_v41, %v11943_v38  ;;  %vm13020_vm8 = vcmp.eq.s32.totalorder %v840_v25, 1  ;;  %v825_v33 = vsel %vm822_vm10, %v11937_v0, %v11938_v42 }
  0x9a   :  { %11318 = vmatmul.mubr.msk.bf16.vlgmr.msra.gmra.mrb[8].mxu1 %vm16826_vm4, %v11314_v34  ;;  %579 = vmatpush1.bf16.msra.mxu0 %v567_v1  ;;  %v707_v56 = vpack.c.bf16 %v703_v27, %v703_v27  ;;  %v709_v39 = vpack.c.bf16 %v705_v51, %v705_v51  ;;  %vm972_vm9 = vcmp.lt.s32.totalorder %v12697_v24, 45  ;;  %vm16831_vm11 = vcmp.ge.s32.totalorder %v12637_v11, 0  ;;  %v11956_v1 = vpop.permute.xlu0 %11955  ;;  %v11329_v34 = vld [vmem:[%s16739_s7 + $0xa] sm:$0x3] }
  0x9b   :  { %620 = vmatpush1.bf16.msra.mxu1 %v573_v43  ;;  %610 = vmatprep.mubr.bf16.mxu0 %v12433_v4  ;;  %vm13033_vm14 = vmand %vm13007_vm6, %vm16831_vm11  ;;  %v998_v61 = vrot.slane %v982_v36, %v12674_v18  ;;  %v990_v62 = vrot.slane %v982_v36, %v12671_v17  ;;  %vm13041_vm2 = vcmp.eq.s32.totalorder %v836_v45, 1  ;;  %vm13045_vm1 = vcmp.eq.s32.totalorder %v844_v46, 1 }
  0x9c   :  { %651 = vmatprep.mubr.bf16.mxu1 %v12433_v4  ;;  %11325 = vmatprep.subr.msk.bf16.mxu0 %vm173_vm13, %v708_v48  ;;  %v856_v44 = vsel %vm13014_vm0, %v823_v53, 0.0  ;;  %v824_v9 = vsel %vm822_vm10, %v11938_v42, %v11942_v41  ;;  %v826_v59 = vsel %vm822_vm10, %v11943_v38, %v11937_v0  ;;  %v854_v7 = vsel %vm13020_vm8, %v825_v33, 0.0  ;;  %vm16839_vm10 = vmmov %vm16826_vm4  ;;  %v11961_v0 = vpop.permute.xlu1 %11960  ;;  %v11324_v53 = vld [vmem:[%s16739_s7 + $0x8] sm:$0x3] }
  0x9d   :  { %11327 = vmatprep.subr.msk.bf16.mxu1 %vm173_vm13, %v710_v26  ;;  %v11953_v40 = vunpack.i.h.bf16 %v11951_v57  ;;  %v11952_v5 = vunpack.i.l.bf16 %v11951_v57  ;;  %v11948_v6 = vunpack.i.h.bf16 %v11946_v50  ;;  %v11947_v12 = vunpack.i.l.bf16 %v11946_v50 }
  0x9e   :  { %vm16838_vm7 = vcmp.lt.s32.totalorder %v12637_v11, 16  ;;  %v717_v19 = vsel %vm173_vm13, %v707_v56, 0  ;;  %v723_v22 = vsel %vm173_vm13, %v709_v39, 0  ;;  %v986_v23 = vrot.slane %v982_v36, %v12683_v20 }
  0x9f   :  { %vm1132_vm5 = vmand %vm13033_vm14, %vm16838_vm7  ;;  %v994_v47 = vrot.slane %v982_v36, %v12686_v21  ;;  %v858_v28 = vpack.c.bf16 %v854_v7, %v854_v7  ;;  %v860_v29 = vpack.c.bf16 %v856_v44, %v856_v44  ;;  %v853_v25 = vsel %vm13041_vm2, %v826_v59, 0.0 }
  0xa0   :  { %v855_v13 = vsel %vm13045_vm1, %v824_v9, 0.0  ;;  %v1133_v30 = vsel %vm1132_vm5, 1, %v12433_v4  ;;  %vm13075_vm0 = vcmp.eq.s32.totalorder %v998_v61, 1  ;;  %v973_v32 = vsel %vm972_vm9, %v11952_v5, %v11953_v40 }
  0xa1   :  { %11321 = vmatmul.mubr.msk.bf16.vlgmr.msra.gmra.mrb[12].mxu0 %vm16839_vm10, %v11319_v58  ;;  %vm13081_vm8 = vcmp.eq.s32.totalorder %v990_v62, 1  ;;  %v975_v38 = vsel %vm972_vm9, %v11947_v12, %v11948_v6  ;;  %v857_v41 = vpack.c.bf16 %v853_v25, %v853_v25  ;;  %v859_v42 = vpack.c.bf16 %v855_v13, %v855_v13 }
  0xa2   :  { %11323 = vmatmul.mubr.msk.bf16.vlgmr.msra.gmra.mrb[12].mxu1 %vm16826_vm4, %v11319_v58  ;;  %729 = vmatpush1.bf16.msra.mxu0 %v717_v19  ;;  %vm1122_vm11 = vcmp.lt.s32.totalorder %v12697_v24, 35  ;;  %vm16844_vm14 = vcmp.ge.s32.totalorder %v12634_v10, 0  ;;  %v1149_v45 = vrot.slane %v1133_v30, %v12674_v18  ;;  %v1141_v46 = vrot.slane %v1133_v30, %v12671_v17  ;;  %v11971_v19 = vpop.permute.xlu1 %11970 }
  0xa3   :  { %770 = vmatpush1.bf16.msra.mxu1 %v723_v22  ;;  %760 = vmatprep.mubr.bf16.mxu0 %v12433_v4  ;;  %vm13094_vm2 = vmand %vm13007_vm6, %vm16844_vm14  ;;  %vm13102_vm1 = vcmp.eq.s32.totalorder %v986_v23, 1  ;;  %vm13106_vm7 = vcmp.eq.s32.totalorder %v994_v47, 1  ;;  %v1006_v27 = vsel %vm13075_vm0, %v973_v32, 0.0  ;;  %v974_v51 = vsel %vm972_vm9, %v11948_v6, %v11952_v5  ;;  %v11966_v22 = vpop.permute.xlu0 %11965 }
  0xa4   :  { %801 = vmatprep.mubr.bf16.mxu1 %v12433_v4  ;;  %11330 = vmatprep.subr.msk.bf16.mxu0 %vm173_vm13, %v858_v28  ;;  %v976_v36 = vsel %vm972_vm9, %v11953_v40, %v11947_v12  ;;  %v1004_v37 = vsel %vm13081_vm8, %v975_v38, 0.0  ;;  %v11963_v54 = vunpack.i.h.bf16 %v11961_v0  ;;  %v11962_v33 = vunpack.i.l.bf16 %v11961_v0  ;;  %vm16852_vm9 = vmmov %vm16826_vm4 }
  0xa5   :  { %11332 = vmatprep.subr.msk.bf16.mxu1 %vm173_vm13, %v860_v29  ;;  %v11958_v56 = vunpack.i.h.bf16 %v11956_v1  ;;  %v11957_v39 = vunpack.i.l.bf16 %v11956_v1  ;;  %vm16851_vm5 = vcmp.lt.s32.totalorder %v12634_v10, 16  ;;  %v867_v57 = vsel %vm173_vm13, %v857_v41, 0 }
  0xa6   :  { %vm1279_vm10 = vmand %vm13094_vm2, %vm16851_vm5  ;;  %v873_v50 = vsel %vm173_vm13, %v859_v42, 0  ;;  %v1137_v60 = vrot.slane %v1133_v30, %v12683_v20  ;;  %v1145_v61 = vrot.slane %v1133_v30, %v12686_v21  ;;  %v1008_v62 = vpack.c.bf16 %v1004_v37, %v1004_v37 }
  0xa7   :  { %v1010_v63 = vpack.c.bf16 %v1006_v27, %v1006_v27  ;;  %v1003_v52 = vsel %vm13102_vm1, %v976_v36, 0.0  ;;  %v1005_v44 = vsel %vm13106_vm7, %v974_v51, 0.0  ;;  %v1280_v9 = vsel %vm1279_vm10, 1, %v12433_v4 }
  0xa8   :  { %vm16853_vm0 = vcmp.ge.s32.totalorder %v12646_v14, 0  ;;  %vm13144_vm14 = vcmp.eq.s32.totalorder %v1149_v45, 1  ;;  %v1123_v58 = vsel %vm1122_vm11, %v11962_v33, %v11963_v54  ;;  %vm13150_vm2 = vcmp.eq.s32.totalorder %v1141_v46, 1 }
  0xa9   :  { %11326 = vmatmul.mubr.msk.bf16.vlgmr.msra.gmra.mrb[16].mxu0 %vm16852_vm9, %v11324_v53  ;;  %vm13140_vm8 = vmand %vm13007_vm6, %vm16853_vm0  ;;  %v1125_v5 = vsel %vm1122_vm11, %v11957_v39, %v11958_v56  ;;  %v1007_v6 = vpack.c.bf16 %v1003_v52, %v1003_v52  ;;  %v1009_v12 = vpack.c.bf16 %v1005_v44, %v1005_v44  ;;  %vm1273_vm1 = vcmp.lt.s32.totalorder %v12697_v24, 34  ;;  %v12401_v44 = vld [vmem:[%s16732_s0] sm:$0xff] }
  0xaa   :  { %11328 = vmatmul.mubr.msk.bf16.vlgmr.msra.gmra.mrb[16].mxu1 %vm16826_vm4, %v11324_v53  ;;  %879 = vmatpush1.bf16.msra.mxu0 %v867_v57  ;;  %vm13159_vm7 = vcmp.eq.s32.totalorder %v1137_v60, 1  ;;  %v1296_v47 = vrot.slane %v1280_v9, %v12674_v18  ;;  %v1288_v28 = vrot.slane %v1280_v9, %v12671_v17  ;;  %vm13167_vm5 = vcmp.eq.s32.totalorder %v1145_v61, 1  ;;  %v11981_v57 = vpop.permute.xlu1 %11980 }
  0xab   :  { %920 = vmatpush1.bf16.msra.mxu1 %v873_v50  ;;  %910 = vmatprep.mubr.bf16.mxu0 %v12433_v4  ;;  %vm16864_vm10 = vcmp.lt.s32.totalorder %v12646_v14, 16  ;;  %v1284_v25 = vrot.slane %v1280_v9, %v12683_v20  ;;  %v1157_v13 = vsel %vm13144_vm14, %v1123_v58, 0.0  ;;  %v1124_v30 = vsel %vm1122_vm11, %v11958_v56, %v11962_v33  ;;  %v11976_v50 = vpop.permute.xlu0 %11975 }
  0xac   :  { %951 = vmatprep.mubr.bf16.mxu1 %v12433_v4  ;;  %11335 = vmatprep.subr.msk.bf16.mxu0 %vm173_vm13, %v1008_v62  ;;  %vm1427_vm9 = vmand %vm13140_vm8, %vm16864_vm10  ;;  %v1126_v31 = vsel %vm1122_vm11, %v11963_v54, %v11957_v39  ;;  %v1155_v32 = vsel %vm13150_vm2, %v1125_v5, 0.0  ;;  %v11973_v38 = vunpack.i.h.bf16 %v11971_v19  ;;  %v11972_v41 = vunpack.i.l.bf16 %v11971_v19  ;;  %v11334_v5 = vld [vmem:[%s16739_s7 + $0xc] sm:$0x3]  ;;  %v11349_v62 = vld [vmem:[%s16739_s7 + $0x12] sm:$0x3] }
  0xad   :  { %11337 = vmatprep.subr.msk.bf16.mxu1 %vm173_vm13, %v1010_v63  ;;  %v11968_v42 = vunpack.i.h.bf16 %v11966_v22  ;;  %v11967_v0 = vunpack.i.l.bf16 %v11966_v22  ;;  %v1017_v1 = vsel %vm173_vm13, %v1007_v6, 0  ;;  %v1023_v43 = vsel %vm173_vm13, %v1009_v12, 0  ;;  %vm16865_vm11 = vmmov %vm16826_vm4  ;;  %v12400_v63 = vld [vmem:[%s16732_s0 + $0x8] sm:$0xff] }
  0xae   :  { %v13190_v45 = vsel %vm1427_vm9, 1, %v12433_v4  ;;  %v1292_v46 = vrot.slane %v1280_v9, %v12686_v21  ;;  %v1159_v48 = vpack.c.bf16 %v1155_v32, %v1155_v32  ;;  %v1161_v26 = vpack.c.bf16 %v1157_v13, %v1157_v13 }
  0xaf   :  { %v1154_v27 = vsel %vm13159_vm7, %v1126_v31, 0.0  ;;  %v1156_v51 = vsel %vm13167_vm5, %v1124_v30, 0.0  ;;  %vm13199_vm0 = vcmp.eq.s32.totalorder %v1296_v47, 1  ;;  %v1274_v37 = vsel %vm1273_vm1, %v11972_v41, %v11973_v38 }
  0xb0   :  { %vm13205_vm8 = vcmp.eq.s32.totalorder %v1288_v28, 1  ;;  %v1276_v54 = vsel %vm1273_vm1, %v11967_v0, %v11968_v42  ;;  %vm1421_vm14 = vcmp.lt.s32.totalorder %v12697_v24, 33  ;;  %v1158_v33 = vpack.c.bf16 %v1154_v27, %v1154_v27 }
  0xb1   :  { %11331 = vmatmul.mubr.msk.bf16.vlgmr.msra.gmra.mrb[20].mxu0 %vm16865_vm11, %v11329_v34  ;;  %v1160_v56 = vpack.c.bf16 %v1156_v51, %v1156_v51  ;;  %v1444_v39 = vrot.slane %v13190_v45, %v12674_v18  ;;  %vm13216_vm2 = vcmp.eq.s32.totalorder %v1284_v25, 1  ;;  %v1436_v61 = vrot.slane %v13190_v45, %v12671_v17 }
  0xb2   :  { %11333 = vmatmul.mubr.msk.bf16.vlgmr.msra.gmra.mrb[20].mxu1 %vm16826_vm4, %v11329_v34  ;;  %1029 = vmatpush1.bf16.msra.mxu0 %v1017_v1  ;;  %vm13224_vm7 = vcmp.eq.s32.totalorder %v1292_v46, 1  ;;  %v13232_v52 = vpack.i.bf16 %v12574_v3, %v12400_v63  ;;  %v13238_v9 = vpack.i.bf16 %v12572_v2, %v12401_v44  ;;  %v1304_v59 = vsel %vm13199_vm0, %v1274_v37, 0.0 }
  0xb3   :  { %1070 = vmatpush1.bf16.msra.mxu1 %v1023_v43  ;;  %1060 = vmatprep.mubr.bf16.mxu0 %v12433_v4  ;;  %v1275_v7 = vsel %vm1273_vm1, %v11968_v42, %v11972_v41  ;;  %v1277_v58 = vsel %vm1273_vm1, %v11973_v38, %v11967_v0  ;;  %v1302_v40 = vsel %vm13205_vm8, %v1276_v54, 0.0  ;;  %v11983_v6 = vunpack.i.h.bf16 %v11981_v57  ;;  %vm16874_vm1 = vmmov %vm16826_vm4  ;;  %v11344_v54 = vld [vmem:[%s16739_s7 + $0x10] sm:$0x3] }
  0xb4   :  { %1101 = vmatprep.mubr.bf16.mxu1 %v12433_v4  ;;  %11340 = vmatprep.subr.msk.bf16.mxu0 %vm173_vm13, %v1159_v48  ;;  %v11982_v12 = vunpack.i.l.bf16 %v11981_v57  ;;  %v11978_v19 = vunpack.i.h.bf16 %v11976_v50  ;;  %v11977_v22 = vunpack.i.l.bf16 %v11976_v50  ;;  %v1168_v23 = vsel %vm173_vm13, %v1158_v33, 0  ;;  %vm16875_vm5 = vmmov %vm16874_vm1  ;;  %v11991_v57 = vpop.permute.xlu1 %11990  ;;  %v11986_v50 = vpop.permute.xlu0 %11985 }
  0xb5   :  { %11342 = vmatprep.subr.msk.bf16.mxu1 %vm173_vm13, %v1161_v26  ;;  %12080 = vrot.lane.b32.xlu1 %v13232_v52, %s12453_s16  ;;  %v1174_v47 = vsel %vm173_vm13, %v1160_v56, 0  ;;  %v1432_v28 = vrot.slane %v13190_v45, %v12683_v20  ;;  %v1440_v29 = vrot.slane %v13190_v45, %v12686_v21  ;;  %v13259_v25 = vpack.c.bf16 %v1302_v40, %v1302_v40  ;;  %v11339_v45 = vld [vmem:[%s16739_s7 + $0xe] sm:$0x3]  ;;  %vm16876_vm0 = vmmov %vm16874_vm1 }
  0xb6   :  { %12075 = vrot.lane.b32.xlu0 %v13238_v9, %s12453_s16  ;;  %v13261_v13 = vpack.c.bf16 %v1304_v59, %v1304_v59  ;;  %v1301_v30 = vsel %vm13216_vm2, %v1277_v58, 0.0  ;;  %v1303_v31 = vsel %vm13224_vm7, %v1275_v7, 0.0  ;;  %vm1448_vm10 = vcmp.eq.s32.totalorder %v1444_v39, 1  ;;  %vm16877_vm8 = vmmov %vm16876_vm0  ;;  %s12461_s16 = smov 115  }
  0xb7   :  { %v1422_v32 = vsel %vm1421_vm14, %v11982_v12, %v11983_v6  ;;  %vm1446_vm9 = vcmp.eq.s32.totalorder %v1436_v61, 1  ;;  %v1424_v34 = vsel %vm1421_vm14, %v11977_v22, %v11978_v19  ;;  %v1305_v38 = vpack.c.bf16 %v1301_v30, %v1301_v30 }
  0xb8   :  { %v1307_v41 = vpack.c.bf16 %v1303_v31, %v1303_v31  ;;  %v1423_v42 = vsel %vm1421_vm14, %v11978_v19, %v11982_v12  ;;  %vm1445_vm11 = vcmp.eq.s32.totalorder %v1432_v28, 1  ;;  %vm1447_vm4 = vcmp.eq.s32.totalorder %v1440_v29, 1 }
  0xb9   :  { %11336 = vmatmul.mubr.msk.bf16.vlgmr.msra.gmra.mrb[24].mxu0 %vm16874_vm1, %v11334_v5  ;;  %v1452_v0 = vsel %vm1448_vm10, %v1422_v32, 0.0  ;;  %v1425_v1 = vsel %vm1421_vm14, %v11983_v6, %v11977_v22  ;;  %v1450_v43 = vsel %vm1446_vm9, %v1424_v34, 0.0  ;;  %12090 = vrot.lane.b32.xlu1 %v13232_v52, %s12454_s17  ;;  %v13288_v46 = vsel %vm173_vm13, %v1305_v38, 0  ;;  %vm16881_vm10 = vmmov %vm16876_vm0  ;;  %v12001_v34 = vpop.permute.xlu1 %12000  ;;  %v11996_v38 = vpop.permute.xlu0 %11995 }
  0xba   :  { %11338 = vmatmul.mubr.msk.bf16.vlgmr.msra.gmra.mrb[24].mxu1 %vm16875_vm5, %v11334_v5  ;;  %1180 = vmatpush1.bf16.msra.mxu0 %v1168_v23  ;;  %v13291_v48 = vsel %vm173_vm13, %v1307_v41, 0  ;;  %v1454_v26 = vpack.c.bf16 %v1450_v43, %v1450_v43  ;;  %v1456_v27 = vpack.c.bf16 %v1452_v0, %v1452_v0  ;;  %v1449_v51 = vsel %vm1445_vm11, %v1425_v1, 0.0  ;;  %vm16880_vm5 = vmmov %vm16876_vm0  ;;  %v1412_v0 = vld [vmem:[%s16741_s9] sm:$0x3] }
  0xbb   :  { %1221 = vmatpush1.bf16.msra.mxu1 %v1174_v47  ;;  %1211 = vmatprep.mubr.bf16.mxu0 %v12433_v4  ;;  %v1451_v36 = vsel %vm1447_vm4, %v1423_v42, 0.0  ;;  %v1453_v37 = vpack.c.bf16 %v1449_v51, %v1449_v51  ;;  %vm16878_vm14 = vcmp.ge.s32.totalorder %v12630_v8, 0  ;;  %vm16879_vm7 = vcmp.lt.s32.totalorder %v12630_v8, 16  ;;  %vm16882_vm11 = vmmov %vm16876_vm0  ;;  %v11354_v47 = vld [vmem:[%s16741_s9 + $0x2] sm:$0x3] }
  0xbc   :  { %1252 = vmatprep.mubr.bf16.mxu1 %v12433_v4  ;;  %11345 = vmatprep.subr.msk.bf16.mxu0 %vm173_vm13, %v13259_v25  ;;  %v1455_v53 = vpack.c.bf16 %v1451_v36, %v1451_v36  ;;  %vm1745_vm2 = vmand %vm13007_vm6, %vm16878_vm14  ;;  %v11993_v63 = vunpack.i.h.bf16 %v11991_v57  ;;  %v11992_v44 = vunpack.i.l.bf16 %v11991_v57  ;;  %v11988_v59 = vunpack.i.h.bf16 %v11986_v50 }
  0xbd   :  { %11347 = vmatprep.subr.msk.bf16.mxu1 %vm173_vm13, %v13261_v13  ;;  %12085 = vrot.lane.b32.xlu0 %v13238_v9, %s12454_s17  ;;  %v1463_v33 = vsel %vm173_vm13, %v1453_v37, 0  ;;  %vm1746_vm1 = vmand %vm1745_vm2, %vm16879_vm7  ;;  %v11987_v7 = vunpack.i.l.bf16 %v11986_v50  ;;  %vm1740_vm9 = vcmp.lt.s32.totalorder %v12697_v24, 32  ;;  %vm16884_vm7 = vcmp.ge.s32.totalorder %v12666_v16, 0  ;;  %s12466_s17 = smov 110  }
  0xbe   :  { %12100 = vrot.lane.b32.xlu1 %v13232_v52, %s12455_s20  ;;  %v1469_v56 = vsel %vm173_vm13, %v1455_v53, 0  ;;  %v1747_v39 = vsel %vm1746_vm1, 1, %v12433_v4  ;;  %vm16883_vm4 = vmmov %vm16876_vm0  ;;  %v1741_v5 = vsel %vm1740_vm9, %v11992_v44, %v11993_v63  ;;  %v1742_v19 = vsel %vm1740_vm9, %v11988_v59, %v11992_v44 }
  0xbf   :  { %v1763_v60 = vrot.slane %v1747_v39, %v12674_v18  ;;  %v1755_v61 = vrot.slane %v1747_v39, %v12671_v17  ;;  %v1751_v58 = vrot.slane %v1747_v39, %v12683_v20  ;;  %v1759_v40 = vrot.slane %v1747_v39, %v12686_v21  ;;  %vm1983_vm1 = vmand %vm13007_vm6, %vm16884_vm7  ;;  %v11363_v39 = vld [vmem:[%s16739_s7 + $0x14] sm:$0x3] }
  0xc0   :  { %v1743_v6 = vsel %vm1740_vm9, %v11987_v7, %v11988_v59  ;;  %v1744_v22 = vsel %vm1740_vm9, %v11993_v63, %v11987_v7  ;;  %vm16887_vm9 = vmmov %vm16883_vm4  ;;  %v12003_v1 = vunpack.i.h.bf16 %v12001_v34  ;;  %v12002_v43 = vunpack.i.l.bf16 %v12001_v34  ;;  %v12011_v63 = vpop.permute.xlu1 %12010  ;;  %v12006_v7 = vpop.permute.xlu0 %12005 }
  0xc1   :  { %11341 = vmatmul.mubr.msk.bf16.vlgmr.msra.gmra.mrb[28].mxu0 %vm16876_vm0, %v11339_v45  ;;  %12095 = vrot.lane.b32.xlu0 %v13238_v9, %s12455_s20  ;;  %vm1767_vm0 = vcmp.eq.s32.totalorder %v1763_v60, 1  ;;  %vm1764_vm14 = vcmp.eq.s32.totalorder %v1751_v58, 1  ;;  %vm1766_vm2 = vcmp.eq.s32.totalorder %v1759_v40, 1  ;;  %v12013_v40 = vunpack.i.h.bf16 %v12011_v63 }
  0xc2   :  { %11343 = vmatmul.mubr.msk.bf16.vlgmr.msra.gmra.mrb[28].mxu1 %vm16877_vm8, %v11339_v45  ;;  %1327 = vmatpush1.bf16.msra.mxu0 %v13288_v46  ;;  %vm1765_vm8 = vcmp.eq.s32.totalorder %v1755_v61, 1  ;;  %v1771_v12 = vsel %vm1767_vm0, %v1741_v5, 0.0  ;;  %v11998_v45 = vunpack.i.h.bf16 %v11996_v38  ;;  %vm16888_vm0 = vmmov %vm16887_vm9  ;;  %v12012_v5 = vunpack.i.l.bf16 %v12011_v63 }
  0xc3   :  { %1368 = vmatpush1.bf16.msra.mxu1 %v13291_v48  ;;  %1358 = vmatprep.mubr.bf16.mxu0 %v12433_v4  ;;  %v1769_v23 = vsel %vm1765_vm8, %v1743_v6, 0.0  ;;  %v1775_v29 = vpack.c.bf16 %v1771_v12, %v1771_v12  ;;  %vm16889_vm8 = vmmov %vm16888_vm0  ;;  %v11368_v6 = vld [vmem:[%s16741_s9 + $0x4] sm:$0x3] }
  0xc4   :  { %1399 = vmatprep.mubr.bf16.mxu1 %v12433_v4  ;;  %11350 = vmatprep.subr.msk.bf16.mxu0 %vm173_vm13, %v1454_v26  ;;  %v1773_v28 = vpack.c.bf16 %v1769_v23, %v1769_v23 }
  0xc5   :  { %11352 = vmatprep.subr.msk.bf16.mxu1 %vm173_vm13, %v1456_v27  ;;  %12110 = vrot.lane.b32.xlu1 %v13232_v52, %s12456_s23 }
  0xc6   :  { %12105 = vrot.lane.b32.xlu0 %v13238_v9, %s12456_s23 }
  0xc9   :  { %11346 = vmatmul.mubr.msk.bf16.vlgmr.msra.gmra.mrb[32].mxu0 %vm16880_vm5, %v11344_v54  ;;  %12120 = vrot.lane.b32.xlu1 %v13232_v52, %s12457_s26  ;;  %vm16885_vm5 = vcmp.lt.s32.totalorder %v12666_v16, 16 }
  0xca   :  { %11348 = vmatmul.mubr.msk.bf16.vlgmr.msra.gmra.mrb[32].mxu1 %vm16881_vm10, %v11344_v54  ;;  %1475 = vmatpush1.bf16.msra.mxu0 %v1463_v33  ;;  %vm1984_vm10 = vmand %vm1983_vm1, %vm16885_vm5  ;;  %vm16890_vm5 = vcmp.ge.s32.totalorder %v12771_v55, 0 }
  0xcb   :  { %1516 = vmatpush1.bf16.msra.mxu1 %v1469_v56  ;;  %11355 = vmatprep.subr.msk.bf16.mxu0 %vm173_vm13, %v1454_v26  ;;  %v1985_v30 = vsel %vm1984_vm10, 1, %v12433_v4  ;;  %vm2221_vm10 = vmand %vm13007_vm6, %vm16890_vm5 }
  0xcc   :  { %11357 = vmatprep.subr.msk.bf16.mxu1 %vm173_vm13, %v1456_v27  ;;  %1506 = vmatprep.mubr.bf16.mxu0 %v12433_v4  ;;  %v2001_v41 = vrot.slane %v1985_v30, %v12674_v18  ;;  %v1993_v42 = vrot.slane %v1985_v30, %v12671_v17  ;;  %v1989_v27 = vrot.slane %v1985_v30, %v12683_v20 }
  0xcd   :  { %1547 = vmatprep.mubr.bf16.mxu1 %v12433_v4  ;;  %12115 = vrot.lane.b32.xlu0 %v13238_v9, %s12457_s26  ;;  %v1997_v51 = vrot.slane %v1985_v30, %v12686_v21  ;;  %v13429_v30 = vld [vmem:[%s16733_s1] sm:$0xf]  ;;  %s12465_s26 = smov 111  }
  0xce   :  { %vm2002_vm7 = vcmp.eq.s32.totalorder %v1989_v27, 1  ;;  %12130 = vrot.lane.b32.xlu1 %v13232_v52, %s12458_s30 }
  0xcf   :  { %vm2004_vm1 = vcmp.eq.s32.totalorder %v1997_v51, 1 }
  0xd1   :  { %11351 = vmatmul.mubr.msk.bf16.vlgmr.msra.gmra.mrb[36].mxu0 %vm16882_vm11, %v11349_v62  ;;  %vm16886_vm11 = vmmov %vm16883_vm4  ;;  %12125 = vrot.lane.b32.xlu0 %v13238_v9, %s12458_s30  ;;  %s12464_s30 = smov 112  }
  0xd2   :  { %11353 = vmatmul.mubr.msk.bf16.vlgmr.msra.gmra.mrb[36].mxu1 %vm16883_vm4, %v11349_v62  ;;  %1566 = vmatpush1.bf16.msra.mxu0 %v1463_v33  ;;  %vm1978_vm4 = vcmp.lt.s32.totalorder %v12697_v24, 31 }
  0xd3   :  { %1607 = vmatpush1.bf16.msra.mxu1 %v1469_v56  ;;  %11359 = vmatprep.subr.msk.bf16.mxu0 %vm173_vm13, %v13259_v25  ;;  %v1768_v25 = vsel %vm1764_vm14, %v1744_v22, 0.0  ;;  %vm2005_vm14 = vcmp.eq.s32.totalorder %v2001_v41, 1  ;;  %v1979_v36 = vsel %vm1978_vm4, %v12002_v43, %v12003_v1  ;;  %v1980_v54 = vsel %vm1978_vm4, %v11998_v45, %v12002_v43 }
  0xd4   :  { %11361 = vmatprep.subr.msk.bf16.mxu1 %vm173_vm13, %v13261_v13  ;;  %1597 = vmatprep.mubr.bf16.mxu0 %v12433_v4  ;;  %v1770_v13 = vsel %vm1766_vm2, %v1742_v19, 0.0  ;;  %v1772_v31 = vpack.c.bf16 %v1768_v25, %v1768_v25  ;;  %vm2003_vm2 = vcmp.eq.s32.totalorder %v1993_v42, 1  ;;  %v2009_v53 = vsel %vm2005_vm14, %v1979_v36, 0.0  ;;  %v11373_v42 = vld [vmem:[%s16739_s7 + $0x16] sm:$0x3] }
  0xd5   :  { %1638 = vmatprep.mubr.bf16.mxu1 %v12433_v4  ;;  %v1774_v32 = vpack.c.bf16 %v1770_v13, %v1770_v13  ;;  %v2013_v50 = vpack.c.bf16 %v2009_v53, %v2009_v53  ;;  %v2008_v61 = vsel %vm2004_vm1, %v1980_v54, 0.0  ;;  %v12008_v19 = vunpack.i.h.bf16 %v12006_v7  ;;  %vm2459_vm1 = vmand %vm13007_vm6, %vm978_vm12  ;;  %12140 = vrot.lane.b32.xlu1 %v13232_v52, %s12459_s24 }
  0xd6   :  { %v2012_v59 = vpack.c.bf16 %v2008_v61, %v2008_v61  ;;  %v12007_v22 = vunpack.i.l.bf16 %v12006_v7  ;;  %vm2460_vm6 = vmand %vm2459_vm1, %vm980_vm3  ;;  %12135 = vrot.lane.b32.xlu0 %v13238_v9, %s12459_s24  ;;  %vm16899_vm1 = vcmp.lt.s32.totalorder %v12637_v11, 16  ;;  %s12463_s24 = smov 113  }
  0xd7   :  { %v1788_v26 = vsel %vm173_vm13, %v1774_v32, 0 }
  0xd9   :  { %11356 = vmatmul.mubr.msk.bf16.vlgmr.msra.gmra.mrb[40].mxu0 %vm16886_vm11, %v11354_v47  ;;  %vm2222_vm11 = vmand %vm2221_vm10, %vm830_vm15  ;;  %12150 = vrot.lane.b32.xlu1 %v13232_v52, %s12460_s2 }
  0xda   :  { %11358 = vmatmul.mubr.msk.bf16.vlgmr.msra.gmra.mrb[40].mxu1 %vm16887_vm9, %v11354_v47  ;;  %1651 = vmatpush1.bf16.msra.mxu0 %v13288_v46  ;;  %v11997_v46 = vunpack.i.l.bf16 %v11996_v38  ;;  %vm16891_vm9 = vmmov %vm16888_vm0  ;;  %v2223_v62 = vsel %vm2222_vm11, 1, %v12433_v4  ;;  %v2026_v47 = vsel %vm173_vm13, %v2012_v59, 0 }
  0xdb   :  { %1692 = vmatpush1.bf16.msra.mxu1 %v13291_v48  ;;  %1682 = vmatprep.mubr.bf16.mxu0 %v12433_v4  ;;  %v1782_v48 = vsel %vm173_vm13, %v1772_v31, 0  ;;  %v2239_v58 = vrot.slane %v2223_v62, %v12674_v18  ;;  %v2231_v12 = vrot.slane %v2223_v62, %v12671_v17  ;;  %v2235_v25 = vrot.slane %v2223_v62, %v12686_v21 }
  0xdc   :  { %1723 = vmatprep.mubr.bf16.mxu1 %v12433_v4  ;;  %11364 = vmatprep.subr.msk.bf16.mxu0 %vm173_vm13, %v1773_v28  ;;  %v1981_v37 = vsel %vm1978_vm4, %v11997_v46, %v11998_v45  ;;  %v1982_v33 = vsel %vm1978_vm4, %v12003_v1, %v11997_v46  ;;  %vm16892_vm4 = vmmov %vm16888_vm0  ;;  %v2606_v31 = vadd.s32 4294967295, %v13429_v30  ;;  %v2461_v45 = vsel %vm2460_vm6, 1, %v12433_v4  ;;  %v12021_v46 = vpop.permute.xlu1 %12020 }
  0xdd   :  { %11366 = vmatprep.subr.msk.bf16.mxu1 %vm173_vm13, %v1775_v29  ;;  %v2007_v56 = vsel %vm2003_vm2, %v1981_v37, 0.0  ;;  %v2006_v60 = vsel %vm2002_vm7, %v1982_v33, 0.0  ;;  %vm16894_vm14 = vmmov %vm16892_vm4  ;;  %vm2243_vm2 = vcmp.eq.s32.totalorder %v2239_v58, 1  ;;  %vm2241_vm7 = vcmp.eq.s32.totalorder %v2231_v12, 1  ;;  %12145 = vrot.lane.b32.xlu0 %v13238_v9, %s12460_s2  ;;  %s12475_s2 = smov 83  }
  0xde   :  { %v2011_v57 = vpack.c.bf16 %v2007_v56, %v2007_v56  ;;  %v2010_v44 = vpack.c.bf16 %v2006_v60, %v2006_v60  ;;  %vm2242_vm10 = vcmp.eq.s32.totalorder %v2235_v25, 1  ;;  %vm2607_vm11 = vcmp.ge.s32.totalorder %v2606_v31, 0  ;;  %vm16900_vm6 = vmmov %vm16892_vm4  ;;  %12160 = vrot.lane.b32.xlu1 %v13232_v52, %s12461_s16 }
  0xdf   :  { %v2477_v36 = vrot.slane %v2461_v45, %v12674_v18  ;;  %v12023_v37 = vunpack.i.h.bf16 %v12021_v46  ;;  %v12022_v53 = vunpack.i.l.bf16 %v12021_v46  ;;  %v2469_v54 = vrot.slane %v2461_v45, %v12671_v17 }
  0xe0   :  { %v2020_v23 = vsel %vm173_vm13, %v2010_v44, 0  ;;  %v2465_v44 = vrot.slane %v2461_v45, %v12683_v20  ;;  %v2473_v59 = vrot.slane %v2461_v45, %v12686_v21 }
  0xe1   :  { %11360 = vmatmul.mubr.msk.bf16.vlgmr.msra.gmra.mrb[44].mxu0 %vm16888_vm0, %v1412_v0  ;;  %vm2216_vm0 = vcmp.lt.s32.totalorder %v12697_v24, 30  ;;  %12155 = vrot.lane.b32.xlu0 %v13238_v9, %s12461_s16  ;;  %s12476_s16 = smov 82  }
  0xe2   :  { %11362 = vmatmul.mubr.msk.bf16.vlgmr.msra.gmra.mrb[44].mxu1 %vm16889_vm8, %v1412_v0  ;;  %1794 = vmatpush1.bf16.msra.mxu0 %v1782_v48  ;;  %vm16893_vm8 = vmmov %vm16892_vm4  ;;  %v2219_v13 = vsel %vm2216_vm0, %v12007_v22, %v12008_v19  ;;  %v2218_v34 = vsel %vm2216_vm0, %v12008_v19, %v12012_v5  ;;  %v2220_v38 = vsel %vm2216_vm0, %v12013_v40, %v12007_v22 }
  0xe3   :  { %1835 = vmatpush1.bf16.msra.mxu1 %v1788_v26  ;;  %11369 = vmatprep.subr.msk.bf16.mxu0 %vm173_vm13, %v1773_v28  ;;  %v2217_v28 = vsel %vm2216_vm0, %v12012_v5, %v12013_v40  ;;  %v2245_v41 = vsel %vm2241_vm7, %v2219_v13, 0.0  ;;  %v2246_v43 = vsel %vm2242_vm10, %v2218_v34, 0.0  ;;  %vm2454_vm7 = vcmp.lt.s32.totalorder %v12697_v24, 29  ;;  %v12031_v5 = vpop.permute.xlu1 %12030 }
  0xe4   :  { %11371 = vmatprep.subr.msk.bf16.mxu1 %vm173_vm13, %v1775_v29  ;;  %1825 = vmatprep.mubr.bf16.mxu0 %v12433_v4  ;;  %v2227_v29 = vrot.slane %v2223_v62, %v12683_v20  ;;  %v2247_v32 = vsel %vm2243_vm2, %v2217_v28, 0.0  ;;  %v2249_v35 = vpack.c.bf16 %v2245_v41, %v2245_v41  ;;  %v2250_v51 = vpack.c.bf16 %v2246_v43, %v2246_v43 }
  0xe5   :  { %1866 = vmatprep.mubr.bf16.mxu1 %v12433_v4  ;;  %v2251_v0 = vpack.c.bf16 %v2247_v32, %v2247_v32  ;;  %vm2481_vm10 = vcmp.eq.s32.totalorder %v2477_v36, 1  ;;  %v2455_v60 = vsel %vm2454_vm7, %v12022_v53, %v12023_v37  ;;  %v12032_v25 = vunpack.i.l.bf16 %v12031_v5  ;;  %12170 = vrot.lane.b32.xlu1 %v13232_v52, %s12462_s19 }
  0xe6   :  { %vm2240_vm5 = vcmp.eq.s32.totalorder %v2227_v29, 1  ;;  %v2485_v58 = vsel %vm2481_vm10, %v2455_v60, 0.0  ;;  %v12033_v29 = vunpack.i.h.bf16 %v12031_v5  ;;  %vm16906_vm10 = vmmov %vm16900_vm6  ;;  %12165 = vrot.lane.b32.xlu0 %v13238_v9, %s12462_s19  ;;  %s12477_s19 = smov 81  }
  0xe7   :  { %v2244_v1 = vsel %vm2240_vm5, %v2220_v38, 0.0 }
  0xe8   :  { %v2248_v27 = vpack.c.bf16 %v2244_v1, %v2244_v1 }
  0xe9   :  { %11365 = vmatmul.mubr.msk.bf16.vlgmr.msra.gmra.mrb[48].mxu0 %vm16891_vm9, %v11363_v39  ;;  %vm2608_vm9 = vcmp.lt.s32.totalorder %v2606_v31, 16  ;;  %v2489_v31 = vpack.c.bf16 %v2485_v58, %v2485_v58  ;;  %12180 = vrot.lane.b32.xlu1 %v13232_v52, %s12463_s24 }
  0xea   :  { %11367 = vmatmul.mubr.msk.bf16.vlgmr.msra.gmra.mrb[48].mxu1 %vm16892_vm4, %v11363_v39  ;;  %1885 = vmatpush1.bf16.msra.mxu0 %v1782_v48  ;;  %vm13452_vm0 = vmand %vm2607_vm11, %vm2608_vm9  ;;  %v11378_v39 = vld [vmem:[%s16741_s9 + $0x6] sm:$0x3]  ;;  %vm13480_vm9 = vcmp.eq.s32.totalorder %v2469_v54, 1 }
  0xeb   :  { %1926 = vmatpush1.bf16.msra.mxu1 %v1788_v26  ;;  %1916 = vmatprep.mubr.bf16.mxu0 %v12433_v4  ;;  %v12016_v26 = vpop.permute.xlu0 %12015  ;;  %vm16901_vm11 = vmmov %vm16892_vm4 }
  0xec   :  { %1957 = vmatprep.mubr.bf16.mxu1 %v12433_v4  ;;  %11374 = vmatprep.subr.msk.bf16.mxu0 %vm173_vm13, %v2011_v57  ;;  %v12018_v33 = vunpack.i.h.bf16 %v12016_v26  ;;  %v12017_v56 = vunpack.i.l.bf16 %v12016_v26 }
  0xed   :  { %11376 = vmatprep.subr.msk.bf16.mxu1 %vm173_vm13, %v2013_v50  ;;  %12175 = vrot.lane.b32.xlu0 %v13238_v9, %s12463_s24  ;;  %s12479_s24 = smov 79  }
  0xee   :  { %v2457_v62 = vsel %vm2454_vm7, %v12017_v56, %v12018_v33  ;;  %v2456_v40 = vsel %vm2454_vm7, %v12018_v33, %v12022_v53  ;;  %v11388_v33 = vld [vmem:[%s16741_s9 + $0x8] sm:$0x3]  ;;  %12190 = vrot.lane.b32.xlu1 %v13232_v52, %s12464_s30 }
  0xef   :  { %v12026_v63 = vpop.permute.xlu0 %12025  ;;  %v2483_v12 = vsel %vm13480_vm9, %v2457_v62, 0.0 }
  0xf0   :  { %v12028_v19 = vunpack.i.h.bf16 %v12026_v63  ;;  %v12027_v22 = vunpack.i.l.bf16 %v12026_v63  ;;  %v2487_v13 = vpack.c.bf16 %v2483_v12, %v2483_v12 }
  0xf1   :  { %11370 = vmatmul.mubr.msk.bf16.vlgmr.msra.gmra.mrb[52].mxu0 %vm16893_vm8, %v11368_v6  ;;  %vm16895_vm8 = vmmov %vm16892_vm4  ;;  %12185 = vrot.lane.b32.xlu0 %v13238_v9, %s12464_s30 }
  0xf2   :  { %11372 = vmatmul.mubr.msk.bf16.vlgmr.msra.gmra.mrb[52].mxu1 %vm16894_vm14, %v11368_v6  ;;  %2032 = vmatpush1.bf16.msra.mxu0 %v2020_v23  ;;  %vm16898_vm14 = vcmp.ge.s32.totalorder %v12637_v11, 0  ;;  %v2458_v6 = vsel %vm2454_vm7, %v12023_v37, %v12017_v56  ;;  %vm16905_vm7 = vcmp.lt.s32.totalorder %v12634_v10, 16 }
  0xf3   :  { %2073 = vmatpush1.bf16.msra.mxu1 %v2026_v47  ;;  %11379 = vmatprep.subr.msk.bf16.mxu0 %vm173_vm13, %v2011_v57  ;;  %vm2610_vm2 = vmand %vm13452_vm0, %vm16898_vm14  ;;  %v2258_v57 = vsel %vm173_vm13, %v2248_v27, 0  ;;  %vm2480_vm14 = vcmp.eq.s32.totalorder %v2473_v59, 1  ;;  %v12036_v26 = vpop.permute.xlu0 %12035 }
  0xf4   :  { %11381 = vmatprep.subr.msk.bf16.mxu1 %vm173_vm13, %v2013_v50  ;;  %2063 = vmatprep.mubr.bf16.mxu0 %v12433_v4  ;;  %v2264_v50 = vsel %vm173_vm13, %v2250_v51, 0  ;;  %vm2611_vm5 = vmand %vm2610_vm2, %vm16899_vm1  ;;  %vm16904_vm2 = vcmp.ge.s32.totalorder %v12634_v10, 0  ;;  %v2484_v38 = vsel %vm2480_vm14, %v2456_v40, 0.0 }
  0xf5   :  { %2104 = vmatprep.mubr.bf16.mxu1 %v12433_v4  ;;  %v2612_v7 = vsel %vm2611_vm5, 1, %v12433_v4  ;;  %vm2757_vm1 = vmand %vm13452_vm0, %vm16904_vm2  ;;  %v2488_v45 = vpack.c.bf16 %v2484_v38, %v2484_v38 }
  0xf6   :  { %v2628_v28 = vrot.slane %v2612_v7, %v12674_v18  ;;  %vm2758_vm5 = vmand %vm2757_vm1, %vm16905_vm7  ;;  %v2616_v41 = vrot.slane %v2612_v7, %v12683_v20 }
  0xf7   :  { %v2759_v46 = vsel %vm2758_vm5, 1, %v12433_v4  ;;  %v2502_v61 = vsel %vm173_vm13, %v2488_v45, 0  ;;  %vm16909_vm2 = vmmov %vm16900_vm6 }
  0xf8   :  { %vm2632_vm9 = vcmp.eq.s32.totalorder %v2628_v28, 1  ;;  %v2775_v56 = vrot.slane %v2759_v46, %v12674_v18  ;;  %vm16910_vm1 = vmmov %vm16909_vm2  ;;  %v2771_v58 = vrot.slane %v2759_v46, %v12686_v21  ;;  %v11393_v28 = vld [vmem:[%s16739_s7 + $0x1a] sm:$0x3] }
  0xf9   :  { %11375 = vmatmul.mubr.msk.bf16.vlgmr.msra.gmra.mrb[56].mxu0 %vm16892_vm4, %v11373_v42  ;;  %vm2601_vm4 = vcmp.lt.s32.totalorder %v12697_v24, 19 }
  0xfa   :  { %11377 = vmatmul.mubr.msk.bf16.vlgmr.msra.gmra.mrb[56].mxu1 %vm16895_vm8, %v11373_v42  ;;  %2123 = vmatpush1.bf16.msra.mxu0 %v2020_v23  ;;  %v2620_v23 = vrot.slane %v2612_v7, %v12671_v17  ;;  %vm2478_vm8 = vcmp.eq.s32.totalorder %v2465_v44, 1  ;;  %v2604_v32 = vsel %vm2601_vm4, %v12027_v22, %v12028_v19  ;;  %v2602_v1 = vsel %vm2601_vm4, %v12032_v25, %v12033_v29 }
  0xfb   :  { %2164 = vmatpush1.bf16.msra.mxu1 %v2026_v47  ;;  %2154 = vmatprep.mubr.bf16.mxu0 %v12433_v4  ;;  %v11383_v47 = vld [vmem:[%s16739_s7 + $0x18] sm:$0x3]  ;;  %v2482_v34 = vsel %vm2478_vm8, %v2458_v6, 0.0  ;;  %v2603_v27 = vsel %vm2601_vm4, %v12028_v19, %v12032_v25  ;;  %v2605_v51 = vsel %vm2601_vm4, %v12033_v29, %v12027_v22  ;;  %v2636_v53 = vsel %vm2632_vm9, %v2602_v1, 0.0 }
  0xfc   :  { %2195 = vmatprep.mubr.bf16.mxu1 %v12433_v4  ;;  %11384 = vmatprep.subr.msk.bf16.mxu0 %vm173_vm13, %v2249_v35  ;;  %v2486_v43 = vpack.c.bf16 %v2482_v34, %v2482_v34  ;;  %vm2629_vm8 = vcmp.eq.s32.totalorder %v2616_v41, 1  ;;  %vm2752_vm4 = vcmp.lt.s32.totalorder %v12697_v24, 18  ;;  %v2640_v63 = vpack.c.bf16 %v2636_v53, %v2636_v53 }
  0xfd   :  { %11386 = vmatprep.subr.msk.bf16.mxu1 %vm173_vm13, %v2251_v0  ;;  %v2633_v44 = vsel %vm2629_vm8, %v2605_v51, 0.0  ;;  %vm2779_vm7 = vcmp.eq.s32.totalorder %v2775_v56, 1  ;;  %vm2778_vm9 = vcmp.eq.s32.totalorder %v2771_v58, 1  ;;  %vm16912_vm8 = vcmp.lt.s32.totalorder %v12646_v14, 16 }
  0xfe   :  { %v2496_v60 = vsel %vm173_vm13, %v2486_v43, 0  ;;  %v2637_v6 = vpack.c.bf16 %v2633_v44, %v2633_v44 }
 0x100   :  { %v2647_v29 = vsel %vm173_vm13, %v2637_v6, 0 }
 0x101   :  { %11380 = vmatmul.mubr.msk.bf16.vlgmr.msra.gmra.mrb[60].mxu0 %vm16900_vm6, %v11378_v39 }
 0x102   :  { %11382 = vmatmul.mubr.msk.bf16.vlgmr.msra.gmra.mrb[60].mxu1 %vm16901_vm11, %v11378_v39  ;;  %2270 = vmatpush1.bf16.msra.mxu0 %v2258_v57  ;;  %vm13516_vm11 = vcmp.eq.s32.totalorder %v2620_v23, 1  ;;  %v2767_v39 = vrot.slane %v2759_v46, %v12671_v17 }
 0x103   :  { %2311 = vmatpush1.bf16.msra.mxu1 %v2264_v50  ;;  %11389 = vmatprep.subr.msk.bf16.mxu0 %vm173_vm13, %v2249_v35  ;;  %v12041_v35 = vpop.permute.xlu1 %12040  ;;  %v2634_v36 = vsel %vm13516_vm11, %v2604_v32, 0.0 }
 0x104   :  { %11391 = vmatprep.subr.msk.bf16.mxu1 %vm173_vm13, %v2251_v0  ;;  %2301 = vmatprep.mubr.bf16.mxu0 %v12433_v4  ;;  %v2624_v0 = vrot.slane %v2612_v7, %v12686_v21  ;;  %v12043_v37 = vunpack.i.h.bf16 %v12041_v35  ;;  %v12042_v54 = vunpack.i.l.bf16 %v12041_v35  ;;  %v2638_v62 = vpack.c.bf16 %v2634_v36, %v2634_v36 }
 0x105   :  { %2342 = vmatprep.mubr.bf16.mxu1 %v12433_v4  ;;  %v2763_v7 = vrot.slane %v2759_v46, %v12683_v20  ;;  %vm2777_vm5 = vcmp.eq.s32.totalorder %v2767_v39, 1  ;;  %v11398_v46 = vld [vmem:[%s16739_s7 + $0x1c] sm:$0x3] }
 0x106   :  { %vm2631_vm14 = vcmp.eq.s32.totalorder %v2624_v0, 1  ;;  %v2753_v40 = vsel %vm2752_vm4, %v12042_v54, %v12043_v37  ;;  %v12046_v0 = vpop.permute.xlu0 %12045 }
 0x107   :  { %v2635_v59 = vsel %vm2631_vm14, %v2603_v27, 0.0  ;;  %v2783_v23 = vsel %vm2779_vm7, %v2753_v40, 0.0  ;;  %vm2776_vm11 = vcmp.eq.s32.totalorder %v2763_v7, 1  ;;  %v12051_v41 = vpop.permute.xlu1 %12050  ;;  %v12048_v27 = vunpack.i.h.bf16 %v12046_v0 }
 0x108   :  { %v2639_v12 = vpack.c.bf16 %v2635_v59, %v2635_v59  ;;  %v12053_v43 = vunpack.i.h.bf16 %v12051_v41  ;;  %v12052_v45 = vunpack.i.l.bf16 %v12051_v41  ;;  %v12047_v51 = vunpack.i.l.bf16 %v12046_v0 }
 0x109   :  { %11385 = vmatmul.mubr.msk.bf16.vlgmr.msra.gmra.mrb[64].mxu0 %vm16906_vm10, %v11383_v47  ;;  %vm16911_vm10 = vcmp.ge.s32.totalorder %v12646_v14, 0 }
 0x10a   :  { %11387 = vmatmul.mubr.msk.bf16.vlgmr.msra.gmra.mrb[64].mxu1 %vm16900_vm6, %v11383_v47  ;;  %2361 = vmatpush1.bf16.msra.mxu0 %v2258_v57  ;;  %v12038_v57 = vunpack.i.h.bf16 %v12036_v26  ;;  %vm2995_vm6 = vmand %vm13452_vm0, %vm16911_vm10  ;;  %v2653_v25 = vsel %vm173_vm13, %v2639_v12, 0  ;;  %v12056_v6 = vpop.permute.xlu0 %12055 }
 0x10b   :  { %2402 = vmatpush1.bf16.msra.mxu1 %v2264_v50  ;;  %2392 = vmatprep.mubr.bf16.mxu0 %v12433_v4  ;;  %v12037_v50 = vunpack.i.l.bf16 %v12036_v26  ;;  %vm2996_vm14 = vmand %vm2995_vm6, %vm16912_vm8  ;;  %v12061_v58 = vpop.permute.xlu1 %12060 }
 0x10c   :  { %2433 = vmatprep.mubr.bf16.mxu1 %v12433_v4  ;;  %11394 = vmatprep.subr.msk.bf16.mxu0 %vm173_vm13, %v2487_v13  ;;  %v2754_v19 = vsel %vm2752_vm4, %v12038_v57, %v12042_v54  ;;  %v2997_v38 = vsel %vm2996_vm14, 1, %v12433_v4 }
 0x10d   :  { %11396 = vmatprep.subr.msk.bf16.mxu1 %vm173_vm13, %v2489_v31  ;;  %v2755_v5 = vsel %vm2752_vm4, %v12037_v50, %v12038_v57  ;;  %v2756_v22 = vsel %vm2752_vm4, %v12043_v37, %v12037_v50  ;;  %v2787_v31 = vpack.c.bf16 %v2783_v23, %v2783_v23  ;;  %v2782_v34 = vsel %vm2778_vm9, %v2754_v19, 0.0  ;;  %vm16913_vm4 = vmmov %vm16910_vm1  ;;  %v11408_v23 = vld [vmem:[%s16741_s9 + $0xa] sm:$0x3] }
 0x10e   :  { %v2781_v47 = vsel %vm2777_vm5, %v2755_v5, 0.0  ;;  %v2780_v32 = vsel %vm2776_vm11, %v2756_v22, 0.0  ;;  %v2786_v35 = vpack.c.bf16 %v2782_v34, %v2782_v34  ;;  %v3013_v1 = vrot.slane %v2997_v38, %v12674_v18  ;;  %v12066_v52 = vpop.permute.xlu0 %12065 }
 0x10f   :  { %v2785_v13 = vpack.c.bf16 %v2781_v47, %v2781_v47  ;;  %v2784_v42 = vpack.c.bf16 %v2780_v32, %v2780_v32  ;;  %v3005_v26 = vrot.slane %v2997_v38, %v12671_v17  ;;  %v3001_v54 = vrot.slane %v2997_v38, %v12683_v20 }
 0x110   :  { %v2800_v37 = vsel %vm173_vm13, %v2786_v35, 0  ;;  %vm3017_vm10 = vcmp.eq.s32.totalorder %v3013_v1, 1  ;;  %vm16917_vm11 = vcmp.ge.s32.totalorder %v12630_v8, 0  ;;  %v12063_v19 = vunpack.i.h.bf16 %v12061_v58  ;;  %v11413_v1 = vld [vmem:[%s16739_s7 + $0x20] sm:$0x3] }
 0x111   :  { %11390 = vmatmul.mubr.msk.bf16.vlgmr.msra.gmra.mrb[68].mxu0 %vm16909_vm2, %v11388_v33  ;;  %vm16914_vm2 = vmmov %vm16910_vm1  ;;  %v2794_v36 = vsel %vm173_vm13, %v2784_v42, 0  ;;  %vm3015_vm6 = vcmp.eq.s32.totalorder %v3005_v26, 1  ;;  %vm3014_vm8 = vcmp.eq.s32.totalorder %v3001_v54, 1  ;;  %v12062_v22 = vunpack.i.l.bf16 %v12061_v58  ;;  %v11423_v54 = vld [vmem:[%s16739_s7 + $0x22] sm:$0x3] }
 0x112   :  { %11392 = vmatmul.mubr.msk.bf16.vlgmr.msra.gmra.mrb[68].mxu1 %vm16910_vm1, %v11388_v33  ;;  %2508 = vmatpush1.bf16.msra.mxu0 %v2496_v60  ;;  %vm2990_vm1 = vcmp.lt.s32.totalorder %v12697_v24, 17  ;;  %vm16915_vm7 = vmmov %vm16914_vm2  ;;  %v3009_v33 = vrot.slane %v2997_v38, %v12686_v21 }
 0x113   :  { %2549 = vmatpush1.bf16.msra.mxu1 %v2502_v61  ;;  %2539 = vmatprep.mubr.bf16.mxu0 %v12433_v4  ;;  %vm16916_vm5 = vmmov %vm16914_vm2  ;;  %v2991_v53 = vsel %vm2990_vm1, %v12052_v45, %v12053_v43  ;;  %v2993_v56 = vsel %vm2990_vm1, %v12047_v51, %v12048_v27  ;;  %v2992_v57 = vsel %vm2990_vm1, %v12048_v27, %v12052_v45  ;;  %v11403_v61 = vld [vmem:[%s16739_s7 + $0x1e] sm:$0x3] }
 0x114   :  { %2580 = vmatprep.mubr.bf16.mxu1 %v12433_v4  ;;  %11399 = vmatprep.subr.msk.bf16.mxu0 %vm173_vm13, %v2638_v62  ;;  %v3021_v39 = vsel %vm3017_vm10, %v2991_v53, 0.0  ;;  %vm3234_vm9 = vmand %vm13452_vm0, %vm16917_vm11  ;;  %v2994_v50 = vsel %vm2990_vm1, %v12053_v43, %v12047_v51  ;;  %v3019_v60 = vsel %vm3015_vm6, %v2993_v56, 0.0  ;;  %vm3016_vm14 = vcmp.eq.s32.totalorder %v3009_v33, 1  ;;  %v12071_v56 = vpop.permute.xlu1 %12070 }
 0x115   :  { %11401 = vmatprep.subr.msk.bf16.mxu1 %vm173_vm13, %v2640_v63  ;;  %v13615_v62 = vpack.c.bf16 %v3019_v60, %v3019_v60  ;;  %v13617_v63 = vpack.c.bf16 %v3021_v39, %v3021_v39  ;;  %v3018_v44 = vsel %vm3014_vm8, %v2994_v50, 0.0  ;;  %v3020_v59 = vsel %vm3016_vm14, %v2992_v57, 0.0  ;;  %vm16920_vm10 = vmmov %vm16916_vm5  ;;  %v11428_v50 = vld [vmem:[%s16741_s9 + $0xe] sm:$0x3] }
 0x116   :  { %v3022_v40 = vpack.c.bf16 %v3018_v44, %v3018_v44  ;;  %v3024_v5 = vpack.c.bf16 %v3020_v59, %v3020_v59  ;;  %vm3229_vm1 = vcmp.lt.s32.totalorder %v12697_v24, 16  ;;  %vm16921_vm6 = vmmov %vm16916_vm5  ;;  %v12073_v39 = vunpack.i.h.bf16 %v12071_v56 }
 0x117   :  { %v12072_v57 = vunpack.i.l.bf16 %v12071_v56  ;;  %v12067_v44 = vunpack.i.l.bf16 %v12066_v52 }
 0x119   :  { %11395 = vmatmul.mubr.msk.bf16.vlgmr.msra.gmra.mrb[72].mxu0 %vm16913_vm4, %v11393_v28  ;;  %vm16918_vm4 = vcmp.lt.s32.totalorder %v12630_v8, 16 }
 0x11a   :  { %11397 = vmatmul.mubr.msk.bf16.vlgmr.msra.gmra.mrb[72].mxu1 %vm16914_vm2, %v11393_v28  ;;  %2659 = vmatpush1.bf16.msra.mxu0 %v2647_v29  ;;  %vm3235_vm2 = vmand %vm3234_vm9, %vm16918_vm4  ;;  %v12058_v28 = vunpack.i.h.bf16 %v12056_v6  ;;  %v12057_v29 = vunpack.i.l.bf16 %v12056_v6 }
 0x11b   :  { %2700 = vmatpush1.bf16.msra.mxu1 %v2653_v25  ;;  %2690 = vmatprep.mubr.bf16.mxu0 %v12433_v4  ;;  %v3236_v7 = vsel %vm3235_vm2, 1, %v12433_v4  ;;  %v13637_v25 = vsel %vm173_vm13, %v3022_v40, 0  ;;  %vm16922_vm4 = vmmov %vm16916_vm5 }
 0x11c   :  { %2731 = vmatprep.mubr.bf16.mxu1 %v12433_v4  ;;  %11404 = vmatprep.subr.msk.bf16.mxu0 %vm173_vm13, %v2785_v13  ;;  %v3252_v12 = vrot.slane %v3236_v7, %v12674_v18  ;;  %v3244_v47 = vrot.slane %v3236_v7, %v12671_v17  ;;  %v3240_v32 = vrot.slane %v3236_v7, %v12683_v20  ;;  %vm16923_vm2 = vmmov %vm16922_vm4 }
 0x11d   :  { %11406 = vmatprep.subr.msk.bf16.mxu1 %vm173_vm13, %v2787_v31  ;;  %v3248_v34 = vrot.slane %v3236_v7, %v12686_v21  ;;  %v3232_v38 = vsel %vm3229_vm1, %v12057_v29, %v12058_v28  ;;  %v3231_v42 = vsel %vm3229_vm1, %v12058_v28, %v12062_v22  ;;  %v3233_v35 = vsel %vm3229_vm1, %v12063_v19, %v12057_v29  ;;  %v13738_v28 = vld [vmem:[%s16732_s0 + $0x8] sm:$0xff] }
 0x11e   :  { %vm3256_vm11 = vcmp.eq.s32.totalorder %v3252_v12, 1  ;;  %vm3254_vm9 = vcmp.eq.s32.totalorder %v3244_v47, 1  ;;  %vm3253_vm8 = vcmp.eq.s32.totalorder %v3240_v32, 1  ;;  %v13742_v29 = vpack.i.bf16 %v12574_v3, %v13738_v28 }
 0x11f   :  { %v3258_v0 = vsel %vm3254_vm9, %v3232_v38, 0.0  ;;  %vm3255_vm14 = vcmp.eq.s32.totalorder %v3248_v34, 1  ;;  %vm16928_vm9 = vmmov %vm16923_vm2 }
 0x120   :  { %v3262_v43 = vpack.c.bf16 %v3258_v0, %v3258_v0  ;;  %v3259_v26 = vsel %vm3255_vm14, %v3231_v42, 0.0  ;;  %vm3639_vm14 = vcmp.lt.s32.totalorder %v12697_v24, 15  ;;  %12200 = vrot.lane.b32.xlu1 %v13742_v29, %s12465_s26 }
 0x121   :  { %11400 = vmatmul.mubr.msk.bf16.vlgmr.msra.gmra.mrb[76].mxu0 %vm16915_vm7, %v11398_v46  ;;  %vm16919_vm7 = vmmov %vm16916_vm5  ;;  %v3263_v51 = vpack.c.bf16 %v3259_v26, %v3259_v26  ;;  %v3640_v59 = vsel %vm3639_vm14, %v12072_v57, %v12073_v39  ;;  %v3643_v12 = vsel %vm3639_vm14, %v12073_v39, %v12067_v44 }
 0x122   :  { %11402 = vmatmul.mubr.msk.bf16.vlgmr.msra.gmra.mrb[76].mxu1 %vm16916_vm5, %v11398_v46  ;;  %2806 = vmatpush1.bf16.msra.mxu0 %v2794_v36  ;;  %v3257_v46 = vsel %vm3253_vm8, %v3233_v35, 0.0  ;;  %vm16929_vm8 = vmmov %vm16923_vm2 }
 0x123   :  { %2847 = vmatpush1.bf16.msra.mxu1 %v2800_v37  ;;  %11409 = vmatprep.subr.msk.bf16.mxu0 %vm173_vm13, %v2785_v13  ;;  %v13640_v13 = vsel %vm173_vm13, %v3024_v5, 0  ;;  %v3261_v27 = vpack.c.bf16 %v3257_v46, %v3257_v46  ;;  %v3277_v53 = vsel %vm173_vm13, %v3263_v51, 0 }
 0x124   :  { %11411 = vmatprep.subr.msk.bf16.mxu1 %vm173_vm13, %v2787_v31  ;;  %2837 = vmatprep.mubr.bf16.mxu0 %v12433_v4  ;;  %v3230_v31 = vsel %vm3229_vm1, %v12062_v22, %v12063_v19  ;;  %vm16926_vm1 = vcmp.ge.s32.totalorder %v12666_v16, 0 }
 0x125   :  { %2878 = vmatprep.mubr.bf16.mxu1 %v12433_v4  ;;  %v3260_v41 = vsel %vm3256_vm11, %v3230_v31, 0.0  ;;  %v13747_v31 = vld [vmem:[%s16732_s0] sm:$0xff]  ;;  %12210 = vrot.lane.b32.xlu1 %v13742_v29, %s12466_s17 }
 0x126   :  { %v3264_v45 = vpack.c.bf16 %v3260_v41, %v3260_v41  ;;  %v13751_v32 = vpack.i.bf16 %v12572_v2, %v13747_v31 }
 0x127   :  { %v12081_v51 = vpop.permute.xlu1 %12080 }
 0x128   :  { %12195 = vrot.lane.b32.xlu0 %v13751_v32, %s12465_s26  ;;  %s12474_s26 = smov 93  }
 0x129   :  { %11405 = vmatmul.mubr.msk.bf16.vlgmr.msra.gmra.mrb[80].mxu0 %vm16919_vm7, %v11403_v61  ;;  %vm16924_vm7 = vmmov %vm16923_vm2  ;;  %12220 = vrot.lane.b32.xlu1 %v13742_v29, %s12467_s22 }
 0x12a   :  { %11407 = vmatmul.mubr.msk.bf16.vlgmr.msra.gmra.mrb[80].mxu1 %vm16916_vm5, %v11403_v61  ;;  %2897 = vmatpush1.bf16.msra.mxu0 %v2794_v36  ;;  %v11418_v36 = vld [vmem:[%s16741_s9 + $0xc] sm:$0x3]  ;;  %vm16925_vm5 = vmmov %vm16923_vm2  ;;  %v12068_v61 = vunpack.i.h.bf16 %v12066_v52 }
 0x12b   :  { %2938 = vmatpush1.bf16.msra.mxu1 %v2800_v37  ;;  %2928 = vmatprep.mubr.bf16.mxu0 %v12433_v4  ;;  %v3271_v37 = vsel %vm173_vm13, %v3261_v27, 0 }
 0x12c   :  { %2969 = vmatprep.mubr.bf16.mxu1 %v12433_v4  ;;  %11414 = vmatprep.subr.msk.bf16.mxu0 %vm173_vm13, %v13615_v62  ;;  %v3642_v40 = vsel %vm3639_vm14, %v12067_v44, %v12068_v61  ;;  %v3641_v6 = vsel %vm3639_vm14, %v12068_v61, %v12072_v57  ;;  %v12083_v57 = vunpack.i.h.bf16 %v12081_v51 }
 0x12d   :  { %11416 = vmatprep.subr.msk.bf16.mxu1 %vm173_vm13, %v13617_v63  ;;  %12205 = vrot.lane.b32.xlu0 %v13751_v32, %s12466_s17  ;;  %s12470_s17 = smov 97  }
 0x12e   :  { %12230 = vrot.lane.b32.xlu1 %v13742_v29, %s12468_s25 }
 0x131   :  { %11410 = vmatmul.mubr.msk.bf16.vlgmr.msra.gmra.mrb[84].mxu0 %vm16920_vm10, %v11408_v23  ;;  %vm3644_vm10 = vmand %vm13452_vm0, %vm16926_vm1  ;;  %12215 = vrot.lane.b32.xlu0 %v13751_v32, %s12467_s22  ;;  %s12471_s22 = smov 96  }
 0x132   :  { %11412 = vmatmul.mubr.msk.bf16.vlgmr.msra.gmra.mrb[84].mxu1 %vm16921_vm6, %v11408_v23  ;;  %3044 = vmatpush1.bf16.msra.mxu0 %v13637_v25  ;;  %vm16927_vm6 = vcmp.lt.s32.totalorder %v12666_v16, 16 }
 0x133   :  { %3085 = vmatpush1.bf16.msra.mxu1 %v13640_v13  ;;  %11419 = vmatprep.subr.msk.bf16.mxu0 %vm173_vm13, %v13615_v62  ;;  %vm3645_vm11 = vmand %vm3644_vm10, %vm16927_vm6 }
 0x134   :  { %11421 = vmatprep.subr.msk.bf16.mxu1 %vm173_vm13, %v13617_v63  ;;  %3075 = vmatprep.mubr.bf16.mxu0 %v12433_v4  ;;  %v3646_v33 = vsel %vm3645_vm11, 1, %v12433_v4  ;;  %vm16931_vm6 = vmmov %vm16923_vm2 }
 0x135   :  { %3116 = vmatprep.mubr.bf16.mxu1 %v12433_v4  ;;  %v3662_v9 = vrot.slane %v3646_v33, %v12674_v18  ;;  %v3654_v60 = vrot.slane %v3646_v33, %v12671_v17  ;;  %v3650_v7 = vrot.slane %v3646_v33, %v12683_v20  ;;  %v3658_v58 = vrot.slane %v3646_v33, %v12686_v21  ;;  %vm16932_vm11 = vmmov %vm16923_vm2 }
 0x136   :  { %12225 = vrot.lane.b32.xlu0 %v13751_v32, %s12468_s25  ;;  %12240 = vrot.lane.b32.xlu1 %v13742_v29, %s12469_s28 }
 0x137   :  { %vm3663_vm1 = vcmp.eq.s32.totalorder %v3650_v7, 1  ;;  %vm3665_vm10 = vcmp.eq.s32.totalorder %v3658_v58, 1  ;;  %v11442_v7 = vld [vmem:[%s16739_s7 + $0x24] sm:$0x3] }
 0x138   :  { %v3667_v23 = vsel %vm3663_vm1, %v3643_v12, 0.0  ;;  %v3669_v47 = vsel %vm3665_vm10, %v3641_v6, 0.0  ;;  %vm16936_vm1 = vmmov %vm16923_vm2 }
 0x139   :  { %11415 = vmatmul.mubr.msk.bf16.vlgmr.msra.gmra.mrb[88].mxu0 %vm16922_vm4, %v11413_v1  ;;  %vm16930_vm4 = vmmov %vm16923_vm2  ;;  %v3671_v34 = vpack.c.bf16 %v3667_v23, %v3667_v23  ;;  %v3673_v38 = vpack.c.bf16 %v3669_v47, %v3669_v47 }
 0x13a   :  { %11417 = vmatmul.mubr.msk.bf16.vlgmr.msra.gmra.mrb[88].mxu1 %vm16923_vm2, %v11413_v1  ;;  %3135 = vmatpush1.bf16.msra.mxu0 %v13637_v25  ;;  %v3220_v1 = vld [vmem:[%s16743_s11] sm:$0x3] }
 0x13b   :  { %3176 = vmatpush1.bf16.msra.mxu1 %v13640_v13  ;;  %3166 = vmatprep.mubr.bf16.mxu0 %v12433_v4  ;;  %v13773_v46 = vsel %vm173_vm13, %v3671_v34, 0  ;;  %v13776_v26 = vsel %vm173_vm13, %v3673_v38, 0 }
 0x13c   :  { %3207 = vmatprep.mubr.bf16.mxu1 %v12433_v4  ;;  %11424 = vmatprep.subr.msk.bf16.mxu0 %vm173_vm13, %v3262_v43 }
 0x13d   :  { %11426 = vmatprep.subr.msk.bf16.mxu1 %vm173_vm13, %v3264_v45  ;;  %12235 = vrot.lane.b32.xlu0 %v13751_v32, %s12469_s28 }
 0x13e   :  { %12250 = vrot.lane.b32.xlu1 %v13742_v29, %s12470_s17 }
 0x141   :  { %11420 = vmatmul.mubr.msk.bf16.vlgmr.msra.gmra.mrb[92].mxu0 %vm16924_vm7, %v11418_v36  ;;  %vm3666_vm7 = vcmp.eq.s32.totalorder %v3662_v9, 1  ;;  %12245 = vrot.lane.b32.xlu0 %v13751_v32, %s12470_s17 }
 0x142   :  { %11422 = vmatmul.mubr.msk.bf16.vlgmr.msra.gmra.mrb[92].mxu1 %vm16925_vm5, %v11418_v36  ;;  %3283 = vmatpush1.bf16.msra.mxu0 %v3271_v37  ;;  %vm3664_vm5 = vcmp.eq.s32.totalorder %v3654_v60, 1  ;;  %v3670_v5 = vsel %vm3666_vm7, %v3640_v59, 0.0  ;;  %v12076_v36 = vpop.permute.xlu0 %12075  ;;  %vm3968_vm7 = vcmp.lt.s32.totalorder %v12697_v24, 14 }
 0x143   :  { %3324 = vmatpush1.bf16.msra.mxu1 %v3277_v53  ;;  %11429 = vmatprep.subr.msk.bf16.mxu0 %vm173_vm13, %v3262_v43  ;;  %v3668_v19 = vsel %vm3664_vm5, %v3642_v40, 0.0  ;;  %v12078_v58 = vunpack.i.h.bf16 %v12076_v36  ;;  %v12077_v40 = vunpack.i.l.bf16 %v12076_v36  ;;  %vm16935_vm5 = vmmov %vm16923_vm2 }
 0x144   :  { %11431 = vmatprep.subr.msk.bf16.mxu1 %vm173_vm13, %v3264_v45  ;;  %3314 = vmatprep.mubr.bf16.mxu0 %v12433_v4  ;;  %v13729_v22 = vpack.c.bf16 %v3668_v19, %v3668_v19 }
 0x145   :  { %3355 = vmatprep.mubr.bf16.mxu1 %v12433_v4  ;;  %v3971_v47 = vsel %vm3968_vm7, %v12077_v40, %v12078_v58  ;;  %12260 = vrot.lane.b32.xlu1 %v13742_v29, %s12471_s22 }
 0x146   :  { %12255 = vrot.lane.b32.xlu0 %v13751_v32, %s12471_s22 }
 0x149   :  { %11425 = vmatmul.mubr.msk.bf16.vlgmr.msra.gmra.mrb[96].mxu0 %vm16928_vm9, %v11423_v54  ;;  %vm16933_vm9 = vcmp.ge.s32.totalorder %v12771_v55, 0  ;;  %12270 = vrot.lane.b32.xlu1 %v13742_v29, %s12472_s27 }
 0x14a   :  { %11427 = vmatmul.mubr.msk.bf16.vlgmr.msra.gmra.mrb[96].mxu1 %vm16929_vm8, %v11423_v54  ;;  %3374 = vmatpush1.bf16.msra.mxu0 %v3271_v37  ;;  %vm3973_vm8 = vmand %vm13452_vm0, %vm16933_vm9 }
 0x14b   :  { %3415 = vmatpush1.bf16.msra.mxu1 %v3277_v53  ;;  %11434 = vmatprep.subr.msk.bf16.mxu0 %vm173_vm13, %v3262_v43  ;;  %vm3974_vm14 = vmand %vm3973_vm8, %vm830_vm15 }
 0x14c   :  { %11436 = vmatprep.subr.msk.bf16.mxu1 %vm173_vm13, %v3264_v45  ;;  %3405 = vmatprep.mubr.bf16.mxu0 %v12433_v4  ;;  %v3975_v27 = vsel %vm3974_vm14, 1, %v12433_v4  ;;  %vm13825_vm8 = vmand %vm13452_vm0, %vm978_vm12  ;;  %vm4358_vm14 = vcmp.ge.s32.totalorder %v13429_v30, 0 }
 0x14d   :  { %3446 = vmatprep.mubr.bf16.mxu1 %v12433_v4  ;;  %v3991_v54 = vrot.slane %v3975_v27, %v12674_v18  ;;  %v3983_v33 = vrot.slane %v3975_v27, %v12671_v17  ;;  %v3979_v12 = vrot.slane %v3975_v27, %v12683_v20  ;;  %v3987_v19 = vrot.slane %v3975_v27, %v12686_v21  ;;  %vm4212_vm0 = vmand %vm13825_vm8, %vm980_vm3 }
 0x14e   :  { %12265 = vrot.lane.b32.xlu0 %v13751_v32, %s12472_s27  ;;  %s12480_s27 = smov 78  }
 0x14f   :  { %vm3995_vm10 = vcmp.eq.s32.totalorder %v3991_v54, 1  ;;  %vm13817_vm9 = vcmp.eq.s32.totalorder %v3987_v19, 1 }
 0x151   :  { %11430 = vmatmul.mubr.msk.bf16.vlgmr.msra.gmra.mrb[100].mxu0 %vm16930_vm4, %v11428_v50  ;;  %vm16934_vm4 = vmmov %vm16923_vm2 }
 0x152   :  { %11432 = vmatmul.mubr.msk.bf16.vlgmr.msra.gmra.mrb[100].mxu1 %vm16923_vm2, %v11428_v50  ;;  %3465 = vmatpush1.bf16.msra.mxu0 %v3271_v37  ;;  %v12082_v50 = vunpack.i.l.bf16 %v12081_v51 }
 0x153   :  { %3506 = vmatpush1.bf16.msra.mxu1 %v3277_v53  ;;  %11438 = vmatprep.subr.msk.bf16.mxu0 %vm173_vm13, %v13615_v62  ;;  %v11433_v62 = vld [vmem:[%s16743_s11 + $0x2] sm:$0x3] }
 0x154   :  { %11440 = vmatprep.subr.msk.bf16.mxu1 %vm173_vm13, %v13617_v63  ;;  %3496 = vmatprep.mubr.bf16.mxu0 %v12433_v4  ;;  %v13731_v63 = vpack.c.bf16 %v3670_v5, %v3670_v5 }
 0x155   :  { %3537 = vmatprep.mubr.bf16.mxu1 %v12433_v4 }
 0x159   :  { %11435 = vmatmul.mubr.msk.bf16.vlgmr.msra.gmra.mrb[104].mxu0 %vm16931_vm6, %v11433_v62  ;;  %vm13803_vm6 = vcmp.eq.s32.totalorder %v3983_v33, 1  ;;  %v12407_v33 = vld [vmem:[%s16733_s1] sm:$0xf] }
 0x15a   :  { %11437 = vmatmul.mubr.msk.bf16.vlgmr.msra.gmra.mrb[104].mxu1 %vm16932_vm11, %v11433_v62  ;;  %3550 = vmatpush1.bf16.msra.mxu0 %v13637_v25  ;;  %v3969_v62 = vsel %vm3968_vm7, %v12082_v50, %v12083_v57  ;;  %vm13813_vm11 = vcmp.eq.s32.totalorder %v3979_v12, 1 }
 0x15b   :  { %3591 = vmatpush1.bf16.msra.mxu1 %v13640_v13  ;;  %3581 = vmatprep.mubr.bf16.mxu0 %v12433_v4  ;;  %v220_v41 = vpop.f32.mrb[0].mxu0 }
 0x15c   :  { %3622 = vmatprep.mubr.bf16.mxu1 %v12433_v4  ;;  %11443 = vmatprep.subr.msk.bf16.mxu0 %vm173_vm13, %v13729_v22  ;;  %v222_v25 = vpop.f32.mrb[1].mxu0 }
 0x15d   :  { %v261_v42 = vpop.f32.mrb[0].mxu1  ;;  %11445 = vmatprep.subr.msk.bf16.mxu1 %vm173_vm13, %v13731_v63  ;;  %v224_v35 = vpop.f32.mrb[2].mxu0 }
 0x15e   :  { %v263_v13 = vpop.f32.mrb[1].mxu1  ;;  %v225_v43 = vpop.f32.mrb[3].mxu0 }
 0x15f   :  { %v265_v0 = vpop.f32.mrb[2].mxu1  ;;  %v3997_v43 = vsel %vm13803_vm6, %v3971_v47, 0.0  ;;  %vm4206_vm6 = vcmp.lt.s32.totalorder %v12697_v24, 13 }
 0x160   :  { %v266_v45 = vpop.f32.mrb[3].mxu1 }
 0x161   :  { %11439 = vmatmul.mubr.msk.bf16.vlgmr.msra.gmra.mrb[108].mxu0 %vm16934_vm4, %v3220_v1  ;;  %vm4359_vm4 = vcmp.lt.s32.totalorder %v13429_v30, 16  ;;  %v12086_v30 = vpop.permute.xlu0 %12085 }
 0x162   :  { %11441 = vmatmul.mubr.msk.bf16.vlgmr.msra.gmra.mrb[108].mxu1 %vm16923_vm2, %v3220_v1  ;;  %3693 = vmatpush1.bf16.msra.mxu0 %v13773_v46  ;;  %v3972_v1 = vsel %vm3968_vm7, %v12083_v57, %v12077_v40  ;;  %vm13850_vm2 = vmand %vm4358_vm14, %vm4359_vm4  ;;  %v4213_v57 = vsel %vm4212_vm0, 1, %v12433_v4  ;;  %v12087_v23 = vunpack.i.l.bf16 %v12086_v30 }
 0x163   :  { %3734 = vmatpush1.bf16.msra.mxu1 %v13776_v26  ;;  %11448 = vmatprep.subr.msk.bf16.mxu0 %vm173_vm13, %v13729_v22  ;;  %v4221_v40 = vrot.slane %v4213_v57, %v12671_v17 }
 0x164   :  { %11450 = vmatprep.subr.msk.bf16.mxu1 %vm173_vm13, %v13731_v63  ;;  %v317_v37 = vpop.f32.mrb[4].mxu0  ;;  %3724 = vmatprep.mubr.bf16.mxu0 %v12433_v4 }
 0x165   :  { %v358_v53 = vpop.f32.mrb[4].mxu1  ;;  %3765 = vmatprep.mubr.bf16.mxu1 %v12433_v4  ;;  %v318_v56 = vadd.f32 %v317_v37, %v220_v41  ;;  %v319_v9 = vpop.f32.mrb[5].mxu0  ;;  %v11447_v37 = vld [vmem:[%s16741_s9 + $0x10] sm:$0x3]  ;;  %vm13912_vm0 = vcmp.eq.s32.totalorder %v4221_v40, 1 }
 0x166   :  { %v359_v52 = vadd.f32 %v358_v53, %v261_v42  ;;  %v360_v39 = vpop.f32.mrb[5].mxu1  ;;  %v320_v60 = vadd.f32 %v319_v9, %v222_v25  ;;  %v321_v44 = vpop.f32.mrb[6].mxu0  ;;  %v3970_v25 = vsel %vm3968_vm7, %v12078_v58, %v12082_v50  ;;  %v3996_v9 = vsel %vm13813_vm11, %v3972_v1, 0.0  ;;  %vm16947_vm7 = vmmov %vm16936_vm1 }
 0x167   :  { %v361_v61 = vadd.f32 %v360_v39, %v263_v13  ;;  %v362_v59 = vpop.f32.mrb[6].mxu1  ;;  %v322_v5 = vpop.f32.mrb[7].mxu0  ;;  %v3998_v39 = vsel %vm13817_vm9, %v3970_v25, 0.0  ;;  %vm16952_vm11 = vcmp.lt.s32.totalorder %v12637_v11, 16  ;;  %v4225_v25 = vrot.slane %v4213_v57, %v12686_v21 }
 0x168   :  { %v363_v6 = vpop.f32.mrb[7].mxu1  ;;  %v13861_v50 = vpop.permute.xlu1 %12090  ;;  %v4002_v44 = vpack.c.bf16 %v3998_v39, %v3998_v39 }
 0x169   :  { %11444 = vmatmul.mubr.msk.bf16.vlgmr.msra.gmra.mrb[112].mxu0 %vm16935_vm5, %v11442_v7  ;;  %vm16948_vm5 = vmmov %vm16936_vm1  ;;  %v12092_v58 = vunpack.i.l.bf16 %v13861_v50 }
 0x16a   :  { %11446 = vmatmul.mubr.msk.bf16.vlgmr.msra.gmra.mrb[112].mxu1 %vm16936_vm1, %v11442_v7  ;;  %3784 = vmatpush1.bf16.msra.mxu0 %v13773_v46  ;;  %vm16949_vm1 = vcmp.ge.s32.totalorder %v12637_v11, 0  ;;  %v12093_v7 = vunpack.i.h.bf16 %v13861_v50  ;;  %vm16957_vm14 = vmmov %vm16948_vm5 }
 0x16b   :  { %3825 = vmatpush1.bf16.msra.mxu1 %v13776_v26  ;;  %11453 = vmatprep.subr.msk.bf16.mxu0 %vm173_vm13, %v13729_v22  ;;  %vm16958_vm4 = vmmov %vm16948_vm5 }
 0x16c   :  { %11455 = vmatprep.subr.msk.bf16.mxu1 %vm173_vm13, %v13731_v63  ;;  %v463_v22 = vpop.f32.mrb[8].mxu0  ;;  %3815 = vmatprep.mubr.bf16.mxu0 %v12433_v4  ;;  %v3999_v63 = vsel %vm3995_vm10, %v3969_v62, 0.0  ;;  %vm13869_vm10 = vmand %vm13850_vm2, %vm16949_vm1  ;;  %v12088_v62 = vunpack.i.h.bf16 %v12086_v30 }
 0x16d   :  { %v504_v42 = vpop.f32.mrb[8].mxu1  ;;  %3856 = vmatprep.mubr.bf16.mxu1 %v12433_v4  ;;  %v511_v13 = vadd.f32 %v463_v22, %v318_v56  ;;  %v465_v35 = vpop.f32.mrb[9].mxu0  ;;  %v4001_v56 = vpack.c.bf16 %v3997_v43, %v3997_v43  ;;  %vm13886_vm9 = vmand %vm13869_vm10, %vm16952_vm11  ;;  %v4207_v43 = vsel %vm4206_vm6, %v12092_v58, %v12093_v7  ;;  %vm13934_vm10 = vcmp.eq.s32.totalorder %v4225_v25, 1 }
 0x16e   :  { %v513_v48 = vadd.f32 %v504_v42, %v359_v52  ;;  %v506_v0 = vpop.f32.mrb[9].mxu1  ;;  %v512_v45 = vadd.f32 %v465_v35, %v320_v60  ;;  %v467_v51 = vpop.f32.mrb[10].mxu0  ;;  %v4003_v52 = vpack.c.bf16 %v3999_v63, %v3999_v63  ;;  %v11452_v42 = vld [vmem:[%s16743_s11 + $0x4] sm:$0x3]  ;;  %v4217_v63 = vrot.slane %v4213_v57, %v12683_v20 }
 0x16f   :  { %v514_v27 = vadd.f32 %v506_v0, %v361_v61  ;;  %v508_v36 = vpop.f32.mrb[10].mxu1  ;;  %v468_v53 = vpop.f32.mrb[11].mxu0  ;;  %v4000_v61 = vpack.c.bf16 %v3996_v9, %v3996_v9  ;;  %v4016_v0 = vsel %vm173_vm13, %v4002_v44, 0  ;;  %v4209_v51 = vsel %vm4206_vm6, %v12087_v23, %v12088_v62 }
 0x170   :  { %v509_v54 = vpop.f32.mrb[11].mxu1  ;;  %v13918_v36 = vpop.permute.xlu1 %12100  ;;  %vm13930_vm1 = vcmp.eq.s32.totalorder %v4217_v63, 1  ;;  %vm16968_vm11 = vcmp.lt.s32.totalorder %v12634_v10, 16 }
 0x171   :  { %11449 = vmatmul.mubr.msk.bf16.vlgmr.msra.gmra.mrb[116].mxu0 %vm16947_vm7, %v11447_v37  ;;  %v4010_v35 = vsel %vm173_vm13, %v4000_v61, 0  ;;  %vm16961_vm7 = vcmp.ge.s32.totalorder %v12634_v10, 0  ;;  %v13928_v53 = vpop.permute.xlu0 %12095  ;;  %v12103_v44 = vunpack.i.h.bf16 %v13918_v36 }
 0x172   :  { %11451 = vmatmul.mubr.msk.bf16.vlgmr.msra.gmra.mrb[116].mxu1 %vm16948_vm5, %v11447_v37  ;;  %3875 = vmatpush1.bf16.msra.mxu0 %v13773_v46  ;;  %vm13924_vm5 = vmand %vm13850_vm2, %vm16961_vm7 }
 0x173   :  { %3916 = vmatpush1.bf16.msra.mxu1 %v13776_v26  ;;  %3906 = vmatprep.mubr.bf16.mxu0 %v12433_v4  ;;  %v4229_v26 = vrot.slane %v4213_v57, %v12674_v18  ;;  %v4208_v57 = vsel %vm4206_vm6, %v12088_v62, %v12092_v58 }
 0x174   :  { %3947 = vmatprep.mubr.bf16.mxu1 %v12433_v4  ;;  %v612_v46 = vpop.f32.mrb[12].mxu0  ;;  %11458 = vmatprep.subr.msk.bf16.mxu0 %vm173_vm13, %v4001_v56 }
 0x175   :  { %v653_v59 = vpop.f32.mrb[12].mxu1  ;;  %11460 = vmatprep.subr.msk.bf16.mxu1 %vm173_vm13, %v4003_v52  ;;  %v660_v5 = vadd.f32 %v612_v46, %v511_v13  ;;  %v614_v12 = vpop.f32.mrb[13].mxu0  ;;  %vm13899_vm8 = vcmp.eq.s32.totalorder %v4229_v26, 1  ;;  %v12102_v46 = vunpack.i.l.bf16 %v13918_v36 }
 0x176   :  { %v662_v6 = vadd.f32 %v653_v59, %v513_v48  ;;  %v655_v19 = vpop.f32.mrb[13].mxu1  ;;  %v661_v34 = vadd.f32 %v614_v12, %v512_v45  ;;  %v616_v41 = vpop.f32.mrb[14].mxu0  ;;  %v13908_v45 = vsel %vm13886_vm9, 1, %v12433_v4  ;;  %v4237_v39 = vsel %vm13899_vm8, %v4207_v43, 0.0  ;;  %vm13960_vm9 = vmand %vm13924_vm5, %vm16968_vm11 }
 0x177   :  { %v663_v38 = vadd.f32 %v655_v19, %v514_v27  ;;  %v657_v22 = vpop.f32.mrb[14].mxu1  ;;  %v617_v13 = vpop.f32.mrb[15].mxu0  ;;  %v4379_v50 = vrot.slane %v13908_v45, %v12674_v18  ;;  %v4371_v30 = vrot.slane %v13908_v45, %v12671_v17  ;;  %v12097_v19 = vunpack.i.l.bf16 %v13928_v53  ;;  %vm16981_vm11 = vmmov %vm16958_vm4 }
 0x178   :  { %v658_v48 = vpop.f32.mrb[15].mxu1  ;;  %v11457_v22 = vld [vmem:[%s16739_s7 + $0x26] sm:$0x3]  ;;  %vm4503_vm8 = vcmp.lt.s32.totalorder %v12697_v24, 2  ;;  %v4241_v25 = vpack.c.bf16 %v4237_v39, %v4237_v39  ;;  %v14000_v36 = vpop.permute.xlu1 %12110 }
 0x179   :  { %11454 = vmatmul.mubr.msk.bf16.vlgmr.msra.gmra.mrb[120].mxu0 %vm16957_vm14, %v11452_v42  ;;  %v4236_v48 = vsel %vm13934_vm10, %v4208_v57, 0.0  ;;  %vm16971_vm14 = vmmov %vm16958_vm4  ;;  %vm13992_vm7 = vcmp.eq.s32.totalorder %v4371_v30, 1 }
 0x17a   :  { %11456 = vmatmul.mubr.msk.bf16.vlgmr.msra.gmra.mrb[120].mxu1 %vm16958_vm4, %v11452_v42  ;;  %4022 = vmatpush1.bf16.msra.mxu0 %v4010_v35  ;;  %v4240_v54 = vpack.c.bf16 %v4236_v48, %v4236_v48  ;;  %vm16980_vm10 = vmmov %vm16958_vm4 }
 0x17b   :  { %4063 = vmatpush1.bf16.msra.mxu1 %v4016_v0  ;;  %11463 = vmatprep.subr.msk.bf16.mxu0 %vm173_vm13, %v4001_v56  ;;  %v4210_v56 = vsel %vm4206_vm6, %v12093_v7, %v12087_v23  ;;  %v12098_v7 = vunpack.i.h.bf16 %v13928_v53  ;;  %vm4353_vm6 = vcmp.lt.s32.totalorder %v12697_v24, 3 }
 0x17c   :  { %11465 = vmatprep.subr.msk.bf16.mxu1 %vm173_vm13, %v4003_v52  ;;  %v762_v60 = vpop.f32.mrb[16].mxu0  ;;  %4053 = vmatprep.mubr.bf16.mxu0 %v12433_v4  ;;  %v4235_v52 = vsel %vm13912_vm0, %v4209_v51, 0.0  ;;  %v4234_v13 = vsel %vm13930_vm1, %v4210_v56, 0.0  ;;  %vm13986_vm0 = vcmp.eq.s32.totalorder %v4379_v50, 1  ;;  %v4354_v43 = vsel %vm4353_vm6, %v12102_v46, %v12103_v44 }
 0x17d   :  { %v803_v61 = vpop.f32.mrb[16].mxu1  ;;  %4094 = vmatprep.mubr.bf16.mxu1 %v12433_v4  ;;  %v810_v26 = vadd.f32 %v762_v60, %v660_v5  ;;  %v764_v40 = vpop.f32.mrb[17].mxu0  ;;  %v4367_v5 = vrot.slane %v13908_v45, %v12683_v20  ;;  %v4239_v63 = vpack.c.bf16 %v4235_v52, %v4235_v52  ;;  %v4356_v27 = vsel %vm4353_vm6, %v12097_v19, %v12098_v7 }
 0x17e   :  { %v812_v58 = vadd.f32 %v803_v61, %v662_v6  ;;  %v805_v12 = vpop.f32.mrb[17].mxu1  ;;  %v811_v62 = vadd.f32 %v764_v40, %v661_v34  ;;  %v766_v47 = vpop.f32.mrb[18].mxu0  ;;  %v13976_v34 = vsel %vm13960_vm9, 1, %v12433_v4  ;;  %v4238_v53 = vpack.c.bf16 %v4234_v13, %v4234_v13 }
 0x17f   :  { %v813_v23 = vadd.f32 %v805_v12, %v663_v38  ;;  %v807_v41 = vpop.f32.mrb[18].mxu1  ;;  %v767_v6 = vpop.f32.mrb[19].mxu0  ;;  %v4375_v38 = vrot.slane %v13908_v45, %v12686_v21  ;;  %v4526_v51 = vrot.slane %v13976_v34, %v12674_v18  ;;  %vm14002_vm5 = vcmp.eq.s32.totalorder %v4367_v5, 1 }
 0x180   :  { %v808_v42 = vpop.f32.mrb[19].mxu1  ;;  %v4518_v9 = vrot.slane %v13976_v34, %v12671_v17  ;;  %v4387_v50 = vsel %vm13986_vm0, %v4354_v43, 0.0  ;;  %v4355_v30 = vsel %vm4353_vm6, %v12098_v7, %v12102_v46  ;;  %v4357_v60 = vsel %vm4353_vm6, %v12103_v44, %v12097_v19 }
 0x181   :  { %11459 = vmatmul.mubr.msk.bf16.vlgmr.msra.gmra.mrb[124].mxu0 %vm16971_vm14, %v11457_v22  ;;  %vm14010_vm1 = vcmp.eq.s32.totalorder %v4375_v38, 1  ;;  %v4385_v61 = vsel %vm13992_vm7, %v4356_v27, 0.0  ;;  %v12113_v12 = vunpack.i.h.bf16 %v14000_v36  ;;  %v12112_v47 = vunpack.i.l.bf16 %v14000_v36 }
 0x182   :  { %11461 = vmatmul.mubr.msk.bf16.vlgmr.msra.gmra.mrb[124].mxu1 %vm16958_vm4, %v11457_v22  ;;  %4113 = vmatpush1.bf16.msra.mxu0 %v4010_v35  ;;  %v12106_v35 = vpop.permute.xlu0 %12105  ;;  %v4248_v6 = vsel %vm173_vm13, %v4238_v53, 0  ;;  %v4254_v42 = vsel %vm173_vm13, %v4240_v54, 0  ;;  %v4514_v38 = vrot.slane %v13976_v34, %v12683_v20  ;;  %v4386_v13 = vsel %vm14010_vm1, %v4355_v30, 0.0  ;;  %vm16992_vm1 = vmmov %vm16980_vm10 }
 0x183   :  { %4154 = vmatpush1.bf16.msra.mxu1 %v4016_v0  ;;  %4144 = vmatprep.mubr.bf16.mxu0 %v12433_v4  ;;  %v12107_v19 = vunpack.i.l.bf16 %v12106_v35  ;;  %vm4530_vm9 = vcmp.eq.s32.totalorder %v4526_v51, 1  ;;  %v4504_v48 = vsel %vm4503_vm8, %v12112_v47, %v12113_v12  ;;  %vm14045_vm6 = vcmp.eq.s32.totalorder %v4518_v9, 1 }
 0x184   :  { %4185 = vmatprep.mubr.bf16.mxu1 %v12433_v4  ;;  %v912_v39 = vpop.f32.mrb[20].mxu0  ;;  %11468 = vmatprep.subr.msk.bf16.mxu0 %vm173_vm13, %v4239_v63  ;;  %v4391_v63 = vpack.c.bf16 %v4387_v50, %v4387_v50  ;;  %v4390_v45 = vpack.c.bf16 %v4386_v13, %v4386_v13  ;;  %vm14053_vm14 = vcmp.eq.s32.totalorder %v4514_v38, 1  ;;  %vm16986_vm4 = vcmp.ge.s32.totalorder %v12646_v14, 0 }
 0x185   :  { %v953_v57 = vpop.f32.mrb[20].mxu1  ;;  %11470 = vmatprep.subr.msk.bf16.mxu1 %vm173_vm13, %v4241_v25  ;;  %v960_v56 = vadd.f32 %v912_v39, %v810_v26  ;;  %v914_v59 = vpop.f32.mrb[21].mxu0  ;;  %v11462_v26 = vld [vmem:[%s16741_s9 + $0x12] sm:$0x3]  ;;  %v4384_v25 = vsel %vm14002_vm5, %v4357_v60, 0.0  ;;  %vm14061_vm0 = vmand %vm13850_vm2, %vm16986_vm4  ;;  %v4534_v53 = vsel %vm4530_vm9, %v4504_v48, 0.0  ;;  %v4507_v9 = vsel %vm4503_vm8, %v12113_v12, %v12107_v19 }
 0x186   :  { %v962_v52 = vadd.f32 %v953_v57, %v812_v58  ;;  %v955_v40 = vpop.f32.mrb[21].mxu1  ;;  %v961_v46 = vadd.f32 %v914_v59, %v811_v62  ;;  %v916_v41 = vpop.f32.mrb[22].mxu0  ;;  %v12108_v58 = vunpack.i.h.bf16 %v12106_v35  ;;  %v4522_v62 = vrot.slane %v13976_v34, %v12686_v21  ;;  %v11467_v12 = vld [vmem:[%s16739_s7 + $0x28] sm:$0x3]  ;;  %vm16994_vm9 = vmmov %vm16992_vm1 }
 0x187   :  { %v963_v7 = vadd.f32 %v955_v40, %v813_v23  ;;  %v957_v44 = vpop.f32.mrb[22].mxu1  ;;  %v917_v22 = vpop.f32.mrb[23].mxu0  ;;  %v4389_v23 = vpack.c.bf16 %v4385_v61, %v4385_v61  ;;  %v4388_v43 = vpack.c.bf16 %v4384_v25, %v4384_v25  ;;  %v4404_v41 = vsel %vm173_vm13, %v4390_v45, 0 }
 0x188   :  { %v958_v5 = vpop.f32.mrb[23].mxu1  ;;  %v4506_v1 = vsel %vm4503_vm8, %v12107_v19, %v12108_v58  ;;  %v4505_v54 = vsel %vm4503_vm8, %v12108_v58, %v12112_v47  ;;  %vm14071_vm7 = vcmp.eq.s32.totalorder %v4522_v62, 1  ;;  %vm16991_vm8 = vcmp.lt.s32.totalorder %v12646_v14, 16  ;;  %v12121_v19 = vpop.permute.xlu1 %12120 }
 0x189   :  { %11464 = vmatmul.mubr.msk.bf16.vlgmr.msra.gmra.mrb[128].mxu0 %vm16980_vm10, %v11462_v26  ;;  %v4532_v30 = vsel %vm14045_vm6, %v4506_v1, 0.0  ;;  %vm4747_vm5 = vmand %vm14061_vm0, %vm16991_vm8  ;;  %v4398_v47 = vsel %vm173_vm13, %v4388_v43, 0  ;;  %v4531_v44 = vsel %vm14053_vm14, %v4507_v9, 0.0  ;;  %v12123_v34 = vunpack.i.h.bf16 %v12121_v19 }
 0x18a   :  { %11466 = vmatmul.mubr.msk.bf16.vlgmr.msra.gmra.mrb[128].mxu1 %vm16981_vm11, %v11462_v26  ;;  %4260 = vmatpush1.bf16.msra.mxu0 %v4248_v6  ;;  %v4533_v26 = vsel %vm14071_vm7, %v4505_v54, 0.0  ;;  %vm16993_vm10 = vmmov %vm16992_vm1  ;;  %v4748_v58 = vsel %vm4747_vm5, 1, %v12433_v4  ;;  %v4535_v22 = vpack.c.bf16 %v4531_v44, %v4531_v44  ;;  %v12116_v6 = vpop.permute.xlu0 %12115  ;;  %vm4741_vm11 = vcmp.lt.s32.totalorder %v12697_v24, 1 }
 0x18b   :  { %4301 = vmatpush1.bf16.msra.mxu1 %v4254_v42  ;;  %4291 = vmatprep.mubr.bf16.mxu0 %v12433_v4  ;;  %v4537_v5 = vpack.c.bf16 %v4533_v26, %v4533_v26  ;;  %v4764_v62 = vrot.slane %v4748_v58, %v12674_v18  ;;  %v12122_v1 = vunpack.i.l.bf16 %v12121_v19  ;;  %vm16995_vm6 = vmmov %vm16992_vm1 }
 0x18c   :  { %4332 = vmatprep.mubr.bf16.mxu1 %v12433_v4  ;;  %v1062_v36 = vpop.f32.mrb[24].mxu0  ;;  %11473 = vmatprep.subr.msk.bf16.mxu0 %vm173_vm13, %v4389_v23  ;;  %v4756_v23 = vrot.slane %v4748_v58, %v12671_v17  ;;  %v4545_v35 = vsel %vm173_vm13, %v4535_v22, 0  ;;  %vm17002_vm8 = vmmov %vm16992_vm1 }
 0x18d   :  { %v1103_v37 = vpop.f32.mrb[24].mxu1  ;;  %11475 = vmatprep.subr.msk.bf16.mxu1 %vm173_vm13, %v4391_v63  ;;  %v1110_v0 = vadd.f32 %v1062_v36, %v960_v56  ;;  %v1064_v57 = vpop.f32.mrb[25].mxu0  ;;  %v11472_v36 = vld [vmem:[%s16739_s7 + $0x2a] sm:$0x3]  ;;  %vm4768_vm14 = vcmp.eq.s32.totalorder %v4764_v62, 1  ;;  %vm17003_vm5 = vmmov %vm16992_vm1 }
 0x18e   :  { %v1112_v39 = vadd.f32 %v1103_v37, %v962_v52  ;;  %v1105_v50 = vpop.f32.mrb[25].mxu1  ;;  %v1111_v60 = vadd.f32 %v1064_v57, %v961_v46  ;;  %v1066_v59 = vpop.f32.mrb[26].mxu0  ;;  %v4536_v46 = vpack.c.bf16 %v4532_v30, %v4532_v30  ;;  %v12118_v37 = vunpack.i.h.bf16 %v12116_v6 }
 0x18f   :  { %v1113_v61 = vadd.f32 %v1105_v50, %v963_v7  ;;  %v1107_v40 = vpop.f32.mrb[26].mxu1  ;;  %v1067_v56 = vpop.f32.mrb[27].mxu0  ;;  %v4538_v7 = vpack.c.bf16 %v4534_v53, %v4534_v53  ;;  %v12117_v53 = vunpack.i.l.bf16 %v12116_v6  ;;  %v4760_v57 = vrot.slane %v4748_v58, %v12686_v21  ;;  %v11477_v6 = vld [vmem:[%s16739_s7 + $0x2c] sm:$0x3] }
 0x190   :  { %v1108_v52 = vpop.f32.mrb[27].mxu1  ;;  %v4742_v50 = vsel %vm4741_vm11, %v12122_v1, %v12123_v34  ;;  %vm14115_vm4 = vcmp.eq.s32.totalorder %v4756_v23, 1 }
 0x191   :  { %11469 = vmatmul.mubr.msk.bf16.vlgmr.msra.gmra.mrb[132].mxu0 %vm16992_vm1, %v11467_v12  ;;  %v4772_v40 = vsel %vm4768_vm14, %v4742_v50, 0.0  ;;  %vm14131_vm7 = vcmp.eq.s32.totalorder %v4760_v57, 1  ;;  %v4745_v44 = vsel %vm4741_vm11, %v12123_v34, %v12117_v53  ;;  %vm17008_vm14 = vmmov %vm16992_vm1 }
 0x192   :  { %11471 = vmatmul.mubr.msk.bf16.vlgmr.msra.gmra.mrb[132].mxu1 %vm16993_vm10, %v11467_v12  ;;  %4410 = vmatpush1.bf16.msra.mxu0 %v4398_v47  ;;  %v4743_v12 = vsel %vm4741_vm11, %v12118_v37, %v12122_v1  ;;  %v4776_v23 = vpack.c.bf16 %v4772_v40, %v4772_v40  ;;  %vm17004_vm10 = vmmov %vm16992_vm1 }
 0x193   :  { %4451 = vmatpush1.bf16.msra.mxu1 %v4404_v41  ;;  %4441 = vmatprep.mubr.bf16.mxu0 %v12433_v4 }
 0x194   :  { %4482 = vmatprep.mubr.bf16.mxu1 %v12433_v4  ;;  %v1213_v42 = vpop.f32.mrb[28].mxu0  ;;  %11478 = vmatprep.subr.msk.bf16.mxu0 %vm173_vm13, %v4536_v46 }
 0x195   :  { %v1254_v38 = vpop.f32.mrb[28].mxu1  ;;  %11480 = vmatprep.subr.msk.bf16.mxu1 %vm173_vm13, %v4538_v7  ;;  %v1261_v63 = vadd.f32 %v1213_v42, %v1110_v0  ;;  %v1215_v13 = vpop.f32.mrb[29].mxu0  ;;  %v4551_v0 = vsel %vm173_vm13, %v4537_v5, 0 }
 0x196   :  { %v1263_v25 = vadd.f32 %v1254_v38, %v1112_v39  ;;  %v1256_v48 = vpop.f32.mrb[29].mxu1  ;;  %v1262_v43 = vadd.f32 %v1215_v13, %v1111_v60  ;;  %v1217_v27 = vpop.f32.mrb[30].mxu0  ;;  %v4752_v39 = vrot.slane %v4748_v58, %v12683_v20  ;;  %v4744_v60 = vsel %vm4741_vm11, %v12117_v53, %v12118_v37  ;;  %vm17005_vm11 = vmmov %vm16992_vm1 }
 0x197   :  { %v1264_v45 = vadd.f32 %v1256_v48, %v1113_v61  ;;  %v1258_v51 = vpop.f32.mrb[30].mxu1  ;;  %v1218_v54 = vpop.f32.mrb[31].mxu0  ;;  %v4770_v26 = vsel %vm14115_vm4, %v4744_v60, 0.0  ;;  %vm17009_vm4 = vcmp.ge.s32.totalorder %v12666_v16, 0 }
 0x198   :  { %v1259_v9 = vpop.f32.mrb[31].mxu1  ;;  %vm14127_vm0 = vcmp.eq.s32.totalorder %v4752_v39, 1  ;;  %v4774_v62 = vpack.c.bf16 %v4770_v26, %v4770_v26 }
 0x199   :  { %11474 = vmatmul.mubr.msk.bf16.vlgmr.msra.gmra.mrb[136].mxu0 %vm16994_vm9, %v11472_v36  ;;  %v11482_v9 = vld [vmem:[%s16741_s9 + $0x14] sm:$0x3]  ;;  %vm17006_vm9 = vmmov %vm16992_vm1 }
 0x19a   :  { %11476 = vmatmul.mubr.msk.bf16.vlgmr.msra.gmra.mrb[136].mxu1 %vm16995_vm6, %v11472_v36  ;;  %4557 = vmatpush1.bf16.msra.mxu0 %v4545_v35  ;;  %vm17007_vm6 = vmmov %vm16992_vm1 }
 0x19b   :  { %4598 = vmatpush1.bf16.msra.mxu1 %v4551_v0  ;;  %11483 = vmatprep.subr.msk.bf16.mxu0 %vm173_vm13, %v4536_v46 }
 0x19c   :  { %11485 = vmatprep.subr.msk.bf16.mxu1 %vm173_vm13, %v4538_v7  ;;  %v1360_v61 = vpop.f32.mrb[32].mxu0  ;;  %4588 = vmatprep.mubr.bf16.mxu0 %v12433_v4 }
 0x19d   :  { %v1401_v59 = vpop.f32.mrb[32].mxu1  ;;  %4629 = vmatprep.mubr.bf16.mxu1 %v12433_v4  ;;  %v1408_v47 = vadd.f32 %v1360_v61, %v1261_v63  ;;  %v1362_v46 = vpop.f32.mrb[33].mxu0  ;;  %v4769_v63 = vsel %vm14127_vm0, %v4745_v44, 0.0  ;;  %vm5360_vm0 = vmand %vm13850_vm2, %vm17009_vm4 }
 0x19e   :  { %v1410_v41 = vadd.f32 %v1401_v59, %v1263_v25  ;;  %v1403_v7 = vpop.f32.mrb[33].mxu1  ;;  %v1409_v58 = vadd.f32 %v1362_v46, %v1262_v43  ;;  %v1364_v22 = vpop.f32.mrb[34].mxu0  ;;  %v4771_v25 = vsel %vm14131_vm7, %v4743_v12, 0.0  ;;  %v4773_v13 = vpack.c.bf16 %v4769_v63, %v4769_v63  ;;  %v11487_v12 = vld [vmem:[%s16739_s7 + $0x2e] sm:$0x3] }
 0x19f   :  { %v1411_v19 = vadd.f32 %v1403_v7, %v1264_v45  ;;  %v1405_v5 = vpop.f32.mrb[34].mxu1  ;;  %v1365_v42 = vpop.f32.mrb[35].mxu0  ;;  %v4775_v48 = vpack.c.bf16 %v4771_v25, %v4771_v25  ;;  %v14203_v63 = vpack.c.bf16 %v13747_v31, %v13747_v31  ;;  %v14207_v25 = vpack.c.bf16 %v13738_v28, %v13738_v28 }
 0x1a0   :  { %v1406_v38 = vpop.f32.mrb[35].mxu1  ;;  %v4783_v39 = vsel %vm173_vm13, %v4773_v13, 0  ;;  %vm17010_vm7 = vcmp.lt.s32.totalorder %v12666_v16, 16 }
 0x1a1   :  { %11479 = vmatmul.mubr.msk.bf16.vlgmr.msra.gmra.mrb[140].mxu0 %vm17002_vm8, %v11477_v6  ;;  %v4789_v57 = vsel %vm173_vm13, %v4775_v48, 0  ;;  %vm5361_vm8 = vmand %vm5360_vm0, %vm17010_vm7 }
 0x1a2   :  { %11481 = vmatmul.mubr.msk.bf16.vlgmr.msra.gmra.mrb[140].mxu1 %vm17003_vm5, %v11477_v6  ;;  %4648 = vmatpush1.bf16.msra.mxu0 %v4545_v35  ;;  %v11492_v6 = vld [vmem:[%s16741_s9 + $0x16] sm:$0x3]  ;;  %vm17011_vm5 = vmmov %vm16992_vm1 }
 0x1a3   :  { %4689 = vmatpush1.bf16.msra.mxu1 %v4551_v0  ;;  %4679 = vmatprep.mubr.bf16.mxu0 %v12433_v4  ;;  %vm17022_vm7 = vmmov %vm16992_vm1 }
 0x1a4   :  { %4720 = vmatprep.mubr.bf16.mxu1 %v12433_v4  ;;  %v1508_v34 = vpop.f32.mrb[36].mxu0  ;;  %11488 = vmatprep.subr.msk.bf16.mxu0 %vm173_vm13, %v4774_v62 }
 0x1a5   :  { %v1549_v1 = vpop.f32.mrb[36].mxu1  ;;  %11490 = vmatprep.subr.msk.bf16.mxu1 %vm173_vm13, %v4776_v23  ;;  %v14154_v43 = vadd.f32 %v1508_v34, %v1408_v47  ;;  %v1510_v27 = vpop.f32.mrb[37].mxu0 }
 0x1a6   :  { %v14156_v45 = vadd.f32 %v1549_v1, %v1410_v41  ;;  %v1551_v51 = vpop.f32.mrb[37].mxu1  ;;  %v14160_v36 = vadd.f32 %v1510_v27, %v1409_v58  ;;  %v1512_v53 = vpop.f32.mrb[38].mxu0 }
 0x1a7   :  { %v14162_v37 = vadd.f32 %v1551_v51, %v1411_v19  ;;  %v1553_v54 = vpop.f32.mrb[38].mxu1  ;;  %v1513_v35 = vpop.f32.mrb[39].mxu0 }
 0x1a8   :  { %v1554_v0 = vpop.f32.mrb[39].mxu1  ;;  %v14236_v35 = vsel %vm173_vm13, %v14203_v63, 0 }
 0x1a9   :  { %11484 = vmatmul.mubr.msk.bf16.vlgmr.msra.gmra.mrb[144].mxu0 %vm16992_vm1, %v11482_v9  ;;  %v12131_v0 = vpop.permute.xlu1 %12130 }
 0x1aa   :  { %11486 = vmatmul.mubr.msk.bf16.vlgmr.msra.gmra.mrb[144].mxu1 %vm17004_vm10, %v11482_v9  ;;  %4795 = vmatpush1.bf16.msra.mxu0 %v4783_v39  ;;  %v11497_v9 = vld [vmem:[%s16743_s11 + $0x6] sm:$0x3]  ;;  %vm5355_vm10 = vcmp.lt.s32.totalorder %v12697_v24, 127 }
 0x1ab   :  { %4836 = vmatpush1.bf16.msra.mxu1 %v4789_v57  ;;  %11493 = vmatprep.subr.msk.bf16.mxu0 %vm173_vm13, %v4774_v62 }
 0x1ac   :  { %11495 = vmatprep.subr.msk.bf16.mxu1 %vm173_vm13, %v4776_v23  ;;  %v1599_v50 = vpop.f32.mrb[40].mxu0  ;;  %4826 = vmatprep.mubr.bf16.mxu0 %v12433_v4 }
 0x1ad   :  { %v1640_v30 = vpop.f32.mrb[40].mxu1  ;;  %4867 = vmatprep.mubr.bf16.mxu1 %v12433_v4  ;;  %v1601_v60 = vpop.f32.mrb[41].mxu0 }
 0x1ae   :  { %v1642_v61 = vpop.f32.mrb[41].mxu1  ;;  %v1603_v59 = vpop.f32.mrb[42].mxu0 }
 0x1af   :  { %v1644_v40 = vpop.f32.mrb[42].mxu1  ;;  %v1604_v56 = vpop.f32.mrb[43].mxu0 }
 0x1b0   :  { %v1645_v52 = vpop.f32.mrb[43].mxu1  ;;  %v12133_v56 = vunpack.i.h.bf16 %v12131_v0 }
 0x1b1   :  { %11489 = vmatmul.mubr.msk.bf16.vlgmr.msra.gmra.mrb[148].mxu0 %vm17005_vm11, %v11487_v12  ;;  %v12132_v52 = vunpack.i.l.bf16 %v12131_v0  ;;  %vm17012_vm11 = vmmov %vm16992_vm1 }
 0x1b2   :  { %11491 = vmatmul.mubr.msk.bf16.vlgmr.msra.gmra.mrb[148].mxu1 %vm17006_vm9, %v11487_v12  ;;  %4886 = vmatpush1.bf16.msra.mxu0 %v4783_v39  ;;  %vm17013_vm9 = vmmov %vm16992_vm1 }
 0x1b3   :  { %4927 = vmatpush1.bf16.msra.mxu1 %v4789_v57  ;;  %11498 = vmatprep.subr.msk.bf16.mxu0 %vm173_vm13, %v4774_v62  ;;  %v14191_v62 = vpack.c.bf16 %v12572_v2, %v12572_v2 }
 0x1b4   :  { %11500 = vmatprep.subr.msk.bf16.mxu1 %vm173_vm13, %v4776_v23  ;;  %v1684_v47 = vpop.f32.mrb[44].mxu0  ;;  %4917 = vmatprep.mubr.bf16.mxu0 %v12433_v4  ;;  %v14195_v23 = vpack.c.bf16 %v12574_v3, %v12574_v3 }
 0x1b5   :  { %v1725_v41 = vpop.f32.mrb[44].mxu1  ;;  %4958 = vmatprep.mubr.bf16.mxu1 %v12433_v4  ;;  %v1685_v46 = vadd.f32 %v1684_v47, %v1599_v50  ;;  %v1686_v44 = vpop.f32.mrb[45].mxu0 }
 0x1b6   :  { %v1726_v7 = vadd.f32 %v1725_v41, %v1640_v30  ;;  %v1727_v26 = vpop.f32.mrb[45].mxu1  ;;  %v1687_v58 = vadd.f32 %v1686_v44, %v1601_v60  ;;  %v1688_v22 = vpop.f32.mrb[46].mxu0 }
 0x1b7   :  { %v1728_v19 = vadd.f32 %v1727_v26, %v1642_v61  ;;  %v1729_v5 = vpop.f32.mrb[46].mxu1  ;;  %v1689_v42 = vpop.f32.mrb[47].mxu0 }
 0x1b8   :  { %v1730_v38 = vpop.f32.mrb[47].mxu1 }
 0x1b9   :  { %11494 = vmatmul.mubr.msk.bf16.vlgmr.msra.gmra.mrb[152].mxu0 %vm17007_vm6, %v11492_v6 }
 0x1ba   :  { %11496 = vmatmul.mubr.msk.bf16.vlgmr.msra.gmra.mrb[152].mxu1 %vm17008_vm14, %v11492_v6  ;;  %4977 = vmatpush1.bf16.msra.mxu0 %v4783_v39  ;;  %v12126_v39 = vpop.permute.xlu0 %12125 }
 0x1bb   :  { %5018 = vmatpush1.bf16.msra.mxu1 %v4789_v57  ;;  %5008 = vmatprep.mubr.bf16.mxu0 %v12433_v4  ;;  %v12127_v22 = vunpack.i.l.bf16 %v12126_v39 }
 0x1bc   :  { %5049 = vmatprep.mubr.bf16.mxu1 %v12433_v4  ;;  %v1827_v13 = vpop.f32.mrb[48].mxu0  ;;  %11503 = vmatprep.subr.msk.bf16.mxu0 %vm173_vm13, %v14191_v62 }
 0x1bd   :  { %v1868_v48 = vpop.f32.mrb[48].mxu1  ;;  %11505 = vmatprep.subr.msk.bf16.mxu1 %vm173_vm13, %v14195_v23  ;;  %v14218_v31 = vadd.f32 %v1827_v13, %v14154_v43  ;;  %v1829_v28 = vpop.f32.mrb[49].mxu0  ;;  %v5359_v38 = vsel %vm5355_vm10, %v12133_v56, %v12127_v22 }
 0x1be   :  { %v14221_v34 = vadd.f32 %v1868_v48, %v14156_v45  ;;  %v1870_v1 = vpop.f32.mrb[49].mxu1  ;;  %v14224_v27 = vadd.f32 %v1829_v28, %v14160_v36  ;;  %v1831_v53 = vpop.f32.mrb[50].mxu0  ;;  %v14240_v36 = vsel %vm173_vm13, %v14207_v25, 0  ;;  %v5356_v28 = vsel %vm5355_vm10, %v12132_v52, %v12133_v56 }
 0x1bf   :  { %v14227_v51 = vadd.f32 %v1870_v1, %v14162_v37  ;;  %v1872_v54 = vpop.f32.mrb[50].mxu1  ;;  %v1832_v43 = vpop.f32.mrb[51].mxu0  ;;  %v5362_v37 = vsel %vm5361_vm8, 1, %v12433_v4  ;;  %vm17023_vm8 = vmmov %vm16992_vm1 }
 0x1c0   :  { %v1873_v45 = vpop.f32.mrb[51].mxu1  ;;  %v5370_v30 = vrot.slane %v5362_v37, %v12671_v17  ;;  %v5378_v60 = vrot.slane %v5362_v37, %v12674_v18  ;;  %v5366_v29 = vrot.slane %v5362_v37, %v12683_v20  ;;  %v5374_v32 = vrot.slane %v5362_v37, %v12686_v21 }
 0x1c1   :  { %11499 = vmatmul.mubr.msk.bf16.vlgmr.msra.gmra.mrb[156].mxu0 %vm17011_vm5, %v11497_v9  ;;  %vm17024_vm5 = vcmp.ge.s32.totalorder %v12771_v55, 0 }
 0x1c2   :  { %11501 = vmatmul.mubr.msk.bf16.vlgmr.msra.gmra.mrb[156].mxu1 %vm16992_vm1, %v11497_v9  ;;  %5080 = vmatpush1.bf16.msra.mxu0 %v14236_v35  ;;  %vm14275_vm6 = vcmp.eq.s32.totalorder %v5370_v30, 1  ;;  %vm14279_vm14 = vcmp.eq.s32.totalorder %v5378_v60, 1  ;;  %vm14297_vm4 = vcmp.eq.s32.totalorder %v5366_v29, 1  ;;  %vm14301_vm0 = vcmp.eq.s32.totalorder %v5374_v32, 1  ;;  %vm14340_vm1 = vmand %vm13850_vm2, %vm17024_vm5 }
 0x1c3   :  { %5121 = vmatpush1.bf16.msra.mxu1 %v14240_v36  ;;  %5111 = vmatprep.mubr.bf16.mxu0 %v12433_v4  ;;  %vm17037_vm5 = vmmov %vm17023_vm8 }
 0x1c4   :  { %5152 = vmatprep.mubr.bf16.mxu1 %v12433_v4  ;;  %v1918_v57 = vpop.f32.mrb[52].mxu0  ;;  %11508 = vmatprep.subr.msk.bf16.mxu0 %vm173_vm13, %v14191_v62 }
 0x1c5   :  { %v1959_v50 = vpop.f32.mrb[52].mxu1  ;;  %11510 = vmatprep.subr.msk.bf16.mxu1 %vm173_vm13, %v14195_v23  ;;  %v14255_v61 = vadd.f32 %v1918_v57, %v1685_v46  ;;  %v1920_v40 = vpop.f32.mrb[53].mxu0  ;;  %v11502_v46 = vld [vmem:[%s16739_s7 + $0x30] sm:$0x3] }
 0x1c6   :  { %v14257_v59 = vadd.f32 %v1959_v50, %v1726_v7  ;;  %v1961_v12 = vpop.f32.mrb[53].mxu1  ;;  %v14261_v47 = vadd.f32 %v1920_v40, %v1687_v58  ;;  %v1922_v44 = vpop.f32.mrb[54].mxu0  ;;  %v12128_v7 = vunpack.i.h.bf16 %v12126_v39  ;;  %v5386_v39 = vsel %vm14279_vm14, %v5359_v38, 0.0 }
 0x1c7   :  { %v14263_v41 = vadd.f32 %v1961_v12, %v1728_v19  ;;  %v1963_v26 = vpop.f32.mrb[54].mxu1  ;;  %v1923_v5 = vpop.f32.mrb[55].mxu0  ;;  %v14326_v56 = vpack.c.bf16 %v5386_v39, %v5386_v39  ;;  %v12405_v44 = vld [vmem:[%s16732_s0 + $0x8] sm:$0xff] }
 0x1c8   :  { %v1964_v6 = vpop.f32.mrb[55].mxu1  ;;  %v5357_v42 = vsel %vm5355_vm10, %v12128_v7, %v12132_v52  ;;  %v5358_v1 = vsel %vm5355_vm10, %v12127_v22, %v12128_v7  ;;  %v14348_v26 = vpack.i.bf16 %v12574_v3, %v12405_v44  ;;  %vm5690_vm10 = vmand %vm14340_vm1, %vm830_vm15  ;;  %v11512_v19 = vld [vmem:[%s16743_s11 + $0x8] sm:$0x3] }
 0x1c9   :  { %11504 = vmatmul.mubr.msk.bf16.vlgmr.msra.gmra.mrb[160].mxu0 %vm17012_vm11, %v11502_v46  ;;  %v5384_v0 = vsel %vm14275_vm6, %v5357_v42, 0.0  ;;  %v5383_v52 = vsel %vm14297_vm4, %v5358_v1, 0.0  ;;  %vm17027_vm11 = vmmov %vm17022_vm7  ;;  %vm5684_vm6 = vcmp.lt.s32.totalorder %v12697_v24, 126 }
 0x1ca   :  { %11506 = vmatmul.mubr.msk.bf16.vlgmr.msra.gmra.mrb[160].mxu1 %vm17013_vm9, %v11502_v46  ;;  %5171 = vmatpush1.bf16.msra.mxu0 %v14236_v35  ;;  %v14324_v12 = vpack.c.bf16 %v5384_v0, %v5384_v0  ;;  %v5387_v46 = vpack.c.bf16 %v5383_v52, %v5383_v52  ;;  %vm17028_vm9 = vmmov %vm17022_vm7 }
 0x1cb   :  { %5212 = vmatpush1.bf16.msra.mxu1 %v14240_v36  ;;  %5202 = vmatprep.mubr.bf16.mxu0 %v12433_v4 }
 0x1cc   :  { %5243 = vmatprep.mubr.bf16.mxu1 %v12433_v4  ;;  %v2065_v13 = vpop.f32.mrb[56].mxu0  ;;  %11513 = vmatprep.subr.msk.bf16.mxu0 %vm173_vm13, %v14191_v62 }
 0x1cd   :  { %v2106_v48 = vpop.f32.mrb[56].mxu1  ;;  %11515 = vmatprep.subr.msk.bf16.mxu1 %vm173_vm13, %v14195_v23  ;;  %v14306_v9 = vadd.f32 %v2065_v13, %v14218_v31  ;;  %v2067_v45 = vpop.f32.mrb[57].mxu0  ;;  %v14384_v13 = vsel %vm173_vm13, %v5387_v46, 0 }
 0x1ce   :  { %v14309_v43 = vadd.f32 %v2106_v48, %v14221_v34  ;;  %v2108_v37 = vpop.f32.mrb[57].mxu1  ;;  %v14316_v57 = vadd.f32 %v2067_v45, %v14224_v27  ;;  %v2069_v30 = vpop.f32.mrb[58].mxu0  ;;  %v11507_v34 = vld [vmem:[%s16741_s9 + $0x18] sm:$0x3]  ;;  %v5385_v27 = vsel %vm14301_vm0, %v5356_v28, 0.0 }
 0x1cf   :  { %v14319_v50 = vadd.f32 %v2108_v37, %v14227_v51  ;;  %v2110_v31 = vpop.f32.mrb[58].mxu1  ;;  %v2070_v60 = vpop.f32.mrb[59].mxu0  ;;  %v5389_v7 = vpack.c.bf16 %v5385_v27, %v5385_v27 }
 0x1d0   :  { %v2111_v40 = vpop.f32.mrb[59].mxu1  ;;  %v12136_v28 = vpop.permute.xlu0 %12135 }
 0x1d1   :  { %11509 = vmatmul.mubr.msk.bf16.vlgmr.msra.gmra.mrb[164].mxu0 %vm17022_vm7, %v11507_v34  ;;  %v14387_v48 = vsel %vm173_vm13, %v5389_v7, 0  ;;  %v12138_v40 = vunpack.i.h.bf16 %v12136_v28  ;;  %v12137_v52 = vunpack.i.l.bf16 %v12136_v28  ;;  %vm14436_vm7 = vmand %vm13850_vm2, %vm978_vm12 }
 0x1d2   :  { %11511 = vmatmul.mubr.msk.bf16.vlgmr.msra.gmra.mrb[164].mxu1 %vm17023_vm8, %v11507_v34  ;;  %5262 = vmatpush1.bf16.msra.mxu0 %v14236_v35  ;;  %v12406_v35 = vld [vmem:[%s16732_s0] sm:$0xff]  ;;  %s12473_s0 = smov 94   ;;  %vm14469_vm1 = vmand %vm14436_vm7, %vm980_vm3 }
 0x1d3   :  { %5303 = vmatpush1.bf16.msra.mxu1 %v14240_v36  ;;  %v14354_v36 = vpack.i.bf16 %v12572_v2, %v12406_v35  ;;  %5293 = vmatprep.mubr.bf16.mxu0 %v12433_v4 }
 0x1d4   :  { %5334 = vmatprep.mubr.bf16.mxu1 %v12433_v4  ;;  %v2156_v22 = vpop.f32.mrb[60].mxu0  ;;  %11518 = vmatprep.subr.msk.bf16.mxu0 %vm173_vm13, %v14324_v12 }
 0x1d5   :  { %v2197_v5 = vpop.f32.mrb[60].mxu1  ;;  %11520 = vmatprep.subr.msk.bf16.mxu1 %vm173_vm13, %v14326_v56  ;;  %v14363_v3 = vadd.f32 %v2156_v22, %v14255_v61  ;;  %v2158_v6 = vpop.f32.mrb[61].mxu0  ;;  %12280 = vrot.lane.b32.xlu1 %v14348_v26, %s12473_s0 }
 0x1d6   :  { %v14366_v2 = vadd.f32 %v2197_v5, %v14257_v59  ;;  %v2199_v29 = vpop.f32.mrb[61].mxu1  ;;  %12275 = vrot.lane.b32.xlu0 %v14354_v36, %s12473_s0  ;;  %v14375_v32 = vadd.f32 %v2158_v6, %v14261_v47  ;;  %v2160_v59 = vpop.f32.mrb[62].mxu0  ;;  %v5691_v47 = vsel %vm5690_vm10, 1, %v12433_v4 }
 0x1d7   :  { %v14378_v61 = vadd.f32 %v2199_v29, %v14263_v41  ;;  %v2201_v58 = vpop.f32.mrb[62].mxu1  ;;  %v2161_v42 = vpop.f32.mrb[63].mxu0  ;;  %v5699_v1 = vrot.slane %v5691_v47, %v12671_v17  ;;  %v5707_v0 = vrot.slane %v5691_v47, %v12674_v18  ;;  %v5695_v39 = vrot.slane %v5691_v47, %v12683_v20 }
 0x1d8   :  { %v2202_v38 = vpop.f32.mrb[63].mxu1  ;;  %v12141_v41 = vpop.permute.xlu1 %12140  ;;  %v5703_v7 = vrot.slane %v5691_v47, %v12686_v21  ;;  %v5687_v29 = vsel %vm5684_vm6, %v12137_v52, %v12138_v40  ;;  %v6074_v58 = vadd.s32 1, %v12407_v33 }
 0x1d9   :  { %11514 = vmatmul.mubr.msk.bf16.vlgmr.msra.gmra.mrb[168].mxu0 %vm17027_vm11, %v11512_v19  ;;  %v12143_v45 = vunpack.i.h.bf16 %v12141_v41  ;;  %v12142_v37 = vunpack.i.l.bf16 %v12141_v41  ;;  %vm14420_vm14 = vcmp.eq.s32.totalorder %v5699_v1, 1  ;;  %vm14424_vm4 = vcmp.eq.s32.totalorder %v5707_v0, 1  ;;  %12290 = vrot.lane.b32.xlu1 %v14348_v26, %s12474_s26 }
 0x1da   :  { %11516 = vmatmul.mubr.msk.bf16.vlgmr.msra.gmra.mrb[168].mxu1 %vm17028_vm9, %v11512_v19  ;;  %5409 = vmatpush1.bf16.msra.mxu0 %v14384_v13  ;;  %vm14428_vm0 = vcmp.eq.s32.totalorder %v5695_v39, 1  ;;  %vm14459_vm2 = vcmp.eq.s32.totalorder %v5703_v7, 1  ;;  %vm6075_vm10 = vcmp.ge.s32.totalorder %v6074_v58, 0  ;;  %vm6076_vm11 = vcmp.lt.s32.totalorder %v6074_v58, 16 }
 0x1db   :  { %5450 = vmatpush1.bf16.msra.mxu1 %v14387_v48  ;;  %11523 = vmatprep.subr.msk.bf16.mxu0 %vm173_vm13, %v14324_v12  ;;  %v5686_v6 = vsel %vm5684_vm6, %v12138_v40, %v12142_v37  ;;  %v5688_v59 = vsel %vm5684_vm6, %v12143_v45, %v12137_v52  ;;  %v5685_v19 = vsel %vm5684_vm6, %v12142_v37, %v12143_v45  ;;  %v5929_v52 = vsel %vm14469_vm1, 1, %v12433_v4  ;;  %vm14507_vm9 = vmand %vm6075_vm10, %vm6076_vm11 }
 0x1dc   :  { %11525 = vmatprep.subr.msk.bf16.mxu1 %vm173_vm13, %v14326_v56  ;;  %v2303_v53 = vpop.f32.mrb[64].mxu0  ;;  %5440 = vmatprep.mubr.bf16.mxu0 %v12433_v4  ;;  %v14463_v38 = vpop.permute.xlu1 %12150  ;;  %v5713_v28 = vsel %vm14420_vm14, %v5686_v6, 0.0  ;;  %v5715_v1 = vsel %vm14424_vm4, %v5688_v59, 0.0  ;;  %v5714_v40 = vsel %vm14459_vm2, %v5685_v19, 0.0  ;;  %vm17044_vm6 = vmmov %vm17037_vm5  ;;  %v5937_v7 = vrot.slane %v5929_v52, %v12671_v17 }
 0x1dd   :  { %v2344_v54 = vpop.f32.mrb[64].mxu1  ;;  %5481 = vmatprep.mubr.bf16.mxu1 %v12433_v4  ;;  %v14404_v30 = vadd.f32 %v2303_v53, %v14306_v9  ;;  %v2305_v34 = vpop.f32.mrb[65].mxu0  ;;  %v11517_v9 = vld [vmem:[%s16739_s7 + $0x32] sm:$0x3]  ;;  %v5712_v53 = vsel %vm14428_vm0, %v5687_v29, 0.0  ;;  %12285 = vrot.lane.b32.xlu0 %v14354_v36, %s12474_s26  ;;  %vm17045_vm14 = vmmov %vm17037_vm5  ;;  %v12152_v22 = vunpack.i.l.bf16 %v14463_v38  ;;  %vm5922_vm4 = vcmp.lt.s32.totalorder %v12697_v24, 125 }
 0x1de   :  { %v14407_v31 = vadd.f32 %v2344_v54, %v14309_v43  ;;  %v2346_v60 = vpop.f32.mrb[65].mxu1  ;;  %v14410_v27 = vadd.f32 %v2305_v34, %v14316_v57  ;;  %v2307_v44 = vpop.f32.mrb[66].mxu0  ;;  %v5945_v5 = vrot.slane %v5929_v52, %v12674_v18  ;;  %vm17046_vm0 = vcmp.ge.s32.totalorder %v12637_v11, 0  ;;  %12300 = vrot.lane.b32.xlu1 %v14348_v26, %s12475_s2 }
 0x1df   :  { %v14413_v51 = vadd.f32 %v2346_v60, %v14319_v50  ;;  %v2348_v35 = vpop.f32.mrb[66].mxu1  ;;  %v2308_v43 = vpop.f32.mrb[67].mxu0  ;;  %v12153_v50 = vunpack.i.h.bf16 %v14463_v38  ;;  %vm14528_vm7 = vmand %vm14507_vm9, %vm17046_vm0  ;;  %v5933_v59 = vrot.slane %v5929_v52, %v12683_v20  ;;  %v5941_v33 = vrot.slane %v5929_v52, %v12686_v21 }
 0x1e0   :  { %v2349_v46 = vpop.f32.mrb[67].mxu1  ;;  %v5716_v43 = vpack.c.bf16 %v5712_v53, %v5712_v53  ;;  %vm5949_vm1 = vcmp.eq.s32.totalorder %v5945_v5, 1  ;;  %vm17055_vm0 = vcmp.ge.s32.totalorder %v12634_v10, 0 }
 0x1e1   :  { %11519 = vmatmul.mubr.msk.bf16.vlgmr.msra.gmra.mrb[172].mxu0 %vm17023_vm8, %v11517_v9  ;;  %v5718_v46 = vpack.c.bf16 %v5714_v40, %v5714_v40  ;;  %12295 = vrot.lane.b32.xlu0 %v14354_v36, %s12475_s2  ;;  %vm14545_vm8 = vcmp.eq.s32.totalorder %v5937_v7, 1  ;;  %vm5946_vm10 = vcmp.eq.s32.totalorder %v5933_v59, 1  ;;  %vm5948_vm11 = vcmp.eq.s32.totalorder %v5941_v33, 1 }
 0x1e2   :  { %11521 = vmatmul.mubr.msk.bf16.vlgmr.msra.gmra.mrb[172].mxu1 %vm17037_vm5, %v11517_v9  ;;  %5500 = vmatpush1.bf16.msra.mxu0 %v14384_v13  ;;  %v5719_v9 = vpack.c.bf16 %v5715_v1, %v5715_v1  ;;  %vm17051_vm5 = vcmp.lt.s32.totalorder %v12637_v11, 16  ;;  %v14560_v53 = vsel %vm173_vm13, %v5716_v43, 0 }
 0x1e3   :  { %5541 = vmatpush1.bf16.msra.mxu1 %v14387_v48  ;;  %11528 = vmatprep.subr.msk.bf16.mxu0 %vm173_vm13, %v14324_v12  ;;  %v14473_v12 = vpop.permute.xlu0 %12145  ;;  %vm14555_vm2 = vmand %vm14528_vm7, %vm17051_vm5 }
 0x1e4   :  { %11530 = vmatprep.subr.msk.bf16.mxu1 %vm173_vm13, %v14326_v56  ;;  %v2394_v56 = vpop.f32.mrb[68].mxu0  ;;  %5531 = vmatprep.mubr.bf16.mxu0 %v12433_v4  ;;  %v12148_v57 = vunpack.i.h.bf16 %v14473_v12  ;;  %v12147_v6 = vunpack.i.l.bf16 %v14473_v12  ;;  %vm14589_vm7 = vmand %vm14507_vm9, %vm17055_vm0 }
 0x1e5   :  { %v2435_v41 = vpop.f32.mrb[68].mxu1  ;;  %5572 = vmatprep.mubr.bf16.mxu1 %v12433_v4  ;;  %v14484_v54 = vadd.f32 %v2394_v56, %v14363_v3  ;;  %v2396_v37 = vpop.f32.mrb[69].mxu0  ;;  %12310 = vrot.lane.b32.xlu1 %v14348_v26, %s12476_s16 }
 0x1e6   :  { %v14487_v45 = vadd.f32 %v2435_v41, %v14366_v2  ;;  %v2437_v0 = vpop.f32.mrb[69].mxu1  ;;  %v14492_v39 = vadd.f32 %v2396_v37, %v14375_v32  ;;  %v2398_v3 = vpop.f32.mrb[70].mxu0  ;;  %v11522_v2 = vld [vmem:[%s16741_s9 + $0x1a] sm:$0x3]  ;;  %v5717_v32 = vpack.c.bf16 %v5713_v28, %v5713_v28  ;;  %v11527_v28 = vld [vmem:[%s16743_s11 + $0xa] sm:$0x3]  ;;  %12305 = vrot.lane.b32.xlu0 %v14354_v36, %s12476_s16 }
 0x1e7   :  { %v14495_v34 = vadd.f32 %v2437_v0, %v14378_v61  ;;  %v2439_v60 = vpop.f32.mrb[70].mxu1  ;;  %v2399_v44 = vpop.f32.mrb[71].mxu0  ;;  %v14563_v37 = vsel %vm173_vm13, %v5718_v46, 0  ;;  %v5926_v0 = vsel %vm5922_vm4, %v12153_v50, %v12147_v6  ;;  %v5923_v3 = vsel %vm5922_vm4, %v12152_v22, %v12153_v50 }
 0x1e8   :  { %v2440_v35 = vpop.f32.mrb[71].mxu1  ;;  %v5925_v60 = vsel %vm5922_vm4, %v12147_v6, %v12148_v57  ;;  %v12156_v40 = vpop.permute.xlu0 %12155  ;;  %v14580_v44 = vsel %vm14555_vm2, 1, %v12433_v4 }
 0x1e9   :  { %11524 = vmatmul.mubr.msk.bf16.vlgmr.msra.gmra.mrb[176].mxu0 %vm17044_vm6, %v11522_v2  ;;  %v5953_v35 = vsel %vm5949_vm1, %v5926_v0, 0.0  ;;  %v12158_v7 = vunpack.i.h.bf16 %v12156_v40  ;;  %v6092_v43 = vrot.slane %v14580_v44, %v12686_v21  ;;  %12320 = vrot.lane.b32.xlu1 %v14348_v26, %s12477_s19 }
 0x1ea   :  { %11526 = vmatmul.mubr.msk.bf16.vlgmr.msra.gmra.mrb[176].mxu1 %vm17045_vm14, %v11522_v2  ;;  %5591 = vmatpush1.bf16.msra.mxu0 %v14384_v13  ;;  %v12161_v2 = vpop.permute.xlu1 %12160  ;;  %vm17054_vm14 = vmmov %vm17044_vm6  ;;  %v6088_v13 = vrot.slane %v14580_v44, %v12671_v17 }
 0x1eb   :  { %5632 = vmatpush1.bf16.msra.mxu1 %v14387_v48  ;;  %5622 = vmatprep.mubr.bf16.mxu0 %v12433_v4  ;;  %v12162_v46 = vunpack.i.l.bf16 %v12161_v2  ;;  %v12163_v6 = vunpack.i.h.bf16 %v12161_v2 }
 0x1ec   :  { %5663 = vmatprep.mubr.bf16.mxu1 %v12433_v4  ;;  %v2541_v48 = vpop.f32.mrb[72].mxu0  ;;  %11533 = vmatprep.subr.msk.bf16.mxu0 %vm173_vm13, %v5717_v32  ;;  %vm14626_vm2 = vcmp.eq.s32.totalorder %v6088_v13, 1 }
 0x1ed   :  { %v2582_v29 = vpop.f32.mrb[72].mxu1  ;;  %11535 = vmatprep.subr.msk.bf16.mxu1 %vm173_vm13, %v5719_v9  ;;  %v2589_v58 = vadd.f32 %v2541_v48, %v14404_v30  ;;  %v2543_v42 = vpop.f32.mrb[73].mxu0  ;;  %12315 = vrot.lane.b32.xlu0 %v14354_v36, %s12477_s19 }
 0x1ee   :  { %v2591_v19 = vadd.f32 %v2582_v29, %v14407_v31  ;;  %v2584_v38 = vpop.f32.mrb[73].mxu1  ;;  %v2590_v47 = vadd.f32 %v2543_v42, %v14410_v27  ;;  %v2545_v56 = vpop.f32.mrb[74].mxu0  ;;  %v5924_v31 = vsel %vm5922_vm4, %v12148_v57, %v12152_v22  ;;  %vm6069_vm4 = vcmp.lt.s32.totalorder %v12697_v24, 115  ;;  %12330 = vrot.lane.b32.xlu1 %v14348_v26, %s12478_s21  ;;  %v11542_v42 = vld [vmem:[%s16739_s7 + $0x36] sm:$0x3] }
 0x1ef   :  { %v2592_v12 = vadd.f32 %v2584_v38, %v14413_v51  ;;  %v2586_v41 = vpop.f32.mrb[74].mxu1  ;;  %v2546_v51 = vpop.f32.mrb[75].mxu0  ;;  %v14575_v52 = vsel %vm14545_vm8, %v5924_v31, 0.0  ;;  %v14595_v22 = vsel %vm5946_vm10, %v5925_v60, 0.0  ;;  %v14597_v57 = vsel %vm5948_vm11, %v5923_v3, 0.0  ;;  %vm17065_vm10 = vmmov %vm17044_vm6 }
 0x1f0   :  { %v2587_v1 = vpop.f32.mrb[75].mxu1  ;;  %vm17058_vm8 = vcmp.lt.s32.totalorder %v12634_v10, 16  ;;  %v5957_v27 = vpack.c.bf16 %v5953_v35, %v5953_v35  ;;  %v6071_v51 = vsel %vm6069_vm4, %v12158_v7, %v12162_v46  ;;  %vm17066_vm11 = vmmov %vm17044_vm6  ;;  %v6070_v2 = vsel %vm6069_vm4, %v12162_v46, %v12163_v6 }
 0x1f1   :  { %11529 = vmatmul.mubr.msk.bf16.vlgmr.msra.gmra.mrb[180].mxu0 %vm17044_vm6, %v11527_v28  ;;  %vm14609_vm5 = vmand %vm14589_vm7, %vm17058_vm8  ;;  %v5954_v1 = vpack.c.bf16 %v14595_v22, %v14595_v22  ;;  %v6084_v35 = vrot.slane %v14580_v44, %v12683_v20  ;;  %vm6220_vm6 = vcmp.lt.s32.totalorder %v12697_v24, 114  ;;  %v6102_v46 = vsel %vm14626_vm2, %v6071_v51, 0.0  ;;  %12325 = vrot.lane.b32.xlu0 %v14354_v36, %s12478_s21 }
 0x1f2   :  { %11531 = vmatmul.mubr.msk.bf16.vlgmr.msra.gmra.mrb[180].mxu1 %vm17054_vm14, %v11527_v28  ;;  %5738 = vmatpush1.bf16.msra.mxu0 %v14560_v53  ;;  %v5955_v28 = vpack.c.bf16 %v14575_v52, %v14575_v52  ;;  %v14639_v60 = vsel %vm14609_vm5, 1, %v12433_v4  ;;  %v14647_v52 = vpop.permute.xlu0 %12165  ;;  %vm17073_vm7 = vmmov %vm17065_vm10  ;;  %vm17075_vm2 = vcmp.ge.s32.totalorder %v12646_v14, 0 }
 0x1f3   :  { %5779 = vmatpush1.bf16.msra.mxu1 %v14563_v37  ;;  %11538 = vmatprep.subr.msk.bf16.mxu0 %vm173_vm13, %v5717_v32  ;;  %v6096_v32 = vrot.slane %v14580_v44, %v12674_v18  ;;  %v12167_v13 = vunpack.i.l.bf16 %v14647_v52  ;;  %vm14678_vm14 = vcmp.eq.s32.totalorder %v6084_v35, 1  ;;  %vm17074_vm8 = vmmov %vm17073_vm7 }
 0x1f4   :  { %11540 = vmatprep.subr.msk.bf16.mxu1 %vm173_vm13, %v5719_v9  ;;  %v2692_v50 = vpop.f32.mrb[76].mxu0  ;;  %5769 = vmatprep.mubr.bf16.mxu0 %v12433_v4  ;;  %v12157_v9 = vunpack.i.l.bf16 %v12156_v40  ;;  %v14645_v40 = vpop.permute.xlu1 %12170 }
 0x1f5   :  { %v2733_v5 = vpop.f32.mrb[76].mxu1  ;;  %5810 = vmatprep.mubr.bf16.mxu1 %v12433_v4  ;;  %v2740_v48 = vadd.f32 %v2692_v50, %v2589_v58  ;;  %v2694_v59 = vpop.f32.mrb[77].mxu0  ;;  %vm14630_vm1 = vcmp.eq.s32.totalorder %v6096_v32, 1  ;;  %v12173_v50 = vunpack.i.h.bf16 %v14645_v40  ;;  %12340 = vrot.lane.b32.xlu1 %v14348_v26, %s12479_s24 }
 0x1f6   :  { %v2742_v29 = vadd.f32 %v2733_v5, %v2591_v19  ;;  %v2735_v33 = vpop.f32.mrb[77].mxu1  ;;  %v2741_v38 = vadd.f32 %v2694_v59, %v2590_v47  ;;  %v2696_v41 = vpop.f32.mrb[78].mxu0  ;;  %v11532_v19 = vld [vmem:[%s16739_s7 + $0x34] sm:$0x3]  ;;  %v5956_v47 = vpack.c.bf16 %v14597_v57, %v14597_v57  ;;  %v6073_v3 = vsel %vm6069_vm4, %v12163_v6, %v12157_v9  ;;  %12335 = vrot.lane.b32.xlu0 %v14354_v36, %s12479_s24 }
 0x1f7   :  { %v2743_v56 = vadd.f32 %v2735_v33, %v2592_v12  ;;  %v2737_v58 = vpop.f32.mrb[78].mxu1  ;;  %v2697_v30 = vpop.f32.mrb[79].mxu0  ;;  %v6072_v22 = vsel %vm6069_vm4, %v12157_v9, %v12158_v7  ;;  %v6104_v57 = vsel %vm14630_vm1, %v6073_v3, 0.0  ;;  %v12172_v5 = vunpack.i.l.bf16 %v14645_v40  ;;  %vm14721_vm1 = vmand %vm14507_vm9, %vm17075_vm2 }
 0x1f8   :  { %v2738_v31 = vpop.f32.mrb[79].mxu1  ;;  %v12168_v6 = vunpack.i.h.bf16 %v14647_v52  ;;  %vm14682_vm4 = vcmp.eq.s32.totalorder %v6092_v43, 1  ;;  %v5964_v30 = vsel %vm173_vm13, %v5954_v1, 0  ;;  %v5970_v51 = vsel %vm173_vm13, %v5956_v47, 0  ;;  %v12176_v12 = vpop.permute.xlu0 %12175 }
 0x1f9   :  { %11534 = vmatmul.mubr.msk.bf16.vlgmr.msra.gmra.mrb[184].mxu0 %vm17065_vm10, %v11532_v19  ;;  %v6108_v0 = vpack.c.bf16 %v6104_v57, %v6104_v57  ;;  %v6224_v3 = vsel %vm6220_vm6, %v12173_v50, %v12167_v13  ;;  %v6101_v40 = vsel %vm14678_vm14, %v6072_v22, 0.0  ;;  %v6103_v1 = vsel %vm14682_vm4, %v6070_v2, 0.0  ;;  %vm17083_vm4 = vmmov %vm17073_vm7  ;;  %12350 = vrot.lane.b32.xlu1 %v14348_v26, %s12480_s27 }
 0x1fa   :  { %11536 = vmatmul.mubr.msk.bf16.vlgmr.msra.gmra.mrb[184].mxu1 %vm17066_vm11, %v11532_v19  ;;  %5829 = vmatpush1.bf16.msra.mxu0 %v14560_v53  ;;  %v6235_v53 = vrot.slane %v14639_v60, %v12671_v17  ;;  %v6231_v47 = vrot.slane %v14639_v60, %v12683_v20  ;;  %v6239_v52 = vrot.slane %v14639_v60, %v12686_v21 }
 0x1fb   :  { %5870 = vmatpush1.bf16.msra.mxu1 %v14563_v37  ;;  %5860 = vmatprep.mubr.bf16.mxu0 %v12433_v4  ;;  %v6243_v37 = vrot.slane %v14639_v60, %v12674_v18  ;;  %v6105_v35 = vpack.c.bf16 %v6101_v40, %v6101_v40  ;;  %v6107_v43 = vpack.c.bf16 %v6103_v1, %v6103_v1 }
 0x1fc   :  { %5901 = vmatprep.mubr.bf16.mxu1 %v12433_v4  ;;  %v2839_v44 = vpop.f32.mrb[80].mxu0  ;;  %11543 = vmatprep.subr.msk.bf16.mxu0 %vm173_vm13, %v5955_v28  ;;  %v11537_v28 = vld [vmem:[%s16741_s9 + $0x1c] sm:$0x3]  ;;  %vm14697_vm0 = vcmp.eq.s32.totalorder %v6235_v53, 1  ;;  %v6221_v60 = vsel %vm6220_vm6, %v12172_v5, %v12173_v50  ;;  %v6223_v53 = vsel %vm6220_vm6, %v12167_v13, %v12168_v6  ;;  %vm14739_vm10 = vcmp.eq.s32.totalorder %v6231_v47, 1 }
 0x1fd   :  { %v2880_v7 = vpop.f32.mrb[80].mxu1  ;;  %11545 = vmatprep.subr.msk.bf16.mxu1 %vm173_vm13, %v5957_v27  ;;  %v14674_v32 = vadd.f32 %v2839_v44, %v2740_v48  ;;  %v2841_v59 = vpop.f32.mrb[81].mxu0  ;;  %vm6247_vm5 = vcmp.eq.s32.totalorder %v6243_v37, 1  ;;  %vm14743_vm11 = vcmp.eq.s32.totalorder %v6239_v52, 1  ;;  %12345 = vrot.lane.b32.xlu0 %v14354_v36, %s12480_s27 }
 0x1fe   :  { %v14676_v9 = vadd.f32 %v2880_v7, %v2742_v29  ;;  %v2882_v33 = vpop.f32.mrb[81].mxu1  ;;  %v14688_v58 = vadd.f32 %v2841_v59, %v2741_v38  ;;  %v2843_v29 = vpop.f32.mrb[82].mxu0  ;;  %v6106_v38 = vpack.c.bf16 %v6102_v46, %v6102_v46  ;;  %v6251_v37 = vsel %vm6247_vm5, %v6224_v3, 0.0  ;;  %12360 = vrot.lane.b32.xlu1 %v14348_v26, %s12481_s29 }
 0x1ff   :  { %v14690_v48 = vadd.f32 %v2882_v33, %v2743_v56  ;;  %v2884_v19 = vpop.f32.mrb[82].mxu1  ;;  %v2844_v31 = vpop.f32.mrb[83].mxu0  ;;  %v6222_v56 = vsel %vm6220_vm6, %v12168_v6, %v12172_v5  ;;  %vm17082_vm6 = vcmp.lt.s32.totalorder %v12646_v14, 16 }
 0x200   :  { %v2885_v27 = vpop.f32.mrb[83].mxu1  ;;  %v6249_v57 = vsel %vm14697_vm0, %v6222_v56, 0.0  ;;  %vm6464_vm14 = vmand %vm14721_vm1, %vm17082_vm6  ;;  %v6250_v31 = vsel %vm14743_vm11, %v6221_v60, 0.0 }
 0x201   :  { %11539 = vmatmul.mubr.msk.bf16.vlgmr.msra.gmra.mrb[188].mxu0 %vm17073_vm7, %v11537_v28  ;;  %v6253_v19 = vpack.c.bf16 %v6249_v57, %v6249_v57  ;;  %vm17084_vm0 = vmmov %vm17083_vm4  ;;  %v6465_v27 = vsel %vm6464_vm14, 1, %v12433_v4  ;;  %vm6458_vm7 = vcmp.lt.s32.totalorder %v12697_v24, 113  ;;  %12355 = vrot.lane.b32.xlu0 %v14354_v36, %s12481_s29 }
 0x202   :  { %11541 = vmatmul.mubr.msk.bf16.vlgmr.msra.gmra.mrb[188].mxu1 %vm17074_vm8, %v11537_v28  ;;  %5976 = vmatpush1.bf16.msra.mxu0 %v5964_v30  ;;  %v6255_v28 = vpack.c.bf16 %v6251_v37, %v6251_v37  ;;  %v6248_v30 = vsel %vm14739_vm10, %v6223_v53, 0.0  ;;  %v6473_v40 = vrot.slane %v6465_v27, %v12671_v17  ;;  %v6481_v1 = vrot.slane %v6465_v27, %v12674_v18  ;;  %vm17085_vm8 = vmmov %vm17084_vm0 }
 0x203   :  { %6017 = vmatpush1.bf16.msra.mxu1 %v5970_v51  ;;  %6007 = vmatprep.mubr.bf16.mxu0 %v12433_v4  ;;  %v12181_v51 = vpop.permute.xlu1 %12180  ;;  %v12177_v37 = vunpack.i.l.bf16 %v12176_v12  ;;  %vm17086_vm5 = vmmov %vm17084_vm0 }
 0x204   :  { %6048 = vmatprep.mubr.bf16.mxu1 %v12433_v4  ;;  %v2930_v22 = vpop.f32.mrb[84].mxu0  ;;  %11548 = vmatprep.subr.msk.bf16.mxu0 %vm173_vm13, %v6106_v38  ;;  %v6252_v38 = vpack.c.bf16 %v6248_v30, %v6248_v30  ;;  %v12182_v2 = vunpack.i.l.bf16 %v12181_v51  ;;  %v12183_v53 = vunpack.i.h.bf16 %v12181_v51  ;;  %vm14801_vm2 = vcmp.eq.s32.totalorder %v6473_v40, 1  ;;  %vm17093_vm6 = vmmov %vm17084_vm0 }
 0x205   :  { %v2971_v46 = vpop.f32.mrb[84].mxu1  ;;  %11550 = vmatprep.subr.msk.bf16.mxu1 %vm173_vm13, %v6108_v0  ;;  %v14734_v44 = vadd.f32 %v2930_v22, %v14484_v54  ;;  %v2932_v59 = vpop.f32.mrb[85].mxu0  ;;  %v6254_v0 = vpack.c.bf16 %v6250_v31, %v6250_v31  ;;  %v12178_v22 = vunpack.i.h.bf16 %v12176_v12  ;;  %vm6485_vm1 = vcmp.eq.s32.totalorder %v6481_v1, 1  ;;  %vm17094_vm14 = vmmov %vm17084_vm0 }
 0x206   :  { %v14737_v7 = vadd.f32 %v2971_v46, %v14487_v45  ;;  %v2973_v33 = vpop.f32.mrb[85].mxu1  ;;  %v14749_v6 = vadd.f32 %v2932_v59, %v14492_v39  ;;  %v2934_v45 = vpop.f32.mrb[86].mxu0  ;;  %v6115_v39 = vsel %vm173_vm13, %v6105_v35, 0  ;;  %v6262_v50 = vsel %vm173_vm13, %v6252_v38, 0 }
 0x207   :  { %v14752_v54 = vadd.f32 %v2973_v33, %v14495_v34  ;;  %v2975_v13 = vpop.f32.mrb[86].mxu1  ;;  %v2935_v41 = vpop.f32.mrb[87].mxu0  ;;  %v6121_v34 = vsel %vm173_vm13, %v6107_v43, 0  ;;  %v6268_v5 = vsel %vm173_vm13, %v6254_v0, 0  ;;  %v6477_v45 = vrot.slane %v6465_v27, %v12686_v21 }
 0x208   :  { %v2976_v29 = vpop.f32.mrb[87].mxu1  ;;  %v6460_v13 = vsel %vm6458_vm7, %v12178_v22, %v12182_v2 }
 0x209   :  { %11544 = vmatmul.mubr.msk.bf16.vlgmr.msra.gmra.mrb[192].mxu0 %vm17083_vm4, %v11542_v42  ;;  %vm14821_vm11 = vcmp.eq.s32.totalorder %v6477_v45, 1  ;;  %vm17095_vm4 = vcmp.ge.s32.totalorder %v12630_v8, 0 }
 0x20a   :  { %11546 = vmatmul.mubr.msk.bf16.vlgmr.msra.gmra.mrb[192].mxu1 %vm17084_vm0, %v11542_v42  ;;  %6127 = vmatpush1.bf16.msra.mxu0 %v6115_v39  ;;  %v6462_v42 = vsel %vm6458_vm7, %v12183_v53, %v12177_v37  ;;  %v6459_v39 = vsel %vm6458_vm7, %v12182_v2, %v12183_v53  ;;  %vm14852_vm0 = vmand %vm14507_vm9, %vm17095_vm4 }
 0x20b   :  { %6168 = vmatpush1.bf16.msra.mxu1 %v6121_v34  ;;  %6158 = vmatprep.mubr.bf16.mxu0 %v12433_v4  ;;  %v6461_v34 = vsel %vm6458_vm7, %v12177_v37, %v12178_v22  ;;  %v6489_v51 = vsel %vm6485_vm1, %v6462_v42, 0.0  ;;  %v6488_v22 = vsel %vm14821_vm11, %v6459_v39, 0.0  ;;  %vm17098_vm7 = vcmp.lt.s32.totalorder %v12630_v8, 16 }
 0x20c   :  { %6199 = vmatprep.mubr.bf16.mxu1 %v12433_v4  ;;  %v3077_v56 = vpop.f32.mrb[88].mxu0  ;;  %11553 = vmatprep.subr.msk.bf16.mxu0 %vm173_vm13, %v6253_v19  ;;  %vm6787_vm1 = vcmp.lt.s32.totalorder %v12697_v24, 112 }
 0x20d   :  { %v3118_v3 = vpop.f32.mrb[88].mxu1  ;;  %11555 = vmatprep.subr.msk.bf16.mxu1 %vm173_vm13, %v6255_v28  ;;  %v14779_v47 = vadd.f32 %v3077_v56, %v14674_v32  ;;  %v3079_v35 = vpop.f32.mrb[89].mxu0 }
 0x20e   :  { %v14782_v52 = vadd.f32 %v3118_v3, %v14676_v9  ;;  %v3120_v43 = vpop.f32.mrb[89].mxu1  ;;  %v14787_v46 = vadd.f32 %v3079_v35, %v14688_v58  ;;  %v3081_v32 = vpop.f32.mrb[90].mxu0  ;;  %v11547_v9 = vld [vmem:[%s16739_s7 + $0x38] sm:$0x3]  ;;  %v6469_v58 = vrot.slane %v6465_v27, %v12683_v20  ;;  %v6487_v27 = vsel %vm14801_vm2, %v6460_v13, 0.0  ;;  %vm17099_vm2 = vmmov %vm17086_vm5 }
 0x20f   :  { %v14790_v60 = vadd.f32 %v3120_v43, %v14690_v48  ;;  %v3122_v57 = vpop.f32.mrb[90].mxu1  ;;  %v3082_v59 = vpop.f32.mrb[91].mxu0  ;;  %v11552_v3 = vld [vmem:[%s16739_s7 + $0x3a] sm:$0x3]  ;;  %vm17101_vm11 = vmmov %vm17099_vm2 }
 0x210   :  { %v3123_v33 = vpop.f32.mrb[91].mxu1  ;;  %vm14817_vm10 = vcmp.eq.s32.totalorder %v6469_v58, 1  ;;  %v12191_v48 = vpop.permute.xlu1 %12190 }
 0x211   :  { %11549 = vmatmul.mubr.msk.bf16.vlgmr.msra.gmra.mrb[196].mxu0 %vm17085_vm8, %v11547_v9  ;;  %v6486_v2 = vsel %vm14817_vm10, %v6461_v34, 0.0  ;;  %vm6793_vm8 = vmand %vm14852_vm0, %vm17098_vm7  ;;  %v12186_v13 = vpop.permute.xlu0 %12185 }
 0x212   :  { %11551 = vmatmul.mubr.msk.bf16.vlgmr.msra.gmra.mrb[196].mxu1 %vm17086_vm5, %v11547_v9  ;;  %6274 = vmatpush1.bf16.msra.mxu0 %v6262_v50  ;;  %vm17100_vm10 = vmmov %vm17099_vm2 }
 0x213   :  { %6315 = vmatpush1.bf16.msra.mxu1 %v6268_v5  ;;  %11558 = vmatprep.subr.msk.bf16.mxu0 %vm173_vm13, %v6253_v19  ;;  %vm17104_vm7 = vmmov %vm17099_vm2 }
 0x214   :  { %11560 = vmatprep.subr.msk.bf16.mxu1 %vm173_vm13, %v6255_v28  ;;  %v3168_v41 = vpop.f32.mrb[92].mxu0  ;;  %6305 = vmatprep.mubr.bf16.mxu0 %v12433_v4 }
 0x215   :  { %v3209_v29 = vpop.f32.mrb[92].mxu1  ;;  %6346 = vmatprep.mubr.bf16.mxu1 %v12433_v4  ;;  %v3170_v28 = vpop.f32.mrb[93].mxu0  ;;  %v3216_v12 = vadd.f32 %v3168_v41, %v14734_v44  ;;  %v14836_v44 = vpack.c.bf16 %v6487_v27, %v6487_v27  ;;  %v12192_v27 = vunpack.i.l.bf16 %v12191_v48 }
 0x216   :  { %v3211_v31 = vpop.f32.mrb[93].mxu1  ;;  %v3218_v38 = vadd.f32 %v3209_v29, %v14737_v7  ;;  %v3172_v0 = vpop.f32.mrb[94].mxu0  ;;  %v3217_v40 = vadd.f32 %v3170_v28, %v14749_v6  ;;  %v14838_v7 = vpack.c.bf16 %v6489_v51, %v6489_v51  ;;  %v6490_v6 = vpack.c.bf16 %v6486_v2, %v6486_v2 }
 0x217   :  { %v3213_v56 = vpop.f32.mrb[94].mxu1  ;;  %v3219_v1 = vadd.f32 %v3211_v31, %v14752_v54  ;;  %v3173_v35 = vpop.f32.mrb[95].mxu0  ;;  %v6492_v54 = vpack.c.bf16 %v6488_v22, %v6488_v22  ;;  %v12193_v31 = vunpack.i.h.bf16 %v12191_v48  ;;  %v12187_v2 = vunpack.i.l.bf16 %v12186_v13 }
 0x218   :  { %v3214_v43 = vpop.f32.mrb[95].mxu1  ;;  %v14882_v36 = vsel %vm173_vm13, %v6490_v6, 0  ;;  %v11562_v35 = vld [vmem:[%s16739_s7 + $0x3c] sm:$0x3] }
 0x219   :  { %11554 = vmatmul.mubr.msk.bf16.vlgmr.msra.gmra.mrb[200].mxu0 %vm17093_vm6, %v11552_v3  ;;  %v12188_v43 = vunpack.i.h.bf16 %v12186_v13 }
 0x21a   :  { %11556 = vmatmul.mubr.msk.bf16.vlgmr.msra.gmra.mrb[200].mxu1 %vm17094_vm14, %v11552_v3  ;;  %6365 = vmatpush1.bf16.msra.mxu0 %v6262_v50 }
 0x21b   :  { %6406 = vmatpush1.bf16.msra.mxu1 %v6268_v5  ;;  %6396 = vmatprep.mubr.bf16.mxu0 %v12433_v4 }
 0x21c   :  { %6437 = vmatprep.mubr.bf16.mxu1 %v12433_v4  ;;  %v3316_v57 = vpop.f32.mrb[96].mxu0  ;;  %11563 = vmatprep.subr.msk.bf16.mxu0 %vm173_vm13, %v14836_v44 }
 0x21d   :  { %v3357_v9 = vpop.f32.mrb[96].mxu1  ;;  %11565 = vmatprep.subr.msk.bf16.mxu1 %vm173_vm13, %v14838_v7  ;;  %v14861_v53 = vadd.f32 %v3316_v57, %v14779_v47  ;;  %v3318_v59 = vpop.f32.mrb[97].mxu0  ;;  %v11557_v47 = vld [vmem:[%s16741_s9 + $0x1e] sm:$0x3] }
 0x21e   :  { %v14864_v37 = vadd.f32 %v3357_v9, %v14782_v52  ;;  %v3359_v33 = vpop.f32.mrb[97].mxu1  ;;  %v14869_v50 = vadd.f32 %v3318_v59, %v14787_v46  ;;  %v3320_v58 = vpop.f32.mrb[98].mxu0  ;;  %v14885_v46 = vsel %vm173_vm13, %v6492_v54, 0  ;;  %v6791_v54 = vsel %vm6787_vm1, %v12193_v31, %v12187_v2 }
 0x21f   :  { %v14872_v5 = vadd.f32 %v3359_v33, %v14790_v60  ;;  %v3361_v45 = vpop.f32.mrb[98].mxu1  ;;  %v3321_v26 = vpop.f32.mrb[99].mxu0  ;;  %v6794_v60 = vsel %vm6793_vm8, 1, %v12433_v4  ;;  %v6788_v33 = vsel %vm6787_vm1, %v12192_v27, %v12193_v31  ;;  %vm17105_vm8 = vmmov %vm17099_vm2 }
 0x220   :  { %v3362_v52 = vpop.f32.mrb[99].mxu1  ;;  %v6802_v29 = vrot.slane %v6794_v60, %v12671_v17  ;;  %v6810_v39 = vrot.slane %v6794_v60, %v12674_v18  ;;  %v6806_v6 = vrot.slane %v6794_v60, %v12686_v21  ;;  %v11567_v26 = vld [vmem:[%s16741_s9 + $0x20] sm:$0x3] }
 0x221   :  { %11559 = vmatmul.mubr.msk.bf16.vlgmr.msra.gmra.mrb[204].mxu0 %vm17086_vm5, %v11557_v47  ;;  %vm17106_vm5 = vcmp.ge.s32.totalorder %v12666_v16, 0 }
 0x222   :  { %11561 = vmatmul.mubr.msk.bf16.vlgmr.msra.gmra.mrb[204].mxu1 %vm17099_vm2, %v11557_v47  ;;  %6512 = vmatpush1.bf16.msra.mxu0 %v14882_v36  ;;  %vm6812_vm6 = vcmp.eq.s32.totalorder %v6802_v29, 1  ;;  %vm14918_vm14 = vcmp.eq.s32.totalorder %v6810_v39, 1  ;;  %vm6813_vm0 = vcmp.eq.s32.totalorder %v6806_v6, 1  ;;  %vm7121_vm2 = vmand %vm14507_vm9, %vm17106_vm5 }
 0x223   :  { %6553 = vmatpush1.bf16.msra.mxu1 %v14885_v46  ;;  %11568 = vmatprep.subr.msk.bf16.mxu0 %vm173_vm13, %v14836_v44 }
 0x224   :  { %11570 = vmatprep.subr.msk.bf16.mxu1 %vm173_vm13, %v14838_v7  ;;  %v3407_v42 = vpop.f32.mrb[100].mxu0  ;;  %6543 = vmatprep.mubr.bf16.mxu0 %v12433_v4 }
 0x225   :  { %v3448_v41 = vpop.f32.mrb[100].mxu1  ;;  %6584 = vmatprep.mubr.bf16.mxu1 %v12433_v4  ;;  %v14900_v34 = vadd.f32 %v3407_v42, %v3216_v12  ;;  %v3409_v19 = vpop.f32.mrb[101].mxu0 }
 0x226   :  { %v14902_v30 = vadd.f32 %v3448_v41, %v3218_v38  ;;  %v3450_v28 = vpop.f32.mrb[101].mxu1  ;;  %v14904_v51 = vadd.f32 %v3409_v19, %v3217_v40  ;;  %v3411_v56 = vpop.f32.mrb[102].mxu0  ;;  %v6798_v38 = vrot.slane %v6794_v60, %v12683_v20  ;;  %v6817_v41 = vsel %vm6813_vm0, %v6788_v33, 0.0 }
 0x227   :  { %v14906_v0 = vadd.f32 %v3450_v28, %v3219_v1  ;;  %v3452_v3 = vpop.f32.mrb[102].mxu1  ;;  %v3412_v12 = vpop.f32.mrb[103].mxu0  ;;  %v6789_v1 = vsel %vm6787_vm1, %v12188_v43, %v12192_v27  ;;  %v6821_v39 = vpack.c.bf16 %v6817_v41, %v6817_v41 }
 0x228   :  { %v3453_v22 = vpop.f32.mrb[103].mxu1  ;;  %vm6811_vm4 = vcmp.eq.s32.totalorder %v6798_v38, 1  ;;  %v6816_v58 = vsel %vm6812_vm6, %v6789_v1, 0.0  ;;  %vm17109_vm6 = vmmov %vm17104_vm7  ;;  %v12201_v1 = vpop.permute.xlu1 %12200 }
 0x229   :  { %11564 = vmatmul.mubr.msk.bf16.vlgmr.msra.gmra.mrb[208].mxu0 %vm17100_vm10, %v11562_v35  ;;  %v14941_v48 = vpack.c.bf16 %v6816_v58, %v6816_v58  ;;  %v14976_v6 = vsel %vm173_vm13, %v6821_v39, 0 }
 0x22a   :  { %11566 = vmatmul.mubr.msk.bf16.vlgmr.msra.gmra.mrb[208].mxu1 %vm17101_vm11, %v11562_v35  ;;  %6603 = vmatpush1.bf16.msra.mxu0 %v14882_v36  ;;  %vm17108_vm11 = vmmov %vm17104_vm7 }
 0x22b   :  { %6644 = vmatpush1.bf16.msra.mxu1 %v14885_v46  ;;  %11573 = vmatprep.subr.msk.bf16.mxu0 %vm173_vm13, %v14836_v44  ;;  %v6790_v44 = vsel %vm6787_vm1, %v12187_v2, %v12188_v43  ;;  %v11572_v2 = vld [vmem:[%s16743_s11 + $0xc] sm:$0x3]  ;;  %vm17107_vm1 = vcmp.lt.s32.totalorder %v12666_v16, 16 }
 0x22c   :  { %11575 = vmatprep.subr.msk.bf16.mxu1 %vm173_vm13, %v14838_v7  ;;  %v3498_v32 = vpop.f32.mrb[104].mxu0  ;;  %6634 = vmatprep.mubr.bf16.mxu0 %v12433_v4  ;;  %v6818_v7 = vsel %vm14918_vm14, %v6791_v54, 0.0  ;;  %v6815_v42 = vsel %vm6811_vm4, %v6790_v44, 0.0  ;;  %vm7122_vm10 = vmand %vm7121_vm2, %vm17107_vm1  ;;  %v10343_v54 = vld [vmem:[%s16740_s8] sm:$0xf]  ;;  %vm7116_vm14 = vcmp.lt.s32.totalorder %v12697_v24, 111 }
 0x22d   :  { %v3539_v57 = vpop.f32.mrb[104].mxu1  ;;  %6675 = vmatprep.mubr.bf16.mxu1 %v12433_v4  ;;  %v3500_v9 = vpop.f32.mrb[105].mxu0  ;;  %v14943_v13 = vpack.c.bf16 %v6818_v7, %v6818_v7  ;;  %v6819_v29 = vpack.c.bf16 %v6815_v42, %v6815_v42  ;;  %v7123_v40 = vsel %vm7122_vm10, 1, %v12433_v4  ;;  %10346 = vperm.xlu1 %12365, %v10343_v54   ;;  %vm17110_vm4 = vmmov %vm17109_vm6 }
 0x22e   :  { %v3541_v59 = vpop.f32.mrb[105].mxu1  ;;  %v3502_v45 = vpop.f32.mrb[106].mxu0  ;;  %v7139_v33 = vrot.slane %v7123_v40, %v12674_v18  ;;  %vm17111_vm0 = vmmov %vm17110_vm4 }
 0x22f   :  { %v3543_v47 = vpop.f32.mrb[106].mxu1  ;;  %v3503_v52 = vpop.f32.mrb[107].mxu0  ;;  %v14973_v38 = vsel %vm173_vm13, %v6819_v29, 0  ;;  %vm17120_vm1 = vmmov %vm17111_vm0 }
 0x230   :  { %v3544_v60 = vpop.f32.mrb[107].mxu1  ;;  %v12203_v47 = vunpack.i.h.bf16 %v12201_v1  ;;  %vm17121_vm10 = vmmov %vm17111_vm0 }
 0x231   :  { %11569 = vmatmul.mubr.msk.bf16.vlgmr.msra.gmra.mrb[212].mxu0 %vm17104_vm7, %v11567_v26 }
 0x232   :  { %11571 = vmatmul.mubr.msk.bf16.vlgmr.msra.gmra.mrb[212].mxu1 %vm17105_vm8, %v11567_v26  ;;  %6694 = vmatpush1.bf16.msra.mxu0 %v14882_v36  ;;  %v12202_v26 = vunpack.i.l.bf16 %v12201_v1  ;;  %vm15020_vm8 = vcmp.eq.s32.totalorder %v7139_v33, 1 }
 0x233   :  { %6735 = vmatpush1.bf16.msra.mxu1 %v14885_v46  ;;  %6725 = vmatprep.mubr.bf16.mxu0 %v12433_v4 }
 0x234   :  { %6766 = vmatprep.mubr.bf16.mxu1 %v12433_v4  ;;  %v3583_v19 = vpop.f32.mrb[108].mxu0  ;;  %11578 = vmatprep.subr.msk.bf16.mxu0 %vm173_vm13, %v14941_v48 }
 0x235   :  { %v3624_v28 = vpop.f32.mrb[108].mxu1  ;;  %11580 = vmatprep.subr.msk.bf16.mxu1 %vm173_vm13, %v14943_v13  ;;  %v14959_v36 = vadd.f32 %v3583_v19, %v3498_v32  ;;  %v3585_v31 = vpop.f32.mrb[109].mxu0 }
 0x236   :  { %v14961_v46 = vadd.f32 %v3624_v28, %v3539_v57  ;;  %v3626_v27 = vpop.f32.mrb[109].mxu1  ;;  %v14963_v56 = vadd.f32 %v3585_v31, %v3500_v9  ;;  %v3587_v35 = vpop.f32.mrb[110].mxu0  ;;  %v7127_v28 = vrot.slane %v7123_v40, %v12683_v20 }
 0x237   :  { %v14965_v3 = vadd.f32 %v3626_v27, %v3541_v59  ;;  %v3628_v43 = vpop.f32.mrb[110].mxu1  ;;  %v3588_v12 = vpop.f32.mrb[111].mxu0  ;;  %v7131_v59 = vrot.slane %v7123_v40, %v12671_v17 }
 0x238   :  { %v3629_v22 = vpop.f32.mrb[111].mxu1  ;;  %v12196_v32 = vpop.permute.xlu0 %12195  ;;  %v10379_v43 = vld [vmem:[%s16744_s12] sm:$0xf]  ;;  %vm15041_vm5 = vcmp.eq.s32.totalorder %v7127_v28, 1 }
 0x239   :  { %11574 = vmatmul.mubr.msk.bf16.vlgmr.msra.gmra.mrb[216].mxu0 %vm17108_vm11, %v11572_v2  ;;  %v12198_v29 = vunpack.i.h.bf16 %v12196_v32  ;;  %vm15016_vm7 = vcmp.eq.s32.totalorder %v7131_v59, 1  ;;  %v7117_v22 = vsel %vm7116_vm14, %v12202_v26, %v12203_v47  ;;  %10382 = vperm.xlu1 %12365, %v10379_v43   ;;  %vm17122_vm11 = vcmp.ge.s32.totalorder %v12771_v55, 0 }
 0x23a   :  { %11576 = vmatmul.mubr.msk.bf16.vlgmr.msra.gmra.mrb[216].mxu1 %vm17109_vm6, %v11572_v2  ;;  %6841 = vmatpush1.bf16.msra.mxu0 %v14973_v38  ;;  %vm7450_vm6 = vmand %vm14507_vm9, %vm17122_vm11 }
 0x23b   :  { %6882 = vmatpush1.bf16.msra.mxu1 %v14976_v6  ;;  %11583 = vmatprep.subr.msk.bf16.mxu0 %vm173_vm13, %v14941_v48  ;;  %v7118_v27 = vsel %vm7116_vm14, %v12198_v29, %v12202_v26 }
 0x23c   :  { %11585 = vmatprep.subr.msk.bf16.mxu1 %vm173_vm13, %v14943_v13  ;;  %v3726_v57 = vpop.f32.mrb[112].mxu0  ;;  %6872 = vmatprep.mubr.bf16.mxu0 %v12433_v4 }
 0x23d   :  { %v3767_v9 = vpop.f32.mrb[112].mxu1  ;;  %6913 = vmatprep.mubr.bf16.mxu1 %v12433_v4  ;;  %v14995_v58 = vadd.f32 %v3726_v57, %v14861_v53  ;;  %v3728_v7 = vpop.f32.mrb[113].mxu0  ;;  %v11577_v53 = vld [vmem:[%s16739_s7 + $0x3e] sm:$0x3] }
 0x23e   :  { %v14998_v44 = vadd.f32 %v3767_v9, %v14864_v37  ;;  %v3769_v45 = vpop.f32.mrb[113].mxu1  ;;  %v15001_v52 = vadd.f32 %v3728_v7, %v14869_v50  ;;  %v3730_v42 = vpop.f32.mrb[114].mxu0  ;;  %v12197_v37 = vunpack.i.l.bf16 %v12196_v32  ;;  %v7135_v50 = vrot.slane %v7123_v40, %v12686_v21 }
 0x23f   :  { %v15004_v60 = vadd.f32 %v3769_v45, %v14872_v5  ;;  %v3771_v41 = vpop.f32.mrb[114].mxu1  ;;  %v3731_v39 = vpop.f32.mrb[115].mxu0  ;;  %v7145_v9 = vsel %vm15016_vm7, %v7118_v27, 0.0  ;;  %vm7445_vm7 = vcmp.lt.s32.totalorder %v12697_v24, 110 }
 0x240   :  { %v3772_v19 = vpop.f32.mrb[115].mxu1  ;;  %v7120_v35 = vsel %vm7116_vm14, %v12203_v47, %v12197_v37  ;;  %v7119_v40 = vsel %vm7116_vm14, %v12197_v37, %v12198_v29  ;;  %vm15045_vm2 = vcmp.eq.s32.totalorder %v7135_v50, 1  ;;  %v15068_v42 = vpack.c.bf16 %v7145_v9, %v7145_v9  ;;  %vm7451_vm14 = vmand %vm7450_vm6, %vm830_vm15 }
 0x241   :  { %11579 = vmatmul.mubr.msk.bf16.vlgmr.msra.gmra.mrb[220].mxu0 %vm17110_vm4, %v11577_v53  ;;  %v7147_v59 = vsel %vm15020_vm8, %v7120_v35, 0.0  ;;  %v11587_v35 = vld [vmem:[%s16743_s11 + $0xe] sm:$0x3]  ;;  %vm17123_vm4 = vmmov %vm17111_vm0 }
 0x242   :  { %11581 = vmatmul.mubr.msk.bf16.vlgmr.msra.gmra.mrb[220].mxu1 %vm17111_vm0, %v11577_v53  ;;  %6932 = vmatpush1.bf16.msra.mxu0 %v14973_v38  ;;  %v15070_v41 = vpack.c.bf16 %v7147_v59, %v7147_v59  ;;  %v7144_v53 = vsel %vm15041_vm5, %v7119_v40, 0.0  ;;  %vm17126_vm5 = vmmov %vm17111_vm0 }
 0x243   :  { %6973 = vmatpush1.bf16.msra.mxu1 %v14976_v6  ;;  %11588 = vmatprep.subr.msk.bf16.mxu0 %vm173_vm13, %v14941_v48 }
 0x244   :  { %11590 = vmatprep.subr.msk.bf16.mxu1 %vm173_vm13, %v14943_v13  ;;  %v3817_v2 = vpop.f32.mrb[116].mxu0  ;;  %6963 = vmatprep.mubr.bf16.mxu0 %v12433_v4 }
 0x245   :  { %v3858_v12 = vpop.f32.mrb[116].mxu1  ;;  %7004 = vmatprep.mubr.bf16.mxu1 %v12433_v4  ;;  %v15050_v13 = vadd.f32 %v3817_v2, %v14900_v34  ;;  %v3819_v32 = vpop.f32.mrb[117].mxu0  ;;  %v7452_v2 = vsel %vm7451_vm14, 1, %v12433_v4 }
 0x246   :  { %v15053_v54 = vadd.f32 %v3858_v12, %v14902_v30  ;;  %v3860_v57 = vpop.f32.mrb[117].mxu1  ;;  %v15060_v33 = vadd.f32 %v3819_v32, %v14904_v51  ;;  %v3821_v34 = vpop.f32.mrb[118].mxu0  ;;  %v11582_v30 = vld [vmem:[%s16741_s9 + $0x22] sm:$0x3]  ;;  %v7146_v51 = vsel %vm15045_vm2, %v7117_v22, 0.0  ;;  %v7460_v32 = vrot.slane %v7452_v2, %v12671_v17  ;;  %vm17127_vm2 = vmmov %vm17111_vm0 }
 0x247   :  { %v15063_v7 = vadd.f32 %v3860_v57, %v14906_v0  ;;  %v3862_v45 = vpop.f32.mrb[118].mxu1  ;;  %v3822_v47 = vpop.f32.mrb[119].mxu0  ;;  %v7148_v0 = vpack.c.bf16 %v7144_v53, %v7144_v53  ;;  %v7150_v29 = vpack.c.bf16 %v7146_v51, %v7146_v51  ;;  %v7468_v57 = vrot.slane %v7452_v2, %v12674_v18 }
 0x248   :  { %v3863_v26 = vpop.f32.mrb[119].mxu1  ;;  %v12206_v12 = vpop.permute.xlu0 %12205  ;;  %vm15144_vm8 = vcmp.eq.s32.totalorder %v7460_v32, 1 }
 0x249   :  { %11584 = vmatmul.mubr.msk.bf16.vlgmr.msra.gmra.mrb[224].mxu0 %vm17120_vm1, %v11582_v30  ;;  %v15108_v43 = vsel %vm173_vm13, %v7148_v0, 0  ;;  %v12207_v47 = vunpack.i.l.bf16 %v12206_v12  ;;  %vm15150_vm1 = vcmp.eq.s32.totalorder %v7468_v57, 1 }
 0x24a   :  { %11586 = vmatmul.mubr.msk.bf16.vlgmr.msra.gmra.mrb[224].mxu1 %vm17121_vm10, %v11582_v30  ;;  %7023 = vmatpush1.bf16.msra.mxu0 %v14973_v38  ;;  %v12208_v30 = vunpack.i.h.bf16 %v12206_v12  ;;  %vm15170_vm10 = vmand %vm14507_vm9, %vm978_vm12 }
 0x24b   :  { %7064 = vmatpush1.bf16.msra.mxu1 %v14976_v6  ;;  %7054 = vmatprep.mubr.bf16.mxu0 %v12433_v4  ;;  %vm7689_vm9 = vmand %vm15170_vm10, %vm980_vm3  ;;  %vm17143_vm10 = vcmp.lt.s32.totalorder %v12637_v11, 16 }
 0x24c   :  { %7095 = vmatprep.mubr.bf16.mxu1 %v12433_v4  ;;  %v3908_v37 = vpop.f32.mrb[120].mxu0  ;;  %11593 = vmatprep.subr.msk.bf16.mxu0 %vm173_vm13, %v15068_v42 }
 0x24d   :  { %v3949_v39 = vpop.f32.mrb[120].mxu1  ;;  %11595 = vmatprep.subr.msk.bf16.mxu1 %vm173_vm13, %v15070_v41  ;;  %v15091_v38 = vadd.f32 %v3908_v37, %v14959_v36  ;;  %v3910_v19 = vpop.f32.mrb[121].mxu0  ;;  %v7456_v37 = vrot.slane %v7452_v2, %v12683_v20 }
 0x24e   :  { %v15094_v6 = vadd.f32 %v3949_v39, %v14961_v46  ;;  %v3951_v28 = vpop.f32.mrb[121].mxu1  ;;  %v15097_v50 = vadd.f32 %v3910_v19, %v14963_v56  ;;  %v3912_v31 = vpop.f32.mrb[122].mxu0  ;;  %v15111_v56 = vsel %vm173_vm13, %v7150_v29, 0  ;;  %v7464_v39 = vrot.slane %v7452_v2, %v12686_v21 }
 0x24f   :  { %v15100_v5 = vadd.f32 %v3951_v28, %v14965_v3  ;;  %v3953_v27 = vpop.f32.mrb[122].mxu1  ;;  %v3913_v36 = vpop.f32.mrb[123].mxu0  ;;  %v15161_v31 = vld [vmem:[%s16733_s1] sm:$0xf]  ;;  %vm15178_vm11 = vcmp.eq.s32.totalorder %v7456_v37, 1  ;;  %v7448_v2 = vsel %vm7445_vm7, %v12207_v47, %v12208_v30 }
 0x250   :  { %v3954_v46 = vpop.f32.mrb[123].mxu1  ;;  %v12211_v3 = vpop.permute.xlu1 %12210  ;;  %v7835_v27 = vadd.s32 2, %v15161_v31  ;;  %vm15182_vm6 = vcmp.eq.s32.totalorder %v7464_v39, 1 }
 0x251   :  { %11589 = vmatmul.mubr.msk.bf16.vlgmr.msra.gmra.mrb[228].mxu0 %vm17123_vm4, %v11587_v35  ;;  %v12213_v1 = vunpack.i.h.bf16 %v12211_v3  ;;  %v12212_v48 = vunpack.i.l.bf16 %v12211_v3 }
 0x252   :  { %11591 = vmatmul.mubr.msk.bf16.vlgmr.msra.gmra.mrb[228].mxu1 %vm17111_vm0, %v11587_v35  ;;  %7170 = vmatpush1.bf16.msra.mxu0 %v15108_v43  ;;  %vm7836_vm14 = vcmp.ge.s32.totalorder %v7835_v27, 0  ;;  %vm7837_vm4 = vcmp.lt.s32.totalorder %v7835_v27, 16 }
 0x253   :  { %7211 = vmatpush1.bf16.msra.mxu1 %v15111_v56  ;;  %11598 = vmatprep.subr.msk.bf16.mxu0 %vm173_vm13, %v15068_v42  ;;  %v7447_v19 = vsel %vm7445_vm7, %v12208_v30, %v12212_v48  ;;  %v7449_v28 = vsel %vm7445_vm7, %v12213_v1, %v12207_v47  ;;  %v7473_v47 = vsel %vm15178_vm11, %v7448_v2, 0.0  ;;  %vm15222_vm0 = vmand %vm7836_vm14, %vm7837_vm4 }
 0x254   :  { %11600 = vmatprep.subr.msk.bf16.mxu1 %vm173_vm13, %v15070_v41  ;;  %v4055_v22 = vpop.f32.mrb[124].mxu0  ;;  %7201 = vmatprep.mubr.bf16.mxu0 %v12433_v4  ;;  %v7476_v12 = vsel %vm15150_vm1, %v7449_v28, 0.0  ;;  %v7477_v37 = vpack.c.bf16 %v7473_v47, %v7473_v47  ;;  %vm7683_vm1 = vcmp.lt.s32.totalorder %v12697_v24, 109 }
 0x255   :  { %v4096_v40 = vpop.f32.mrb[124].mxu1  ;;  %7242 = vmatprep.mubr.bf16.mxu1 %v12433_v4  ;;  %v15127_v9 = vadd.f32 %v4055_v22, %v14995_v58  ;;  %v4057_v34 = vpop.f32.mrb[125].mxu0  ;;  %v11592_v58 = vld [vmem:[%s16739_s7 + $0x40] sm:$0x3] }
 0x256   :  { %v15130_v59 = vadd.f32 %v4096_v40, %v14998_v44  ;;  %v4098_v45 = vpop.f32.mrb[125].mxu1  ;;  %v15133_v26 = vadd.f32 %v4057_v34, %v15001_v52  ;;  %v4059_v51 = vpop.f32.mrb[126].mxu0 }
 0x257   :  { %v15136_v53 = vadd.f32 %v4098_v45, %v15004_v60  ;;  %v4100_v0 = vpop.f32.mrb[126].mxu1  ;;  %v4060_v44 = vpop.f32.mrb[127].mxu0 }
 0x258   :  { %v4101_v29 = vpop.f32.mrb[127].mxu1  ;;  %v7480_v0 = vpack.c.bf16 %v7476_v12, %v7476_v12  ;;  %v12216_v44 = vpop.permute.xlu0 %12215 }
 0x259   :  { %11594 = vmatmul.mubr.msk.bf16.vlgmr.msra.gmra.mrb[232].mxu0 %vm17126_vm5, %v11592_v58  ;;  %vm17140_vm5 = vcmp.ge.s32.totalorder %v12637_v11, 0  ;;  %v12217_v36 = vunpack.i.l.bf16 %v12216_v44 }
 0x25a   :  { %11596 = vmatmul.mubr.msk.bf16.vlgmr.msra.gmra.mrb[232].mxu1 %vm17127_vm2, %v11592_v58  ;;  %7261 = vmatpush1.bf16.msra.mxu0 %v15108_v43  ;;  %v12221_v58 = vpop.permute.xlu1 %12220 }
 0x25b   :  { %7302 = vmatpush1.bf16.msra.mxu1 %v15111_v56  ;;  %11603 = vmatprep.subr.msk.bf16.mxu0 %vm173_vm13, %v15068_v42  ;;  %v7446_v42 = vsel %vm7445_vm7, %v12212_v48, %v12213_v1  ;;  %vm17138_vm7 = vmmov %vm17127_vm2  ;;  %v12222_v52 = vunpack.i.l.bf16 %v12221_v58  ;;  %v12223_v27 = vunpack.i.h.bf16 %v12221_v58 }
 0x25c   :  { %11605 = vmatprep.subr.msk.bf16.mxu1 %vm173_vm13, %v15070_v41  ;;  %v4146_v3 = vpop.f32.mrb[128].mxu0  ;;  %7292 = vmatprep.mubr.bf16.mxu0 %v12433_v4  ;;  %v7474_v41 = vsel %vm15144_vm8, %v7447_v19, 0.0  ;;  %vm17139_vm8 = vmmov %vm17127_vm2  ;;  %v12218_v19 = vunpack.i.h.bf16 %v12216_v44 }
 0x25d   :  { %v4187_v61 = vpop.f32.mrb[128].mxu1  ;;  %7333 = vmatprep.mubr.bf16.mxu1 %v12433_v4  ;;  %v15197_v22 = vadd.f32 %v4146_v3, %v15050_v13  ;;  %v4148_v32 = vpop.f32.mrb[129].mxu0  ;;  %v7478_v51 = vpack.c.bf16 %v7474_v41, %v7474_v41  ;;  %vm15237_vm2 = vmand %vm15222_vm0, %vm17140_vm5  ;;  %v7684_v58 = vsel %vm7683_vm1, %v12222_v52, %v12223_v27  ;;  %vm17150_vm5 = vcmp.ge.s32.totalorder %v12634_v10, 0 }
 0x25e   :  { %v15200_v40 = vadd.f32 %v4187_v61, %v15053_v54  ;;  %v4189_v57 = vpop.f32.mrb[129].mxu1  ;;  %v15207_v1 = vadd.f32 %v4148_v32, %v15060_v33  ;;  %v4150_v13 = vpop.f32.mrb[130].mxu0  ;;  %v11597_v54 = vld [vmem:[%s16741_s9 + $0x24] sm:$0x3]  ;;  %v7475_v33 = vsel %vm15182_vm6, %v7446_v42, 0.0  ;;  %vm7840_vm11 = vmand %vm15237_vm2, %vm17143_vm10  ;;  %v7686_v44 = vsel %vm7683_vm1, %v12217_v36, %v12218_v19 }
 0x25f   :  { %v15210_v48 = vadd.f32 %v4189_v57, %v15063_v7  ;;  %v4191_v34 = vpop.f32.mrb[130].mxu1  ;;  %v4151_v45 = vpop.f32.mrb[131].mxu0  ;;  %v7690_v7 = vsel %vm7689_vm9, 1, %v12433_v4  ;;  %v7479_v39 = vpack.c.bf16 %v7475_v33, %v7475_v33  ;;  %v11602_v57 = vld [vmem:[%s16743_s11 + $0x10] sm:$0x3]  ;;  %v15253_v13 = vsel %vm173_vm13, %v7477_v37, 0  ;;  %vm17144_vm14 = vmmov %vm17138_vm7 }
 0x260   :  { %v4192_v30 = vpop.f32.mrb[131].mxu1  ;;  %v7698_v60 = vrot.slane %v7690_v7, %v12671_v17  ;;  %v7706_v35 = vrot.slane %v7690_v7, %v12674_v18  ;;  %v7685_v34 = vsel %vm7683_vm1, %v12218_v19, %v12222_v52  ;;  %v7687_v45 = vsel %vm7683_vm1, %v12223_v27, %v12217_v36  ;;  %vm17145_vm4 = vmmov %vm17138_vm7  ;;  %v12226_v33 = vpop.permute.xlu0 %12225 }
 0x261   :  { %11599 = vmatmul.mubr.msk.bf16.vlgmr.msra.gmra.mrb[236].mxu0 %vm17138_vm7, %v11597_v54  ;;  %v12231_v30 = vpop.permute.xlu1 %12230  ;;  %v15269_v47 = vsel %vm7840_vm11, 1, %v12433_v4  ;;  %vm15290_vm2 = vmand %vm15222_vm0, %vm17150_vm5  ;;  %v12228_v27 = vunpack.i.h.bf16 %v12226_v33  ;;  %vm7830_vm1 = vcmp.lt.s32.totalorder %v12697_v24, 99  ;;  %vm17153_vm10 = vcmp.lt.s32.totalorder %v12634_v10, 16 }
 0x262   :  { %11601 = vmatmul.mubr.msk.bf16.vlgmr.msra.gmra.mrb[236].mxu1 %vm17139_vm8, %v11597_v54  ;;  %7352 = vmatpush1.bf16.msra.mxu0 %v15108_v43  ;;  %vm7708_vm6 = vcmp.eq.s32.totalorder %v7698_v60, 1  ;;  %v7702_v54 = vrot.slane %v7690_v7, %v12686_v21  ;;  %vm7710_vm9 = vcmp.eq.s32.totalorder %v7706_v35, 1  ;;  %v12233_v60 = vunpack.i.h.bf16 %v12231_v30  ;;  %vm7987_vm11 = vmand %vm15290_vm2, %vm17153_vm10 }
 0x263   :  { %7393 = vmatpush1.bf16.msra.mxu1 %v15111_v56  ;;  %7383 = vmatprep.mubr.bf16.mxu0 %v12433_v4  ;;  %v12232_v28 = vunpack.i.l.bf16 %v12231_v30  ;;  %v12227_v35 = vunpack.i.l.bf16 %v12226_v33  ;;  %v7845_v37 = vrot.slane %v15269_v47, %v12683_v20  ;;  %vm17159_vm2 = vmmov %vm17145_vm4 }
 0x264   :  { %7424 = vmatprep.mubr.bf16.mxu1 %v12433_v4  ;;  %v4293_v43 = vpop.f32.mrb[132].mxu0  ;;  %11608 = vmatprep.subr.msk.bf16.mxu0 %vm173_vm13, %v7478_v51  ;;  %vm15282_vm8 = vcmp.eq.s32.totalorder %v7702_v54, 1 }
 0x265   :  { %v4334_v56 = vpop.f32.mrb[132].mxu1  ;;  %11610 = vmatprep.subr.msk.bf16.mxu1 %vm173_vm13, %v7480_v0  ;;  %v4341_v46 = vadd.f32 %v4293_v43, %v15127_v9  ;;  %v4295_v61 = vpop.f32.mrb[133].mxu0  ;;  %v7694_v9 = vrot.slane %v7690_v7, %v12683_v20  ;;  %v7712_v7 = vsel %vm7708_vm6, %v7685_v34, 0.0  ;;  %v7832_v33 = vsel %vm7830_vm1, %v12228_v27, %v12232_v28 }
 0x266   :  { %v4343_v3 = vadd.f32 %v4334_v56, %v15130_v59  ;;  %v4336_v42 = vpop.f32.mrb[133].mxu1  ;;  %v4342_v41 = vadd.f32 %v4295_v61, %v15133_v26  ;;  %v4297_v12 = vpop.f32.mrb[134].mxu0 }
 0x267   :  { %v4344_v2 = vadd.f32 %v4336_v42, %v15136_v53  ;;  %v4338_v32 = vpop.f32.mrb[134].mxu1  ;;  %v4298_v59 = vpop.f32.mrb[135].mxu0  ;;  %v7493_v53 = vsel %vm173_vm13, %v7479_v39, 0  ;;  %vm15276_vm7 = vcmp.eq.s32.totalorder %v7694_v9, 1  ;;  %v7714_v39 = vsel %vm7710_vm9, %v7687_v45, 0.0 }
 0x268   :  { %v4339_v26 = vpop.f32.mrb[135].mxu1  ;;  %v7718_v54 = vpack.c.bf16 %v7714_v39, %v7714_v39  ;;  %v7711_v45 = vsel %vm15276_vm7, %v7686_v44, 0.0  ;;  %v15326_v44 = vpop.permute.xlu1 %12240  ;;  %v7853_v39 = vrot.slane %v15269_v47, %v12686_v21  ;;  %vm7981_vm7 = vcmp.lt.s32.totalorder %v12697_v24, 98 }
 0x269   :  { %11604 = vmatmul.mubr.msk.bf16.vlgmr.msra.gmra.mrb[240].mxu0 %vm17144_vm14, %v11602_v57  ;;  %v11607_v26 = vld [vmem:[%s16739_s7 + $0x42] sm:$0x3]  ;;  %vm17158_vm14 = vmmov %vm17145_vm4  ;;  %v7715_v43 = vpack.c.bf16 %v7711_v45, %v7711_v45 }
 0x26a   :  { %11606 = vmatmul.mubr.msk.bf16.vlgmr.msra.gmra.mrb[240].mxu1 %vm17145_vm4, %v11602_v57  ;;  %7499 = vmatpush1.bf16.msra.mxu0 %v15253_v13  ;;  %vm7860_vm5 = vcmp.eq.s32.totalorder %v7853_v39, 1 }
 0x26b   :  { %7540 = vmatpush1.bf16.msra.mxu1 %v7493_v53  ;;  %11613 = vmatprep.subr.msk.bf16.mxu0 %vm173_vm13, %v7478_v51  ;;  %v7849_v51 = vrot.slane %v15269_v47, %v12671_v17 }
 0x26c   :  { %11615 = vmatprep.subr.msk.bf16.mxu1 %vm173_vm13, %v7480_v0  ;;  %v4443_v19 = vpop.f32.mrb[136].mxu0  ;;  %7530 = vmatprep.mubr.bf16.mxu0 %v12433_v4  ;;  %v7857_v0 = vrot.slane %v15269_v47, %v12674_v18  ;;  %v7833_v47 = vsel %vm7830_vm1, %v12227_v35, %v12228_v27 }
 0x26d   :  { %v4484_v56 = vpop.f32.mrb[136].mxu1  ;;  %7571 = vmatprep.mubr.bf16.mxu1 %v12433_v4  ;;  %v4491_v36 = vadd.f32 %v4443_v19, %v4341_v46  ;;  %v4445_v42 = vpop.f32.mrb[137].mxu0  ;;  %vm15312_vm6 = vcmp.eq.s32.totalorder %v7849_v51, 1  ;;  %v7831_v19 = vsel %vm7830_vm1, %v12232_v28, %v12233_v60 }
 0x26e   :  { %v4493_v61 = vadd.f32 %v4484_v56, %v4343_v3  ;;  %v4486_v12 = vpop.f32.mrb[137].mxu1  ;;  %v4492_v32 = vadd.f32 %v4445_v42, %v4342_v41  ;;  %v4447_v9 = vpop.f32.mrb[138].mxu0  ;;  %v7716_v3 = vpack.c.bf16 %v7712_v7, %v7712_v7  ;;  %v7713_v41 = vsel %vm15282_vm8, %v7684_v58, 0.0 }
 0x26f   :  { %v4494_v57 = vadd.f32 %v4486_v12, %v4344_v2  ;;  %v4488_v59 = vpop.f32.mrb[138].mxu1  ;;  %v4448_v34 = vpop.f32.mrb[139].mxu0  ;;  %vm15316_vm9 = vcmp.eq.s32.totalorder %v7857_v0, 1  ;;  %v7834_v7 = vsel %vm7830_vm1, %v12233_v60, %v12227_v35  ;;  %v15329_v58 = vsel %vm7987_vm11, 1, %v12433_v4  ;;  %vm17160_vm1 = vmmov %vm17159_vm2 }
 0x270   :  { %v4489_v46 = vpop.f32.mrb[139].mxu1  ;;  %v7717_v52 = vpack.c.bf16 %v7713_v41, %v7713_v41  ;;  %v7863_v56 = vsel %vm15312_vm6, %v7832_v33, 0.0  ;;  %v12243_v42 = vunpack.i.h.bf16 %v15326_v44  ;;  %v12242_v60 = vunpack.i.l.bf16 %v15326_v44 }
 0x271   :  { %11609 = vmatmul.mubr.msk.bf16.vlgmr.msra.gmra.mrb[244].mxu0 %vm17158_vm14, %v11607_v26  ;;  %v7996_v28 = vrot.slane %v15329_v58, %v12671_v17  ;;  %v8004_v27 = vrot.slane %v15329_v58, %v12674_v18  ;;  %vm7858_vm8 = vcmp.eq.s32.totalorder %v7845_v37, 1  ;;  %v7867_v33 = vpack.c.bf16 %v7863_v56, %v7863_v56 }
 0x272   :  { %11611 = vmatmul.mubr.msk.bf16.vlgmr.msra.gmra.mrb[244].mxu1 %vm17145_vm4, %v11607_v26  ;;  %7590 = vmatpush1.bf16.msra.mxu0 %v15253_v13  ;;  %v7865_v13 = vsel %vm15316_vm9, %v7834_v7, 0.0  ;;  %v7731_v30 = vsel %vm173_vm13, %v7717_v52, 0  ;;  %v7864_v44 = vsel %vm7860_vm5, %v7831_v19, 0.0  ;;  %v8000_v37 = vrot.slane %v15329_v58, %v12686_v21  ;;  %vm17173_vm5 = vmmov %vm17160_vm1 }
 0x273   :  { %7631 = vmatpush1.bf16.msra.mxu1 %v7493_v53  ;;  %7621 = vmatprep.mubr.bf16.mxu0 %v12433_v4  ;;  %v12236_v53 = vpop.permute.xlu0 %12235  ;;  %v7869_v7 = vpack.c.bf16 %v7865_v13, %v7865_v13  ;;  %vm15374_vm10 = vcmp.eq.s32.totalorder %v7996_v28, 1  ;;  %vm15378_vm11 = vcmp.eq.s32.totalorder %v8004_v27, 1  ;;  %v7868_v56 = vpack.c.bf16 %v7864_v44, %v7864_v44  ;;  %v12251_v44 = vpop.permute.xlu1 %12250 }
 0x274   :  { %7662 = vmatprep.mubr.bf16.mxu1 %v12433_v4  ;;  %v4590_v51 = vpop.f32.mrb[140].mxu0  ;;  %11618 = vmatprep.subr.msk.bf16.mxu0 %vm173_vm13, %v7716_v3  ;;  %v12238_v45 = vunpack.i.h.bf16 %v12236_v53  ;;  %v12237_v41 = vunpack.i.l.bf16 %v12236_v53  ;;  %vm17165_vm6 = vcmp.ge.s32.totalorder %v12646_v14, 0  ;;  %vm15406_vm4 = vcmp.eq.s32.totalorder %v8000_v37, 1 }
 0x275   :  { %v4631_v0 = vpop.f32.mrb[140].mxu1  ;;  %11620 = vmatprep.subr.msk.bf16.mxu1 %vm173_vm13, %v7718_v54  ;;  %v15355_v35 = vadd.f32 %v4590_v51, %v4491_v36  ;;  %v4592_v9 = vpop.f32.mrb[141].mxu0  ;;  %v11612_v54 = vld [vmem:[%s16741_s9 + $0x26] sm:$0x3]  ;;  %vm15392_vm9 = vmand %vm15222_vm0, %vm17165_vm6  ;;  %v7982_v51 = vsel %vm7981_vm7, %v12242_v60, %v12243_v42 }
 0x276   :  { %v15357_v12 = vadd.f32 %v4631_v0, %v4493_v61  ;;  %v4633_v59 = vpop.f32.mrb[141].mxu1  ;;  %v15359_v26 = vadd.f32 %v4592_v9, %v4492_v32  ;;  %v4594_v46 = vpop.f32.mrb[142].mxu0  ;;  %v7725_v61 = vsel %vm173_vm13, %v7715_v43, 0  ;;  %v7862_v32 = vsel %vm7858_vm8, %v7833_v47, 0.0 }
 0x277   :  { %v15361_v34 = vadd.f32 %v4633_v59, %v4494_v57  ;;  %v4635_v3 = vpop.f32.mrb[142].mxu1  ;;  %v4595_v36 = vpop.f32.mrb[143].mxu0  ;;  %v7992_v57 = vrot.slane %v15329_v58, %v12683_v20  ;;  %v7983_v52 = vsel %vm7981_vm7, %v12238_v45, %v12242_v60  ;;  %v7985_v58 = vsel %vm7981_vm7, %v12243_v42, %v12237_v41 }
 0x278   :  { %v4636_v2 = vpop.f32.mrb[143].mxu1  ;;  %v7866_v19 = vpack.c.bf16 %v7862_v32, %v7862_v32  ;;  %v7984_v0 = vsel %vm7981_vm7, %v12237_v41, %v12238_v45  ;;  %v8010_v46 = vsel %vm15374_vm10, %v7983_v52, 0.0  ;;  %v8012_v3 = vsel %vm15378_vm11, %v7985_v58, 0.0 }
 0x279   :  { %11614 = vmatmul.mubr.msk.bf16.vlgmr.msra.gmra.mrb[248].mxu0 %vm17159_vm2, %v11612_v54  ;;  %vm15402_vm14 = vcmp.eq.s32.totalorder %v7992_v57, 1  ;;  %vm17172_vm7 = vcmp.lt.s32.totalorder %v12646_v14, 16  ;;  %vm17174_vm2 = vmmov %vm17160_vm1  ;;  %v12246_v57 = vpop.permute.xlu0 %12245 }
 0x27a   :  { %11616 = vmatmul.mubr.msk.bf16.vlgmr.msra.gmra.mrb[248].mxu1 %vm17160_vm1, %v11612_v54  ;;  %7737 = vmatpush1.bf16.msra.mxu0 %v7725_v61  ;;  %vm8225_vm8 = vmand %vm15392_vm9, %vm17172_vm7  ;;  %v7876_v61 = vsel %vm173_vm13, %v7866_v19, 0  ;;  %vm8219_vm1 = vcmp.lt.s32.totalorder %v12697_v24, 97 }
 0x27b   :  { %7778 = vmatpush1.bf16.msra.mxu1 %v7731_v30  ;;  %7768 = vmatprep.mubr.bf16.mxu0 %v12433_v4  ;;  %v8014_v30 = vpack.c.bf16 %v8010_v46, %v8010_v46  ;;  %v8226_v32 = vsel %vm8225_vm8, 1, %v12433_v4  ;;  %v12253_v46 = vunpack.i.h.bf16 %v12251_v44  ;;  %vm17175_vm10 = vmmov %vm17174_vm2 }
 0x27c   :  { %7809 = vmatprep.mubr.bf16.mxu1 %v12433_v4  ;;  %v4681_v13 = vpop.f32.mrb[144].mxu0  ;;  %11623 = vmatprep.subr.msk.bf16.mxu0 %vm173_vm13, %v7867_v33  ;;  %v8009_v33 = vsel %vm15402_vm14, %v7984_v0, 0.0  ;;  %v8234_v58 = vrot.slane %v8226_v32, %v12671_v17  ;;  %v8242_v19 = vrot.slane %v8226_v32, %v12674_v18  ;;  %v12248_v0 = vunpack.i.h.bf16 %v12246_v57  ;;  %vm17176_vm11 = vmmov %vm17174_vm2 }
 0x27d   :  { %v4722_v53 = vpop.f32.mrb[144].mxu1  ;;  %11625 = vmatprep.subr.msk.bf16.mxu1 %vm173_vm13, %v7869_v7  ;;  %v15411_v9 = vadd.f32 %v4681_v13, %v15197_v22  ;;  %v4683_v60 = vpop.f32.mrb[145].mxu0  ;;  %v8011_v7 = vsel %vm15406_vm4, %v7982_v51, 0.0  ;;  %v8013_v37 = vpack.c.bf16 %v8009_v33, %v8009_v33  ;;  %v12252_v51 = vunpack.i.l.bf16 %v12251_v44 }
 0x27e   :  { %v15414_v42 = vadd.f32 %v4722_v53, %v15200_v40  ;;  %v4724_v59 = vpop.f32.mrb[145].mxu1  ;;  %v15421_v54 = vadd.f32 %v4683_v60, %v15207_v1  ;;  %v4685_v41 = vpop.f32.mrb[146].mxu0  ;;  %v11617_v40 = vld [vmem:[%s16739_s7 + $0x44] sm:$0x3]  ;;  %v7882_v1 = vsel %vm173_vm13, %v7868_v56, 0  ;;  %v8015_v39 = vpack.c.bf16 %v8011_v7, %v8011_v7 }
 0x27f   :  { %v15424_v45 = vadd.f32 %v4724_v59, %v15210_v48  ;;  %v4726_v22 = vpop.f32.mrb[146].mxu1  ;;  %v4686_v36 = vpop.f32.mrb[147].mxu0  ;;  %v8016_v48 = vpack.c.bf16 %v8012_v3, %v8012_v3  ;;  %v12247_v3 = vunpack.i.l.bf16 %v12246_v57  ;;  %vm8244_vm6 = vcmp.eq.s32.totalorder %v8234_v58, 1 }
 0x280   :  { %v4727_v2 = vpop.f32.mrb[147].mxu1  ;;  %v8023_v22 = vsel %vm173_vm13, %v8013_v37, 0  ;;  %v8238_v36 = vrot.slane %v8226_v32, %v12686_v21  ;;  %vm15472_vm9 = vcmp.eq.s32.totalorder %v8242_v19, 1  ;;  %vm17179_vm14 = vcmp.ge.s32.totalorder %v12630_v8, 0 }
 0x281   :  { %11619 = vmatmul.mubr.msk.bf16.vlgmr.msra.gmra.mrb[252].mxu0 %vm17173_vm5, %v11617_v40  ;;  %vm15484_vm4 = vmand %vm15222_vm0, %vm17179_vm14  ;;  %vm17186_vm5 = vcmp.lt.s32.totalorder %v12630_v8, 16 }
 0x282   :  { %11621 = vmatmul.mubr.msk.bf16.vlgmr.msra.gmra.mrb[252].mxu1 %vm17174_vm2, %v11617_v40  ;;  %7888 = vmatpush1.bf16.msra.mxu0 %v7876_v61  ;;  %v8029_v40 = vsel %vm173_vm13, %v8015_v39, 0  ;;  %v8223_v61 = vsel %vm8219_vm1, %v12253_v46, %v12247_v3  ;;  %vm15496_vm8 = vcmp.eq.s32.totalorder %v8238_v36, 1  ;;  %vm8463_vm2 = vmand %vm15484_vm4, %vm17186_vm5 }
 0x283   :  { %7929 = vmatpush1.bf16.msra.mxu1 %v7882_v1  ;;  %7919 = vmatprep.mubr.bf16.mxu0 %v12433_v4  ;;  %v8250_v58 = vsel %vm15472_vm9, %v8223_v61, 0.0 }
 0x284   :  { %7960 = vmatprep.mubr.bf16.mxu1 %v12433_v4  ;;  %v4828_v43 = vpop.f32.mrb[148].mxu0  ;;  %11628 = vmatprep.subr.msk.bf16.mxu0 %vm173_vm13, %v8014_v30 }
 0x285   :  { %v4869_v52 = vpop.f32.mrb[148].mxu1  ;;  %11630 = vmatprep.subr.msk.bf16.mxu1 %vm173_vm13, %v8016_v48  ;;  %v15450_v56 = vadd.f32 %v4828_v43, %v15355_v35  ;;  %v4830_v13 = vpop.f32.mrb[149].mxu0  ;;  %v11622_v35 = vld [vmem:[%s16739_s7 + $0x46] sm:$0x3] }
 0x286   :  { %v15453_v47 = vadd.f32 %v4869_v52, %v15357_v12  ;;  %v4871_v53 = vpop.f32.mrb[149].mxu1  ;;  %v15456_v28 = vadd.f32 %v4830_v13, %v15359_v26  ;;  %v4832_v60 = vpop.f32.mrb[150].mxu0  ;;  %v8230_v26 = vrot.slane %v8226_v32, %v12683_v20  ;;  %v8220_v32 = vsel %vm8219_vm1, %v12252_v51, %v12253_v46 }
 0x287   :  { %v15459_v27 = vadd.f32 %v4871_v53, %v15361_v34  ;;  %v4873_v59 = vpop.f32.mrb[150].mxu1  ;;  %v4833_v12 = vpop.f32.mrb[151].mxu0  ;;  %v8221_v34 = vsel %vm8219_vm1, %v12248_v0, %v12252_v51  ;;  %v8222_v52 = vsel %vm8219_vm1, %v12247_v3, %v12248_v0  ;;  %vm17187_vm1 = vmmov %vm17175_vm10 }
 0x288   :  { %v4874_v41 = vpop.f32.mrb[151].mxu1  ;;  %vm15492_vm7 = vcmp.eq.s32.totalorder %v8230_v26, 1  ;;  %v8254_v59 = vpack.c.bf16 %v8250_v58, %v8250_v58  ;;  %v12261_v46 = vpop.permute.xlu1 %12260  ;;  %vm17190_vm9 = vmmov %vm17187_vm1 }
 0x289   :  { %11624 = vmatmul.mubr.msk.bf16.vlgmr.msra.gmra.mrb[0].mxu0 %vm17175_vm10, %v11622_v35  ;;  %vm17188_vm10 = vmmov %vm17187_vm1  ;;  %v12256_v41 = vpop.permute.xlu0 %12255 }
 0x28a   :  { %11626 = vmatmul.mubr.msk.bf16.vlgmr.msra.gmra.mrb[0].mxu1 %vm17176_vm11, %v11622_v35  ;;  %8035 = vmatpush1.bf16.msra.mxu0 %v8023_v22  ;;  %v8464_v35 = vsel %vm8463_vm2, 1, %v12433_v4  ;;  %vm8457_vm11 = vcmp.lt.s32.totalorder %v12697_v24, 96 }
 0x28b   :  { %8076 = vmatpush1.bf16.msra.mxu1 %v8029_v40  ;;  %11633 = vmatprep.subr.msk.bf16.mxu0 %vm173_vm13, %v8014_v30  ;;  %v8248_v30 = vsel %vm8244_vm6, %v8221_v34, 0.0  ;;  %v8472_v34 = vrot.slane %v8464_v35, %v12671_v17  ;;  %v8480_v2 = vrot.slane %v8464_v35, %v12674_v18  ;;  %vm17189_vm6 = vmmov %vm17187_vm1 }
 0x28c   :  { %11635 = vmatprep.subr.msk.bf16.mxu1 %vm173_vm13, %v8016_v48  ;;  %v4919_v33 = vpop.f32.mrb[152].mxu0  ;;  %8066 = vmatprep.mubr.bf16.mxu0 %v12433_v4  ;;  %v8252_v60 = vpack.c.bf16 %v8248_v30, %v8248_v30 }
 0x28d   :  { %v4960_v7 = vpop.f32.mrb[152].mxu1  ;;  %8107 = vmatprep.mubr.bf16.mxu1 %v12433_v4  ;;  %v15501_v57 = vadd.f32 %v4919_v33, %v15411_v9  ;;  %v4921_v39 = vpop.f32.mrb[153].mxu0  ;;  %v12263_v33 = vunpack.i.h.bf16 %v12261_v46  ;;  %vm15558_vm14 = vcmp.eq.s32.totalorder %v8472_v34, 1  ;;  %vm15562_vm4 = vcmp.eq.s32.totalorder %v8480_v2, 1 }
 0x28e   :  { %v15504_v37 = vadd.f32 %v4960_v7, %v15414_v42  ;;  %v4962_v43 = vpop.f32.mrb[153].mxu1  ;;  %v15511_v19 = vadd.f32 %v4921_v39, %v15421_v54  ;;  %v4923_v53 = vpop.f32.mrb[154].mxu0  ;;  %v11627_v42 = vld [vmem:[%s16739_s7 + $0x48] sm:$0x3]  ;;  %v8247_v54 = vsel %vm15492_vm7, %v8222_v52, 0.0  ;;  %v12262_v7 = vunpack.i.l.bf16 %v12261_v46 }
 0x28f   :  { %v15514_v13 = vadd.f32 %v4962_v43, %v15424_v45  ;;  %v4964_v9 = vpop.f32.mrb[154].mxu1  ;;  %v4924_v51 = vpop.f32.mrb[155].mxu0  ;;  %v8249_v45 = vsel %vm15496_vm8, %v8220_v32, 0.0  ;;  %v8251_v3 = vpack.c.bf16 %v8247_v54, %v8247_v54  ;;  %v12258_v39 = vunpack.i.h.bf16 %v12256_v41 }
 0x290   :  { %v4965_v0 = vpop.f32.mrb[155].mxu1  ;;  %v8253_v12 = vpack.c.bf16 %v8249_v45, %v8249_v45  ;;  %v12257_v43 = vunpack.i.l.bf16 %v12256_v41  ;;  %vm17195_vm7 = vcmp.ge.s32.totalorder %v12666_v16, 0  ;;  %v8458_v46 = vsel %vm8457_vm11, %v12262_v7, %v12263_v33 }
 0x291   :  { %11629 = vmatmul.mubr.msk.bf16.vlgmr.msra.gmra.mrb[4].mxu0 %vm17187_vm1, %v11627_v42  ;;  %v8261_v58 = vsel %vm173_vm13, %v8251_v3, 0  ;;  %v8459_v51 = vsel %vm8457_vm11, %v12258_v39, %v12262_v7  ;;  %vm15576_vm8 = vmand %vm15222_vm0, %vm17195_vm7  ;;  %vm17202_vm1 = vcmp.lt.s32.totalorder %v12666_v16, 16 }
 0x292   :  { %11631 = vmatmul.mubr.msk.bf16.vlgmr.msra.gmra.mrb[4].mxu1 %vm17188_vm10, %v11627_v42  ;;  %8126 = vmatpush1.bf16.msra.mxu0 %v8023_v22  ;;  %v8267_v53 = vsel %vm173_vm13, %v8253_v12, 0  ;;  %v8461_v0 = vsel %vm8457_vm11, %v12263_v33, %v12257_v43  ;;  %v8486_v34 = vsel %vm15558_vm14, %v8459_v51, 0.0  ;;  %vm8701_vm10 = vmand %vm15576_vm8, %vm17202_vm1 }
 0x293   :  { %8167 = vmatpush1.bf16.msra.mxu1 %v8029_v40  ;;  %8157 = vmatprep.mubr.bf16.mxu0 %v12433_v4  ;;  %v8488_v2 = vsel %vm15562_vm4, %v8461_v0, 0.0  ;;  %vm17204_vm14 = vmmov %vm17189_vm6 }
 0x294   :  { %8198 = vmatprep.mubr.bf16.mxu1 %v12433_v4  ;;  %v5010_v26 = vpop.f32.mrb[156].mxu0  ;;  %11638 = vmatprep.subr.msk.bf16.mxu0 %vm173_vm13, %v8252_v60  ;;  %vm17205_vm4 = vmmov %vm17189_vm6 }
 0x295   :  { %v5051_v36 = vpop.f32.mrb[156].mxu1  ;;  %11640 = vmatprep.subr.msk.bf16.mxu1 %vm173_vm13, %v8254_v59  ;;  %v15537_v22 = vadd.f32 %v5010_v26, %v15091_v38  ;;  %v5012_v61 = vpop.f32.mrb[157].mxu0  ;;  %v11632_v38 = vld [vmem:[%s16741_s9 + $0x28] sm:$0x3] }
 0x296   :  { %v15540_v40 = vadd.f32 %v5051_v36, %v15094_v6  ;;  %v5053_v1 = vpop.f32.mrb[157].mxu1  ;;  %v15543_v32 = vadd.f32 %v5012_v61, %v15097_v50  ;;  %v5014_v48 = vpop.f32.mrb[158].mxu0  ;;  %v8468_v50 = vrot.slane %v8464_v35, %v12683_v20 }
 0x297   :  { %v15546_v30 = vadd.f32 %v5053_v1, %v15100_v5  ;;  %v5055_v44 = vpop.f32.mrb[158].mxu1  ;;  %v5015_v6 = vpop.f32.mrb[159].mxu0  ;;  %v8476_v5 = vrot.slane %v8464_v35, %v12686_v21 }
 0x298   :  { %v5056_v52 = vpop.f32.mrb[159].mxu1  ;;  %vm15586_vm5 = vcmp.eq.s32.totalorder %v8468_v50, 1  ;;  %v8490_v44 = vpack.c.bf16 %v8486_v34, %v8486_v34  ;;  %v12266_v50 = vpop.permute.xlu0 %12265 }
 0x299   :  { %11634 = vmatmul.mubr.msk.bf16.vlgmr.msra.gmra.mrb[8].mxu0 %vm17189_vm6, %v11632_v38  ;;  %vm15590_vm2 = vcmp.eq.s32.totalorder %v8476_v5, 1 }
 0x29a   :  { %11636 = vmatmul.mubr.msk.bf16.vlgmr.msra.gmra.mrb[8].mxu1 %vm17190_vm9, %v11632_v38  ;;  %8273 = vmatpush1.bf16.msra.mxu0 %v8261_v58  ;;  %v8492_v38 = vpack.c.bf16 %v8488_v2, %v8488_v2  ;;  %vm8695_vm9 = vcmp.lt.s32.totalorder %v12697_v24, 95 }
 0x29b   :  { %8314 = vmatpush1.bf16.msra.mxu1 %v8267_v53  ;;  %11643 = vmatprep.subr.msk.bf16.mxu0 %vm173_vm13, %v8252_v60  ;;  %v8460_v60 = vsel %vm8457_vm11, %v12257_v43, %v12258_v39  ;;  %vm17203_vm11 = vmmov %vm17189_vm6  ;;  %v8702_v39 = vsel %vm8701_vm10, 1, %v12433_v4  ;;  %v12271_v43 = vpop.permute.xlu1 %12270 }
 0x29c   :  { %11645 = vmatprep.subr.msk.bf16.mxu1 %vm173_vm13, %v8254_v59  ;;  %v5113_v45 = vpop.f32.mrb[160].mxu0  ;;  %8304 = vmatprep.mubr.bf16.mxu0 %v12433_v4  ;;  %v8710_v42 = vrot.slane %v8702_v39, %v12671_v17  ;;  %v8718_v51 = vrot.slane %v8702_v39, %v12674_v18 }
 0x29d   :  { %v5154_v35 = vpop.f32.mrb[160].mxu1  ;;  %8345 = vmatprep.mubr.bf16.mxu1 %v12433_v4  ;;  %v15595_v12 = vadd.f32 %v5113_v45, %v15450_v56  ;;  %v5115_v26 = vpop.f32.mrb[161].mxu0  ;;  %v12273_v45 = vunpack.i.h.bf16 %v12271_v43 }
 0x29e   :  { %v15598_v41 = vadd.f32 %v5154_v35, %v15453_v47  ;;  %v5156_v36 = vpop.f32.mrb[161].mxu1  ;;  %v15605_v61 = vadd.f32 %v5115_v26, %v15456_v28  ;;  %v5117_v33 = vpop.f32.mrb[162].mxu0  ;;  %v11637_v47 = vld [vmem:[%s16739_s7 + $0x4a] sm:$0x3]  ;;  %v8485_v28 = vsel %vm15586_vm5, %v8460_v60, 0.0  ;;  %v12272_v35 = vunpack.i.l.bf16 %v12271_v43 }
 0x29f   :  { %v15608_v1 = vadd.f32 %v5156_v36, %v15459_v27  ;;  %v5158_v56 = vpop.f32.mrb[162].mxu1  ;;  %v5118_v7 = vpop.f32.mrb[163].mxu0  ;;  %v8487_v27 = vsel %vm15590_vm2, %v8458_v46, 0.0  ;;  %v8489_v6 = vpack.c.bf16 %v8485_v28, %v8485_v28  ;;  %v12268_v26 = vunpack.i.h.bf16 %v12266_v50 }
 0x2a0   :  { %v5159_v48 = vpop.f32.mrb[163].mxu1  ;;  %v8491_v52 = vpack.c.bf16 %v8487_v27, %v8487_v27  ;;  %v12267_v36 = vunpack.i.l.bf16 %v12266_v50  ;;  %vm15652_vm7 = vcmp.eq.s32.totalorder %v8710_v42, 1  ;;  %vm15656_vm8 = vcmp.eq.s32.totalorder %v8718_v51, 1 }
 0x2a1   :  { %11639 = vmatmul.mubr.msk.bf16.vlgmr.msra.gmra.mrb[12].mxu0 %vm17203_vm11, %v11637_v47  ;;  %v8499_v2 = vsel %vm173_vm13, %v8489_v6, 0  ;;  %v8697_v7 = vsel %vm8695_vm9, %v12268_v26, %v12272_v35  ;;  %vm17210_vm5 = vcmp.ge.s32.totalorder %v12771_v55, 0  ;;  %v8696_v43 = vsel %vm8695_vm9, %v12272_v35, %v12273_v45  ;;  %v10361_v35 = vld [vmem:[%s16742_s10] sm:$0xf] }
 0x2a2   :  { %11641 = vmatmul.mubr.msk.bf16.vlgmr.msra.gmra.mrb[12].mxu1 %vm17189_vm6, %v11637_v47  ;;  %8364 = vmatpush1.bf16.msra.mxu0 %v8261_v58  ;;  %v8505_v33 = vsel %vm173_vm13, %v8491_v52, 0  ;;  %v8699_v48 = vsel %vm8695_vm9, %v12273_v45, %v12267_v36  ;;  %vm15670_vm2 = vmand %vm15222_vm0, %vm17210_vm5  ;;  %v8724_v42 = vsel %vm15652_vm7, %v8697_v7, 0.0 }
 0x2a3   :  { %8405 = vmatpush1.bf16.msra.mxu1 %v8267_v53  ;;  %8395 = vmatprep.mubr.bf16.mxu0 %v12433_v4  ;;  %v8726_v51 = vsel %vm15656_vm8, %v8699_v48, 0.0  ;;  %vm8939_vm11 = vmand %vm15670_vm2, %vm830_vm15 }
 0x2a4   :  { %8436 = vmatprep.mubr.bf16.mxu1 %v12433_v4  ;;  %v5204_v5 = vpop.f32.mrb[164].mxu0  ;;  %11648 = vmatprep.subr.msk.bf16.mxu0 %vm173_vm13, %v8490_v44  ;;  %vm17217_vm6 = vmmov %vm17205_vm4 }
 0x2a5   :  { %v5245_v9 = vpop.f32.mrb[164].mxu1  ;;  %11650 = vmatprep.subr.msk.bf16.mxu1 %vm173_vm13, %v8492_v38  ;;  %v15631_v58 = vadd.f32 %v5204_v5, %v15501_v57  ;;  %v5206_v0 = vpop.f32.mrb[165].mxu0  ;;  %v11642_v57 = vld [vmem:[%s16741_s9 + $0x2a] sm:$0x3]  ;;  %10364 = vperm.xlu0 %12364, %v10361_v35   ;;  %vm17221_vm7 = vmmov %vm17217_vm6 }
 0x2a6   :  { %v15634_v53 = vadd.f32 %v5245_v9, %v15504_v37  ;;  %v5247_v54 = vpop.f32.mrb[165].mxu1  ;;  %v15637_v46 = vadd.f32 %v5206_v0, %v15511_v19  ;;  %v5208_v59 = vpop.f32.mrb[166].mxu0  ;;  %v8706_v19 = vrot.slane %v8702_v39, %v12683_v20  ;;  %vm17222_vm8 = vmmov %vm17217_vm6 }
 0x2a7   :  { %v15640_v60 = vadd.f32 %v5247_v54, %v15514_v13  ;;  %v5249_v3 = vpop.f32.mrb[166].mxu1  ;;  %v5209_v37 = vpop.f32.mrb[167].mxu0  ;;  %v8714_v13 = vrot.slane %v8702_v39, %v12686_v21 }
 0x2a8   :  { %v5250_v34 = vpop.f32.mrb[167].mxu1  ;;  %vm15680_vm1 = vcmp.eq.s32.totalorder %v8706_v19, 1  ;;  %v8730_v3 = vpack.c.bf16 %v8726_v51, %v8726_v51  ;;  %v8940_v37 = vsel %vm8939_vm11, 1, %v12433_v4 }
 0x2a9   :  { %11644 = vmatmul.mubr.msk.bf16.vlgmr.msra.gmra.mrb[16].mxu0 %vm17204_vm14, %v11642_v57  ;;  %vm15684_vm10 = vcmp.eq.s32.totalorder %v8714_v13, 1  ;;  %v12276_v34 = vpop.permute.xlu0 %12275  ;;  %vm8933_vm14 = vcmp.lt.s32.totalorder %v12697_v24, 94  ;;  %v8948_v48 = vrot.slane %v8940_v37, %v12671_v17 }
 0x2aa   :  { %11646 = vmatmul.mubr.msk.bf16.vlgmr.msra.gmra.mrb[16].mxu1 %vm17205_vm4, %v11642_v57  ;;  %8511 = vmatpush1.bf16.msra.mxu0 %v8499_v2 }
 0x2ab   :  { %8552 = vmatpush1.bf16.msra.mxu1 %v8505_v33  ;;  %11653 = vmatprep.subr.msk.bf16.mxu0 %vm173_vm13, %v8490_v44  ;;  %v8698_v44 = vsel %vm8695_vm9, %v12267_v36, %v12268_v26  ;;  %v8725_v26 = vsel %vm15684_vm10, %v8696_v43, 0.0  ;;  %vm17218_vm9 = vmmov %vm17205_vm4  ;;  %v12281_v36 = vpop.permute.xlu1 %12280  ;;  %vm15758_vm5 = vcmp.eq.s32.totalorder %v8948_v48, 1 }
 0x2ac   :  { %11655 = vmatprep.subr.msk.bf16.mxu1 %vm173_vm13, %v8492_v38  ;;  %v5295_v27 = vpop.f32.mrb[168].mxu0  ;;  %8542 = vmatprep.mubr.bf16.mxu0 %v12433_v4  ;;  %v8723_v57 = vsel %vm15680_vm1, %v8698_v44, 0.0  ;;  %v8729_v13 = vpack.c.bf16 %v8725_v26, %v8725_v26  ;;  %v12282_v7 = vunpack.i.l.bf16 %v12281_v36  ;;  %v12278_v44 = vunpack.i.h.bf16 %v12276_v34  ;;  %vm15751_vm4 = vmand %vm15222_vm0, %vm978_vm12 }
 0x2ad   :  { %v5336_v39 = vpop.f32.mrb[168].mxu1  ;;  %8583 = vmatprep.mubr.bf16.mxu1 %v12433_v4  ;;  %v15689_v52 = vadd.f32 %v5295_v27, %v15537_v22  ;;  %v5297_v5 = vpop.f32.mrb[169].mxu0  ;;  %v8727_v19 = vpack.c.bf16 %v8723_v57, %v8723_v57  ;;  %v12277_v38 = vunpack.i.l.bf16 %v12276_v34  ;;  %v12283_v51 = vunpack.i.h.bf16 %v12281_v36  ;;  %vm15790_vm10 = vmand %vm15751_vm4, %vm980_vm3 }
 0x2ae   :  { %v15692_v50 = vadd.f32 %v5336_v39, %v15540_v40  ;;  %v5338_v9 = vpop.f32.mrb[169].mxu1  ;;  %v15699_v0 = vadd.f32 %v5297_v5, %v15543_v32  ;;  %v5299_v45 = vpop.f32.mrb[170].mxu0  ;;  %v11647_v40 = vld [vmem:[%s16739_s7 + $0x4c] sm:$0x3]  ;;  %v8743_v35 = vsel %vm173_vm13, %v8729_v13, 0  ;;  %vm17236_vm4 = vmmov %vm17221_vm7 }
 0x2af   :  { %v15702_v54 = vadd.f32 %v5338_v9, %v15546_v30  ;;  %v5340_v22 = vpop.f32.mrb[170].mxu1  ;;  %v5300_v32 = vpop.f32.mrb[171].mxu0  ;;  %v8728_v30 = vpack.c.bf16 %v8724_v42, %v8724_v42  ;;  %v8936_v29 = vsel %vm8933_vm14, %v12277_v38, %v12278_v44  ;;  %v8937_v36 = vsel %vm8933_vm14, %v12283_v51, %v12277_v38 }
 0x2b0   :  { %v5341_v59 = vpop.f32.mrb[171].mxu1  ;;  %v15784_v34 = vpop.permute.xlu1 %12290 }
 0x2b1   :  { %11649 = vmatmul.mubr.msk.bf16.vlgmr.msra.gmra.mrb[20].mxu0 %vm17217_vm6, %v11647_v40  ;;  %v8935_v59 = vsel %vm8933_vm14, %v12278_v44, %v12282_v7  ;;  %v15794_v13 = vpop.permute.xlu0 %12285  ;;  %v12292_v32 = vunpack.i.l.bf16 %v15784_v34 }
 0x2b2   :  { %11651 = vmatmul.mubr.msk.bf16.vlgmr.msra.gmra.mrb[20].mxu1 %vm17218_vm9, %v11647_v40  ;;  %8602 = vmatpush1.bf16.msra.mxu0 %v8499_v2  ;;  %v8956_v2 = vrot.slane %v8940_v37, %v12674_v18  ;;  %v8737_v40 = vsel %vm173_vm13, %v8727_v19, 0 }
 0x2b3   :  { %8643 = vmatpush1.bf16.msra.mxu1 %v8505_v33  ;;  %8633 = vmatprep.mubr.bf16.mxu0 %v12433_v4  ;;  %v8944_v33 = vrot.slane %v8940_v37, %v12683_v20 }
 0x2b4   :  { %8674 = vmatprep.mubr.bf16.mxu1 %v12433_v4  ;;  %v5442_v56 = vpop.f32.mrb[172].mxu0  ;;  %11658 = vmatprep.subr.msk.bf16.mxu0 %vm173_vm13, %v8728_v30  ;;  %vm15772_vm2 = vcmp.eq.s32.totalorder %v8956_v2, 1 }
 0x2b5   :  { %v5483_v47 = vpop.f32.mrb[172].mxu1  ;;  %11660 = vmatprep.subr.msk.bf16.mxu1 %vm173_vm13, %v8730_v3  ;;  %v15730_v28 = vadd.f32 %v5442_v56, %v15595_v12  ;;  %v5444_v39 = vpop.f32.mrb[173].mxu0  ;;  %v11652_v12 = vld [vmem:[%s16741_s9 + $0x2c] sm:$0x3]  ;;  %vm15766_vm0 = vcmp.eq.s32.totalorder %v8944_v33, 1 }
 0x2b6   :  { %v15733_v27 = vadd.f32 %v5483_v47, %v15598_v41  ;;  %v5485_v43 = vpop.f32.mrb[173].mxu1  ;;  %v15736_v6 = vadd.f32 %v5444_v39, %v15605_v61  ;;  %v5446_v9 = vpop.f32.mrb[174].mxu0  ;;  %v8952_v41 = vrot.slane %v8940_v37, %v12686_v21  ;;  %v8964_v39 = vsel %vm15772_vm2, %v8937_v36, 0.0 }
 0x2b7   :  { %v15739_v5 = vadd.f32 %v5485_v43, %v15608_v1  ;;  %v5487_v42 = vpop.f32.mrb[174].mxu1  ;;  %v5447_v45 = vpop.f32.mrb[175].mxu0  ;;  %v9323_v1 = vadd.s32 3, %v15161_v31  ;;  %v8934_v31 = vsel %vm8933_vm14, %v12282_v7, %v12283_v51  ;;  %vm17235_vm14 = vmmov %vm17221_vm7  ;;  %v12293_v61 = vunpack.i.h.bf16 %v15784_v34 }
 0x2b8   :  { %v5488_v22 = vpop.f32.mrb[175].mxu1  ;;  %vm15778_vm1 = vcmp.eq.s32.totalorder %v8952_v41, 1  ;;  %v9178_v42 = vsel %vm15790_vm10, 1, %v12433_v4  ;;  %v8968_v41 = vpack.c.bf16 %v8964_v39, %v8964_v39  ;;  %v11662_v39 = vld [vmem:[%s16741_s9 + $0x2e] sm:$0x3] }
 0x2b9   :  { %11654 = vmatmul.mubr.msk.bf16.vlgmr.msra.gmra.mrb[24].mxu0 %vm17221_vm7, %v11652_v12  ;;  %vm9324_vm11 = vcmp.ge.s32.totalorder %v9323_v1, 0  ;;  %vm9325_vm6 = vcmp.lt.s32.totalorder %v9323_v1, 16  ;;  %v8963_v43 = vsel %vm15778_vm1, %v8934_v31, 0.0  ;;  %vm9171_vm7 = vcmp.lt.s32.totalorder %v12697_v24, 93 }
 0x2ba   :  { %11656 = vmatmul.mubr.msk.bf16.vlgmr.msra.gmra.mrb[24].mxu1 %vm17222_vm8, %v11652_v12  ;;  %8749 = vmatpush1.bf16.msra.mxu0 %v8737_v40  ;;  %vm15826_vm9 = vmand %vm9324_vm11, %vm9325_vm6  ;;  %v8967_v22 = vpack.c.bf16 %v8963_v43, %v8963_v43  ;;  %v12288_v1 = vunpack.i.h.bf16 %v15794_v13  ;;  %vm17237_vm8 = vcmp.ge.s32.totalorder %v12637_v11, 0  ;;  %v9190_v31 = vrot.slane %v9178_v42, %v12686_v21 }
 0x2bb   :  { %8790 = vmatpush1.bf16.msra.mxu1 %v8743_v35  ;;  %11663 = vmatprep.subr.msk.bf16.mxu0 %vm173_vm13, %v8728_v30  ;;  %v8962_v30 = vsel %vm15758_vm5, %v8935_v59, 0.0  ;;  %v9182_v59 = vrot.slane %v9178_v42, %v12683_v20  ;;  %vm15842_vm5 = vmand %vm15826_vm9, %vm17237_vm8  ;;  %vm17244_vm8 = vcmp.ge.s32.totalorder %v12634_v10, 0 }
 0x2bc   :  { %11665 = vmatprep.subr.msk.bf16.mxu1 %vm173_vm13, %v8730_v3  ;;  %v5533_v56 = vpop.f32.mrb[176].mxu0  ;;  %8780 = vmatprep.mubr.bf16.mxu0 %v12433_v4  ;;  %v8961_v3 = vsel %vm15766_vm0, %v8936_v29, 0.0  ;;  %v12287_v29 = vunpack.i.l.bf16 %v15794_v13  ;;  %v15857_v34 = vsel %vm173_vm13, %v8967_v22, 0  ;;  %vm17240_vm0 = vcmp.lt.s32.totalorder %v12637_v11, 16 }
 0x2bd   :  { %v5574_v47 = vpop.f32.mrb[176].mxu1  ;;  %8821 = vmatprep.mubr.bf16.mxu1 %v12433_v4  ;;  %v15803_v7 = vadd.f32 %v5533_v56, %v15631_v58  ;;  %v5535_v2 = vpop.f32.mrb[177].mxu0  ;;  %v8965_v45 = vpack.c.bf16 %v8961_v3, %v8961_v3  ;;  %vm9328_vm2 = vmand %vm15842_vm5, %vm17240_vm0  ;;  %vm15871_vm1 = vcmp.eq.s32.totalorder %v9182_v59, 1  ;;  %vm9197_vm10 = vcmp.eq.s32.totalorder %v9190_v31, 1 }
 0x2be   :  { %v15806_v48 = vadd.f32 %v5574_v47, %v15634_v53  ;;  %v5576_v33 = vpop.f32.mrb[177].mxu1  ;;  %v15813_v44 = vadd.f32 %v5535_v2, %v15637_v46  ;;  %v5537_v9 = vpop.f32.mrb[178].mxu0  ;;  %v11657_v53 = vld [vmem:[%s16739_s7 + $0x4e] sm:$0x3]  ;;  %v9174_v11 = vsel %vm9171_vm7, %v12287_v29, %v12288_v1  ;;  %vm15899_vm5 = vmand %vm15826_vm9, %vm17244_vm8  ;;  %vm17247_vm0 = vcmp.lt.s32.totalorder %v12634_v10, 16 }
 0x2bf   :  { %v15816_v38 = vadd.f32 %v5576_v33, %v15640_v60  ;;  %v5578_v58 = vpop.f32.mrb[178].mxu1  ;;  %v5538_v12 = vpop.f32.mrb[179].mxu0  ;;  %v8966_v60 = vpack.c.bf16 %v8962_v30, %v8962_v30  ;;  %v15854_v37 = vsel %vm173_vm13, %v8965_v45, 0  ;;  %v9172_v30 = vsel %vm9171_vm7, %v12292_v32, %v12293_v61 }
 0x2c0   :  { %v5579_v51 = vpop.f32.mrb[179].mxu1  ;;  %v9329_v58 = vsel %vm9328_vm2, 1, %v12433_v4  ;;  %v9199_v12 = vsel %vm15871_vm1, %v9174_v11, 0.0  ;;  %vm15919_vm2 = vmand %vm15899_vm5, %vm17247_vm0  ;;  %vm17263_vm0 = vcmp.lt.s32.totalorder %v12646_v14, 16 }
 0x2c1   :  { %11659 = vmatmul.mubr.msk.bf16.vlgmr.msra.gmra.mrb[28].mxu0 %vm17235_vm14, %v11657_v53  ;;  %vm17243_vm14 = vmmov %vm17236_vm4  ;;  %v9201_v51 = vsel %vm9197_vm10, %v9172_v30, 0.0  ;;  %v9337_v30 = vrot.slane %v9329_v58, %v12671_v17  ;;  %v9345_v3 = vrot.slane %v9329_v58, %v12674_v18  ;;  %vm17252_vm10 = vcmp.ge.s32.totalorder %v12646_v14, 0 }
 0x2c2   :  { %11661 = vmatmul.mubr.msk.bf16.vlgmr.msra.gmra.mrb[28].mxu1 %vm17236_vm4, %v11657_v53  ;;  %8840 = vmatpush1.bf16.msra.mxu0 %v8737_v40  ;;  %v9186_v40 = vrot.slane %v9178_v42, %v12671_v17  ;;  %v12296_v53 = vpop.permute.xlu0 %12295 }
 0x2c3   :  { %8881 = vmatpush1.bf16.msra.mxu1 %v8743_v35  ;;  %8871 = vmatprep.mubr.bf16.mxu0 %v12433_v4  ;;  %v9194_v35 = vrot.slane %v9178_v42, %v12674_v18  ;;  %v12301_v42 = vpop.permute.xlu1 %12300  ;;  %v12297_v59 = vunpack.i.l.bf16 %v12296_v53  ;;  %vm15974_vm8 = vcmp.eq.s32.totalorder %v9345_v3, 1 }
 0x2c4   :  { %8912 = vmatprep.mubr.bf16.mxu1 %v12433_v4  ;;  %v5624_v26 = vpop.f32.mrb[180].mxu0  ;;  %11668 = vmatprep.subr.msk.bf16.mxu0 %vm173_vm13, %v8966_v60  ;;  %vm9196_vm11 = vcmp.eq.s32.totalorder %v9186_v40, 1  ;;  %v12303_v31 = vunpack.i.h.bf16 %v12301_v42  ;;  %v12302_v40 = vunpack.i.l.bf16 %v12301_v42 }
 0x2c5   :  { %v5665_v36 = vpop.f32.mrb[180].mxu1  ;;  %11670 = vmatprep.subr.msk.bf16.mxu1 %vm173_vm13, %v8968_v41  ;;  %v15860_v19 = vadd.f32 %v5624_v26, %v15689_v52  ;;  %v5626_v56 = vpop.f32.mrb[181].mxu0  ;;  %vm9198_vm6 = vcmp.eq.s32.totalorder %v9194_v35, 1  ;;  %v9203_v35 = vpack.c.bf16 %v9199_v12, %v9199_v12  ;;  %v9205_v26 = vpack.c.bf16 %v9201_v51, %v9201_v51 }
 0x2c6   :  { %v15863_v13 = vadd.f32 %v5665_v36, %v15692_v50  ;;  %v5667_v47 = vpop.f32.mrb[181].mxu1  ;;  %v15876_v52 = vadd.f32 %v5626_v56, %v15699_v0  ;;  %v5628_v2 = vpop.f32.mrb[182].mxu0  ;;  %v9173_v0 = vsel %vm9171_vm7, %v12288_v1, %v12292_v32  ;;  %v12298_v32 = vunpack.i.h.bf16 %v12296_v53 }
 0x2c7   :  { %v15879_v50 = vadd.f32 %v5667_v47, %v15702_v54  ;;  %v5669_v33 = vpop.f32.mrb[182].mxu1  ;;  %v5629_v43 = vpop.f32.mrb[183].mxu0  ;;  %v9175_v54 = vsel %vm9171_vm7, %v12293_v61, %v12287_v29  ;;  %v15905_v22 = vsel %vm9196_vm11, %v9173_v0, 0.0  ;;  %vm9318_vm7 = vcmp.lt.s32.totalorder %v12697_v24, 83  ;;  %vm15964_vm11 = vmand %vm15826_vm9, %vm17252_vm10 }
 0x2c8   :  { %v5670_v9 = vpop.f32.mrb[183].mxu1  ;;  %v15907_v61 = vsel %vm9198_vm6, %v9175_v54, 0.0  ;;  %v9333_v1 = vrot.slane %v9329_v58, %v12683_v20  ;;  %v9204_v0 = vpack.c.bf16 %v15905_v22, %v15905_v22  ;;  %v9219_v53 = vsel %vm173_vm13, %v9205_v26, 0  ;;  %v12311_v42 = vpop.permute.xlu1 %12310  ;;  %vm17255_vm6 = vmmov %vm17236_vm4 }
 0x2c9   :  { %11664 = vmatmul.mubr.msk.bf16.vlgmr.msra.gmra.mrb[32].mxu0 %vm17243_vm14, %v11662_v39  ;;  %v9321_v9 = vsel %vm9318_vm7, %v12297_v59, %v12298_v32  ;;  %v9206_v54 = vpack.c.bf16 %v15907_v61, %v15907_v61  ;;  %v12306_v12 = vpop.permute.xlu0 %12305  ;;  %vm17256_vm14 = vmmov %vm17236_vm4  ;;  %v9320_v61 = vsel %vm9318_vm7, %v12298_v32, %v12302_v40 }
 0x2ca   :  { %11666 = vmatmul.mubr.msk.bf16.vlgmr.msra.gmra.mrb[32].mxu1 %vm17236_vm4, %v11662_v39  ;;  %8987 = vmatpush1.bf16.msra.mxu0 %v15854_v37  ;;  %vm15948_vm1 = vcmp.eq.s32.totalorder %v9333_v1, 1  ;;  %vm15970_vm4 = vcmp.eq.s32.totalorder %v9337_v30, 1  ;;  %v9322_v1 = vsel %vm9318_vm7, %v12303_v31, %v12297_v59  ;;  %v12308_v32 = vunpack.i.h.bf16 %v12306_v12 }
 0x2cb   :  { %9028 = vmatpush1.bf16.msra.mxu1 %v15857_v34  ;;  %11673 = vmatprep.subr.msk.bf16.mxu0 %vm173_vm13, %v8966_v60  ;;  %v9353_v14 = vsel %vm15974_vm8, %v9322_v1, 0.0 }
 0x2cc   :  { %11675 = vmatprep.subr.msk.bf16.mxu1 %vm173_vm13, %v8968_v41  ;;  %v5771_v29 = vpop.f32.mrb[184].mxu0  ;;  %9018 = vmatprep.mubr.bf16.mxu0 %v12433_v4  ;;  %v9357_v22 = vpack.c.bf16 %v9353_v14, %v9353_v14  ;;  %v12321_v1 = vpop.permute.xlu1 %12320 }
 0x2cd   :  { %v5812_v57 = vpop.f32.mrb[184].mxu1  ;;  %9059 = vmatprep.mubr.bf16.mxu1 %v12433_v4  ;;  %v15924_v41 = vadd.f32 %v5771_v29, %v15730_v28  ;;  %v5773_v56 = vpop.f32.mrb[185].mxu0  ;;  %v11667_v28 = vld [vmem:[%s16739_s7 + $0x50] sm:$0x3]  ;;  %v9319_v29 = vsel %vm9318_vm7, %v12302_v40, %v12303_v31  ;;  %vm16000_vm7 = vmand %vm15964_vm11, %vm17263_vm0 }
 0x2ce   :  { %v15927_v36 = vadd.f32 %v5812_v57, %v15733_v27  ;;  %v5814_v47 = vpop.f32.mrb[185].mxu1  ;;  %v15932_v10 = vadd.f32 %v5773_v56, %v15736_v6  ;;  %v5775_v33 = vpop.f32.mrb[186].mxu0  ;;  %v9341_v27 = vrot.slane %v9329_v58, %v12686_v21  ;;  %v15946_v6 = vsel %vm15919_vm2, 1, %v12433_v4  ;;  %vm17270_vm11 = vmmov %vm17255_vm6 }
 0x2cf   :  { %v15935_v2 = vadd.f32 %v5814_v47, %v15739_v5  ;;  %v5816_v39 = vpop.f32.mrb[186].mxu1  ;;  %v5776_v11 = vpop.f32.mrb[187].mxu0  ;;  %v15957_v58 = vsel %vm173_vm13, %v9203_v35, 0  ;;  %v9484_v57 = vrot.slane %v15946_v6, %v12671_v17  ;;  %v9350_v35 = vsel %vm15948_vm1, %v9321_v9, 0.0 }
 0x2d0   :  { %v5817_v43 = vpop.f32.mrb[187].mxu1  ;;  %vm15990_vm5 = vcmp.eq.s32.totalorder %v9341_v27, 1  ;;  %v9480_v31 = vrot.slane %v15946_v6, %v12683_v20  ;;  %v9351_v56 = vsel %vm15970_vm4, %v9320_v61, 0.0  ;;  %vm9469_vm2 = vcmp.lt.s32.totalorder %v12697_v24, 82 }
 0x2d1   :  { %11669 = vmatmul.mubr.msk.bf16.vlgmr.msra.gmra.mrb[36].mxu0 %vm17255_vm6, %v11667_v28  ;;  %v9492_v47 = vrot.slane %v15946_v6, %v12674_v18  ;;  %v9352_v27 = vsel %vm15990_vm5, %v9319_v29, 0.0  ;;  %vm16037_vm1 = vcmp.eq.s32.totalorder %v9484_v57, 1  ;;  %v9355_v45 = vpack.c.bf16 %v9351_v56, %v9351_v56  ;;  %v12316_v29 = vpop.permute.xlu0 %12315 }
 0x2d2   :  { %11671 = vmatmul.mubr.msk.bf16.vlgmr.msra.gmra.mrb[36].mxu1 %vm17256_vm14, %v11667_v28  ;;  %9078 = vmatpush1.bf16.msra.mxu0 %v15854_v37  ;;  %v12312_v37 = vunpack.i.l.bf16 %v12311_v42  ;;  %v12313_v28 = vunpack.i.h.bf16 %v12311_v42  ;;  %vm16045_vm10 = vcmp.eq.s32.totalorder %v9480_v31, 1  ;;  %v9356_v61 = vpack.c.bf16 %v9352_v27, %v9352_v27 }
 0x2d3   :  { %9119 = vmatpush1.bf16.msra.mxu1 %v15857_v34  ;;  %9109 = vmatprep.mubr.bf16.mxu0 %v12433_v4  ;;  %v12307_v34 = vunpack.i.l.bf16 %v12306_v12  ;;  %v9488_v57 = vrot.slane %v15946_v6, %v12686_v21  ;;  %vm16055_vm14 = vcmp.eq.s32.totalorder %v9492_v47, 1  ;;  %vm17273_vm4 = vcmp.ge.s32.totalorder %v12630_v8, 0 }
 0x2d4   :  { %9150 = vmatprep.mubr.bf16.mxu1 %v12433_v4  ;;  %v5862_v40 = vpop.f32.mrb[188].mxu0  ;;  %11678 = vmatprep.subr.msk.bf16.mxu0 %vm173_vm13, %v9204_v0  ;;  %v16035_v0 = vsel %vm16000_vm7, 1, %v12433_v4  ;;  %vm16077_vm8 = vmand %vm15826_vm9, %vm17273_vm4  ;;  %v12317_v56 = vunpack.i.l.bf16 %v12316_v29  ;;  %vm9616_vm5 = vcmp.lt.s32.totalorder %v12697_v24, 81  ;;  %vm17288_vm4 = vcmp.ge.s32.totalorder %v12666_v16, 0 }
 0x2d5   :  { %v5903_v60 = vpop.f32.mrb[188].mxu1  ;;  %11680 = vmatprep.subr.msk.bf16.mxu1 %vm173_vm13, %v9206_v54  ;;  %v16016_v30 = vadd.f32 %v5862_v40, %v15803_v7  ;;  %v5864_v33 = vpop.f32.mrb[189].mxu0  ;;  %v11672_v7 = vld [vmem:[%s16741_s9 + $0x30] sm:$0x3]  ;;  %v9472_v12 = vsel %vm9469_vm2, %v12307_v34, %v12308_v32  ;;  %v9631_v59 = vrot.slane %v16035_v0, %v12671_v17  ;;  %vm16089_vm0 = vcmp.eq.s32.totalorder %v9488_v57, 1 }
 0x2d6   :  { %v16019_v3 = vadd.f32 %v5903_v60, %v15806_v48  ;;  %v5905_v39 = vpop.f32.mrb[189].mxu1  ;;  %v16024_v11 = vadd.f32 %v5864_v33, %v15813_v44  ;;  %v5866_v9 = vpop.f32.mrb[190].mxu0  ;;  %v9354_v48 = vpack.c.bf16 %v9350_v35, %v9350_v35  ;;  %v9470_v35 = vsel %vm9469_vm2, %v12312_v37, %v12313_v28 }
 0x2d7   :  { %v16027_v43 = vadd.f32 %v5905_v39, %v15816_v38  ;;  %v5907_v5 = vpop.f32.mrb[190].mxu1  ;;  %v5867_v54 = vpop.f32.mrb[191].mxu0  ;;  %v9471_v38 = vsel %vm9469_vm2, %v12308_v32, %v12312_v37  ;;  %v9473_v32 = vsel %vm9469_vm2, %v12313_v28, %v12307_v34  ;;  %v9639_v37 = vrot.slane %v16035_v0, %v12674_v18 }
 0x2d8   :  { %v5908_v42 = vpop.f32.mrb[191].mxu1  ;;  %v16066_v6 = vsel %vm16037_vm1, %v9471_v38, 0.0  ;;  %v9364_v31 = vsel %vm173_vm13, %v9354_v48, 0  ;;  %v9497_v40 = vsel %vm16045_vm10, %v9472_v12, 0.0  ;;  %v12318_v60 = vunpack.i.h.bf16 %v12316_v29  ;;  %v11677_v12 = vld [vmem:[%s16739_s7 + $0x52] sm:$0x3] }
 0x2d9   :  { %11674 = vmatmul.mubr.msk.bf16.vlgmr.msra.gmra.mrb[40].mxu0 %vm17270_vm11, %v11672_v7  ;;  %v9500_v33 = vsel %vm16055_vm14, %v9473_v32, 0.0  ;;  %v9370_v39 = vsel %vm173_vm13, %v9356_v61, 0  ;;  %vm16095_vm7 = vcmp.eq.s32.totalorder %v9631_v59, 1  ;;  %vm17280_vm2 = vcmp.lt.s32.totalorder %v12630_v8, 16  ;;  %v16133_v32 = vpop.permute.xlu0 %12325  ;;  %vm17285_vm11 = vmmov %vm17255_vm6 }
 0x2da   :  { %11676 = vmatmul.mubr.msk.bf16.vlgmr.msra.gmra.mrb[40].mxu1 %vm17255_vm6, %v11672_v7  ;;  %9225 = vmatpush1.bf16.msra.mxu0 %v15957_v58  ;;  %v12323_v58 = vunpack.i.h.bf16 %v12321_v1  ;;  %vm16103_vm1 = vmand %vm16077_vm8, %vm17280_vm2  ;;  %v9627_v42 = vrot.slane %v16035_v0, %v12683_v20  ;;  %vm16114_vm10 = vcmp.eq.s32.totalorder %v9639_v37, 1  ;;  %v9501_v51 = vpack.c.bf16 %v9497_v40, %v9497_v40 }
 0x2db   :  { %9266 = vmatpush1.bf16.msra.mxu1 %v9219_v53  ;;  %9256 = vmatprep.mubr.bf16.mxu0 %v12433_v4  ;;  %v12322_v53 = vunpack.i.l.bf16 %v12321_v1  ;;  %v9635_v1 = vrot.slane %v16035_v0, %v12686_v21  ;;  %v9502_v29 = vpack.c.bf16 %v16066_v6, %v16066_v6  ;;  %v9504_v57 = vpack.c.bf16 %v9500_v33, %v9500_v33  ;;  %vm16149_vm8 = vmand %vm15826_vm9, %vm17288_vm4 }
 0x2dc   :  { %9297 = vmatprep.mubr.bf16.mxu1 %v12433_v4  ;;  %v6009_v14 = vpop.f32.mrb[192].mxu0  ;;  %11683 = vmatprep.subr.msk.bf16.mxu0 %vm173_vm13, %v9355_v45  ;;  %v16131_v26 = vsel %vm16103_vm1, 1, %v12433_v4  ;;  %v9619_v0 = vsel %vm9616_vm5, %v12317_v56, %v12318_v60  ;;  %vm16141_vm14 = vcmp.eq.s32.totalorder %v9627_v42, 1  ;;  %v9511_v34 = vsel %vm173_vm13, %v9501_v51, 0 }
 0x2dd   :  { %v6050_v47 = vpop.f32.mrb[192].mxu1  ;;  %11685 = vmatprep.subr.msk.bf16.mxu1 %vm173_vm13, %v9357_v22  ;;  %v6057_v27 = vadd.f32 %v6009_v14, %v15924_v41  ;;  %v6011_v5 = vpop.f32.mrb[193].mxu0  ;;  %v9618_v61 = vsel %vm9616_vm5, %v12318_v60, %v12322_v53  ;;  %v12328_v60 = vunpack.i.h.bf16 %v16133_v32  ;;  %v9774_v14 = vrot.slane %v16131_v26, %v12683_v20 }
 0x2de   :  { %v6059_v9 = vadd.f32 %v6050_v47, %v15927_v36  ;;  %v6052_v7 = vpop.f32.mrb[193].mxu1  ;;  %v6058_v41 = vadd.f32 %v6011_v5, %v15932_v10  ;;  %v6013_v44 = vpop.f32.mrb[194].mxu0  ;;  %v9620_v10 = vsel %vm9616_vm5, %v12323_v58, %v12317_v56  ;;  %v16155_v37 = vsel %vm16095_vm7, %v9618_v61, 0.0 }
 0x2df   :  { %v6060_v36 = vadd.f32 %v6052_v7, %v15935_v2  ;;  %v6054_v38 = vpop.f32.mrb[194].mxu1  ;;  %v6014_v45 = vpop.f32.mrb[195].mxu0  ;;  %v9499_v2 = vsel %vm16089_vm0, %v9470_v35, 0.0  ;;  %v9617_v35 = vsel %vm9616_vm5, %v12322_v53, %v12323_v58  ;;  %v16159_v40 = vsel %vm16114_vm10, %v9620_v10, 0.0 }
 0x2e0   :  { %v6055_v22 = vpop.f32.mrb[195].mxu1  ;;  %v9503_v58 = vpack.c.bf16 %v9499_v2, %v9499_v2  ;;  %v12331_v53 = vpop.permute.xlu1 %12330  ;;  %vm16166_vm5 = vcmp.eq.s32.totalorder %v9635_v1, 1  ;;  %vm9763_vm0 = vcmp.lt.s32.totalorder %v12697_v24, 80  ;;  %v9786_v28 = vrot.slane %v16131_v26, %v12674_v18 }
 0x2e1   :  { %11679 = vmatmul.mubr.msk.bf16.vlgmr.msra.gmra.mrb[44].mxu0 %vm17285_vm11, %v11677_v12  ;;  %v9644_v5 = vsel %vm16141_vm14, %v9619_v0, 0.0  ;;  %vm17293_vm7 = vcmp.lt.s32.totalorder %v12666_v16, 16  ;;  %v12333_v38 = vunpack.i.h.bf16 %v12331_v53  ;;  %v11682_v16 = vld [vmem:[%s16739_s7 + $0x54] sm:$0x3]  ;;  %v9646_v10 = vsel %vm16166_vm5, %v9617_v35, 0.0  ;;  %v16219_v59 = vpop.permute.xlu0 %12335  ;;  %vm17300_vm11 = vmmov %vm17255_vm6 }
 0x2e2   :  { %11681 = vmatmul.mubr.msk.bf16.vlgmr.msra.gmra.mrb[44].mxu1 %vm17255_vm6, %v11677_v12  ;;  %9376 = vmatpush1.bf16.msra.mxu0 %v9364_v31  ;;  %v12327_v31 = vunpack.i.l.bf16 %v16133_v32  ;;  %vm16185_vm2 = vmand %vm16149_vm8, %vm17293_vm7  ;;  %v12332_v12 = vunpack.i.l.bf16 %v12331_v53  ;;  %v9517_v61 = vsel %vm173_vm13, %v9503_v58, 0  ;;  %vm16204_vm1 = vcmp.eq.s32.totalorder %v9774_v14, 1 }
 0x2e3   :  { %9417 = vmatpush1.bf16.msra.mxu1 %v9370_v39  ;;  %9407 = vmatprep.mubr.bf16.mxu0 %v12433_v4  ;;  %v9778_v39 = vrot.slane %v16131_v26, %v12671_v17  ;;  %v9648_v35 = vpack.c.bf16 %v9644_v5, %v9644_v5  ;;  %v9782_v6 = vrot.slane %v16131_v26, %v12686_v21  ;;  %vm16227_vm14 = vcmp.eq.s32.totalorder %v9786_v28, 1 }
 0x2e4   :  { %9448 = vmatprep.mubr.bf16.mxu1 %v12433_v4  ;;  %v6160_v47 = vpop.f32.mrb[196].mxu0  ;;  %11688 = vmatprep.subr.msk.bf16.mxu0 %vm173_vm13, %v9502_v29  ;;  %v11036_v29 = vld [vmem:[%s16738_s6] sm:$0xf]  ;;  %v16217_v0 = vpop.permute.xlu1 %12340  ;;  %v9765_v58 = vsel %vm9763_vm0, %v12328_v60, %v12332_v12  ;;  %v9650_v53 = vpack.c.bf16 %v9646_v10, %v9646_v10  ;;  %v9767_v26 = vsel %vm9763_vm0, %v12333_v38, %v12327_v31  ;;  %vm17303_vm4 = vcmp.ge.s32.totalorder %v12771_v55, 0 }
 0x2e5   :  { %v6201_v33 = vpop.f32.mrb[196].mxu1  ;;  %11690 = vmatprep.subr.msk.bf16.mxu1 %vm173_vm13, %v9504_v57  ;;  %v6208_v48 = vadd.f32 %v6160_v47, %v6057_v27  ;;  %v6162_v42 = vpop.f32.mrb[197].mxu0  ;;  %v9651_v57 = vpack.c.bf16 %v16159_v40, %v16159_v40  ;;  %vm16213_vm10 = vcmp.eq.s32.totalorder %v9778_v39, 1  ;;  %11039 = vperm.xlu0 %12364, %v11036_v29   ;;  %vm16245_vm8 = vmand %vm15826_vm9, %vm17303_vm4  ;;  %v12337_v39 = vunpack.i.l.bf16 %v16219_v59 }
 0x2e6   :  { %v6210_v54 = vadd.f32 %v6201_v33, %v6059_v9  ;;  %v6203_v44 = vpop.f32.mrb[197].mxu1  ;;  %v6209_v8 = vadd.f32 %v6162_v42, %v6058_v41  ;;  %v6164_v45 = vpop.f32.mrb[198].mxu0  ;;  %v9649_v9 = vpack.c.bf16 %v16155_v37, %v16155_v37  ;;  %v9766_v41 = vsel %vm9763_vm0, %v12327_v31, %v12328_v60  ;;  %vm16276_vm7 = vmand %vm16245_vm8, %vm830_vm15 }
 0x2e7   :  { %v6211_v51 = vadd.f32 %v6203_v44, %v6060_v36  ;;  %v6205_v22 = vpop.f32.mrb[198].mxu1  ;;  %v6165_v2 = vpop.f32.mrb[199].mxu0  ;;  %v16202_v36 = vsel %vm16185_vm2, 1, %v12433_v4  ;;  %v9764_v37 = vsel %vm9763_vm0, %v12332_v12, %v12333_v38  ;;  %v9791_v47 = vsel %vm16204_vm1, %v9766_v41, 0.0  ;;  %vm17314_vm1 = vmmov %vm17255_vm6 }
 0x2e8   :  { %v6206_v27 = vpop.f32.mrb[199].mxu1  ;;  %v9925_v56 = vrot.slane %v16202_v36, %v12671_v17  ;;  %v9933_v14 = vrot.slane %v16202_v36, %v12674_v18  ;;  %v12342_v31 = vunpack.i.l.bf16 %v16217_v0  ;;  %v12338_v33 = vunpack.i.h.bf16 %v16219_v59  ;;  %vm17328_vm8 = vmmov %vm17314_vm1 }
 0x2e9   :  { %11684 = vmatmul.mubr.msk.bf16.vlgmr.msra.gmra.mrb[48].mxu0 %vm17300_vm11, %v11682_v16  ;;  %v9792_v7 = vsel %vm16213_vm10, %v9765_v58, 0.0  ;;  %v9658_v42 = vsel %vm173_vm13, %v9648_v35, 0  ;;  %vm9910_vm5 = vcmp.lt.s32.totalorder %v12697_v24, 79  ;;  %vm16261_vm0 = vcmp.eq.s32.totalorder %v9782_v6, 1  ;;  %v11267_v35 = vld [vmem:[%s16746_s14] sm:$0xf]  ;;  %v16304_v6 = vpop.permute.xlu1 %12350  ;;  %v16311_v58 = vpop.permute.xlu0 %12345  ;;  %vm17315_vm10 = vmmov %vm17314_vm1 }
 0x2ea   :  { %11686 = vmatmul.mubr.msk.bf16.vlgmr.msra.gmra.mrb[48].mxu1 %vm17255_vm6, %v11682_v16  ;;  %9523 = vmatpush1.bf16.msra.mxu0 %v9511_v34  ;;  %v12343_v34 = vunpack.i.h.bf16 %v16217_v0  ;;  %v9794_v16 = vsel %vm16227_vm14, %v9767_v26, 0.0  ;;  %vm16287_vm2 = vcmp.eq.s32.totalorder %v9925_v56, 1  ;;  %v9795_v55 = vpack.c.bf16 %v9791_v47, %v9791_v47  ;;  %vm16336_vm11 = vmand %vm15826_vm9, %vm978_vm12 }
 0x2eb   :  { %9564 = vmatpush1.bf16.msra.mxu1 %v9517_v61  ;;  %9554 = vmatprep.mubr.bf16.mxu0 %v12433_v4  ;;  %v9664_v61 = vsel %vm173_vm13, %v9650_v53, 0  ;;  %vm16291_vm15 = vcmp.eq.s32.totalorder %v9933_v14, 1  ;;  %v9793_v32 = vsel %vm16261_vm0, %v9764_v37, 0.0  ;;  %v9796_v0 = vpack.c.bf16 %v9792_v7, %v9792_v7  ;;  %vm16373_vm14 = vmand %vm16336_vm11, %vm980_vm3 }
 0x2ec   :  { %9595 = vmatprep.mubr.bf16.mxu1 %v12433_v4  ;;  %v6307_v28 = vpop.f32.mrb[200].mxu0  ;;  %11693 = vmatprep.subr.msk.bf16.mxu0 %vm173_vm13, %v9649_v9  ;;  %v11687_v9 = vld [vmem:[%s16739_s7 + $0x56] sm:$0x3]  ;;  %v9798_v59 = vpack.c.bf16 %v9794_v16, %v9794_v16  ;;  %v16309_v40 = vsel %vm16276_vm7, 1, %v12433_v4  ;;  %v9921_v53 = vrot.slane %v16202_v36, %v12683_v20  ;;  %v9911_v37 = vsel %vm9910_vm5, %v12342_v31, %v12343_v34 }
 0x2ed   :  { %v6348_v5 = vpop.f32.mrb[200].mxu1  ;;  %11695 = vmatprep.subr.msk.bf16.mxu1 %vm173_vm13, %v9651_v57  ;;  %v16265_v38 = vadd.f32 %v6307_v28, %v6208_v48  ;;  %v6309_v45 = vpop.f32.mrb[201].mxu0  ;;  %11270 = vperm.xlu1 %12365, %v11267_v35   ;;  %v9913_v26 = vsel %vm9910_vm5, %v12337_v39, %v12338_v33  ;;  %v9929_v56 = vrot.slane %v16202_v36, %v12686_v21  ;;  %v9805_v60 = vsel %vm173_vm13, %v9795_v55, 0  ;;  %v11692_v55 = vld [vmem:[%s16739_s7 + $0x58] sm:$0x3] }
 0x2ee   :  { %v16267_v12 = vadd.f32 %v6348_v5, %v6210_v54  ;;  %v6350_v22 = vpop.f32.mrb[201].mxu1  ;;  %v16280_v2 = vadd.f32 %v6309_v45, %v6209_v8  ;;  %v6311_v54 = vpop.f32.mrb[202].mxu0  ;;  %v9912_v8 = vsel %vm9910_vm5, %v12338_v33, %v12342_v31  ;;  %v9797_v28 = vpack.c.bf16 %v9793_v32, %v9793_v32 }
 0x2ef   :  { %v16282_v48 = vadd.f32 %v6350_v22, %v6211_v51  ;;  %v6352_v27 = vpop.f32.mrb[202].mxu1  ;;  %v6312_v1 = vpop.f32.mrb[203].mxu0  ;;  %v9914_v51 = vsel %vm9910_vm5, %v12343_v34, %v12337_v39  ;;  %v16325_v14 = vsel %vm16287_vm2, %v9912_v8, 0.0  ;;  %vm10057_vm6 = vcmp.lt.s32.totalorder %v12697_v24, 78  ;;  %vm17329_vm5 = vmmov %vm17314_vm1 }
 0x2f0   :  { %v6353_v29 = vpop.f32.mrb[203].mxu1  ;;  %v16329_v47 = vsel %vm16291_vm15, %v9914_v51, 0.0  ;;  %v12352_v36 = vunpack.i.l.bf16 %v16304_v6  ;;  %v10072_v31 = vrot.slane %v16309_v40, %v12671_v17  ;;  %v12348_v33 = vunpack.i.h.bf16 %v16311_v58 }
 0x2f1   :  { %11689 = vmatmul.mubr.msk.bf16.vlgmr.msra.gmra.mrb[52].mxu0 %vm17314_vm1, %v11687_v9  ;;  %v12353_v46 = vunpack.i.h.bf16 %v16304_v6  ;;  %v10080_v7 = vrot.slane %v16309_v40, %v12674_v18  ;;  %vm16353_vm12 = vcmp.eq.s32.totalorder %v9921_v53, 1  ;;  %v9943_v10 = vpack.c.bf16 %v16325_v14, %v16325_v14  ;;  %v16414_v6 = vpop.permute.xlu1 %12360 }
 0x2f2   :  { %11691 = vmatmul.mubr.msk.bf16.vlgmr.msra.gmra.mrb[52].mxu1 %vm17315_vm10, %v11687_v9  ;;  %9670 = vmatpush1.bf16.msra.mxu0 %v9658_v42  ;;  %v12347_v42 = vunpack.i.l.bf16 %v16311_v58  ;;  %vm16365_vm9 = vcmp.eq.s32.totalorder %v9929_v56, 1  ;;  %v9811_v49 = vsel %vm173_vm13, %v9797_v28, 0  ;;  %v9945_v1 = vpack.c.bf16 %v16329_v47, %v16329_v47  ;;  %v16416_v58 = vpop.permute.xlu0 %12355  ;;  %vm17334_vm10 = vmmov %vm17314_vm1 }
 0x2f3   :  { %9711 = vmatpush1.bf16.msra.mxu1 %v9664_v61  ;;  %9701 = vmatprep.mubr.bf16.mxu0 %v12433_v4  ;;  %vm16389_vm3 = vcmp.eq.s32.totalorder %v10072_v31, 1  ;;  %v10068_v51 = vrot.slane %v16309_v40, %v12683_v20  ;;  %vm16399_vm4 = vcmp.eq.s32.totalorder %v10080_v7, 1  ;;  %v10076_v53 = vrot.slane %v16309_v40, %v12686_v21 }
 0x2f4   :  { %9742 = vmatprep.mubr.bf16.mxu1 %v12433_v4  ;;  %v6398_v39 = vpop.f32.mrb[204].mxu0  ;;  %11698 = vmatprep.subr.msk.bf16.mxu0 %vm173_vm13, %v9796_v0  ;;  %v10061_v35 = vsel %vm10057_vm6, %v12353_v46, %v12347_v42  ;;  %v9940_v0 = vsel %vm16365_vm9, %v9911_v37, 0.0  ;;  %v10058_v37 = vsel %vm10057_vm6, %v12352_v36, %v12353_v46  ;;  %v10060_v56 = vsel %vm10057_vm6, %v12347_v42, %v12348_v33  ;;  %vm17337_vm9 = vmmov %vm17314_vm1 }
 0x2f5   :  { %v6439_v5 = vpop.f32.mrb[204].mxu1  ;;  %11700 = vmatprep.subr.msk.bf16.mxu1 %vm173_vm13, %v9798_v59  ;;  %v16358_v45 = vadd.f32 %v6398_v39, %v16016_v30  ;;  %v6400_v16 = vpop.f32.mrb[205].mxu0  ;;  %v16410_v59 = vsel %vm16373_vm14, 1, %v12433_v4  ;;  %v10088_v47 = vsel %vm16399_vm4, %v10061_v35, 0.0  ;;  %v9944_v40 = vpack.c.bf16 %v9940_v0, %v9940_v0  ;;  %vm17338_vm14 = vmmov %vm17314_vm1 }
 0x2f6   :  { %v16361_v22 = vadd.f32 %v6439_v5, %v16019_v3  ;;  %v6441_v61 = vpop.f32.mrb[205].mxu1  ;;  %v16378_v30 = vadd.f32 %v6400_v16, %v16024_v11  ;;  %v6402_v9 = vpop.f32.mrb[206].mxu0  ;;  %v10059_v11 = vsel %vm10057_vm6, %v12348_v33, %v12352_v36  ;;  %vm16432_vm0 = vcmp.eq.s32.totalorder %v10068_v51, 1  ;;  %vm17340_vm4 = vmmov %vm17314_vm1 }
 0x2f7   :  { %v16381_v3 = vadd.f32 %v6441_v61, %v16027_v43  ;;  %v6443_v41 = vpop.f32.mrb[206].mxu1  ;;  %v6403_v29 = vpop.f32.mrb[207].mxu0  ;;  %v9938_v43 = vsel %vm16353_vm12, %v9913_v26, 0.0  ;;  %v10086_v26 = vsel %vm16389_vm3, %v10059_v11, 0.0  ;;  %v12363_v31 = vunpack.i.h.bf16 %v16414_v6  ;;  %vm17339_vm3 = vmmov %vm17314_vm1 }
 0x2f8   :  { %v6444_v57 = vpop.f32.mrb[207].mxu1  ;;  %v9942_v14 = vpack.c.bf16 %v9938_v43, %v9938_v43  ;;  %v12362_v33 = vunpack.i.l.bf16 %v16414_v6  ;;  %v10227_v39 = vrot.slane %v16410_v59, %v12674_v18  ;;  %v12358_v5 = vunpack.i.h.bf16 %v16416_v58 }
 0x2f9   :  { %11694 = vmatmul.mubr.msk.bf16.vlgmr.msra.gmra.mrb[56].mxu0 %vm17328_vm8, %v11692_v55  ;;  %v12357_v44 = vunpack.i.l.bf16 %v16416_v58  ;;  %vm10083_vm7 = vcmp.eq.s32.totalorder %v10076_v53, 1  ;;  %vm10204_vm2 = vcmp.lt.s32.totalorder %v12697_v24, 77  ;;  %v9958_v9 = vsel %vm173_vm13, %v9944_v40, 0  ;;  %vm17341_vm8 = vmmov %vm17314_vm1 }
 0x2fa   :  { %11696 = vmatmul.mubr.msk.bf16.vlgmr.msra.gmra.mrb[56].mxu1 %vm17329_vm5, %v11692_v55  ;;  %9817 = vmatpush1.bf16.msra.mxu0 %v9805_v60  ;;  %v10219_v60 = vrot.slane %v16410_v59, %v12671_v17  ;;  %v9952_v27 = vsel %vm173_vm13, %v9942_v14, 0  ;;  %v10090_v41 = vpack.c.bf16 %v10086_v26, %v10086_v26  ;;  %vm16472_vm11 = vcmp.eq.s32.totalorder %v10227_v39, 1  ;;  %vm17342_vm5 = vmmov %vm17314_vm1 }
 0x2fb   :  { %9858 = vmatpush1.bf16.msra.mxu1 %v9811_v49  ;;  %9848 = vmatprep.mubr.bf16.mxu0 %v12433_v4  ;;  %v10087_v49 = vsel %vm10083_vm7, %v10058_v37, 0.0  ;;  %v10206_v57 = vsel %vm10204_vm2, %v12358_v5, %v12362_v33  ;;  %v10208_v8 = vsel %vm10204_vm2, %v12363_v31, %v12357_v44  ;;  %v10223_v11 = vrot.slane %v16410_v59, %v12686_v21 }
 0x2fc   :  { %9889 = vmatprep.mubr.bf16.mxu1 %v12433_v4  ;;  %v6545_v34 = vpop.f32.mrb[208].mxu0  ;;  %11703 = vmatprep.subr.msk.bf16.mxu0 %vm173_vm13, %v9943_v10  ;;  %vm16462_vm15 = vcmp.eq.s32.totalorder %v10219_v60, 1  ;;  %v10091_v43 = vpack.c.bf16 %v10087_v49, %v10087_v49  ;;  %v10205_v35 = vsel %vm10204_vm2, %v12362_v33, %v12363_v31  ;;  %v10207_v0 = vsel %vm10204_vm2, %v12357_v44, %v12358_v5 }
 0x2fd   :  { %v6586_v36 = vpop.f32.mrb[208].mxu1  ;;  %11705 = vmatprep.subr.msk.bf16.mxu1 %vm173_vm13, %v9945_v1  ;;  %v16444_v17 = vadd.f32 %v6545_v34, %v16265_v38  ;;  %v6547_v7 = vpop.f32.mrb[209].mxu0  ;;  %v11697_v38 = vld [vmem:[%s16739_s7 + $0x5a] sm:$0x3]  ;;  %v10215_v1 = vrot.slane %v16410_v59, %v12683_v20  ;;  %v10233_v21 = vsel %vm16462_vm15, %v10206_v57, 0.0  ;;  %v10235_v59 = vsel %vm16472_vm11, %v10208_v8, 0.0 }
 0x2fe   :  { %v16447_v46 = vadd.f32 %v6586_v36, %v16267_v12  ;;  %v6588_v42 = vpop.f32.mrb[209].mxu1  ;;  %v16451_v16 = vadd.f32 %v6547_v7, %v16280_v2  ;;  %v6549_v18 = vpop.f32.mrb[210].mxu0  ;;  %v10092_v2 = vpack.c.bf16 %v10088_v47, %v10088_v47  ;;  %vm10230_vm12 = vcmp.eq.s32.totalorder %v10223_v11, 1  ;;  %v11712_v8 = vld [vmem:[%s16739_s7 + $0x60] sm:$0x3] }
 0x2ff   :  { %v16454_v61 = vadd.f32 %v6588_v42, %v16282_v48  ;;  %v6590_v10 = vpop.f32.mrb[210].mxu1  ;;  %v6550_v12 = vpop.f32.mrb[211].mxu0  ;;  %v10085_v48 = vsel %vm16432_vm0, %v10060_v56, 0.0  ;;  %vm10228_vm6 = vcmp.eq.s32.totalorder %v10215_v1, 1  ;;  %v10105_v60 = vsel %vm173_vm13, %v10091_v43, 0  ;;  %vm17343_vm0 = vmmov %vm17314_vm1 }
 0x300   :  { %v6591_v54 = vpop.f32.mrb[211].mxu1  ;;  %v10089_v20 = vpack.c.bf16 %v10085_v48, %v10085_v48  ;;  %v10237_v28 = vpack.c.bf16 %v10233_v21, %v10233_v21  ;;  %v10239_v34 = vpack.c.bf16 %v10235_v59, %v10235_v59  ;;  %v10232_v36 = vsel %vm10228_vm6, %v10207_v0, 0.0  ;;  %vm17344_vm7 = vmmov %vm17343_vm0 }
 0x301   :  { %11699 = vmatmul.mubr.msk.bf16.vlgmr.msra.gmra.mrb[60].mxu0 %vm17314_vm1, %v11697_v38  ;;  %v11707_v54 = vld [vmem:[%s16739_s7 + $0x5e] sm:$0x3]  ;;  %vm17345_vm2 = vmmov %vm17343_vm0  ;;  %vm12483_vm11 = vmmov 0  }
 0x302   :  { %11701 = vmatmul.mubr.msk.bf16.vlgmr.msra.gmra.mrb[60].mxu1 %vm17334_vm10, %v11697_v38  ;;  %9964 = vmatpush1.bf16.msra.mxu0 %v9952_v27  ;;  %vm17346_vm15 = vmmov %vm17343_vm0 }
 0x303   :  { %10005 = vmatpush1.bf16.msra.mxu1 %v9958_v9  ;;  %9995 = vmatprep.mubr.bf16.mxu0 %v12433_v4  ;;  %vm17347_vm1 = vmmov %vm17343_vm0 }
 0x304   :  { %10036 = vmatprep.mubr.bf16.mxu1 %v12433_v4  ;;  %v6636_v51 = vpop.f32.mrb[212].mxu0  ;;  %11708 = vmatprep.subr.msk.bf16.mxu0 %vm173_vm13, %v10090_v41  ;;  %vm17348_vm10 = vmmov %vm17343_vm0 }
 0x305   :  { %v6677_v32 = vpop.f32.mrb[212].mxu1  ;;  %11710 = vmatprep.subr.msk.bf16.mxu1 %vm173_vm13, %v10092_v2  ;;  %v16495_v6 = vadd.f32 %v6636_v51, %v16358_v45  ;;  %v6638_v53 = vpop.f32.mrb[213].mxu0  ;;  %v11702_v45 = vld [vmem:[%s16739_s7 + $0x5c] sm:$0x3]  ;;  %vm17349_vm6 = vmmov %vm17343_vm0 }
 0x306   :  { %v16498_v58 = vadd.f32 %v6677_v32, %v16361_v22  ;;  %v6679_v37 = vpop.f32.mrb[213].mxu1  ;;  %v16501_v26 = vadd.f32 %v6638_v53, %v16378_v30  ;;  %v6640_v24 = vpop.f32.mrb[214].mxu0  ;;  %v10099_v22 = vsel %vm173_vm13, %v10089_v20, 0  ;;  %v10234_v30 = vsel %vm10230_vm12, %v10205_v35, 0.0 }
 0x307   :  { %v16504_v56 = vadd.f32 %v6679_v37, %v16381_v3  ;;  %v6681_v14 = vpop.f32.mrb[214].mxu1  ;;  %v6641_v47 = vpop.f32.mrb[215].mxu0  ;;  %v10236_v3 = vpack.c.bf16 %v10232_v36, %v10232_v36  ;;  %v10238_v31 = vpack.c.bf16 %v10234_v30, %v10234_v30  ;;  %vm11168_vm12 = vcmask 1040384  }
 0x308   :  { %v6682_v40 = vpop.f32.mrb[215].mxu1 }
 0x309   :  { %11704 = vmatmul.mubr.msk.bf16.vlgmr.msra.gmra.mrb[64].mxu0 %vm17337_vm9, %v11702_v45  ;;  %v10246_v41 = vsel %vm173_vm13, %v10236_v3, 0  ;;  %vm17350_vm9 = vmmov %vm17343_vm0 }
 0x30a   :  { %11706 = vmatmul.mubr.msk.bf16.vlgmr.msra.gmra.mrb[64].mxu1 %vm17338_vm14, %v11702_v45  ;;  %10111 = vmatpush1.bf16.msra.mxu0 %v10099_v22 }
 0x30b   :  { %10152 = vmatpush1.bf16.msra.mxu1 %v10105_v60  ;;  %10142 = vmatprep.mubr.bf16.mxu0 %v12433_v4 }
 0x30c   :  { %10183 = vmatprep.mubr.bf16.mxu1 %v12433_v4  ;;  %v6727_v33 = vpop.f32.mrb[216].mxu0  ;;  %11713 = vmatprep.subr.msk.bf16.mxu0 %vm173_vm13, %v10237_v28 }
 0x30d   :  { %v6768_v39 = vpop.f32.mrb[216].mxu1  ;;  %11715 = vmatprep.subr.msk.bf16.mxu1 %vm173_vm13, %v10239_v34  ;;  %v6775_v5 = vadd.f32 %v6727_v33, %v15860_v19  ;;  %v6729_v42 = vpop.f32.mrb[217].mxu0  ;;  %v10252_v19 = vsel %vm173_vm13, %v10238_v31, 0 }
 0x30e   :  { %v6777_v7 = vadd.f32 %v6768_v39, %v15863_v13  ;;  %v6770_v44 = vpop.f32.mrb[217].mxu1  ;;  %v6776_v18 = vadd.f32 %v6729_v42, %v15876_v52  ;;  %v6731_v38 = vpop.f32.mrb[218].mxu0 }
 0x30f   :  { %v6778_v10 = vadd.f32 %v6770_v44, %v15879_v50  ;;  %v6772_v12 = vpop.f32.mrb[218].mxu1  ;;  %v6732_v27 = vpop.f32.mrb[219].mxu0 }
 0x310   :  { %v6773_v9 = vpop.f32.mrb[219].mxu1 }
 0x311   :  { %11709 = vmatmul.mubr.msk.bf16.vlgmr.msra.gmra.mrb[68].mxu0 %vm17339_vm3, %v11707_v54 }
 0x312   :  { %11711 = vmatmul.mubr.msk.bf16.vlgmr.msra.gmra.mrb[68].mxu1 %vm17340_vm4, %v11707_v54  ;;  %10258 = vmatpush1.bf16.msra.mxu0 %v10246_v41 }
 0x313   :  { %10299 = vmatpush1.bf16.msra.mxu1 %v10252_v19  ;;  %10289 = vmatprep.mubr.bf16.mxu0 %v12433_v4 }
 0x314   :  { %10330 = vmatprep.mubr.bf16.mxu1 %v12433_v4  ;;  %v6874_v13 = vpop.f32.mrb[220].mxu0 }
 0x315   :  { %v6915_v52 = vpop.f32.mrb[220].mxu1  ;;  %v6922_v50 = vadd.f32 %v6874_v13, %v16444_v17  ;;  %v6876_v55 = vpop.f32.mrb[221].mxu0 }
 0x316   :  { %v6924_v2 = vadd.f32 %v6915_v52, %v16447_v46  ;;  %v6917_v48 = vpop.f32.mrb[221].mxu1  ;;  %v6923_v49 = vadd.f32 %v6876_v55, %v16451_v16  ;;  %v6878_v29 = vpop.f32.mrb[222].mxu0 }
 0x317   :  { %v6925_v1 = vadd.f32 %v6917_v48, %v16454_v61  ;;  %v6919_v57 = vpop.f32.mrb[222].mxu1  ;;  %v6879_v11 = vpop.f32.mrb[223].mxu0 }
 0x318   :  { %v6920_v20 = vpop.f32.mrb[223].mxu1 }
 0x319   :  { %11714 = vmatmul.mubr.msk.bf16.vlgmr.msra.gmra.mrb[72].mxu0 %vm17341_vm8, %v11712_v8 }
 0x31a   :  { %11716 = vmatmul.mubr.msk.bf16.vlgmr.msra.gmra.mrb[72].mxu1 %vm17342_vm5, %v11712_v8  ;;  %10448 = vmatprep.mubr.bf16.mxu0 %v12433_v4 }
 0x31b   :  { %10489 = vmatprep.mubr.bf16.mxu1 %v12433_v4 }
 0x31c   :  { %v6965_v17 = vpop.f32.mrb[224].mxu0 }
 0x31d   :  { %v7006_v46 = vpop.f32.mrb[224].mxu1  ;;  %v7013_v16 = vadd.f32 %v6965_v17, %v16495_v6  ;;  %v6967_v43 = vpop.f32.mrb[225].mxu0 }
 0x31e   :  { %v7015_v61 = vadd.f32 %v7006_v46, %v16498_v58  ;;  %v7008_v51 = vpop.f32.mrb[225].mxu1  ;;  %v7014_v32 = vadd.f32 %v6967_v43, %v16501_v26  ;;  %v6969_v21 = vpop.f32.mrb[226].mxu0 }
 0x31f   :  { %v7016_v35 = vadd.f32 %v7008_v51, %v16504_v56  ;;  %v7010_v0 = vpop.f32.mrb[226].mxu1  ;;  %v6970_v59 = vpop.f32.mrb[227].mxu0 }
 0x320   :  { %v7011_v53 = vpop.f32.mrb[227].mxu1 }
 0x324   :  { %v7056_v37 = vpop.f32.mrb[228].mxu0 }
 0x325   :  { %v7097_v24 = vpop.f32.mrb[228].mxu1  ;;  %v7104_v14 = vadd.f32 %v7056_v37, %v6775_v5  ;;  %v7058_v47 = vpop.f32.mrb[229].mxu0 }
 0x326   :  { %v7106_v45 = vadd.f32 %v7097_v24, %v6777_v7  ;;  %v7099_v40 = vpop.f32.mrb[229].mxu1  ;;  %v7105_v22 = vadd.f32 %v7058_v47, %v6776_v18  ;;  %v7060_v60 = vpop.f32.mrb[230].mxu0 }
 0x327   :  { %v7107_v6 = vadd.f32 %v7099_v40, %v6778_v10  ;;  %v7101_v58 = vpop.f32.mrb[230].mxu1  ;;  %v7061_v28 = vpop.f32.mrb[231].mxu0 }
 0x328   :  { %v7102_v34 = vpop.f32.mrb[231].mxu1 }
 0x32c   :  { %v7203_v36 = vpop.f32.mrb[232].mxu0 }
 0x32d   :  { %v7244_v26 = vpop.f32.mrb[232].mxu1  ;;  %v7251_v30 = vadd.f32 %v7203_v36, %v6922_v50  ;;  %v7205_v3 = vpop.f32.mrb[233].mxu0 }
 0x32e   :  { %v7253_v56 = vadd.f32 %v7244_v26, %v6924_v2  ;;  %v7246_v31 = vpop.f32.mrb[233].mxu1  ;;  %v7252_v33 = vadd.f32 %v7205_v3, %v6923_v49  ;;  %v7207_v42 = vpop.f32.mrb[234].mxu0 }
 0x32f   :  { %v7254_v39 = vadd.f32 %v7246_v31, %v6925_v1  ;;  %v7248_v44 = vpop.f32.mrb[234].mxu1  ;;  %v7208_v5 = vpop.f32.mrb[235].mxu0 }
 0x330   :  { %v7249_v7 = vpop.f32.mrb[235].mxu1 }
 0x334   :  { %v7294_v38 = vpop.f32.mrb[236].mxu0 }
 0x335   :  { %v7335_v12 = vpop.f32.mrb[236].mxu1  ;;  %v7342_v18 = vadd.f32 %v7294_v38, %v7013_v16  ;;  %v7296_v54 = vpop.f32.mrb[237].mxu0 }
 0x336   :  { %v7344_v10 = vadd.f32 %v7335_v12, %v7015_v61  ;;  %v7337_v27 = vpop.f32.mrb[237].mxu1  ;;  %v7343_v9 = vadd.f32 %v7296_v54, %v7014_v32  ;;  %v7298_v19 = vpop.f32.mrb[238].mxu0 }
 0x337   :  { %v7345_v41 = vadd.f32 %v7337_v27, %v7016_v35  ;;  %v7339_v13 = vpop.f32.mrb[238].mxu1  ;;  %v7299_v52 = vpop.f32.mrb[239].mxu0 }
 0x338   :  { %v7340_v50 = vpop.f32.mrb[239].mxu1 }
 0x33c   :  { %v7385_v2 = vpop.f32.mrb[240].mxu0 }
 0x33d   :  { %v7426_v55 = vpop.f32.mrb[240].mxu1  ;;  %v16545_v48 = vadd.f32 %v7385_v2, %v7104_v14  ;;  %v7387_v1 = vpop.f32.mrb[241].mxu0 }
 0x33e   :  { %v16547_v49 = vadd.f32 %v7426_v55, %v7106_v45  ;;  %v7428_v29 = vpop.f32.mrb[241].mxu1  ;;  %v16549_v57 = vadd.f32 %v7387_v1, %v7105_v22  ;;  %v7389_v11 = vpop.f32.mrb[242].mxu0 }
 0x33f   :  { %v16551_v8 = vadd.f32 %v7428_v29, %v7107_v6  ;;  %v7430_v20 = vpop.f32.mrb[242].mxu1  ;;  %v7390_v17 = vpop.f32.mrb[243].mxu0 }
 0x340   :  { %v7431_v46 = vpop.f32.mrb[243].mxu1 }
 0x344   :  { %v7532_v16 = vpop.f32.mrb[244].mxu0 }
 0x345   :  { %v7573_v61 = vpop.f32.mrb[244].mxu1  ;;  %v7580_v43 = vadd.f32 %v7532_v16, %v7251_v30  ;;  %v7534_v32 = vpop.f32.mrb[245].mxu0 }
 0x346   :  { %v7582_v51 = vadd.f32 %v7573_v61, %v7253_v56  ;;  %v7575_v35 = vpop.f32.mrb[245].mxu1  ;;  %v7581_v21 = vadd.f32 %v7534_v32, %v7252_v33  ;;  %v7536_v59 = vpop.f32.mrb[246].mxu0 }
 0x347   :  { %v7583_v0 = vadd.f32 %v7575_v35, %v7254_v39  ;;  %v7577_v53 = vpop.f32.mrb[246].mxu1  ;;  %v7537_v37 = vpop.f32.mrb[247].mxu0 }
 0x348   :  { %v7578_v24 = vpop.f32.mrb[247].mxu1 }
 0x34c   :  { %v7623_v14 = vpop.f32.mrb[248].mxu0 }
 0x34d   :  { %v7664_v45 = vpop.f32.mrb[248].mxu1  ;;  %v7671_v47 = vadd.f32 %v7623_v14, %v7342_v18  ;;  %v7625_v22 = vpop.f32.mrb[249].mxu0 }
 0x34e   :  { %v7673_v40 = vadd.f32 %v7664_v45, %v7344_v10  ;;  %v7666_v6 = vpop.f32.mrb[249].mxu1  ;;  %v7672_v60 = vadd.f32 %v7625_v22, %v7343_v9  ;;  %v7627_v28 = vpop.f32.mrb[250].mxu0 }
 0x34f   :  { %v7674_v58 = vadd.f32 %v7666_v6, %v7345_v41  ;;  %v7668_v34 = vpop.f32.mrb[250].mxu1  ;;  %v7628_v36 = vpop.f32.mrb[251].mxu0 }
 0x350   :  { %v7669_v26 = vpop.f32.mrb[251].mxu1 }
 0x354   :  { %v7770_v30 = vpop.f32.mrb[252].mxu0 }
 0x355   :  { %v7811_v56 = vpop.f32.mrb[252].mxu1  ;;  %v7818_v3 = vadd.f32 %v7770_v30, %v7580_v43  ;;  %v7772_v33 = vpop.f32.mrb[253].mxu0 }
 0x356   :  { %v7820_v31 = vadd.f32 %v7811_v56, %v7582_v51  ;;  %v7813_v39 = vpop.f32.mrb[253].mxu1  ;;  %v7819_v42 = vadd.f32 %v7772_v33, %v7581_v21  ;;  %v7774_v5 = vpop.f32.mrb[254].mxu0 }
 0x357   :  { %v7821_v44 = vadd.f32 %v7813_v39, %v7583_v0  ;;  %v7815_v7 = vpop.f32.mrb[254].mxu1  ;;  %v7775_v38 = vpop.f32.mrb[255].mxu0 }
 0x358   :  { %v7816_v12 = vpop.f32.mrb[255].mxu1 }
 0x35c   :  { %v7921_v18 = vpop.f32.mrb[0].mxu0 }
 0x35d   :  { %v7962_v10 = vpop.f32.mrb[0].mxu1  ;;  %v7969_v54 = vadd.f32 %v7921_v18, %v7818_v3  ;;  %v7923_v9 = vpop.f32.mrb[1].mxu0 }
 0x35e   :  { %v7971_v27 = vadd.f32 %v7962_v10, %v7820_v31  ;;  %v7964_v41 = vpop.f32.mrb[1].mxu1  ;;  %v7970_v19 = vadd.f32 %v7923_v9, %v7819_v42  ;;  %v7925_v52 = vpop.f32.mrb[2].mxu0 }
 0x35f   :  { %v7972_v13 = vadd.f32 %v7964_v41, %v7821_v44  ;;  %v7966_v50 = vpop.f32.mrb[2].mxu1  ;;  %v7926_v2 = vpop.f32.mrb[3].mxu0 }
 0x360   :  { %v7967_v55 = vpop.f32.mrb[3].mxu1 }
 0x364   :  { %v8068_v1 = vpop.f32.mrb[4].mxu0 }
 0x365   :  { %v8109_v29 = vpop.f32.mrb[4].mxu1  ;;  %v8116_v11 = vadd.f32 %v8068_v1, %v7969_v54  ;;  %v8070_v17 = vpop.f32.mrb[5].mxu0 }
 0x366   :  { %v8118_v20 = vadd.f32 %v8109_v29, %v7971_v27  ;;  %v8111_v46 = vpop.f32.mrb[5].mxu1  ;;  %v8117_v16 = vadd.f32 %v8070_v17, %v7970_v19  ;;  %v8072_v43 = vpop.f32.mrb[6].mxu0 }
 0x367   :  { %v8119_v61 = vadd.f32 %v8111_v46, %v7972_v13  ;;  %v8113_v51 = vpop.f32.mrb[6].mxu1  ;;  %v8073_v32 = vpop.f32.mrb[7].mxu0 }
 0x368   :  { %v8114_v35 = vpop.f32.mrb[7].mxu1 }
 0x36c   :  { %v8159_v21 = vpop.f32.mrb[8].mxu0 }
 0x36d   :  { %v8200_v0 = vpop.f32.mrb[8].mxu1  ;;  %v8207_v59 = vadd.f32 %v8159_v21, %v7671_v47  ;;  %v8161_v37 = vpop.f32.mrb[9].mxu0 }
 0x36e   :  { %v8209_v53 = vadd.f32 %v8200_v0, %v7673_v40  ;;  %v8202_v24 = vpop.f32.mrb[9].mxu1  ;;  %v8208_v14 = vadd.f32 %v8161_v37, %v7672_v60  ;;  %v8163_v22 = vpop.f32.mrb[10].mxu0 }
 0x36f   :  { %v8210_v45 = vadd.f32 %v8202_v24, %v7674_v58  ;;  %v8204_v6 = vpop.f32.mrb[10].mxu1  ;;  %v8164_v28 = vpop.f32.mrb[11].mxu0 }
 0x370   :  { %v8205_v34 = vpop.f32.mrb[11].mxu1 }
 0x374   :  { %v8306_v36 = vpop.f32.mrb[12].mxu0 }
 0x375   :  { %v8347_v26 = vpop.f32.mrb[12].mxu1  ;;  %v8354_v30 = vadd.f32 %v8306_v36, %v8116_v11  ;;  %v8308_v3 = vpop.f32.mrb[13].mxu0 }
 0x376   :  { %v8356_v56 = vadd.f32 %v8347_v26, %v8118_v20  ;;  %v8349_v31 = vpop.f32.mrb[13].mxu1  ;;  %v8355_v33 = vadd.f32 %v8308_v3, %v8117_v16  ;;  %v8310_v42 = vpop.f32.mrb[14].mxu0 }
 0x377   :  { %v8357_v39 = vadd.f32 %v8349_v31, %v8119_v61  ;;  %v8351_v44 = vpop.f32.mrb[14].mxu1  ;;  %v8311_v47 = vpop.f32.mrb[15].mxu0 }
 0x378   :  { %v8352_v40 = vpop.f32.mrb[15].mxu1 }
 0x37c   :  { %v8397_v5 = vpop.f32.mrb[16].mxu0 }
 0x37d   :  { %v8438_v7 = vpop.f32.mrb[16].mxu1  ;;  %v8445_v60 = vadd.f32 %v8397_v5, %v8207_v59  ;;  %v8399_v38 = vpop.f32.mrb[17].mxu0 }
 0x37e   :  { %v8447_v58 = vadd.f32 %v8438_v7, %v8209_v53  ;;  %v8440_v12 = vpop.f32.mrb[17].mxu1  ;;  %v8446_v18 = vadd.f32 %v8399_v38, %v8208_v14  ;;  %v8401_v54 = vpop.f32.mrb[18].mxu0 }
 0x37f   :  { %v8448_v10 = vadd.f32 %v8440_v12, %v8210_v45  ;;  %v8442_v27 = vpop.f32.mrb[18].mxu1  ;;  %v8402_v9 = vpop.f32.mrb[19].mxu0 }
 0x380   :  { %v8443_v41 = vpop.f32.mrb[19].mxu1 }
 0x384   :  { %v8544_v19 = vpop.f32.mrb[20].mxu0 }
 0x385   :  { %v8585_v13 = vpop.f32.mrb[20].mxu1  ;;  %v8592_v52 = vadd.f32 %v8544_v19, %v8354_v30  ;;  %v8546_v2 = vpop.f32.mrb[21].mxu0 }
 0x386   :  { %v8594_v50 = vadd.f32 %v8585_v13, %v8356_v56  ;;  %v8587_v55 = vpop.f32.mrb[21].mxu1  ;;  %v8593_v1 = vadd.f32 %v8546_v2, %v8355_v33  ;;  %v8548_v11 = vpop.f32.mrb[22].mxu0 }
 0x387   :  { %v8595_v29 = vadd.f32 %v8587_v55, %v8357_v39  ;;  %v8589_v20 = vpop.f32.mrb[22].mxu1  ;;  %v8549_v17 = vpop.f32.mrb[23].mxu0 }
 0x388   :  { %v8590_v46 = vpop.f32.mrb[23].mxu1 }
 0x38c   :  { %v8635_v16 = vpop.f32.mrb[24].mxu0 }
 0x38d   :  { %v8676_v61 = vpop.f32.mrb[24].mxu1  ;;  %v8683_v43 = vadd.f32 %v8635_v16, %v8445_v60  ;;  %v8637_v32 = vpop.f32.mrb[25].mxu0 }
 0x38e   :  { %v8685_v51 = vadd.f32 %v8676_v61, %v8447_v58  ;;  %v8678_v35 = vpop.f32.mrb[25].mxu1  ;;  %v8684_v21 = vadd.f32 %v8637_v32, %v8446_v18  ;;  %v8639_v59 = vpop.f32.mrb[26].mxu0 }
 0x38f   :  { %v8686_v0 = vadd.f32 %v8678_v35, %v8448_v10  ;;  %v8680_v53 = vpop.f32.mrb[26].mxu1  ;;  %v8640_v37 = vpop.f32.mrb[27].mxu0 }
 0x390   :  { %v8681_v24 = vpop.f32.mrb[27].mxu1 }
 0x394   :  { %v8782_v14 = vpop.f32.mrb[28].mxu0 }
 0x395   :  { %v8823_v45 = vpop.f32.mrb[28].mxu1  ;;  %v8830_v22 = vadd.f32 %v8782_v14, %v8592_v52  ;;  %v8784_v28 = vpop.f32.mrb[29].mxu0 }
 0x396   :  { %v8832_v6 = vadd.f32 %v8823_v45, %v8594_v50  ;;  %v8825_v34 = vpop.f32.mrb[29].mxu1  ;;  %v8831_v36 = vadd.f32 %v8784_v28, %v8593_v1  ;;  %v8786_v30 = vpop.f32.mrb[30].mxu0 }
 0x397   :  { %v8833_v26 = vadd.f32 %v8825_v34, %v8595_v29  ;;  %v8827_v56 = vpop.f32.mrb[30].mxu1  ;;  %v8787_v3 = vpop.f32.mrb[31].mxu0 }
 0x398   :  { %v8828_v31 = vpop.f32.mrb[31].mxu1  ;;  %v10365_v1 = vpop.permute.xlu0 %10364 }
 0x39c   :  { %v8873_v33 = vpop.f32.mrb[32].mxu0 }
 0x39d   :  { %v8914_v39 = vpop.f32.mrb[32].mxu1  ;;  %v8921_v42 = vadd.f32 %v8873_v33, %v8683_v43  ;;  %v8875_v47 = vpop.f32.mrb[33].mxu0 }
 0x39e   :  { %v8923_v44 = vadd.f32 %v8914_v39, %v8685_v51  ;;  %v8916_v40 = vpop.f32.mrb[33].mxu1  ;;  %v8922_v5 = vadd.f32 %v8875_v47, %v8684_v21  ;;  %v8877_v60 = vpop.f32.mrb[34].mxu0 }
 0x39f   :  { %v8924_v7 = vadd.f32 %v8916_v40, %v8686_v0  ;;  %v8918_v58 = vpop.f32.mrb[34].mxu1  ;;  %v8878_v38 = vpop.f32.mrb[35].mxu0 }
 0x3a0   :  { %v8919_v12 = vpop.f32.mrb[35].mxu1  ;;  %v11718_v58 = vld [vmem:[%s16745_s13 + $0x4] sm:$0x3] }
 0x3a4   :  { %v9020_v18 = vpop.f32.mrb[36].mxu0 }
 0x3a5   :  { %v9061_v10 = vpop.f32.mrb[36].mxu1  ;;  %v9068_v54 = vadd.f32 %v9020_v18, %v8830_v22  ;;  %v9022_v9 = vpop.f32.mrb[37].mxu0 }
 0x3a6   :  { %v9070_v27 = vadd.f32 %v9061_v10, %v8832_v6  ;;  %v9063_v41 = vpop.f32.mrb[37].mxu1  ;;  %v9069_v19 = vadd.f32 %v9022_v9, %v8831_v36  ;;  %v9024_v52 = vpop.f32.mrb[38].mxu0 }
 0x3a7   :  { %v9071_v13 = vadd.f32 %v9063_v41, %v8833_v26  ;;  %v9065_v50 = vpop.f32.mrb[38].mxu1  ;;  %v9025_v2 = vpop.f32.mrb[39].mxu0 }
 0x3a8   :  { %v9066_v55 = vpop.f32.mrb[39].mxu1 }
 0x3ac   :  { %v9111_v29 = vpop.f32.mrb[40].mxu0 }
 0x3ad   :  { %v9152_v11 = vpop.f32.mrb[40].mxu1  ;;  %v9159_v20 = vadd.f32 %v9111_v29, %v8921_v42  ;;  %v9113_v46 = vpop.f32.mrb[41].mxu0 }
 0x3ae   :  { %v9161_v17 = vadd.f32 %v9152_v11, %v8923_v44  ;;  %v9154_v16 = vpop.f32.mrb[41].mxu1  ;;  %v9160_v61 = vadd.f32 %v9113_v46, %v8922_v5  ;;  %v9115_v51 = vpop.f32.mrb[42].mxu0 }
 0x3af   :  { %v9162_v43 = vadd.f32 %v9154_v16, %v8924_v7  ;;  %v9156_v32 = vpop.f32.mrb[42].mxu1  ;;  %v10367_v35 = vadd.f32 %v10365_v1, %v9159_v20  ;;  %v9116_v0 = vpop.f32.mrb[43].mxu0 }
 0x3b0   :  { %v10369_v21 = vadd.f32 %v10365_v1, %v9161_v17  ;;  %v9157_v59 = vpop.f32.mrb[43].mxu1  ;;  %v10368_v53 = vadd.f32 %v10365_v1, %v9160_v61 }
 0x3b1   :  { %v10370_v37 = vadd.f32 %v10365_v1, %v9162_v43  ;;  %v10371_v24 = vmax.f32 %v10367_v35, 0.0 }
 0x3b2   :  { %v10373_v14 = vmax.f32 %v10369_v21, 0.0  ;;  %v10372_v45 = vmax.f32 %v10368_v53, 0.0 }
 0x3b3   :  { %v10374_v22 = vmax.f32 %v10370_v37, 0.0  ;;  %v10375_v6 = vpack.c.bf16 %v10371_v24, %v10371_v24 }
 0x3b4   :  { %v10377_v28 = vpack.c.bf16 %v10373_v14, %v10373_v14  ;;  %v10376_v34 = vpack.c.bf16 %v10372_v45, %v10372_v45  ;;  %v9258_v26 = vpop.f32.mrb[44].mxu0 }
 0x3b5   :  { %v10378_v36 = vpack.c.bf16 %v10374_v22, %v10374_v22  ;;  %v9299_v30 = vpop.f32.mrb[44].mxu1  ;;  %v9306_v56 = vadd.f32 %v9258_v26, %v9068_v54  ;;  %v9260_v31 = vpop.f32.mrb[45].mxu0  ;;  %v10405_v39 = vsel %vm173_vm13, %v10375_v6, 0 }
 0x3b6   :  { %v9308_v3 = vadd.f32 %v9299_v30, %v9070_v27  ;;  %v9301_v33 = vpop.f32.mrb[45].mxu1  ;;  %v10411_v42 = vsel %vm173_vm13, %v10377_v28, 0  ;;  %v9307_v44 = vadd.f32 %v9260_v31, %v9069_v19  ;;  %v9262_v40 = vpop.f32.mrb[46].mxu0  ;;  %11719 = vmatprep.subr.msk.bf16.mxu0 %vm173_vm13, %v10376_v34 }
 0x3b7   :  { %v9309_v47 = vadd.f32 %v9301_v33, %v9071_v13  ;;  %v9303_v5 = vpop.f32.mrb[46].mxu1  ;;  %11721 = vmatprep.subr.msk.bf16.mxu1 %vm173_vm13, %v10378_v36  ;;  %v9263_v7 = vpop.f32.mrb[47].mxu0  ;;  %10417 = vmatpush1.bf16.msra.mxu0 %v10405_v39 }
 0x3b8   :  { %v9304_v60 = vpop.f32.mrb[47].mxu1  ;;  %10458 = vmatpush1.bf16.msra.mxu1 %v10411_v42 }
 0x3ba   :  { %11720 = vmatmul.mubr.msk.bf16.vlgmr.msra.gmra.mrb[76].mxu0 %vm17343_vm0, %v11718_v58 }
 0x3bb   :  { %11722 = vmatmul.mubr.msk.bf16.vlgmr.msra.gmra.mrb[76].mxu1 %vm17344_vm7, %v11718_v58  ;;  %10545 = vmatprep.mubr.bf16.mxu0 %v12433_v4 }
 0x3bc   :  { %10586 = vmatprep.mubr.bf16.mxu1 %v12433_v4  ;;  %v9409_v38 = vpop.f32.mrb[48].mxu0 }
 0x3bd   :  { %v9450_v12 = vpop.f32.mrb[48].mxu1  ;;  %v9457_v18 = vadd.f32 %v9409_v38, %v9306_v56  ;;  %v9411_v54 = vpop.f32.mrb[49].mxu0 }
 0x3be   :  { %v9459_v10 = vadd.f32 %v9450_v12, %v9308_v3  ;;  %v9452_v27 = vpop.f32.mrb[49].mxu1  ;;  %v9458_v9 = vadd.f32 %v9411_v54, %v9307_v44  ;;  %v9413_v19 = vpop.f32.mrb[50].mxu0 }
 0x3bf   :  { %v9460_v41 = vadd.f32 %v9452_v27, %v9309_v47  ;;  %v9454_v13 = vpop.f32.mrb[50].mxu1  ;;  %v9414_v52 = vpop.f32.mrb[51].mxu0 }
 0x3c0   :  { %v9455_v50 = vpop.f32.mrb[51].mxu1 }
 0x3c4   :  { %v9556_v2 = vpop.f32.mrb[52].mxu0 }
 0x3c5   :  { %v9597_v55 = vpop.f32.mrb[52].mxu1  ;;  %v9604_v1 = vadd.f32 %v9556_v2, %v9457_v18  ;;  %v9558_v11 = vpop.f32.mrb[53].mxu0 }
 0x3c6   :  { %v9606_v29 = vadd.f32 %v9597_v55, %v9459_v10  ;;  %v9599_v20 = vpop.f32.mrb[53].mxu1  ;;  %v9605_v17 = vadd.f32 %v9558_v11, %v9458_v9  ;;  %v9560_v16 = vpop.f32.mrb[54].mxu0 }
 0x3c7   :  { %v9607_v46 = vadd.f32 %v9599_v20, %v9460_v41  ;;  %v9601_v61 = vpop.f32.mrb[54].mxu1  ;;  %v9561_v43 = vpop.f32.mrb[55].mxu0 }
 0x3c8   :  { %v9602_v51 = vpop.f32.mrb[55].mxu1  ;;  %v10347_v9 = vpop.permute.xlu1 %10346 }
 0x3cc   :  { %v9703_v32 = vpop.f32.mrb[56].mxu0 }
 0x3cd   :  { %v9744_v35 = vpop.f32.mrb[56].mxu1  ;;  %v9751_v21 = vadd.f32 %v9703_v32, %v9604_v1  ;;  %v9705_v59 = vpop.f32.mrb[57].mxu0 }
 0x3ce   :  { %v9753_v0 = vadd.f32 %v9744_v35, %v9606_v29  ;;  %v9746_v53 = vpop.f32.mrb[57].mxu1  ;;  %v9752_v37 = vadd.f32 %v9705_v59, %v9605_v17  ;;  %v9707_v14 = vpop.f32.mrb[58].mxu0 }
 0x3cf   :  { %v9754_v24 = vadd.f32 %v9746_v53, %v9607_v46  ;;  %v9748_v45 = vpop.f32.mrb[58].mxu1  ;;  %v9708_v22 = vpop.f32.mrb[59].mxu0 }
 0x3d0   :  { %v9749_v6 = vpop.f32.mrb[59].mxu1  ;;  %v10383_v46 = vpop.permute.xlu1 %10382 }
 0x3d1   :  { %v10385_v43 = vadd.f32 %v10383_v46, %v16545_v48  ;;  %v10387_v51 = vadd.f32 %v10383_v46, %v16547_v49  ;;  %v10386_v59 = vadd.f32 %v10383_v46, %v16549_v57  ;;  %v10388_v53 = vadd.f32 %v10383_v46, %v16551_v8  ;;  %v12385_v46 = vld [vmem:[%s16735_s3 + $0xe0] sm:$0xff]  }
 0x3d4   :  { %v9850_v28 = vpop.f32.mrb[60].mxu0 }
 0x3d5   :  { %v9891_v34 = vpop.f32.mrb[60].mxu1  ;;  %v9898_v36 = vadd.f32 %v9850_v28, %v9751_v21  ;;  %v9852_v30 = vpop.f32.mrb[61].mxu0 }
 0x3d6   :  { %v9900_v26 = vadd.f32 %v9891_v34, %v9753_v0  ;;  %v9893_v56 = vpop.f32.mrb[61].mxu1  ;;  %v9899_v3 = vadd.f32 %v9852_v30, %v9752_v37  ;;  %v9854_v33 = vpop.f32.mrb[62].mxu0  ;;  %v10389_v30 = vmax.f32 %v10385_v43, 0.0  ;;  %v12388_v43 = vld [vmem:[%s16735_s3 + $0x68] sm:$0xff]  }
 0x3d7   :  { %v9901_v31 = vadd.f32 %v9893_v56, %v9754_v24  ;;  %v9895_v39 = vpop.f32.mrb[62].mxu1  ;;  %v9855_v42 = vpop.f32.mrb[63].mxu0  ;;  %v10391_v56 = vmax.f32 %v10387_v51, 0.0  ;;  %v12389_v51 = vld [vmem:[%s16735_s3 + $0xe8] sm:$0xff]  }
 0x3d8   :  { %v9896_v44 = vpop.f32.mrb[63].mxu1 }
 0x3dc   :  { %v9997_v47 = vpop.f32.mrb[64].mxu0 }
 0x3dd   :  { %v10038_v40 = vpop.f32.mrb[64].mxu1  ;;  %v10045_v5 = vadd.f32 %v9997_v47, %v9898_v36  ;;  %v9999_v60 = vpop.f32.mrb[65].mxu0 }
 0x3de   :  { %v10047_v7 = vadd.f32 %v10038_v40, %v9900_v26  ;;  %v10040_v58 = vpop.f32.mrb[65].mxu1  ;;  %v10046_v38 = vadd.f32 %v9999_v60, %v9899_v3  ;;  %v10001_v18 = vpop.f32.mrb[66].mxu0  ;;  %v10390_v3 = vmax.f32 %v10386_v59, 0.0  ;;  %v12394_v59 = vld [vmem:[%s16735_s3 + $0x30] sm:$0xff]  }
 0x3df   :  { %v10048_v12 = vadd.f32 %v10040_v58, %v9901_v31  ;;  %v10042_v10 = vpop.f32.mrb[66].mxu1  ;;  %v10002_v54 = vpop.f32.mrb[67].mxu0  ;;  %v10392_v31 = vmax.f32 %v10388_v53, 0.0  ;;  %v10395_v58 = vpack.c.bf16 %v10391_v56, %v10391_v56  ;;  %v12369_v18 = vld [vmem:[%s16735_s3 + $0xc0] sm:$0xff]   ;;  %v12395_v53 = vld [vmem:[%s16735_s3 + $0xb0] sm:$0xff]  }
 0x3e0   :  { %v10043_v27 = vpop.f32.mrb[67].mxu1 }
 0x3e1   :  { %v10396_v60 = vpack.c.bf16 %v10392_v31, %v10392_v31  ;;  %v10607_v54 = vsel %vm173_vm13, %v10395_v58, 0  ;;  %v11727_v27 = vld [vmem:[%s16745_s13 + $0x6] sm:$0x3] }
 0x3e4   :  { %v10144_v41 = vpop.f32.mrb[68].mxu0 }
 0x3e5   :  { %v10185_v19 = vpop.f32.mrb[68].mxu1  ;;  %v10192_v13 = vadd.f32 %v10144_v41, %v10045_v5  ;;  %v10146_v50 = vpop.f32.mrb[69].mxu0  ;;  %v10393_v5 = vpack.c.bf16 %v10389_v30, %v10389_v30  ;;  %v12371_v41 = vld [vmem:[%s16735_s3 + $0x80] sm:$0xff]  }
 0x3e6   :  { %v10194_v52 = vadd.f32 %v10185_v19, %v10047_v7  ;;  %v10187_v2 = vpop.f32.mrb[69].mxu1  ;;  %v10193_v55 = vadd.f32 %v10146_v50, %v10046_v38  ;;  %v10148_v29 = vpop.f32.mrb[70].mxu0  ;;  %v10394_v7 = vpack.c.bf16 %v10390_v3, %v10390_v3  ;;  %v11717_v38 = vld [vmem:[%s16745_s13 + $0x2] sm:$0x3]  ;;  %v12372_v19 = vld [vmem:[%s16735_s3 + $0x48] sm:$0xff]  }
 0x3e7   :  { %v10195_v1 = vadd.f32 %v10187_v2, %v10048_v12  ;;  %v10189_v11 = vpop.f32.mrb[70].mxu1  ;;  %v10149_v20 = vpop.f32.mrb[71].mxu0  ;;  %v12368_v12 = vld [vmem:[%s16735_s3 + $0x40] sm:$0xff]   ;;  %v10601_v10 = vsel %vm173_vm13, %v10393_v5, 0  ;;  %v12375_v50 = vld [vmem:[%s16735_s3 + $0x88] sm:$0xff]   ;;  %v12376_v2 = vld [vmem:[%s16735_s3 + $0x50] sm:$0xff]  }
 0x3e8   :  { %v10190_v17 = vpop.f32.mrb[71].mxu1  ;;  %v12379_v29 = vld [vmem:[%s16735_s3 + $0x90] sm:$0xff]   ;;  %v12380_v11 = vld [vmem:[%s16735_s3 + $0x58] sm:$0xff]  }
 0x3e9   :  { %v12383_v20 = vld [vmem:[%s16735_s3 + $0x98] sm:$0xff]   ;;  %v12384_v17 = vld [vmem:[%s16735_s3 + $0x60] sm:$0xff]  }
 0x3ec   :  { %v10291_v16 = vpop.f32.mrb[72].mxu0 }
 0x3ed   :  { %v10332_v61 = vpop.f32.mrb[72].mxu1  ;;  %v10339_v32 = vadd.f32 %v10291_v16, %v10192_v13  ;;  %v10293_v21 = vpop.f32.mrb[73].mxu0  ;;  %v12373_v13 = vld [vmem:[%s16735_s3 + $0xc8] sm:$0xff]   ;;  %v12386_v16 = vld [vmem:[%s16735_s3 + $0x20] sm:$0xff]  }
 0x3ee   :  { %v10341_v35 = vadd.f32 %v10332_v61, %v10194_v52  ;;  %v10334_v0 = vpop.f32.mrb[73].mxu1  ;;  %v10340_v37 = vadd.f32 %v10293_v21, %v10193_v55  ;;  %v10295_v14 = vpop.f32.mrb[74].mxu0  ;;  %v12374_v52 = vld [vmem:[%s16735_s3 + $0x8] sm:$0xff]   ;;  %v12377_v55 = vld [vmem:[%s16735_s3 + $0xd0] sm:$0xff]   ;;  %v12387_v61 = vld [vmem:[%s16735_s3 + $0xa0] sm:$0xff]  }
 0x3ef   :  { %v10342_v24 = vadd.f32 %v10334_v0, %v10195_v1  ;;  %v10336_v45 = vpop.f32.mrb[74].mxu1  ;;  %v10349_v22 = vadd.f32 %v10347_v9, %v10339_v32  ;;  %v10296_v28 = vpop.f32.mrb[75].mxu0  ;;  %v12378_v1 = vld [vmem:[%s16735_s3 + $0x10] sm:$0xff]   ;;  %v12390_v32 = vld [vmem:[%s16735_s3 + $0x28] sm:$0xff]   ;;  %v12398_v14 = vld [vmem:[%s16735_s3 + $0x38] sm:$0xff]  }
 0x3f0   :  { %v10351_v6 = vadd.f32 %v10347_v9, %v10341_v35  ;;  %v10337_v34 = vpop.f32.mrb[75].mxu1  ;;  %v10350_v36 = vadd.f32 %v10347_v9, %v10340_v37  ;;  %v12391_v35 = vld [vmem:[%s16735_s3 + $0xa8] sm:$0xff]   ;;  %v12392_v21 = vld [vmem:[%s16735_s3 + $0x70] sm:$0xff]   ;;  %v12396_v37 = vld [vmem:[%s16735_s3 + $0x78] sm:$0xff]  }
 0x3f1   :  { %v10352_v48 = vadd.f32 %v10347_v9, %v10342_v24  ;;  %v10353_v26 = vmax.f32 %v10349_v22, 0.0  ;;  %v12370_v9 = vld [vmem:[%s16735_s3] sm:$0xff]   ;;  %v12393_v0 = vld [vmem:[%s16735_s3 + $0xf0] sm:$0xff]   ;;  %v12397_v24 = vld [vmem:[%s16735_s3 + $0xf8] sm:$0xff]   ;;  %v12482_v22 = vmov 0.0  }
 0x3f2   :  { %v10355_v49 = vmax.f32 %v10351_v6, 0.0  ;;  %v10354_v33 = vmax.f32 %v10350_v36, 0.0  ;;  %v12399_v45 = vld [vmem:[%s16735_s3 + $0xb8] sm:$0xff]  }
 0x3f3   :  { %v10356_v57 = vmax.f32 %v10352_v48, 0.0  ;;  %v10357_v39 = vpack.c.bf16 %v10353_v26, %v10353_v26 }
 0x3f4   :  { %v10359_v8 = vpack.c.bf16 %v10355_v49, %v10355_v49  ;;  %v10358_v42 = vpack.c.bf16 %v10354_v33, %v10354_v33 }
 0x3f5   :  { %v10360_v44 = vpack.c.bf16 %v10356_v57, %v10356_v57  ;;  %v10502_v47 = vsel %vm173_vm13, %v10357_v39, 0 }
 0x3f6   :  { %v10508_v40 = vsel %vm173_vm13, %v10359_v8, 0  ;;  %11723 = vmatprep.subr.msk.bf16.mxu0 %vm173_vm13, %v10358_v42 }
 0x3f7   :  { %11725 = vmatprep.subr.msk.bf16.mxu1 %vm173_vm13, %v10360_v44  ;;  %10514 = vmatpush1.bf16.msra.mxu0 %v10502_v47 }
 0x3f8   :  { %10555 = vmatpush1.bf16.msra.mxu1 %v10508_v40  ;;  %11728 = vmatprep.subr.msk.bf16.mxu0 %vm173_vm13, %v10394_v7 }
 0x3f9   :  { %11730 = vmatprep.subr.msk.bf16.mxu1 %vm173_vm13, %v10396_v60 }
 0x3fa   :  { %11724 = vmatmul.mubr.msk.bf16.vlgmr.msra.gmra.mrb[80].mxu0 %vm17345_vm2, %v11717_v38 }
 0x3fb   :  { %11726 = vmatmul.mubr.msk.bf16.vlgmr.msra.gmra.mrb[80].mxu1 %vm17346_vm15, %v11717_v38  ;;  %10613 = vmatpush1.bf16.msra.mxu0 %v10601_v10 }
 0x3fc   :  { %10654 = vmatpush1.bf16.msra.mxu1 %v10607_v54  ;;  %10644 = vmatprep.mubr.bf16.mxu0 %v12433_v4 }
 0x3fd   :  { %10685 = vmatprep.mubr.bf16.mxu1 %v12433_v4  ;;  %11771 = vmatprep.subr.bf16.mxu0 %v12368_v12 }
 0x3fe   :  { %11793 = vmatprep.subr.bf16.mxu1 %v12369_v18 }
 0x402   :  { %11729 = vmatmul.mubr.msk.bf16.vlgmr.msra.gmra.mrb[84].mxu0 %vm17347_vm1, %v11727_v27 }
 0x403   :  { %11731 = vmatmul.mubr.msk.bf16.vlgmr.msra.gmra.mrb[84].mxu1 %vm17348_vm10, %v11727_v27  ;;  %11772 = vmatpush3.bf16.msra.mxu0 %v12370_v9 }
 0x404   :  { %11794 = vmatpush3.bf16.msra.mxu1 %v12371_v41  ;;  %11773 = vmatprep.subr.bf16.mxu0 %v12372_v19 }
 0x405   :  { %11795 = vmatprep.subr.bf16.mxu1 %v12373_v13  ;;  %10986 = vmatprep.mubr.bf16.mxu0 %v14191_v62  ;;  %v12381_v62 = vld [vmem:[%s16735_s3 + $0xd8] sm:$0xff]  }
 0x406   :  { %11026 = vmatprep.mubr.bf16.mxu1 %v14195_v23  ;;  %v12382_v23 = vld [vmem:[%s16735_s3 + $0x18] sm:$0xff]  }
 0x407   :  { %11774 = vmatpush3.bf16.msra.mxu0 %v12374_v52 }
 0x408   :  { %11796 = vmatpush3.bf16.msra.mxu1 %v12375_v50  ;;  %11775 = vmatprep.subr.bf16.mxu0 %v12376_v2 }
 0x409   :  { %11797 = vmatprep.subr.bf16.mxu1 %v12377_v55 }
 0x40b   :  { %11776 = vmatpush3.bf16.msra.mxu0 %v12378_v1 }
 0x40c   :  { %11798 = vmatpush3.bf16.msra.mxu1 %v12379_v29  ;;  %11777 = vmatprep.subr.bf16.mxu0 %v12380_v11 }
 0x40d   :  { %11799 = vmatprep.subr.bf16.mxu1 %v12381_v62 }
 0x40f   :  { %11778 = vmatpush3.bf16.msra.mxu0 %v12382_v23 }
 0x410   :  { %11800 = vmatpush3.bf16.msra.mxu1 %v12383_v20  ;;  %11779 = vmatprep.subr.bf16.mxu0 %v12384_v17  ;;  %v11034_v17 = vld [vmem:[%s16737_s5] sm:$0x3] }
 0x411   :  { %11801 = vmatprep.subr.bf16.mxu1 %v12385_v46  ;;  %v11766_v46 = vld.sshfl [vmem:[%s16736_s4] sm:$0x33 pattern:$0x75316420] }
 0x413   :  { %11780 = vmatpush3.bf16.msra.mxu0 %v12386_v16  ;;  %v12484_v16 = vmov 1966171168  }
 0x414   :  { %11802 = vmatpush3.bf16.msra.mxu1 %v12387_v61  ;;  %11781 = vmatprep.subr.bf16.mxu0 %v12388_v43  ;;  %v11149_v61 = vunpack.c.l.s4 %v12484_v16  ;;  %v11147_v43 = vcombine.high %v11766_v46, %v11766_v46 }
 0x415   :  { %11803 = vmatprep.subr.bf16.mxu1 %v12389_v51 }
 0x416   :  { %v11150_v51 = vunpack.c.0.s8 %v11149_v61 }
 0x417   :  { %11782 = vmatpush3.bf16.msra.mxu0 %v12390_v32 }
 0x418   :  { %11804 = vmatpush3.bf16.msra.mxu1 %v12391_v35  ;;  %11783 = vmatprep.subr.bf16.mxu0 %v12392_v21  ;;  %v11153_v32 = vsub.s32 %v11150_v51, %v12653_v15  ;;  %v11040_v21 = vpop.permute.xlu0 %11039  ;;  %v11089_v15 = vld [vmem:[%s16745_s13] sm:$0x3]  ;;  %s12485_s13 = smov [#allocation2]  }
 0x419   :  { %11805 = vmatprep.subr.bf16.mxu1 %v12393_v0  ;;  %s11297_s10 = sshll.u32 %s12485_s13, 4  ;;  %s11298_s10 = int_to_ptr.vmem [resolvable:$true] %s11297_s10 }
 0x41a   :  { %v11161_v35 = vrot.slane %v11147_v43, %v11153_v32  ;;  %s12409_s0 = scalar_lea.vmem %s11298_s10, 256  ;;  %p12414_p1 = scmp.lt.s32.totalorder %s11298_s10, %s11298_s10 }
 0x41b   :  { %11784 = vmatpush3.bf16.msra.mxu0 %v12394_v59  ;;  %p12410_p0 = scmp.ne.s32.totalorder %s11298_s10, %s12409_s0  ;;  %p12415_p2 = scmp.lt.s32.totalorder %s12409_s0, %s12409_s0 }
 0x41c   :  { %11806 = vmatpush3.bf16.msra.mxu1 %v12395_v53  ;;  %11785 = vmatprep.subr.bf16.mxu0 %v12396_v37 }
 0x41d   :  { %11807 = vmatprep.subr.bf16.mxu1 %v12397_v24  ;;  %p12416_p3 = por %p12415_p2, %p12414_p1 }
 0x41f   :  { %11786 = vmatpush3.bf16.msra.mxu0 %v12398_v14  ;;  %p12417_p4 = pnand %p12416_p3, %p12410_p0 }
 0x420   :  { %11808 = vmatpush3.bf16.msra.mxu1 %v12399_v45  ;;  %11819 = vmatprep.subr.bf16.mxu0 %v12482_v22 }
 0x421   :  { %11825 = vmatprep.subr.bf16.mxu1 %v12482_v22 }
 0x422   :  { %10987 = vmatmul.mubr.bf16.vlgmr.msra.gmra.mrb[88].mxu0 %v14203_v63 }
 0x423   :  { %11027 = vmatmul.mubr.bf16.vlgmr.msra.gmra.mrb[88].mxu1 %v14207_v25  ;;  %11821 = vmatprep.mubr.msk.bf16.mxu0 %vm12483_vm11, %v12482_v22 }
 0x424   :  { %11827 = vmatprep.mubr.msk.bf16.mxu1 %vm12483_vm11, %v12482_v22  ;;  %v11163_v22 = vcombine.high %v11161_v35, %v11161_v35 }
 0x48d   :  { %v10450_v6 = vpop.f32.mrb[76].mxu0 }
 0x48e   :  { %v10491_v28 = vpop.f32.mrb[76].mxu1  ;;  %v10452_v34 = vpop.f32.mrb[77].mxu0 }
 0x48f   :  { %v10493_v36 = vpop.f32.mrb[77].mxu1  ;;  %v10454_v48 = vpop.f32.mrb[78].mxu0 }
 0x490   :  { %v10495_v26 = vpop.f32.mrb[78].mxu1  ;;  %v10455_v49 = vpop.f32.mrb[79].mxu0 }
 0x491   :  { %v10496_v30 = vpop.f32.mrb[79].mxu1 }
 0x4cd   :  { %v10547_v56 = vpop.f32.mrb[80].mxu0 }
 0x4ce   :  { %v10588_v3 = vpop.f32.mrb[80].mxu1  ;;  %v10548_v31 = vadd.f32 %v10547_v56, %v10450_v6  ;;  %v10549_v33 = vpop.f32.mrb[81].mxu0 }
 0x4cf   :  { %v10589_v63 = vadd.f32 %v10588_v3, %v10491_v28  ;;  %v10590_v25 = vpop.f32.mrb[81].mxu1  ;;  %v10550_v57 = vadd.f32 %v10549_v33, %v10452_v34  ;;  %v10551_v8 = vpop.f32.mrb[82].mxu0  ;;  %v11154_v28 = vrot.slane %v11766_v46, %v11153_v32 }
 0x4d0   :  { %v10591_v39 = vadd.f32 %v10590_v25, %v10493_v36  ;;  %v10592_v42 = vpop.f32.mrb[82].mxu1  ;;  %v10552_v44 = vpop.f32.mrb[83].mxu0 }
 0x4d1   :  { %v10593_v47 = vpop.f32.mrb[83].mxu1  ;;  %v11162_v34 = vcombine.high %v11154_v28, %v11154_v28  ;;  %v11170_v36 = vsel %vm11168_vm12, %v11154_v28, 0 }
 0x4d3   :  { %v11176_v48 = vsel %vm11168_vm12, %v11162_v34, 0 }
 0x4d5   :  { %v10646_v40 = vpop.f32.mrb[84].mxu0 }
 0x4d6   :  { %v10687_v5 = vpop.f32.mrb[84].mxu1  ;;  %v16688_v7 = vadd.f32 %v10646_v40, %v10548_v31  ;;  %v10648_v58 = vpop.f32.mrb[85].mxu0 }
 0x4d7   :  { %v16690_v60 = vadd.f32 %v10687_v5, %v10589_v63  ;;  %v10689_v38 = vpop.f32.mrb[85].mxu1  ;;  %v16692_v12 = vadd.f32 %v10648_v58, %v10550_v57  ;;  %v10650_v10 = vpop.f32.mrb[86].mxu0 }
 0x4d8   :  { %v16694_v18 = vadd.f32 %v10689_v38, %v10591_v39  ;;  %v10691_v54 = vpop.f32.mrb[86].mxu1  ;;  %v10651_v27 = vpop.f32.mrb[87].mxu0 }
 0x4d9   :  { %v10692_v9 = vpop.f32.mrb[87].mxu1  ;;  %v11271_v31 = vpop.permute.xlu1 %11270 }
 0x4f5   :  { %v11787_v41 = vpop.f32.mrb[88].mxu0 }
 0x4f6   :  { %v11809_v19 = vpop.f32.mrb[88].mxu1  ;;  %v11788_v13 = vpop.f32.mrb[89].mxu0 }
 0x4f7   :  { %v11810_v52 = vpop.f32.mrb[89].mxu1  ;;  %v11789_v50 = vadd.f32 %v11788_v13, %v11787_v41  ;;  %v11790_v55 = vpop.f32.mrb[90].mxu0 }
 0x4f8   :  { %v11811_v2 = vadd.f32 %v11810_v52, %v11809_v19  ;;  %v11812_v1 = vpop.f32.mrb[90].mxu1  ;;  %v11791_v29 = vpop.f32.mrb[91].mxu0 }
 0x4f9   :  { %v11813_v11 = vpop.f32.mrb[91].mxu1 }
 0x4fa   :  { %v11029_v62 = vadd.f32 %v11811_v2, %v11789_v50 }
 0x4fc   :  { %v11035_v23 = vpack.c.bf16 %v11029_v62, %v11029_v62 }
 0x4fe   :  { %v11046_v20 = vsel %vm173_vm13, %v11035_v23, 0 }
 0x4ff   :  { %11820 = vmatpush3.bf16.msra.mxu0 %v11046_v20 }
 0x500   :  { %11767 = vmatprep.subr.msk.bf16.mxu0 %vm11168_vm12, %v11161_v35 }
 0x502   :  { %11822 = vmatmul.mubr.msk.bf16.vlgmr.msra.gmra.mrb[92].mxu0 %vm17349_vm6, %v11034_v17 }
 0x503   :  { %11213 = vmatprep.mubr.bf16.mxu0 %v12433_v4  ;;  %11182 = vmatpush1.bf16.msra.mxu0 %v11170_v36 }
 0x5d5   :  { %v11082_v0 = vpop.f32.mrb[92].mxu0 }
 0x5d6   :  { %v11083_v59 = vadd.f32 %v11082_v0, %v11040_v21  ;;  %v11823_v53 = vpop.f32.mrb[93].mxu0 }
 0x5d7   :  { %v11085_v37 = vpop.f32.mrb[94].mxu0 }
 0x5d8   :  { %v11088_v24 = vmax.f32 %v11083_v59, 0.0  ;;  %v11824_v14 = vpop.f32.mrb[95].mxu0 }
 0x5da   :  { %v11090_v45 = vpack.c.bf16 %v11088_v24, %v11088_v24 }
 0x5dc   :  { %v11095_v6 = vsel %vm173_vm13, %v11090_v45, 0  ;;  %vm11164_vm13 = vcmask 15360  }
 0x5dd   :  { %11826 = vmatpush3.bf16.msra.mxu1 %v11095_v6 }
 0x5de   :  { %11769 = vmatprep.subr.msk.bf16.mxu1 %vm11168_vm12, %v11163_v22 }
 0x5e0   :  { %11828 = vmatmul.mubr.msk.bf16.vlgmr.msra.gmra.mrb[92].mxu1 %vm17350_vm9, %v11089_v15 }
 0x5e1   :  { %11254 = vmatprep.mubr.bf16.mxu1 %v12433_v4  ;;  %11223 = vmatpush1.bf16.msra.mxu1 %v11176_v48 }
 0x6b3   :  { %v11131_v26 = vpop.f32.mrb[92].mxu1 }
 0x6b4   :  { %v11137_v49 = vpack.c.bf16 %v11131_v26, %v11131_v26  ;;  %v11829_v30 = vpop.f32.mrb[93].mxu1 }
 0x6b5   :  { %v11134_v56 = vpop.f32.mrb[94].mxu1 }
 0x6b6   :  { %11768 = vmatmul.mubr.msk.bf16.vlgmr.msra.gmra.mrb[96].mxu0 %vm11164_vm13, %v11137_v49  ;;  %11770 = vmatmul.mubr.msk.bf16.vlgmr.msra.gmra.mrb[96].mxu1 %vm11164_vm13, %v11137_v49  ;;  %v11830_v3 = vpop.f32.mrb[95].mxu1 }
 0x789   :  { %v11215_v63 = vpop.f32.mrb[96].mxu0  ;;  %v11256_v33 = vpop.f32.mrb[96].mxu1 }
 0x78a   :  { %v11263_v4 = vadd.f32 %v11215_v63, %v16688_v7  ;;  %v11265_v25 = vadd.f32 %v11256_v33, %v16690_v60  ;;  %v11217_v57 = vpop.f32.mrb[97].mxu0  ;;  %v11258_v39 = vpop.f32.mrb[97].mxu1 }
 0x78b   :  { %v11264_v8 = vadd.f32 %v11217_v57, %v16692_v12  ;;  %v11266_v42 = vadd.f32 %v11258_v39, %v16694_v18  ;;  %v11219_v44 = vpop.f32.mrb[98].mxu0  ;;  %v11260_v47 = vpop.f32.mrb[98].mxu1 }
 0x78c   :  { %v11273_v40 = vadd.f32 %v11271_v31, %v11263_v4  ;;  %v11275_v5 = vadd.f32 %v11271_v31, %v11265_v25  ;;  %v11220_v58 = vpop.f32.mrb[99].mxu0  ;;  %v11261_v38 = vpop.f32.mrb[99].mxu1 }
 0x78d   :  { %v11274_v10 = vadd.f32 %v11271_v31, %v11264_v8  ;;  %v11276_v54 = vadd.f32 %v11271_v31, %v11266_v42 }
 0x78e   :  { %v11277_v27 = vmax.f32 %v11273_v40, 0.0  ;;  %v11279_v9 = vmax.f32 %v11275_v5, 0.0 }
 0x78f   :  { %v11278_v7 = vmax.f32 %v11274_v10, 0.0  ;;  %v11280_v60 = vmax.f32 %v11276_v54, 0.0 }
 0x791   :  { %v11285_v41 = vcombine.low %v11277_v27, %v11278_v7  ;;  %v11286_v19 = vcombine.low %v11279_v9, %v11280_v60 }
 0x793   :  { %11289 = vst [vmem:[#allocation2] sm:$0xff] %v11285_v41  ;;  %11290 = vst [vmem:[#allocation2 + $0x8] sm:$0xff] %v11286_v19 }
 0x794   :  { %12420 = shalt.err (!%p12417_p4)
}
 0x795   :  { %s12421_s21 = scalar_lea.hbm %s16747_s15, 256 }
 0x796   :  { %p12422_p5 = scmp.ne.s32.totalorder %s16747_s15, %s12421_s21  ;;  %p12425_p6 = scmp.lt.u32.totalorder %s12421_s21, %s16747_s15 }
 0x798   :  { %p12427_p7 = pnand %p12425_p6, %p12422_p5 }
 0x79a   :  { %12430 = shalt.err (!%p12427_p7)
}
 0x79b   :  { %11300 = dma.vmem_to_hbm [thread:$0]  %s11298_s10, 256, %s16747_s15, [#allocation3]  }
 0x79c   :  { %12431 = dma.done.wait [#allocation3], 256  }
 0x79d   :  { %12432 = vsyncadd [#allocation3], 4294967040 }
 0x79e   :  { %11304 = vsyncpa [#allocation3], 1 }

</bundles_post_ra>
